<compile_context>
chip_gen: v5e
topology: v5e:2x2
jax: 0.10.0
libtpu: 0.0.40
codegen_flags: <defaults>
</compile_context>

<pallas_src>
import math
from functools import partial, lru_cache

import jax
import jax.numpy as jnp
from jax.experimental import pallas as pl
from jax.experimental.pallas import tpu as pltpu


# --------------------------------------------------------------------------
# Small helpers
# --------------------------------------------------------------------------

def _round_up(x, m):
    return ((x + m - 1) // m) * m


def _pick_tile(total, target, quantum):
    """Largest divisor of `total` that is <= target and a multiple of `quantum`.
    Falls back to `total` itself (full dim always satisfies the (8,128) block rule)."""
    if total <= target:
        return total
    t = (target // quantum) * quantum
    while t >= quantum:
        if total % t == 0:
            return t
        t -= quantum
    return total


@lru_cache(maxsize=None)
def _vmem_limit_bytes():
    # Generation-aware VMEM limit: ~75% of physical (96 MiB v5e/v6e, 48 MiB v7x).
    try:
        cap = pltpu.get_tpu_info().vmem_capacity_bytes
    except Exception:
        cap = 64 * 1024 * 1024
    return min(int(cap) * 3 // 4, 100 * 1024 * 1024)


def _cparams(n_parallel, n_arbitrary=0):
    sem = ("parallel",) * n_parallel + ("arbitrary",) * n_arbitrary
    return pltpu.CompilerParams(dimension_semantics=sem,
                                vmem_limit_bytes=_vmem_limit_bytes())


# --------------------------------------------------------------------------
# Kernel bodies
# --------------------------------------------------------------------------

def _layernorm_math(x, a, b, eps):
    # Annotated-Transformer LayerNorm: unbiased std (divide by D-1), divide by (std + eps).
    d = x.shape[-1]
    mean = jnp.mean(x, axis=-1, keepdims=True)
    var = jnp.sum((x - mean) ** 2, axis=-1, keepdims=True) * (1.0 / (d - 1))
    inv = pl.reciprocal(jnp.sqrt(var) + eps, approx=False)   # approx=True at production
    return a * (x - mean) * inv + b


def _ffn_sublayer_kernel(*refs, eps, compute_dtype, fuse_final_norm):
    # refs: x, ln_a, ln_b, w1, b1, w2, b2, [final_a, final_b,] out, n_scratch, acc_scratch
    if fuse_final_norm:
        (x_ref, a_ref, b_ref, w1_ref, b1_ref, w2_ref, b2_ref,
         fa_ref, fb_ref, o_ref, n_ref, acc_ref) = refs
    else:
        (x_ref, a_ref, b_ref, w1_ref, b1_ref, w2_ref, b2_ref,
         o_ref, n_ref, acc_ref) = refs
    cd = compute_dtype
    j = pl.program_id(1)

    @pl.when(j == 0)
    def _():
        acc_ref[...] = jnp.zeros_like(acc_ref)
        # Cache pre-norm once per row tile (reused across all d_ff tiles).
        n_ref[...] = _layernorm_math(x_ref[...], a_ref[...], b_ref[...], eps)

    hid = jnp.dot(n_ref[...].astype(cd), w1_ref[...].astype(cd),
                  preferred_element_type=jnp.float32) + b1_ref[...]
    hid = jnp.maximum(hid, 0.0)                    # ReLU (dropout = identity, eval mode)
    acc_ref[...] += jnp.dot(hid.astype(cd), w2_ref[...].astype(cd),
                            preferred_element_type=jnp.float32)

    @pl.when(j == pl.num_programs(1) - 1)
    def _():
        y = x_ref[...] + acc_ref[...] + b2_ref[...]          # fused residual + W2 bias
        if fuse_final_norm:                                   # fused final encoder/decoder LN
            y = _layernorm_math(y, fa_ref[...], fb_ref[...], eps)
        o_ref[...] = y.astype(o_ref.dtype)


def _attn_sublayer_kernel(*refs, h, d_k, has_kv, normalize_kv, eps, compute_dtype):
    # refs: x, [kv,] mask_bias, ln_a, ln_b, wq, bq, wkv, bkv, wo, bo, out
    if has_kv:
        (x_ref, kv_ref, m_ref, a_ref, b_ref,
         wq_ref, bq_ref, wkv_ref, bkv_ref, wo_ref, bo_ref, o_ref) = refs
    else:
        (x_ref, m_ref, a_ref, b_ref,
         wq_ref, bq_ref, wkv_ref, bkv_ref, wo_ref, bo_ref, o_ref) = refs
        kv_ref = None
    cd = compute_dtype

    x = x_ref[0]                                             # (tq, D)
    tq, D = x.shape
    q_in = _layernorm_math(x, a_ref[...], b_ref[...], eps)   # fused pre-norm (query side)
    if has_kv:
        kv_raw = kv_ref[0]                                   # (Sk, D)
        kv_in = _layernorm_math(kv_raw, a_ref[...], b_ref[...], eps) if normalize_kv else kv_raw
    else:
        kv_in = q_in                                         # self-attn, one q tile = full seq
    Sk = kv_in.shape[0]

    # Full-width projections (contraction K = D, MXU-efficient); K|V share one [D,2D] weight.
    q = jnp.dot(q_in.astype(cd), wq_ref[...].astype(cd),
                preferred_element_type=jnp.float32) + bq_ref[...]
    kvp = jnp.dot(kv_in.astype(cd), wkv_ref[...].astype(cd),
                  preferred_element_type=jnp.float32) + bkv_ref[...]
    k, v = kvp[:, :D], kvp[:, D:]
    q = q * (1.0 / math.sqrt(d_k))                           # fold 1/sqrt(d_k) into Q once

    # Head split via static lane slices stacked onto a leading head axis (no lane-splitting
    # reshapes), so QK^T and P@V are single batched MXU matmuls over all heads.
    qh = jnp.stack([q[:, i * d_k:(i + 1) * d_k] for i in range(h)], axis=0)   # (h, tq, d_k)
    kh = jnp.stack([k[:, i * d_k:(i + 1) * d_k] for i in range(h)], axis=0)   # (h, Sk, d_k)
    vh = jnp.stack([v[:, i * d_k:(i + 1) * d_k] for i in range(h)], axis=0)   # (h, Sk, d_k)

    s = jnp.einsum('hqd,hkd->hqk', qh.astype(cd), kh.astype(cd),
                   preferred_element_type=jnp.float32)                        # (h, tq, Sk)
    bias = jnp.broadcast_to(m_ref[0].astype(jnp.float32), (tq, Sk))           # additive mask bias
    s = s + bias[None, :, :]
    s_max = jnp.max(s, axis=-1, keepdims=True)
    p = jnp.exp(s - s_max)
    denom = jnp.sum(p, axis=-1, keepdims=True)
    p = p * pl.reciprocal(denom, approx=False)               # approx=True at production
    oh = jnp.einsum('hqk,hkd->hqd', p.astype(cd), vh.astype(cd),
                    preferred_element_type=jnp.float32)                       # (h, tq, d_k)

    # Merge heads by lane concat, then ONE [tq,D]@[D,D] output projection (full MXU contraction).
    o = jnp.concatenate([oh[i] for i in range(h)], axis=-1)                   # (tq, D)
    y = jnp.dot(o.astype(cd), wo_ref[...].astype(cd),
                preferred_element_type=jnp.float32) + bo_ref[...]
    o_ref[0] = (x + y).astype(o_ref.dtype)                   # fused residual + output bias


# --------------------------------------------------------------------------
# pallas_call wrappers
# --------------------------------------------------------------------------
# TODO(synk): pipeline_mode=pl.Buffered(1) on the constant-index weight BlockSpecs would halve
# their VMEM (worth it on v7x); left at the default double-buffering here for lowering safety.

def ffn_sublayer(x, ln_a, ln_b, w1, b1, w2, b2, *, compute_dtype, final_ln=None,
                 eps=1e-6, tile_rows=256, tile_ff=512):
    B, S, D = x.shape
    R = B * S
    d_ff = w1.shape[1]

    tm = min(_round_up(tile_rows, 8), _round_up(R, 8))
    Rp = _round_up(R, tm)
    xr = x.reshape(R, D)
    if Rp != R:                                      # pad rows instead of one giant block
        xr = jnp.pad(xr, ((0, Rp - R), (0, 0)))
    tf = _pick_tile(d_ff, tile_ff, 128)              # d_ff tiled -> weights never whole in VMEM
    nf = d_ff // tf

    cast = (lambda w: w.astype(compute_dtype)) if compute_dtype != jnp.float32 else (lambda w: w)
    fuse = final_ln is not None

    in_specs = [
        pl.BlockSpec((tm, D), lambda i, j: (i, 0)),          # x (residual input)
        pl.BlockSpec((1, D), lambda i, j: (0, 0)),           # ln scale
        pl.BlockSpec((1, D), lambda i, j: (0, 0)),           # ln bias
        pl.BlockSpec((D, tf), lambda i, j: (0, j)),          # w1 column tile
        pl.BlockSpec((1, tf), lambda i, j: (0, j)),          # b1 tile
        pl.BlockSpec((tf, D), lambda i, j: (j, 0)),          # w2 row tile
        pl.BlockSpec((1, D), lambda i, j: (0, 0)),           # b2
    ]
    operands = [xr, ln_a.reshape(1, D), ln_b.reshape(1, D),
                cast(w1), b1.reshape(1, d_ff), cast(w2), b2.reshape(1, D)]
    if fuse:
        fa, fb = final_ln
        in_specs += [pl.BlockSpec((1, D), lambda i, j: (0, 0)),
                     pl.BlockSpec((1, D), lambda i, j: (0, 0))]
        operands += [fa.reshape(1, D), fb.reshape(1, D)]

    out = pl.pallas_call(
        partial(_ffn_sublayer_kernel, eps=eps, compute_dtype=compute_dtype,
                fuse_final_norm=fuse),
        grid=(Rp // tm, nf),
        out_shape=jax.ShapeDtypeStruct((Rp, D), jnp.float32),
        in_specs=in_specs,
        out_specs=pl.BlockSpec((tm, D), lambda i, j: (i, 0)),
        scratch_shapes=[pltpu.VMEM((tm, D), jnp.float32),    # cached LN(x) across d_ff tiles
                        pltpu.VMEM((tm, D), jnp.float32)],   # f32 accumulator
        compiler_params=_cparams(1, 1),                      # rows parallel, d_ff reduction
    )(*operands)
    if Rp != R:
        out = out[:R]
    return out.reshape(B, S, D)


def attn_sublayer(x, kv, mask_bias, ln_a, ln_b, wq, bq, wkv, bkv, wo, bo, *,
                  h, d_k, self_attention, compute_dtype, eps=1e-6, tile_q=256):
    B, Sq, D = x.shape
    tq = _pick_tile(Sq, tile_q, 32)
    nq = Sq // tq
    # Self-attention with a single q tile needs no separate K/V operand (saves one (Sk,D) DMA).
    has_kv = not (self_attention and nq == 1)
    if self_attention:
        kv = x
    Sk = kv.shape[1]
    mq = mask_bias.shape[1]

    cast = (lambda w: w.astype(compute_dtype)) if compute_dtype != jnp.float32 else (lambda w: w)

    def const(shape):
        return pl.BlockSpec(shape, lambda b, qi: (0,) * len(shape))

    in_specs = [pl.BlockSpec((1, tq, D), lambda b, qi: (b, qi, 0))]       # x: residual + query
    operands = [x]
    if has_kv:
        in_specs.append(pl.BlockSpec((1, Sk, D), lambda b, qi: (b, 0, 0)))
        operands.append(kv)
    if mq == 1:
        in_specs.append(pl.BlockSpec((1, 1, Sk), lambda b, qi: (b, 0, 0)))    # bcast mask
    else:
        in_specs.append(pl.BlockSpec((1, tq, Sk), lambda b, qi: (b, qi, 0)))  # per-query mask
    operands.append(mask_bias)
    in_specs += [const((1, D)), const((1, D)),
                 const((D, D)), const((1, D)),
                 const((D, 2 * D)), const((1, 2 * D)),
                 const((D, D)), const((1, D))]
    operands += [ln_a.reshape(1, D), ln_b.reshape(1, D),
                 cast(wq), bq.reshape(1, D),
                 cast(wkv), bkv.reshape(1, 2 * D),
                 cast(wo), bo.reshape(1, D)]

    kernel = partial(_attn_sublayer_kernel, h=h, d_k=d_k, has_kv=has_kv,
                     normalize_kv=self_attention, eps=eps, compute_dtype=compute_dtype)
    # TODO(synk): for very long Sk on v7x, add an Sk reduction axis with flash-style m/l/acc scratch.
    return pl.pallas_call(
        kernel,
        grid=(B, nq),
        out_shape=jax.ShapeDtypeStruct((B, Sq, D), jnp.float32),
        in_specs=in_specs,
        out_specs=pl.BlockSpec((1, tq, D), lambda b, qi: (b, qi, 0)),
        compiler_params=_cparams(2),                          # batch & q-tiles both parallel
    )(*operands)


# --------------------------------------------------------------------------
# Model glue
# --------------------------------------------------------------------------

def embed(table, pe, tokens, d_model):
    # TODO(synk): token-embedding gather + positional-encoding add stay in plain JAX
    # (data-dependent table lookup); everything downstream runs in Pallas kernels.
    S = tokens.shape[1]
    return table[tokens] * math.sqrt(d_model) + pe[None, :S, :]


def encoder_decoder_forward(params, src, tgt, src_mask, tgt_mask, *,
                            h, d_k, d_model, compute_dtype=jnp.float32):
    # Masks -> additive bf16 biases (half the DMA of f32, add instead of select in-kernel).
    src_bias = jnp.where(src_mask == 0, -1e9, 0.0).astype(jnp.bfloat16)
    tgt_bias = jnp.where(tgt_mask == 0, -1e9, 0.0).astype(jnp.bfloat16)

    # ---- encode(src_embed(src), src_mask) ----
    x = embed(params['src_emb'], params['pe'], src, d_model)
    n_enc = len(params['enc_layers'])
    for li, lp in enumerate(params['enc_layers']):
        x = attn_sublayer(x, None, src_bias, lp['ln0_a'], lp['ln0_b'], **lp['self_attn'],
                          h=h, d_k=d_k, self_attention=True, compute_dtype=compute_dtype)
        fin = (params['enc_norm_a'], params['enc_norm_b']) if li == n_enc - 1 else None
        x = ffn_sublayer(x, lp['ln1_a'], lp['ln1_b'], lp['w1'], lp['b1'], lp['w2'], lp['b2'],
                         compute_dtype=compute_dtype, final_ln=fin)
    memory = x   # final encoder LayerNorm already fused into the last FFN kernel

    # ---- decode(memory, src_mask, tgt_embed(tgt), tgt_mask) ----
    x = embed(params['tgt_emb'], params['pe'], tgt, d_model)
    n_dec = len(params['dec_layers'])
    for li, lp in enumerate(params['dec_layers']):
        x = attn_sublayer(x, None, tgt_bias, lp['ln0_a'], lp['ln0_b'], **lp['self_attn'],
                          h=h, d_k=d_k, self_attention=True, compute_dtype=compute_dtype)
        x = attn_sublayer(x, memory, src_bias, lp['ln1_a'], lp['ln1_b'], **lp['src_attn'],
                          h=h, d_k=d_k, self_attention=False, compute_dtype=compute_dtype)
        fin = (params['dec_norm_a'], params['dec_norm_b']) if li == n_dec - 1 else None
        x = ffn_sublayer(x, lp['ln2_a'], lp['ln2_b'], lp['w1'], lp['b1'], lp['w2'], lp['b2'],
                         compute_dtype=compute_dtype, final_ln=fin)
    return x     # final decoder LayerNorm already fused into the last FFN kernel


# --------------------------------------------------------------------------
# Deterministic parameter init
# --------------------------------------------------------------------------

def _positional_encoding(max_len, d_model):
    pos = jnp.arange(max_len, dtype=jnp.float32)[:, None]
    div = jnp.exp(jnp.arange(0, d_model, 2, dtype=jnp.float32) * (-math.log(10000.0) / d_model))
    ang = pos * div
    return jnp.stack([jnp.sin(ang), jnp.cos(ang)], axis=-1).reshape(max_len, d_model)


def init_params(key, n_layers, d_model, d_ff, src_vocab, tgt_vocab, max_len=64):
    keys = iter(jax.random.split(key, 8 + 16 * n_layers))

    def w(din, dout):
        return 0.02 * jax.random.normal(next(keys), (din, dout), jnp.float32)

    def attn():
        return {'wq': w(d_model, d_model), 'bq': jnp.zeros((d_model,), jnp.float32),
                'wkv': w(d_model, 2 * d_model), 'bkv': jnp.zeros((2 * d_model,), jnp.float32),
                'wo': w(d_model, d_model), 'bo': jnp.zeros((d_model,), jnp.float32)}

    def ffn_p():
        return {'w1': w(d_model, d_ff), 'b1': jnp.zeros((d_ff,), jnp.float32),
                'w2': w(d_ff, d_model), 'b2': jnp.zeros((d_model,), jnp.float32)}

    def ln():
        return jnp.ones((d_model,), jnp.float32), jnp.zeros((d_model,), jnp.float32)

    enc_layers, dec_layers = [], []
    for _ in range(n_layers):
        l = {'self_attn': attn(), **ffn_p()}
        l['ln0_a'], l['ln0_b'] = ln()
        l['ln1_a'], l['ln1_b'] = ln()
        enc_layers.append(l)
    for _ in range(n_layers):
        l = {'self_attn': attn(), 'src_attn': attn(), **ffn_p()}
        l['ln0_a'], l['ln0_b'] = ln()
        l['ln1_a'], l['ln1_b'] = ln()
        l['ln2_a'], l['ln2_b'] = ln()
        dec_layers.append(l)

    enc_na, enc_nb = ln()
    dec_na, dec_nb = ln()
    return {'src_emb': 0.02 * jax.random.normal(next(keys), (src_vocab, d_model), jnp.float32),
            'tgt_emb': 0.02 * jax.random.normal(next(keys), (tgt_vocab, d_model), jnp.float32),
            'pe': _positional_encoding(max_len, d_model),
            'enc_layers': enc_layers, 'dec_layers': dec_layers,
            'enc_norm_a': enc_na, 'enc_norm_b': enc_nb,
            'dec_norm_a': dec_na, 'dec_norm_b': dec_nb}


# --------------------------------------------------------------------------
# Pure-JAX reference (sanity check for the Pallas kernels)
# --------------------------------------------------------------------------

def _ref_ln(x, a, b, eps=1e-6):
    mean = x.mean(-1, keepdims=True)
    std = jnp.sqrt(jnp.sum((x - mean) ** 2, -1, keepdims=True) / (x.shape[-1] - 1))
    return a * (x - mean) / (std + eps) + b


def _ref_attn(p, q_in, kv_in, mask, h, d_k):
    B, Sq, D = q_in.shape
    Sk = kv_in.shape[1]
    wk, wv = p['wkv'][:, :D], p['wkv'][:, D:]
    bk, bv = p['bkv'][:D], p['bkv'][D:]
    q = (q_in @ p['wq'] + p['bq']).reshape(B, Sq, h, d_k).transpose(0, 2, 1, 3)
    k = (kv_in @ wk + bk).reshape(B, Sk, h, d_k).transpose(0, 2, 1, 3)
    v = (kv_in @ wv + bv).reshape(B, Sk, h, d_k).transpose(0, 2, 1, 3)
    s = jnp.einsum('bhqd,bhkd->bhqk', q, k) / math.sqrt(d_k)
    s = jnp.where(mask[:, None, :, :] == 0, -1e9, s)
    a = jax.nn.softmax(s, -1)
    o = jnp.einsum('bhqk,bhkd->bhqd', a, v).transpose(0, 2, 1, 3).reshape(B, Sq, D)
    return o @ p['wo'] + p['bo']


def _ref_encoder_decoder(params, src, tgt, src_mask, tgt_mask, h, d_k, d_model):
    x = params['src_emb'][src] * math.sqrt(d_model) + params['pe'][None, :src.shape[1]]
    for p in params['enc_layers']:
        n = _ref_ln(x, p['ln0_a'], p['ln0_b'])
        x = x + _ref_attn(p['self_attn'], n, n, src_mask, h, d_k)
        n = _ref_ln(x, p['ln1_a'], p['ln1_b'])
        x = x + (jnp.maximum(n @ p['w1'] + p['b1'], 0.0) @ p['w2'] + p['b2'])
    memory = _ref_ln(x, params['enc_norm_a'], params['enc_norm_b'])

    x = params['tgt_emb'][tgt] * math.sqrt(d_model) + params['pe'][None, :tgt.shape[1]]
    for p in params['dec_layers']:
        n = _ref_ln(x, p['ln0_a'], p['ln0_b'])
        x = x + _ref_attn(p['self_attn'], n, n, tgt_mask, h, d_k)
        n = _ref_ln(x, p['ln1_a'], p['ln1_b'])
        x = x + _ref_attn(p['src_attn'], n, memory, src_mask, h, d_k)
        n = _ref_ln(x, p['ln2_a'], p['ln2_b'])
        x = x + (jnp.maximum(n @ p['w1'] + p['b1'], 0.0) @ p['w2'] + p['b2'])
    return _ref_ln(x, params['dec_norm_a'], params['dec_norm_b'])


# --------------------------------------------------------------------------

if __name__ == "__main__":
    B, S_SRC, S_TGT = 2, 8, 8
    D_MODEL, N_HEADS, D_FF, N_LAYERS = 32, 4, 64, 2
    SRC_VOCAB, TGT_VOCAB = 53, 61
    D_K = D_MODEL // N_HEADS

    root = jax.random.PRNGKey(0)
    k_src, k_tgt, k_p = jax.random.split(root, 3)

    src = jax.random.randint(k_src, (B, S_SRC), 0, SRC_VOCAB)
    tgt = jax.random.randint(k_tgt, (B, S_TGT), 0, TGT_VOCAB)
    src_mask = jnp.ones((B, 1, S_SRC), jnp.float32)
    tgt_mask = jnp.broadcast_to(jnp.tril(jnp.ones((S_TGT, S_TGT), jnp.float32)),
                                (B, S_TGT, S_TGT))

    params = init_params(k_p, N_LAYERS, D_MODEL, D_FF, SRC_VOCAB, TGT_VOCAB)

    # compute_dtype=jnp.bfloat16 is the production setting for v6e/v7x MXU at realistic sizes;
    # the demo keeps f32 so the output matches the f32 PyTorch-equivalent reference tightly.
    fwd = jax.jit(partial(encoder_decoder_forward, h=N_HEADS, d_k=D_K, d_model=D_MODEL,
                          compute_dtype=jnp.float32))
    out = jax.block_until_ready(fwd(params, src, tgt, src_mask, tgt_mask))

    ref = _ref_encoder_decoder(params, src, tgt, src_mask, tgt_mask, N_HEADS, D_K, D_MODEL)
    assert out.shape == (B, S_TGT, D_MODEL)
    assert jnp.allclose(out, ref, atol=2e-3, rtol=2e-3), "Pallas output mismatch vs JAX reference"

    print("KERNEL_OK")
</pallas_src>

<mosaic_0001>
module attributes {stable_mosaic.version = 11 : i64} {
  func.func @_attn_sublayer_kernel(%arg0: i32, %arg1: i32, %arg2: memref<1x8x32xf32, #tpu.memory_space<vmem>>, %arg3: memref<1x1x8xbf16, #tpu.memory_space<vmem>>, %arg4: memref<1x32xf32, #tpu.memory_space<vmem>>, %arg5: memref<1x32xf32, #tpu.memory_space<vmem>>, %arg6: memref<32x32xf32, #tpu.memory_space<vmem>>, %arg7: memref<1x32xf32, #tpu.memory_space<vmem>>, %arg8: memref<32x64xf32, #tpu.memory_space<vmem>>, %arg9: memref<1x64xf32, #tpu.memory_space<vmem>>, %arg10: memref<32x32xf32, #tpu.memory_space<vmem>>, %arg11: memref<1x32xf32, #tpu.memory_space<vmem>>, %arg12: memref<1x8x32xf32, #tpu.memory_space<vmem>>) attributes {dimension_semantics = [#tpu.dimension_semantics<parallel>, #tpu.dimension_semantics<parallel>], iteration_bounds = array<i64: 2, 1>, scalar_prefetch = 0 : i64, scratch_operands = 0 : i64, tpu.core_type = #tpu.core_type<tc>, window_params = [{transform_indices = @transform_0, window_bounds = array<i64: 1, 8, 32>}, {transform_indices = @transform_1, window_bounds = array<i64: 1, 1, 8>}, {pipeline_mode = #tpu.pipeline_mode<synchronous>, transform_indices = @transform_2, window_bounds = array<i64: 1, 32>}, {pipeline_mode = #tpu.pipeline_mode<synchronous>, transform_indices = @transform_3, window_bounds = array<i64: 1, 32>}, {pipeline_mode = #tpu.pipeline_mode<synchronous>, transform_indices = @transform_4, window_bounds = array<i64: 32, 32>}, {pipeline_mode = #tpu.pipeline_mode<synchronous>, transform_indices = @transform_5, window_bounds = array<i64: 1, 32>}, {pipeline_mode = #tpu.pipeline_mode<synchronous>, transform_indices = @transform_6, window_bounds = array<i64: 32, 64>}, {pipeline_mode = #tpu.pipeline_mode<synchronous>, transform_indices = @transform_7, window_bounds = array<i64: 1, 64>}, {pipeline_mode = #tpu.pipeline_mode<synchronous>, transform_indices = @transform_8, window_bounds = array<i64: 32, 32>}, {pipeline_mode = #tpu.pipeline_mode<synchronous>, transform_indices = @transform_9, window_bounds = array<i64: 1, 32>}, {transform_indices = @transform_10, window_bounds = array<i64: 1, 8, 32>}]} {
    %c0 = arith.constant 0 : index
    %c0_0 = arith.constant 0 : index
    %c0_1 = arith.constant 0 : index
    %0 = vector.load %arg2[%c0, %c0_0, %c0_1] : memref<1x8x32xf32, #tpu.memory_space<vmem>>, vector<1x8x32xf32>
    %1 = vector.shape_cast %0 : vector<1x8x32xf32> to vector<8x32xf32>
    %c0_2 = arith.constant 0 : index
    %c0_3 = arith.constant 0 : index
    %2 = vector.load %arg4[%c0_2, %c0_3] : memref<1x32xf32, #tpu.memory_space<vmem>>, vector<1x32xf32>
    %c0_4 = arith.constant 0 : index
    %c0_5 = arith.constant 0 : index
    %3 = vector.load %arg5[%c0_4, %c0_5] : memref<1x32xf32, #tpu.memory_space<vmem>>, vector<1x32xf32>
    %cst = arith.constant dense<0.000000e+00> : vector<8xf32>
    %4 = vector.multi_reduction <add>, %1, %cst [1] : vector<8x32xf32> to vector<8xf32>
    %5 = vector.shape_cast %4 : vector<8xf32> to vector<8x1xf32>
    %cst_6 = arith.constant 3.200000e+01 : f32
    %6 = vector.broadcast %cst_6 : f32 to vector<8x1xf32>
    %7 = arith.divf %5, %6 : vector<8x1xf32>
    %8 = vector.broadcast %7 : vector<8x1xf32> to vector<8x32xf32>
    %9 = arith.subf %1, %8 : vector<8x32xf32>
    %10 = arith.mulf %9, %9 : vector<8x32xf32>
    %cst_7 = arith.constant dense<0.000000e+00> : vector<8xf32>
    %11 = vector.multi_reduction <add>, %10, %cst_7 [1] : vector<8x32xf32> to vector<8xf32>
    %12 = vector.shape_cast %11 : vector<8xf32> to vector<8x1xf32>
    %cst_8 = arith.constant 0.0322580636 : f32
    %13 = vector.broadcast %cst_8 : f32 to vector<8x1xf32>
    %14 = arith.mulf %12, %13 : vector<8x1xf32>
    %15 = math.sqrt %14 : vector<8x1xf32>
    %cst_9 = arith.constant 9.99999997E-7 : f32
    %16 = vector.broadcast %cst_9 : f32 to vector<8x1xf32>
    %17 = arith.addf %15, %16 : vector<8x1xf32>
    %18 = tpu.reciprocal %17 : vector<8x1xf32> -> vector<8x1xf32>
    %19 = vector.broadcast %7 : vector<8x1xf32> to vector<8x32xf32>
    %20 = arith.subf %1, %19 : vector<8x32xf32>
    %21 = vector.broadcast %2 : vector<1x32xf32> to vector<8x32xf32>
    %22 = arith.mulf %21, %20 : vector<8x32xf32>
    %23 = vector.broadcast %18 : vector<8x1xf32> to vector<8x32xf32>
    %24 = arith.mulf %22, %23 : vector<8x32xf32>
    %25 = vector.broadcast %3 : vector<1x32xf32> to vector<8x32xf32>
    %26 = arith.addf %24, %25 : vector<8x32xf32>
    %c0_10 = arith.constant 0 : index
    %c0_11 = arith.constant 0 : index
    %27 = vector.load %arg6[%c0_10, %c0_11] : memref<32x32xf32, #tpu.memory_space<vmem>>, vector<32x32xf32>
    %cst_12 = arith.constant dense<0.000000e+00> : vector<8x32xf32>
    %28 = tpu.matmul %26, %27, %cst_12 {dimension_numbers = #tpu.dot_dimension_numbers<[1], [0], [0], [1], [0, 0, 1, 1], [], []>} : vector<8x32xf32>, vector<32x32xf32>, vector<8x32xf32> -> vector<8x32xf32>
    %c0_13 = arith.constant 0 : index
    %c0_14 = arith.constant 0 : index
    %29 = vector.load %arg7[%c0_13, %c0_14] : memref<1x32xf32, #tpu.memory_space<vmem>>, vector<1x32xf32>
    %30 = vector.broadcast %29 : vector<1x32xf32> to vector<8x32xf32>
    %31 = arith.addf %28, %30 : vector<8x32xf32>
    %c0_15 = arith.constant 0 : index
    %c0_16 = arith.constant 0 : index
    %32 = vector.load %arg8[%c0_15, %c0_16] : memref<32x64xf32, #tpu.memory_space<vmem>>, vector<32x64xf32>
    %cst_17 = arith.constant dense<0.000000e+00> : vector<8x64xf32>
    %33 = tpu.matmul %26, %32, %cst_17 {dimension_numbers = #tpu.dot_dimension_numbers<[1], [0], [0], [1], [0, 0, 1, 1], [], []>} : vector<8x32xf32>, vector<32x64xf32>, vector<8x64xf32> -> vector<8x64xf32>
    %c0_18 = arith.constant 0 : index
    %c0_19 = arith.constant 0 : index
    %34 = vector.load %arg9[%c0_18, %c0_19] : memref<1x64xf32, #tpu.memory_space<vmem>>, vector<1x64xf32>
    %35 = vector.broadcast %34 : vector<1x64xf32> to vector<8x64xf32>
    %36 = arith.addf %33, %35 : vector<8x64xf32>
    %37 = vector.extract_strided_slice %36 {offsets = [0, 0], sizes = [8, 32], strides = [1, 1]} : vector<8x64xf32> to vector<8x32xf32>
    %38 = vector.extract_strided_slice %36 {offsets = [0, 32], sizes = [8, 32], strides = [1, 1]} : vector<8x64xf32> to vector<8x32xf32>
    %cst_20 = arith.constant 0.353553385 : f32
    %39 = vector.broadcast %cst_20 : f32 to vector<8x32xf32>
    %40 = arith.mulf %31, %39 : vector<8x32xf32>
    %41 = vector.extract_strided_slice %40 {offsets = [0, 0], sizes = [8, 8], strides = [1, 1]} : vector<8x32xf32> to vector<8x8xf32>
    %42 = vector.extract_strided_slice %40 {offsets = [0, 8], sizes = [8, 8], strides = [1, 1]} : vector<8x32xf32> to vector<8x8xf32>
    %43 = vector.extract_strided_slice %40 {offsets = [0, 16], sizes = [8, 8], strides = [1, 1]} : vector<8x32xf32> to vector<8x8xf32>
    %44 = vector.extract_strided_slice %40 {offsets = [0, 24], sizes = [8, 8], strides = [1, 1]} : vector<8x32xf32> to vector<8x8xf32>
    %45 = vector.shape_cast %41 : vector<8x8xf32> to vector<1x8x8xf32>
    %46 = vector.shape_cast %42 : vector<8x8xf32> to vector<1x8x8xf32>
    %47 = vector.shape_cast %43 : vector<8x8xf32> to vector<1x8x8xf32>
    %48 = vector.shape_cast %44 : vector<8x8xf32> to vector<1x8x8xf32>
    %49 = tpu.concatenate %45, %46, %47, %48 in 0 : vector<1x8x8xf32>, vector<1x8x8xf32>, vector<1x8x8xf32>, vector<1x8x8xf32> -> vector<4x8x8xf32>
    %50 = vector.extract_strided_slice %37 {offsets = [0, 0], sizes = [8, 8], strides = [1, 1]} : vector<8x32xf32> to vector<8x8xf32>
    %51 = vector.extract_strided_slice %37 {offsets = [0, 8], sizes = [8, 8], strides = [1, 1]} : vector<8x32xf32> to vector<8x8xf32>
    %52 = vector.extract_strided_slice %37 {offsets = [0, 16], sizes = [8, 8], strides = [1, 1]} : vector<8x32xf32> to vector<8x8xf32>
    %53 = vector.extract_strided_slice %37 {offsets = [0, 24], sizes = [8, 8], strides = [1, 1]} : vector<8x32xf32> to vector<8x8xf32>
    %54 = vector.shape_cast %50 : vector<8x8xf32> to vector<1x8x8xf32>
    %55 = vector.shape_cast %51 : vector<8x8xf32> to vector<1x8x8xf32>
    %56 = vector.shape_cast %52 : vector<8x8xf32> to vector<1x8x8xf32>
    %57 = vector.shape_cast %53 : vector<8x8xf32> to vector<1x8x8xf32>
    %58 = tpu.concatenate %54, %55, %56, %57 in 0 : vector<1x8x8xf32>, vector<1x8x8xf32>, vector<1x8x8xf32>, vector<1x8x8xf32> -> vector<4x8x8xf32>
    %59 = vector.extract_strided_slice %38 {offsets = [0, 0], sizes = [8, 8], strides = [1, 1]} : vector<8x32xf32> to vector<8x8xf32>
    %60 = vector.extract_strided_slice %38 {offsets = [0, 8], sizes = [8, 8], strides = [1, 1]} : vector<8x32xf32> to vector<8x8xf32>
    %61 = vector.extract_strided_slice %38 {offsets = [0, 16], sizes = [8, 8], strides = [1, 1]} : vector<8x32xf32> to vector<8x8xf32>
    %62 = vector.extract_strided_slice %38 {offsets = [0, 24], sizes = [8, 8], strides = [1, 1]} : vector<8x32xf32> to vector<8x8xf32>
    %63 = vector.shape_cast %59 : vector<8x8xf32> to vector<1x8x8xf32>
    %64 = vector.shape_cast %60 : vector<8x8xf32> to vector<1x8x8xf32>
    %65 = vector.shape_cast %61 : vector<8x8xf32> to vector<1x8x8xf32>
    %66 = vector.shape_cast %62 : vector<8x8xf32> to vector<1x8x8xf32>
    %67 = tpu.concatenate %63, %64, %65, %66 in 0 : vector<1x8x8xf32>, vector<1x8x8xf32>, vector<1x8x8xf32>, vector<1x8x8xf32> -> vector<4x8x8xf32>
    "tpu.trace_start"() <{level = 10 : i32, message = "hqd,hkd->hqk"}> : () -> ()
    %cst_21 = arith.constant dense<0.000000e+00> : vector<4x8x8xf32>
    %68 = tpu.matmul %49, %58, %cst_21 {dimension_numbers = #tpu.dot_dimension_numbers<[2], [2], [1], [1], [0, 0, 0, 1, 1, 1], [0], [0]>} : vector<4x8x8xf32>, vector<4x8x8xf32>, vector<4x8x8xf32> -> vector<4x8x8xf32>
    "tpu.trace_stop"() : () -> ()
    %c0_22 = arith.constant 0 : index
    %c0_23 = arith.constant 0 : index
    %c0_24 = arith.constant 0 : index
    %69 = vector.load %arg3[%c0_22, %c0_23, %c0_24] : memref<1x1x8xbf16, #tpu.memory_space<vmem>>, vector<1x1x8xbf16>
    %70 = vector.shape_cast %69 : vector<1x1x8xbf16> to vector<1x8xbf16>
    %71 = arith.extf %70 : vector<1x8xbf16> to vector<1x8xf32>
    %72 = vector.shape_cast %71 : vector<1x8xf32> to vector<1x8xf32>
    %73 = vector.broadcast %72 : vector<1x8xf32> to vector<8x8xf32>
    %74 = vector.shape_cast %73 : vector<8x8xf32> to vector<1x8x8xf32>
    %75 = vector.broadcast %74 : vector<1x8x8xf32> to vector<4x8x8xf32>
    %76 = arith.addf %68, %75 : vector<4x8x8xf32>
    %cst_25 = arith.constant dense<0xFF800000> : vector<4x8xf32>
    %77 = vector.multi_reduction <maximumf>, %76, %cst_25 [2] : vector<4x8x8xf32> to vector<4x8xf32>
    %78 = vector.shape_cast %77 : vector<4x8xf32> to vector<4x8x1xf32>
    %79 = vector.broadcast %78 : vector<4x8x1xf32> to vector<4x8x8xf32>
    %80 = arith.subf %76, %79 : vector<4x8x8xf32>
    %81 = math.exp %80 : vector<4x8x8xf32>
    %cst_26 = arith.constant dense<0.000000e+00> : vector<4x8xf32>
    %82 = vector.multi_reduction <add>, %81, %cst_26 [2] : vector<4x8x8xf32> to vector<4x8xf32>
    %83 = vector.shape_cast %82 : vector<4x8xf32> to vector<4x8x1xf32>
    %84 = tpu.reciprocal %83 : vector<4x8x1xf32> -> vector<4x8x1xf32>
    %85 = vector.broadcast %84 : vector<4x8x1xf32> to vector<4x8x8xf32>
    %86 = arith.mulf %81, %85 : vector<4x8x8xf32>
    "tpu.trace_start"() <{level = 10 : i32, message = "hqk,hkd->hqd"}> : () -> ()
    %cst_27 = arith.constant dense<0.000000e+00> : vector<4x8x8xf32>
    %87 = tpu.matmul %86, %67, %cst_27 {dimension_numbers = #tpu.dot_dimension_numbers<[2], [1], [1], [2], [0, 0, 0, 1, 1, 2], [0], [0]>} : vector<4x8x8xf32>, vector<4x8x8xf32>, vector<4x8x8xf32> -> vector<4x8x8xf32>
    "tpu.trace_stop"() : () -> ()
    %88 = vector.extract_strided_slice %87 {offsets = [0, 0, 0], sizes = [1, 8, 8], strides = [1, 1, 1]} : vector<4x8x8xf32> to vector<1x8x8xf32>
    %89 = vector.shape_cast %88 : vector<1x8x8xf32> to vector<8x8xf32>
    %90 = vector.extract_strided_slice %87 {offsets = [1, 0, 0], sizes = [1, 8, 8], strides = [1, 1, 1]} : vector<4x8x8xf32> to vector<1x8x8xf32>
    %91 = vector.shape_cast %90 : vector<1x8x8xf32> to vector<8x8xf32>
    %92 = vector.extract_strided_slice %87 {offsets = [2, 0, 0], sizes = [1, 8, 8], strides = [1, 1, 1]} : vector<4x8x8xf32> to vector<1x8x8xf32>
    %93 = vector.shape_cast %92 : vector<1x8x8xf32> to vector<8x8xf32>
    %94 = vector.extract_strided_slice %87 {offsets = [3, 0, 0], sizes = [1, 8, 8], strides = [1, 1, 1]} : vector<4x8x8xf32> to vector<1x8x8xf32>
    %95 = vector.shape_cast %94 : vector<1x8x8xf32> to vector<8x8xf32>
    %96 = tpu.concatenate %89, %91, %93, %95 in 1 : vector<8x8xf32>, vector<8x8xf32>, vector<8x8xf32>, vector<8x8xf32> -> vector<8x32xf32>
    %c0_28 = arith.constant 0 : index
    %c0_29 = arith.constant 0 : index
    %97 = vector.load %arg10[%c0_28, %c0_29] : memref<32x32xf32, #tpu.memory_space<vmem>>, vector<32x32xf32>
    %cst_30 = arith.constant dense<0.000000e+00> : vector<8x32xf32>
    %98 = tpu.matmul %96, %97, %cst_30 {dimension_numbers = #tpu.dot_dimension_numbers<[1], [0], [0], [1], [0, 0, 1, 1], [], []>} : vector<8x32xf32>, vector<32x32xf32>, vector<8x32xf32> -> vector<8x32xf32>
    %c0_31 = arith.constant 0 : index
    %c0_32 = arith.constant 0 : index
    %99 = vector.load %arg11[%c0_31, %c0_32] : memref<1x32xf32, #tpu.memory_space<vmem>>, vector<1x32xf32>
    %100 = vector.broadcast %99 : vector<1x32xf32> to vector<8x32xf32>
    %101 = arith.addf %98, %100 : vector<8x32xf32>
    %102 = arith.addf %1, %101 : vector<8x32xf32>
    %c0_33 = arith.constant 0 : index
    %c0_34 = arith.constant 0 : index
    %c0_35 = arith.constant 0 : index
    %103 = vector.load %arg12[%c0_33, %c0_34, %c0_35] : memref<1x8x32xf32, #tpu.memory_space<vmem>>, vector<1x8x32xf32>
    %104 = vector.shape_cast %103 : vector<1x8x32xf32> to vector<8x32xf32>
    %105 = vector.shape_cast %102 : vector<8x32xf32> to vector<1x8x32xf32>
    tpu.vector_store %arg12[%c0_33, %c0_34, %c0_35], %105 {strides = array<i32>} : memref<1x8x32xf32, #tpu.memory_space<vmem>>, vector<1x8x32xf32>,
    return
  }
  func.func @transform_0(%arg0: i32, %arg1: i32) -> (i32, i32, i32) {
    %c0_i32 = arith.constant 0 : i32
    %c0_i32_0 = arith.constant 0 : i32
    return %arg0, %arg1, %c0_i32 : i32, i32, i32
  }
  func.func @transform_1(%arg0: i32, %arg1: i32) -> (i32, i32, i32) {
    %c0_i32 = arith.constant 0 : i32
    %c0_i32_0 = arith.constant 0 : i32
    %c0_i32_1 = arith.constant 0 : i32
    return %arg0, %c0_i32, %c0_i32_0 : i32, i32, i32
  }
  func.func @transform_2(%arg0: i32, %arg1: i32) -> (i32, i32) {
    %c0_i32 = arith.constant 0 : i32
    %c0_i32_0 = arith.constant 0 : i32
    %c0_i32_1 = arith.constant 0 : i32
    return %c0_i32, %c0_i32_0 : i32, i32
  }
  func.func @transform_3(%arg0: i32, %arg1: i32) -> (i32, i32) {
    %c0_i32 = arith.constant 0 : i32
    %c0_i32_0 = arith.constant 0 : i32
    %c0_i32_1 = arith.constant 0 : i32
    return %c0_i32, %c0_i32_0 : i32, i32
  }
  func.func @transform_4(%arg0: i32, %arg1: i32) -> (i32, i32) {
    %c0_i32 = arith.constant 0 : i32
    %c0_i32_0 = arith.constant 0 : i32
    %c0_i32_1 = arith.constant 0 : i32
    return %c0_i32, %c0_i32_0 : i32, i32
  }
  func.func @transform_5(%arg0: i32, %arg1: i32) -> (i32, i32) {
    %c0_i32 = arith.constant 0 : i32
    %c0_i32_0 = arith.constant 0 : i32
    %c0_i32_1 = arith.constant 0 : i32
    return %c0_i32, %c0_i32_0 : i32, i32
  }
  func.func @transform_6(%arg0: i32, %arg1: i32) -> (i32, i32) {
    %c0_i32 = arith.constant 0 : i32
    %c0_i32_0 = arith.constant 0 : i32
    %c0_i32_1 = arith.constant 0 : i32
    return %c0_i32, %c0_i32_0 : i32, i32
  }
  func.func @transform_7(%arg0: i32, %arg1: i32) -> (i32, i32) {
    %c0_i32 = arith.constant 0 : i32
    %c0_i32_0 = arith.constant 0 : i32
    %c0_i32_1 = arith.constant 0 : i32
    return %c0_i32, %c0_i32_0 : i32, i32
  }
  func.func @transform_8(%arg0: i32, %arg1: i32) -> (i32, i32) {
    %c0_i32 = arith.constant 0 : i32
    %c0_i32_0 = arith.constant 0 : i32
    %c0_i32_1 = arith.constant 0 : i32
    return %c0_i32, %c0_i32_0 : i32, i32
  }
  func.func @transform_9(%arg0: i32, %arg1: i32) -> (i32, i32) {
    %c0_i32 = arith.constant 0 : i32
    %c0_i32_0 = arith.constant 0 : i32
    %c0_i32_1 = arith.constant 0 : i32
    return %c0_i32, %c0_i32_0 : i32, i32
  }
  func.func @transform_10(%arg0: i32, %arg1: i32) -> (i32, i32, i32) {
    %c0_i32 = arith.constant 0 : i32
    %c0_i32_0 = arith.constant 0 : i32
    return %arg0, %arg1, %c0_i32 : i32, i32, i32
  }
}

module attributes {stable_mosaic.version = 11 : i64} {
  func.func @_ffn_sublayer_kernel(%arg0: i32, %arg1: i32, %arg2: memref<16x32xf32, #tpu.memory_space<vmem>>, %arg3: memref<1x32xf32, #tpu.memory_space<vmem>>, %arg4: memref<1x32xf32, #tpu.memory_space<vmem>>, %arg5: memref<32x64xf32, #tpu.memory_space<vmem>>, %arg6: memref<1x64xf32, #tpu.memory_space<vmem>>, %arg7: memref<64x32xf32, #tpu.memory_space<vmem>>, %arg8: memref<1x32xf32, #tpu.memory_space<vmem>>, %arg9: memref<1x32xf32, #tpu.memory_space<vmem>>, %arg10: memref<1x32xf32, #tpu.memory_space<vmem>>, %arg11: memref<16x32xf32, #tpu.memory_space<vmem>>, %arg12: memref<16x32xf32, #tpu.memory_space<vmem>>, %arg13: memref<16x32xf32, #tpu.memory_space<vmem>>) attributes {dimension_semantics = [#tpu.dimension_semantics<parallel>, #tpu.dimension_semantics<arbitrary>], iteration_bounds = array<i64: 1, 1>, scalar_prefetch = 0 : i64, scratch_operands = 2 : i64, tpu.core_type = #tpu.core_type<tc>, window_params = [{transform_indices = @transform_0, window_bounds = array<i64: 16, 32>}, {pipeline_mode = #tpu.pipeline_mode<synchronous>, transform_indices = @transform_1, window_bounds = array<i64: 1, 32>}, {pipeline_mode = #tpu.pipeline_mode<synchronous>, transform_indices = @transform_2, window_bounds = array<i64: 1, 32>}, {transform_indices = @transform_3, window_bounds = array<i64: 32, 64>}, {transform_indices = @transform_4, window_bounds = array<i64: 1, 64>}, {transform_indices = @transform_5, window_bounds = array<i64: 64, 32>}, {pipeline_mode = #tpu.pipeline_mode<synchronous>, transform_indices = @transform_6, window_bounds = array<i64: 1, 32>}, {pipeline_mode = #tpu.pipeline_mode<synchronous>, transform_indices = @transform_7, window_bounds = array<i64: 1, 32>}, {pipeline_mode = #tpu.pipeline_mode<synchronous>, transform_indices = @transform_8, window_bounds = array<i64: 1, 32>}, {transform_indices = @transform_9, window_bounds = array<i64: 16, 32>}]} {
    %c0_i32 = arith.constant 0 : i32
    %0 = arith.cmpi eq, %arg1, %c0_i32 : i32
    %1 = arith.extui %0 : i1 to i32
    %c0_i32_0 = arith.constant 0 : i32
    %2 = arith.cmpi ne, %1, %c0_i32_0 : i32
    scf.if %2 {
      %cst_16 = arith.constant 0.000000e+00 : f32
      %19 = vector.broadcast %cst_16 : f32 to vector<16x32xf32>
      %c0_17 = arith.constant 0 : index
      %c0_18 = arith.constant 0 : index
      %20 = vector.load %arg13[%c0_17, %c0_18] : memref<16x32xf32, #tpu.memory_space<vmem>>, vector<16x32xf32>
      tpu.vector_store %arg13[%c0_17, %c0_18], %19 {strides = array<i32>} : memref<16x32xf32, #tpu.memory_space<vmem>>, vector<16x32xf32>,
      %c0_19 = arith.constant 0 : index
      %c0_20 = arith.constant 0 : index
      %21 = vector.load %arg2[%c0_19, %c0_20] : memref<16x32xf32, #tpu.memory_space<vmem>>, vector<16x32xf32>
      %c0_21 = arith.constant 0 : index
      %c0_22 = arith.constant 0 : index
      %22 = vector.load %arg3[%c0_21, %c0_22] : memref<1x32xf32, #tpu.memory_space<vmem>>, vector<1x32xf32>
      %c0_23 = arith.constant 0 : index
      %c0_24 = arith.constant 0 : index
      %23 = vector.load %arg4[%c0_23, %c0_24] : memref<1x32xf32, #tpu.memory_space<vmem>>, vector<1x32xf32>
      %cst_25 = arith.constant dense<0.000000e+00> : vector<16xf32>
      %24 = vector.multi_reduction <add>, %21, %cst_25 [1] : vector<16x32xf32> to vector<16xf32>
      %25 = vector.shape_cast %24 : vector<16xf32> to vector<16x1xf32>
      %cst_26 = arith.constant 3.200000e+01 : f32
      %26 = vector.broadcast %cst_26 : f32 to vector<16x1xf32>
      %27 = arith.divf %25, %26 : vector<16x1xf32>
      %28 = vector.broadcast %27 : vector<16x1xf32> to vector<16x32xf32>
      %29 = arith.subf %21, %28 : vector<16x32xf32>
      %30 = arith.mulf %29, %29 : vector<16x32xf32>
      %cst_27 = arith.constant dense<0.000000e+00> : vector<16xf32>
      %31 = vector.multi_reduction <add>, %30, %cst_27 [1] : vector<16x32xf32> to vector<16xf32>
      %32 = vector.shape_cast %31 : vector<16xf32> to vector<16x1xf32>
      %cst_28 = arith.constant 0.0322580636 : f32
      %33 = vector.broadcast %cst_28 : f32 to vector<16x1xf32>
      %34 = arith.mulf %32, %33 : vector<16x1xf32>
      %35 = math.sqrt %34 : vector<16x1xf32>
      %cst_29 = arith.constant 9.99999997E-7 : f32
      %36 = vector.broadcast %cst_29 : f32 to vector<16x1xf32>
      %37 = arith.addf %35, %36 : vector<16x1xf32>
      %38 = tpu.reciprocal %37 : vector<16x1xf32> -> vector<16x1xf32>
      %39 = vector.broadcast %27 : vector<16x1xf32> to vector<16x32xf32>
      %40 = arith.subf %21, %39 : vector<16x32xf32>
      %41 = vector.broadcast %22 : vector<1x32xf32> to vector<16x32xf32>
      %42 = arith.mulf %41, %40 : vector<16x32xf32>
      %43 = vector.broadcast %38 : vector<16x1xf32> to vector<16x32xf32>
      %44 = arith.mulf %42, %43 : vector<16x32xf32>
      %45 = vector.broadcast %23 : vector<1x32xf32> to vector<16x32xf32>
      %46 = arith.addf %44, %45 : vector<16x32xf32>
      %c0_30 = arith.constant 0 : index
      %c0_31 = arith.constant 0 : index
      %47 = vector.load %arg12[%c0_30, %c0_31] : memref<16x32xf32, #tpu.memory_space<vmem>>, vector<16x32xf32>
      tpu.vector_store %arg12[%c0_30, %c0_31], %46 {strides = array<i32>} : memref<16x32xf32, #tpu.memory_space<vmem>>, vector<16x32xf32>,
    } else {
    }
    %c0 = arith.constant 0 : index
    %c0_1 = arith.constant 0 : index
    %3 = vector.load %arg12[%c0, %c0_1] : memref<16x32xf32, #tpu.memory_space<vmem>>, vector<16x32xf32>
    %c0_2 = arith.constant 0 : index
    %c0_3 = arith.constant 0 : index
    %4 = vector.load %arg5[%c0_2, %c0_3] : memref<32x64xf32, #tpu.memory_space<vmem>>, vector<32x64xf32>
    %cst = arith.constant dense<0.000000e+00> : vector<16x64xf32>
    %5 = tpu.matmul %3, %4, %cst {dimension_numbers = #tpu.dot_dimension_numbers<[1], [0], [0], [1], [0, 0, 1, 1], [], []>} : vector<16x32xf32>, vector<32x64xf32>, vector<16x64xf32> -> vector<16x64xf32>
    %c0_4 = arith.constant 0 : index
    %c0_5 = arith.constant 0 : index
    %6 = vector.load %arg6[%c0_4, %c0_5] : memref<1x64xf32, #tpu.memory_space<vmem>>, vector<1x64xf32>
    %7 = vector.broadcast %6 : vector<1x64xf32> to vector<16x64xf32>
    %8 = arith.addf %5, %7 : vector<16x64xf32>
    %cst_6 = arith.constant 0.000000e+00 : f32
    %9 = vector.broadcast %cst_6 : f32 to vector<16x64xf32>
    %10 = arith.maximumf %8, %9 : vector<16x64xf32>
    %c0_7 = arith.constant 0 : index
    %c0_8 = arith.constant 0 : index
    %11 = vector.load %arg13[%c0_7, %c0_8] : memref<16x32xf32, #tpu.memory_space<vmem>>, vector<16x32xf32>
    %c0_9 = arith.constant 0 : index
    %c0_10 = arith.constant 0 : index
    %12 = vector.load %arg7[%c0_9, %c0_10] : memref<64x32xf32, #tpu.memory_space<vmem>>, vector<64x32xf32>
    %cst_11 = arith.constant dense<0.000000e+00> : vector<16x32xf32>
    %13 = tpu.matmul %10, %12, %cst_11 {dimension_numbers = #tpu.dot_dimension_numbers<[1], [0], [0], [1], [0, 0, 1, 1], [], []>} : vector<16x64xf32>, vector<64x32xf32>, vector<16x32xf32> -> vector<16x32xf32>
    %14 = arith.addf %11, %13 : vector<16x32xf32>
    %c0_12 = arith.constant 0 : index
    %c0_13 = arith.constant 0 : index
    %15 = vector.load %arg13[%c0_12, %c0_13] : memref<16x32xf32, #tpu.memory_space<vmem>>, vector<16x32xf32>
    tpu.vector_store %arg13[%c0_12, %c0_13], %14 {strides = array<i32>} : memref<16x32xf32, #tpu.memory_space<vmem>>, vector<16x32xf32>,
    %c0_i32_14 = arith.constant 0 : i32
    %16 = arith.cmpi eq, %arg1, %c0_i32_14 : i32
    %17 = arith.extui %16 : i1 to i32
    %c0_i32_15 = arith.constant 0 : i32
    %18 = arith.cmpi ne, %17, %c0_i32_15 : i32
    scf.if %18 {
      %c0_16 = arith.constant 0 : index
      %c0_17 = arith.constant 0 : index
      %19 = vector.load %arg2[%c0_16, %c0_17] : memref<16x32xf32, #tpu.memory_space<vmem>>, vector<16x32xf32>
      %c0_18 = arith.constant 0 : index
      %c0_19 = arith.constant 0 : index
      %20 = vector.load %arg13[%c0_18, %c0_19] : memref<16x32xf32, #tpu.memory_space<vmem>>, vector<16x32xf32>
      %21 = arith.addf %19, %20 : vector<16x32xf32>
      %c0_20 = arith.constant 0 : index
      %c0_21 = arith.constant 0 : index
      %22 = vector.load %arg8[%c0_20, %c0_21] : memref<1x32xf32, #tpu.memory_space<vmem>>, vector<1x32xf32>
      %23 = vector.broadcast %22 : vector<1x32xf32> to vector<16x32xf32>
      %24 = arith.addf %21, %23 : vector<16x32xf32>
      %c0_22 = arith.constant 0 : index
      %c0_23 = arith.constant 0 : index
      %25 = vector.load %arg9[%c0_22, %c0_23] : memref<1x32xf32, #tpu.memory_space<vmem>>, vector<1x32xf32>
      %c0_24 = arith.constant 0 : index
      %c0_25 = arith.constant 0 : index
      %26 = vector.load %arg10[%c0_24, %c0_25] : memref<1x32xf32, #tpu.memory_space<vmem>>, vector<1x32xf32>
      %cst_26 = arith.constant dense<0.000000e+00> : vector<16xf32>
      %27 = vector.multi_reduction <add>, %24, %cst_26 [1] : vector<16x32xf32> to vector<16xf32>
      %28 = vector.shape_cast %27 : vector<16xf32> to vector<16x1xf32>
      %cst_27 = arith.constant 3.200000e+01 : f32
      %29 = vector.broadcast %cst_27 : f32 to vector<16x1xf32>
      %30 = arith.divf %28, %29 : vector<16x1xf32>
      %31 = vector.broadcast %30 : vector<16x1xf32> to vector<16x32xf32>
      %32 = arith.subf %24, %31 : vector<16x32xf32>
      %33 = arith.mulf %32, %32 : vector<16x32xf32>
      %cst_28 = arith.constant dense<0.000000e+00> : vector<16xf32>
      %34 = vector.multi_reduction <add>, %33, %cst_28 [1] : vector<16x32xf32> to vector<16xf32>
      %35 = vector.shape_cast %34 : vector<16xf32> to vector<16x1xf32>
      %cst_29 = arith.constant 0.0322580636 : f32
      %36 = vector.broadcast %cst_29 : f32 to vector<16x1xf32>
      %37 = arith.mulf %35, %36 : vector<16x1xf32>
      %38 = math.sqrt %37 : vector<16x1xf32>
      %cst_30 = arith.constant 9.99999997E-7 : f32
      %39 = vector.broadcast %cst_30 : f32 to vector<16x1xf32>
      %40 = arith.addf %38, %39 : vector<16x1xf32>
      %41 = tpu.reciprocal %40 : vector<16x1xf32> -> vector<16x1xf32>
      %42 = vector.broadcast %30 : vector<16x1xf32> to vector<16x32xf32>
      %43 = arith.subf %24, %42 : vector<16x32xf32>
      %44 = vector.broadcast %25 : vector<1x32xf32> to vector<16x32xf32>
      %45 = arith.mulf %44, %43 : vector<16x32xf32>
      %46 = vector.broadcast %41 : vector<16x1xf32> to vector<16x32xf32>
      %47 = arith.mulf %45, %46 : vector<16x32xf32>
      %48 = vector.broadcast %26 : vector<1x32xf32> to vector<16x32xf32>
      %49 = arith.addf %47, %48 : vector<16x32xf32>
      %c0_31 = arith.constant 0 : index
      %c0_32 = arith.constant 0 : index
      %50 = vector.load %arg11[%c0_31, %c0_32] : memref<16x32xf32, #tpu.memory_space<vmem>>, vector<16x32xf32>
      tpu.vector_store %arg11[%c0_31, %c0_32], %49 {strides = array<i32>} : memref<16x32xf32, #tpu.memory_space<vmem>>, vector<16x32xf32>,
    } else {
    }
    return
  }
  func.func @transform_0(%arg0: i32, %arg1: i32) -> (i32, i32) {
    %c0_i32 = arith.constant 0 : i32
    %c0_i32_0 = arith.constant 0 : i32
    return %arg0, %c0_i32 : i32, i32
  }
  func.func @transform_1(%arg0: i32, %arg1: i32) -> (i32, i32) {
    %c0_i32 = arith.constant 0 : i32
    %c0_i32_0 = arith.constant 0 : i32
    %c0_i32_1 = arith.constant 0 : i32
    return %c0_i32, %c0_i32_0 : i32, i32
  }
  func.func @transform_2(%arg0: i32, %arg1: i32) -> (i32, i32) {
    %c0_i32 = arith.constant 0 : i32
    %c0_i32_0 = arith.constant 0 : i32
    %c0_i32_1 = arith.constant 0 : i32
    return %c0_i32, %c0_i32_0 : i32, i32
  }
  func.func @transform_3(%arg0: i32, %arg1: i32) -> (i32, i32) {
    %c0_i32 = arith.constant 0 : i32
    %c0_i32_0 = arith.constant 0 : i32
    return %c0_i32, %arg1 : i32, i32
  }
  func.func @transform_4(%arg0: i32, %arg1: i32) -> (i32, i32) {
    %c0_i32 = arith.constant 0 : i32
    %c0_i32_0 = arith.constant 0 : i32
    return %c0_i32, %arg1 : i32, i32
  }
  func.func @transform_5(%arg0: i32, %arg1: i32) -> (i32, i32) {
    %c0_i32 = arith.constant 0 : i32
    %c0_i32_0 = arith.constant 0 : i32
    return %arg1, %c0_i32 : i32, i32
  }
  func.func @transform_6(%arg0: i32, %arg1: i32) -> (i32, i32) {
    %c0_i32 = arith.constant 0 : i32
    %c0_i32_0 = arith.constant 0 : i32
    %c0_i32_1 = arith.constant 0 : i32
    return %c0_i32, %c0_i32_0 : i32, i32
  }
  func.func @transform_7(%arg0: i32, %arg1: i32) -> (i32, i32) {
    %c0_i32 = arith.constant 0 : i32
    %c0_i32_0 = arith.constant 0 : i32
    %c0_i32_1 = arith.constant 0 : i32
    return %c0_i32, %c0_i32_0 : i32, i32
  }
  func.func @transform_8(%arg0: i32, %arg1: i32) -> (i32, i32) {
    %c0_i32 = arith.constant 0 : i32
    %c0_i32_0 = arith.constant 0 : i32
    %c0_i32_1 = arith.constant 0 : i32
    return %c0_i32, %c0_i32_0 : i32, i32
  }
  func.func @transform_9(%arg0: i32, %arg1: i32) -> (i32, i32) {
    %c0_i32 = arith.constant 0 : i32
    %c0_i32_0 = arith.constant 0 : i32
    return %arg0, %c0_i32 : i32, i32
  }
}

module attributes {stable_mosaic.version = 11 : i64} {
  func.func @_ffn_sublayer_kernel(%arg0: i32, %arg1: i32, %arg2: memref<16x32xf32, #tpu.memory_space<vmem>>, %arg3: memref<1x32xf32, #tpu.memory_space<vmem>>, %arg4: memref<1x32xf32, #tpu.memory_space<vmem>>, %arg5: memref<32x64xf32, #tpu.memory_space<vmem>>, %arg6: memref<1x64xf32, #tpu.memory_space<vmem>>, %arg7: memref<64x32xf32, #tpu.memory_space<vmem>>, %arg8: memref<1x32xf32, #tpu.memory_space<vmem>>, %arg9: memref<16x32xf32, #tpu.memory_space<vmem>>, %arg10: memref<16x32xf32, #tpu.memory_space<vmem>>, %arg11: memref<16x32xf32, #tpu.memory_space<vmem>>) attributes {dimension_semantics = [#tpu.dimension_semantics<parallel>, #tpu.dimension_semantics<arbitrary>], iteration_bounds = array<i64: 1, 1>, scalar_prefetch = 0 : i64, scratch_operands = 2 : i64, tpu.core_type = #tpu.core_type<tc>, window_params = [{transform_indices = @transform_0, window_bounds = array<i64: 16, 32>}, {pipeline_mode = #tpu.pipeline_mode<synchronous>, transform_indices = @transform_1, window_bounds = array<i64: 1, 32>}, {pipeline_mode = #tpu.pipeline_mode<synchronous>, transform_indices = @transform_2, window_bounds = array<i64: 1, 32>}, {transform_indices = @transform_3, window_bounds = array<i64: 32, 64>}, {transform_indices = @transform_4, window_bounds = array<i64: 1, 64>}, {transform_indices = @transform_5, window_bounds = array<i64: 64, 32>}, {pipeline_mode = #tpu.pipeline_mode<synchronous>, transform_indices = @transform_6, window_bounds = array<i64: 1, 32>}, {transform_indices = @transform_7, window_bounds = array<i64: 16, 32>}]} {
    %c0_i32 = arith.constant 0 : i32
    %0 = arith.cmpi eq, %arg1, %c0_i32 : i32
    %1 = arith.extui %0 : i1 to i32
    %c0_i32_0 = arith.constant 0 : i32
    %2 = arith.cmpi ne, %1, %c0_i32_0 : i32
    scf.if %2 {
      %cst_16 = arith.constant 0.000000e+00 : f32
      %19 = vector.broadcast %cst_16 : f32 to vector<16x32xf32>
      %c0_17 = arith.constant 0 : index
      %c0_18 = arith.constant 0 : index
      %20 = vector.load %arg11[%c0_17, %c0_18] : memref<16x32xf32, #tpu.memory_space<vmem>>, vector<16x32xf32>
      tpu.vector_store %arg11[%c0_17, %c0_18], %19 {strides = array<i32>} : memref<16x32xf32, #tpu.memory_space<vmem>>, vector<16x32xf32>,
      %c0_19 = arith.constant 0 : index
      %c0_20 = arith.constant 0 : index
      %21 = vector.load %arg2[%c0_19, %c0_20] : memref<16x32xf32, #tpu.memory_space<vmem>>, vector<16x32xf32>
      %c0_21 = arith.constant 0 : index
      %c0_22 = arith.constant 0 : index
      %22 = vector.load %arg3[%c0_21, %c0_22] : memref<1x32xf32, #tpu.memory_space<vmem>>, vector<1x32xf32>
      %c0_23 = arith.constant 0 : index
      %c0_24 = arith.constant 0 : index
      %23 = vector.load %arg4[%c0_23, %c0_24] : memref<1x32xf32, #tpu.memory_space<vmem>>, vector<1x32xf32>
      %cst_25 = arith.constant dense<0.000000e+00> : vector<16xf32>
      %24 = vector.multi_reduction <add>, %21, %cst_25 [1] : vector<16x32xf32> to vector<16xf32>
      %25 = vector.shape_cast %24 : vector<16xf32> to vector<16x1xf32>
      %cst_26 = arith.constant 3.200000e+01 : f32
      %26 = vector.broadcast %cst_26 : f32 to vector<16x1xf32>
      %27 = arith.divf %25, %26 : vector<16x1xf32>
      %28 = vector.broadcast %27 : vector<16x1xf32> to vector<16x32xf32>
      %29 = arith.subf %21, %28 : vector<16x32xf32>
      %30 = arith.mulf %29, %29 : vector<16x32xf32>
      %cst_27 = arith.constant dense<0.000000e+00> : vector<16xf32>
      %31 = vector.multi_reduction <add>, %30, %cst_27 [1] : vector<16x32xf32> to vector<16xf32>
      %32 = vector.shape_cast %31 : vector<16xf32> to vector<16x1xf32>
      %cst_28 = arith.constant 0.0322580636 : f32
      %33 = vector.broadcast %cst_28 : f32 to vector<16x1xf32>
      %34 = arith.mulf %32, %33 : vector<16x1xf32>
      %35 = math.sqrt %34 : vector<16x1xf32>
      %cst_29 = arith.constant 9.99999997E-7 : f32
      %36 = vector.broadcast %cst_29 : f32 to vector<16x1xf32>
      %37 = arith.addf %35, %36 : vector<16x1xf32>
      %38 = tpu.reciprocal %37 : vector<16x1xf32> -> vector<16x1xf32>
      %39 = vector.broadcast %27 : vector<16x1xf32> to vector<16x32xf32>
      %40 = arith.subf %21, %39 : vector<16x32xf32>
      %41 = vector.broadcast %22 : vector<1x32xf32> to vector<16x32xf32>
      %42 = arith.mulf %41, %40 : vector<16x32xf32>
      %43 = vector.broadcast %38 : vector<16x1xf32> to vector<16x32xf32>
      %44 = arith.mulf %42, %43 : vector<16x32xf32>
      %45 = vector.broadcast %23 : vector<1x32xf32> to vector<16x32xf32>
      %46 = arith.addf %44, %45 : vector<16x32xf32>
      %c0_30 = arith.constant 0 : index
      %c0_31 = arith.constant 0 : index
      %47 = vector.load %arg10[%c0_30, %c0_31] : memref<16x32xf32, #tpu.memory_space<vmem>>, vector<16x32xf32>
      tpu.vector_store %arg10[%c0_30, %c0_31], %46 {strides = array<i32>} : memref<16x32xf32, #tpu.memory_space<vmem>>, vector<16x32xf32>,
    } else {
    }
    %c0 = arith.constant 0 : index
    %c0_1 = arith.constant 0 : index
    %3 = vector.load %arg10[%c0, %c0_1] : memref<16x32xf32, #tpu.memory_space<vmem>>, vector<16x32xf32>
    %c0_2 = arith.constant 0 : index
    %c0_3 = arith.constant 0 : index
    %4 = vector.load %arg5[%c0_2, %c0_3] : memref<32x64xf32, #tpu.memory_space<vmem>>, vector<32x64xf32>
    %cst = arith.constant dense<0.000000e+00> : vector<16x64xf32>
    %5 = tpu.matmul %3, %4, %cst {dimension_numbers = #tpu.dot_dimension_numbers<[1], [0], [0], [1], [0, 0, 1, 1], [], []>} : vector<16x32xf32>, vector<32x64xf32>, vector<16x64xf32> -> vector<16x64xf32>
    %c0_4 = arith.constant 0 : index
    %c0_5 = arith.constant 0 : index
    %6 = vector.load %arg6[%c0_4, %c0_5] : memref<1x64xf32, #tpu.memory_space<vmem>>, vector<1x64xf32>
    %7 = vector.broadcast %6 : vector<1x64xf32> to vector<16x64xf32>
    %8 = arith.addf %5, %7 : vector<16x64xf32>
    %cst_6 = arith.constant 0.000000e+00 : f32
    %9 = vector.broadcast %cst_6 : f32 to vector<16x64xf32>
    %10 = arith.maximumf %8, %9 : vector<16x64xf32>
    %c0_7 = arith.constant 0 : index
    %c0_8 = arith.constant 0 : index
    %11 = vector.load %arg11[%c0_7, %c0_8] : memref<16x32xf32, #tpu.memory_space<vmem>>, vector<16x32xf32>
    %c0_9 = arith.constant 0 : index
    %c0_10 = arith.constant 0 : index
    %12 = vector.load %arg7[%c0_9, %c0_10] : memref<64x32xf32, #tpu.memory_space<vmem>>, vector<64x32xf32>
    %cst_11 = arith.constant dense<0.000000e+00> : vector<16x32xf32>
    %13 = tpu.matmul %10, %12, %cst_11 {dimension_numbers = #tpu.dot_dimension_numbers<[1], [0], [0], [1], [0, 0, 1, 1], [], []>} : vector<16x64xf32>, vector<64x32xf32>, vector<16x32xf32> -> vector<16x32xf32>
    %14 = arith.addf %11, %13 : vector<16x32xf32>
    %c0_12 = arith.constant 0 : index
    %c0_13 = arith.constant 0 : index
    %15 = vector.load %arg11[%c0_12, %c0_13] : memref<16x32xf32, #tpu.memory_space<vmem>>, vector<16x32xf32>
    tpu.vector_store %arg11[%c0_12, %c0_13], %14 {strides = array<i32>} : memref<16x32xf32, #tpu.memory_space<vmem>>, vector<16x32xf32>,
    %c0_i32_14 = arith.constant 0 : i32
    %16 = arith.cmpi eq, %arg1, %c0_i32_14 : i32
    %17 = arith.extui %16 : i1 to i32
    %c0_i32_15 = arith.constant 0 : i32
    %18 = arith.cmpi ne, %17, %c0_i32_15 : i32
    scf.if %18 {
      %c0_16 = arith.constant 0 : index
      %c0_17 = arith.constant 0 : index
      %19 = vector.load %arg2[%c0_16, %c0_17] : memref<16x32xf32, #tpu.memory_space<vmem>>, vector<16x32xf32>
      %c0_18 = arith.constant 0 : index
      %c0_19 = arith.constant 0 : index
      %20 = vector.load %arg11[%c0_18, %c0_19] : memref<16x32xf32, #tpu.memory_space<vmem>>, vector<16x32xf32>
      %21 = arith.addf %19, %20 : vector<16x32xf32>
      %c0_20 = arith.constant 0 : index
      %c0_21 = arith.constant 0 : index
      %22 = vector.load %arg8[%c0_20, %c0_21] : memref<1x32xf32, #tpu.memory_space<vmem>>, vector<1x32xf32>
      %23 = vector.broadcast %22 : vector<1x32xf32> to vector<16x32xf32>
      %24 = arith.addf %21, %23 : vector<16x32xf32>
      %c0_22 = arith.constant 0 : index
      %c0_23 = arith.constant 0 : index
      %25 = vector.load %arg9[%c0_22, %c0_23] : memref<16x32xf32, #tpu.memory_space<vmem>>, vector<16x32xf32>
      tpu.vector_store %arg9[%c0_22, %c0_23], %24 {strides = array<i32>} : memref<16x32xf32, #tpu.memory_space<vmem>>, vector<16x32xf32>,
    } else {
    }
    return
  }
  func.func @transform_0(%arg0: i32, %arg1: i32) -> (i32, i32) {
    %c0_i32 = arith.constant 0 : i32
    %c0_i32_0 = arith.constant 0 : i32
    return %arg0, %c0_i32 : i32, i32
  }
  func.func @transform_1(%arg0: i32, %arg1: i32) -> (i32, i32) {
    %c0_i32 = arith.constant 0 : i32
    %c0_i32_0 = arith.constant 0 : i32
    %c0_i32_1 = arith.constant 0 : i32
    return %c0_i32, %c0_i32_0 : i32, i32
  }
  func.func @transform_2(%arg0: i32, %arg1: i32) -> (i32, i32) {
    %c0_i32 = arith.constant 0 : i32
    %c0_i32_0 = arith.constant 0 : i32
    %c0_i32_1 = arith.constant 0 : i32
    return %c0_i32, %c0_i32_0 : i32, i32
  }
  func.func @transform_3(%arg0: i32, %arg1: i32) -> (i32, i32) {
    %c0_i32 = arith.constant 0 : i32
    %c0_i32_0 = arith.constant 0 : i32
    return %c0_i32, %arg1 : i32, i32
  }
  func.func @transform_4(%arg0: i32, %arg1: i32) -> (i32, i32) {
    %c0_i32 = arith.constant 0 : i32
    %c0_i32_0 = arith.constant 0 : i32
    return %c0_i32, %arg1 : i32, i32
  }
  func.func @transform_5(%arg0: i32, %arg1: i32) -> (i32, i32) {
    %c0_i32 = arith.constant 0 : i32
    %c0_i32_0 = arith.constant 0 : i32
    return %arg1, %c0_i32 : i32, i32
  }
  func.func @transform_6(%arg0: i32, %arg1: i32) -> (i32, i32) {
    %c0_i32 = arith.constant 0 : i32
    %c0_i32_0 = arith.constant 0 : i32
    %c0_i32_1 = arith.constant 0 : i32
    return %c0_i32, %c0_i32_0 : i32, i32
  }
  func.func @transform_7(%arg0: i32, %arg1: i32) -> (i32, i32) {
    %c0_i32 = arith.constant 0 : i32
    %c0_i32_0 = arith.constant 0 : i32
    return %arg0, %c0_i32 : i32, i32
  }
}

module attributes {stable_mosaic.version = 11 : i64} {
  func.func @_attn_sublayer_kernel(%arg0: i32, %arg1: i32, %arg2: memref<1x8x32xf32, #tpu.memory_space<vmem>>, %arg3: memref<1x8x8xbf16, #tpu.memory_space<vmem>>, %arg4: memref<1x32xf32, #tpu.memory_space<vmem>>, %arg5: memref<1x32xf32, #tpu.memory_space<vmem>>, %arg6: memref<32x32xf32, #tpu.memory_space<vmem>>, %arg7: memref<1x32xf32, #tpu.memory_space<vmem>>, %arg8: memref<32x64xf32, #tpu.memory_space<vmem>>, %arg9: memref<1x64xf32, #tpu.memory_space<vmem>>, %arg10: memref<32x32xf32, #tpu.memory_space<vmem>>, %arg11: memref<1x32xf32, #tpu.memory_space<vmem>>, %arg12: memref<1x8x32xf32, #tpu.memory_space<vmem>>) attributes {dimension_semantics = [#tpu.dimension_semantics<parallel>, #tpu.dimension_semantics<parallel>], iteration_bounds = array<i64: 2, 1>, scalar_prefetch = 0 : i64, scratch_operands = 0 : i64, tpu.core_type = #tpu.core_type<tc>, window_params = [{transform_indices = @transform_0, window_bounds = array<i64: 1, 8, 32>}, {transform_indices = @transform_1, window_bounds = array<i64: 1, 8, 8>}, {pipeline_mode = #tpu.pipeline_mode<synchronous>, transform_indices = @transform_2, window_bounds = array<i64: 1, 32>}, {pipeline_mode = #tpu.pipeline_mode<synchronous>, transform_indices = @transform_3, window_bounds = array<i64: 1, 32>}, {pipeline_mode = #tpu.pipeline_mode<synchronous>, transform_indices = @transform_4, window_bounds = array<i64: 32, 32>}, {pipeline_mode = #tpu.pipeline_mode<synchronous>, transform_indices = @transform_5, window_bounds = array<i64: 1, 32>}, {pipeline_mode = #tpu.pipeline_mode<synchronous>, transform_indices = @transform_6, window_bounds = array<i64: 32, 64>}, {pipeline_mode = #tpu.pipeline_mode<synchronous>, transform_indices = @transform_7, window_bounds = array<i64: 1, 64>}, {pipeline_mode = #tpu.pipeline_mode<synchronous>, transform_indices = @transform_8, window_bounds = array<i64: 32, 32>}, {pipeline_mode = #tpu.pipeline_mode<synchronous>, transform_indices = @transform_9, window_bounds = array<i64: 1, 32>}, {transform_indices = @transform_10, window_bounds = array<i64: 1, 8, 32>}]} {
    %c0 = arith.constant 0 : index
    %c0_0 = arith.constant 0 : index
    %c0_1 = arith.constant 0 : index
    %0 = vector.load %arg2[%c0, %c0_0, %c0_1] : memref<1x8x32xf32, #tpu.memory_space<vmem>>, vector<1x8x32xf32>
    %1 = vector.shape_cast %0 : vector<1x8x32xf32> to vector<8x32xf32>
    %c0_2 = arith.constant 0 : index
    %c0_3 = arith.constant 0 : index
    %2 = vector.load %arg4[%c0_2, %c0_3] : memref<1x32xf32, #tpu.memory_space<vmem>>, vector<1x32xf32>
    %c0_4 = arith.constant 0 : index
    %c0_5 = arith.constant 0 : index
    %3 = vector.load %arg5[%c0_4, %c0_5] : memref<1x32xf32, #tpu.memory_space<vmem>>, vector<1x32xf32>
    %cst = arith.constant dense<0.000000e+00> : vector<8xf32>
    %4 = vector.multi_reduction <add>, %1, %cst [1] : vector<8x32xf32> to vector<8xf32>
    %5 = vector.shape_cast %4 : vector<8xf32> to vector<8x1xf32>
    %cst_6 = arith.constant 3.200000e+01 : f32
    %6 = vector.broadcast %cst_6 : f32 to vector<8x1xf32>
    %7 = arith.divf %5, %6 : vector<8x1xf32>
    %8 = vector.broadcast %7 : vector<8x1xf32> to vector<8x32xf32>
    %9 = arith.subf %1, %8 : vector<8x32xf32>
    %10 = arith.mulf %9, %9 : vector<8x32xf32>
    %cst_7 = arith.constant dense<0.000000e+00> : vector<8xf32>
    %11 = vector.multi_reduction <add>, %10, %cst_7 [1] : vector<8x32xf32> to vector<8xf32>
    %12 = vector.shape_cast %11 : vector<8xf32> to vector<8x1xf32>
    %cst_8 = arith.constant 0.0322580636 : f32
    %13 = vector.broadcast %cst_8 : f32 to vector<8x1xf32>
    %14 = arith.mulf %12, %13 : vector<8x1xf32>
    %15 = math.sqrt %14 : vector<8x1xf32>
    %cst_9 = arith.constant 9.99999997E-7 : f32
    %16 = vector.broadcast %cst_9 : f32 to vector<8x1xf32>
    %17 = arith.addf %15, %16 : vector<8x1xf32>
    %18 = tpu.reciprocal %17 : vector<8x1xf32> -> vector<8x1xf32>
    %19 = vector.broadcast %7 : vector<8x1xf32> to vector<8x32xf32>
    %20 = arith.subf %1, %19 : vector<8x32xf32>
    %21 = vector.broadcast %2 : vector<1x32xf32> to vector<8x32xf32>
    %22 = arith.mulf %21, %20 : vector<8x32xf32>
    %23 = vector.broadcast %18 : vector<8x1xf32> to vector<8x32xf32>
    %24 = arith.mulf %22, %23 : vector<8x32xf32>
    %25 = vector.broadcast %3 : vector<1x32xf32> to vector<8x32xf32>
    %26 = arith.addf %24, %25 : vector<8x32xf32>
    %c0_10 = arith.constant 0 : index
    %c0_11 = arith.constant 0 : index
    %27 = vector.load %arg6[%c0_10, %c0_11] : memref<32x32xf32, #tpu.memory_space<vmem>>, vector<32x32xf32>
    %cst_12 = arith.constant dense<0.000000e+00> : vector<8x32xf32>
    %28 = tpu.matmul %26, %27, %cst_12 {dimension_numbers = #tpu.dot_dimension_numbers<[1], [0], [0], [1], [0, 0, 1, 1], [], []>} : vector<8x32xf32>, vector<32x32xf32>, vector<8x32xf32> -> vector<8x32xf32>
    %c0_13 = arith.constant 0 : index
    %c0_14 = arith.constant 0 : index
    %29 = vector.load %arg7[%c0_13, %c0_14] : memref<1x32xf32, #tpu.memory_space<vmem>>, vector<1x32xf32>
    %30 = vector.broadcast %29 : vector<1x32xf32> to vector<8x32xf32>
    %31 = arith.addf %28, %30 : vector<8x32xf32>
    %c0_15 = arith.constant 0 : index
    %c0_16 = arith.constant 0 : index
    %32 = vector.load %arg8[%c0_15, %c0_16] : memref<32x64xf32, #tpu.memory_space<vmem>>, vector<32x64xf32>
    %cst_17 = arith.constant dense<0.000000e+00> : vector<8x64xf32>
    %33 = tpu.matmul %26, %32, %cst_17 {dimension_numbers = #tpu.dot_dimension_numbers<[1], [0], [0], [1], [0, 0, 1, 1], [], []>} : vector<8x32xf32>, vector<32x64xf32>, vector<8x64xf32> -> vector<8x64xf32>
    %c0_18 = arith.constant 0 : index
    %c0_19 = arith.constant 0 : index
    %34 = vector.load %arg9[%c0_18, %c0_19] : memref<1x64xf32, #tpu.memory_space<vmem>>, vector<1x64xf32>
    %35 = vector.broadcast %34 : vector<1x64xf32> to vector<8x64xf32>
    %36 = arith.addf %33, %35 : vector<8x64xf32>
    %37 = vector.extract_strided_slice %36 {offsets = [0, 0], sizes = [8, 32], strides = [1, 1]} : vector<8x64xf32> to vector<8x32xf32>
    %38 = vector.extract_strided_slice %36 {offsets = [0, 32], sizes = [8, 32], strides = [1, 1]} : vector<8x64xf32> to vector<8x32xf32>
    %cst_20 = arith.constant 0.353553385 : f32
    %39 = vector.broadcast %cst_20 : f32 to vector<8x32xf32>
    %40 = arith.mulf %31, %39 : vector<8x32xf32>
    %41 = vector.extract_strided_slice %40 {offsets = [0, 0], sizes = [8, 8], strides = [1, 1]} : vector<8x32xf32> to vector<8x8xf32>
    %42 = vector.extract_strided_slice %40 {offsets = [0, 8], sizes = [8, 8], strides = [1, 1]} : vector<8x32xf32> to vector<8x8xf32>
    %43 = vector.extract_strided_slice %40 {offsets = [0, 16], sizes = [8, 8], strides = [1, 1]} : vector<8x32xf32> to vector<8x8xf32>
    %44 = vector.extract_strided_slice %40 {offsets = [0, 24], sizes = [8, 8], strides = [1, 1]} : vector<8x32xf32> to vector<8x8xf32>
    %45 = vector.shape_cast %41 : vector<8x8xf32> to vector<1x8x8xf32>
    %46 = vector.shape_cast %42 : vector<8x8xf32> to vector<1x8x8xf32>
    %47 = vector.shape_cast %43 : vector<8x8xf32> to vector<1x8x8xf32>
    %48 = vector.shape_cast %44 : vector<8x8xf32> to vector<1x8x8xf32>
    %49 = tpu.concatenate %45, %46, %47, %48 in 0 : vector<1x8x8xf32>, vector<1x8x8xf32>, vector<1x8x8xf32>, vector<1x8x8xf32> -> vector<4x8x8xf32>
    %50 = vector.extract_strided_slice %37 {offsets = [0, 0], sizes = [8, 8], strides = [1, 1]} : vector<8x32xf32> to vector<8x8xf32>
    %51 = vector.extract_strided_slice %37 {offsets = [0, 8], sizes = [8, 8], strides = [1, 1]} : vector<8x32xf32> to vector<8x8xf32>
    %52 = vector.extract_strided_slice %37 {offsets = [0, 16], sizes = [8, 8], strides = [1, 1]} : vector<8x32xf32> to vector<8x8xf32>
    %53 = vector.extract_strided_slice %37 {offsets = [0, 24], sizes = [8, 8], strides = [1, 1]} : vector<8x32xf32> to vector<8x8xf32>
    %54 = vector.shape_cast %50 : vector<8x8xf32> to vector<1x8x8xf32>
    %55 = vector.shape_cast %51 : vector<8x8xf32> to vector<1x8x8xf32>
    %56 = vector.shape_cast %52 : vector<8x8xf32> to vector<1x8x8xf32>
    %57 = vector.shape_cast %53 : vector<8x8xf32> to vector<1x8x8xf32>
    %58 = tpu.concatenate %54, %55, %56, %57 in 0 : vector<1x8x8xf32>, vector<1x8x8xf32>, vector<1x8x8xf32>, vector<1x8x8xf32> -> vector<4x8x8xf32>
    %59 = vector.extract_strided_slice %38 {offsets = [0, 0], sizes = [8, 8], strides = [1, 1]} : vector<8x32xf32> to vector<8x8xf32>
    %60 = vector.extract_strided_slice %38 {offsets = [0, 8], sizes = [8, 8], strides = [1, 1]} : vector<8x32xf32> to vector<8x8xf32>
    %61 = vector.extract_strided_slice %38 {offsets = [0, 16], sizes = [8, 8], strides = [1, 1]} : vector<8x32xf32> to vector<8x8xf32>
    %62 = vector.extract_strided_slice %38 {offsets = [0, 24], sizes = [8, 8], strides = [1, 1]} : vector<8x32xf32> to vector<8x8xf32>
    %63 = vector.shape_cast %59 : vector<8x8xf32> to vector<1x8x8xf32>
    %64 = vector.shape_cast %60 : vector<8x8xf32> to vector<1x8x8xf32>
    %65 = vector.shape_cast %61 : vector<8x8xf32> to vector<1x8x8xf32>
    %66 = vector.shape_cast %62 : vector<8x8xf32> to vector<1x8x8xf32>
    %67 = tpu.concatenate %63, %64, %65, %66 in 0 : vector<1x8x8xf32>, vector<1x8x8xf32>, vector<1x8x8xf32>, vector<1x8x8xf32> -> vector<4x8x8xf32>
    "tpu.trace_start"() <{level = 10 : i32, message = "hqd,hkd->hqk"}> : () -> ()
    %cst_21 = arith.constant dense<0.000000e+00> : vector<4x8x8xf32>
    %68 = tpu.matmul %49, %58, %cst_21 {dimension_numbers = #tpu.dot_dimension_numbers<[2], [2], [1], [1], [0, 0, 0, 1, 1, 1], [0], [0]>} : vector<4x8x8xf32>, vector<4x8x8xf32>, vector<4x8x8xf32> -> vector<4x8x8xf32>
    "tpu.trace_stop"() : () -> ()
    %c0_22 = arith.constant 0 : index
    %c0_23 = arith.constant 0 : index
    %c0_24 = arith.constant 0 : index
    %69 = vector.load %arg3[%c0_22, %c0_23, %c0_24] : memref<1x8x8xbf16, #tpu.memory_space<vmem>>, vector<1x8x8xbf16>
    %70 = vector.shape_cast %69 : vector<1x8x8xbf16> to vector<8x8xbf16>
    %71 = arith.extf %70 : vector<8x8xbf16> to vector<8x8xf32>
    %72 = vector.shape_cast %71 : vector<8x8xf32> to vector<1x8x8xf32>
    %73 = vector.broadcast %72 : vector<1x8x8xf32> to vector<4x8x8xf32>
    %74 = arith.addf %68, %73 : vector<4x8x8xf32>
    %cst_25 = arith.constant dense<0xFF800000> : vector<4x8xf32>
    %75 = vector.multi_reduction <maximumf>, %74, %cst_25 [2] : vector<4x8x8xf32> to vector<4x8xf32>
    %76 = vector.shape_cast %75 : vector<4x8xf32> to vector<4x8x1xf32>
    %77 = vector.broadcast %76 : vector<4x8x1xf32> to vector<4x8x8xf32>
    %78 = arith.subf %74, %77 : vector<4x8x8xf32>
    %79 = math.exp %78 : vector<4x8x8xf32>
    %cst_26 = arith.constant dense<0.000000e+00> : vector<4x8xf32>
    %80 = vector.multi_reduction <add>, %79, %cst_26 [2] : vector<4x8x8xf32> to vector<4x8xf32>
    %81 = vector.shape_cast %80 : vector<4x8xf32> to vector<4x8x1xf32>
    %82 = tpu.reciprocal %81 : vector<4x8x1xf32> -> vector<4x8x1xf32>
    %83 = vector.broadcast %82 : vector<4x8x1xf32> to vector<4x8x8xf32>
    %84 = arith.mulf %79, %83 : vector<4x8x8xf32>
    "tpu.trace_start"() <{level = 10 : i32, message = "hqk,hkd->hqd"}> : () -> ()
    %cst_27 = arith.constant dense<0.000000e+00> : vector<4x8x8xf32>
    %85 = tpu.matmul %84, %67, %cst_27 {dimension_numbers = #tpu.dot_dimension_numbers<[2], [1], [1], [2], [0, 0, 0, 1, 1, 2], [0], [0]>} : vector<4x8x8xf32>, vector<4x8x8xf32>, vector<4x8x8xf32> -> vector<4x8x8xf32>
    "tpu.trace_stop"() : () -> ()
    %86 = vector.extract_strided_slice %85 {offsets = [0, 0, 0], sizes = [1, 8, 8], strides = [1, 1, 1]} : vector<4x8x8xf32> to vector<1x8x8xf32>
    %87 = vector.shape_cast %86 : vector<1x8x8xf32> to vector<8x8xf32>
    %88 = vector.extract_strided_slice %85 {offsets = [1, 0, 0], sizes = [1, 8, 8], strides = [1, 1, 1]} : vector<4x8x8xf32> to vector<1x8x8xf32>
    %89 = vector.shape_cast %88 : vector<1x8x8xf32> to vector<8x8xf32>
    %90 = vector.extract_strided_slice %85 {offsets = [2, 0, 0], sizes = [1, 8, 8], strides = [1, 1, 1]} : vector<4x8x8xf32> to vector<1x8x8xf32>
    %91 = vector.shape_cast %90 : vector<1x8x8xf32> to vector<8x8xf32>
    %92 = vector.extract_strided_slice %85 {offsets = [3, 0, 0], sizes = [1, 8, 8], strides = [1, 1, 1]} : vector<4x8x8xf32> to vector<1x8x8xf32>
    %93 = vector.shape_cast %92 : vector<1x8x8xf32> to vector<8x8xf32>
    %94 = tpu.concatenate %87, %89, %91, %93 in 1 : vector<8x8xf32>, vector<8x8xf32>, vector<8x8xf32>, vector<8x8xf32> -> vector<8x32xf32>
    %c0_28 = arith.constant 0 : index
    %c0_29 = arith.constant 0 : index
    %95 = vector.load %arg10[%c0_28, %c0_29] : memref<32x32xf32, #tpu.memory_space<vmem>>, vector<32x32xf32>
    %cst_30 = arith.constant dense<0.000000e+00> : vector<8x32xf32>
    %96 = tpu.matmul %94, %95, %cst_30 {dimension_numbers = #tpu.dot_dimension_numbers<[1], [0], [0], [1], [0, 0, 1, 1], [], []>} : vector<8x32xf32>, vector<32x32xf32>, vector<8x32xf32> -> vector<8x32xf32>
    %c0_31 = arith.constant 0 : index
    %c0_32 = arith.constant 0 : index
    %97 = vector.load %arg11[%c0_31, %c0_32] : memref<1x32xf32, #tpu.memory_space<vmem>>, vector<1x32xf32>
    %98 = vector.broadcast %97 : vector<1x32xf32> to vector<8x32xf32>
    %99 = arith.addf %96, %98 : vector<8x32xf32>
    %100 = arith.addf %1, %99 : vector<8x32xf32>
    %c0_33 = arith.constant 0 : index
    %c0_34 = arith.constant 0 : index
    %c0_35 = arith.constant 0 : index
    %101 = vector.load %arg12[%c0_33, %c0_34, %c0_35] : memref<1x8x32xf32, #tpu.memory_space<vmem>>, vector<1x8x32xf32>
    %102 = vector.shape_cast %101 : vector<1x8x32xf32> to vector<8x32xf32>
    %103 = vector.shape_cast %100 : vector<8x32xf32> to vector<1x8x32xf32>
    tpu.vector_store %arg12[%c0_33, %c0_34, %c0_35], %103 {strides = array<i32>} : memref<1x8x32xf32, #tpu.memory_space<vmem>>, vector<1x8x32xf32>,
    return
  }
  func.func @transform_0(%arg0: i32, %arg1: i32) -> (i32, i32, i32) {
    %c0_i32 = arith.constant 0 : i32
    %c0_i32_0 = arith.constant 0 : i32
    return %arg0, %arg1, %c0_i32 : i32, i32, i32
  }
  func.func @transform_1(%arg0: i32, %arg1: i32) -> (i32, i32, i32) {
    %c0_i32 = arith.constant 0 : i32
    %c0_i32_0 = arith.constant 0 : i32
    return %arg0, %arg1, %c0_i32 : i32, i32, i32
  }
  func.func @transform_2(%arg0: i32, %arg1: i32) -> (i32, i32) {
    %c0_i32 = arith.constant 0 : i32
    %c0_i32_0 = arith.constant 0 : i32
    %c0_i32_1 = arith.constant 0 : i32
    return %c0_i32, %c0_i32_0 : i32, i32
  }
  func.func @transform_3(%arg0: i32, %arg1: i32) -> (i32, i32) {
    %c0_i32 = arith.constant 0 : i32
    %c0_i32_0 = arith.constant 0 : i32
    %c0_i32_1 = arith.constant 0 : i32
    return %c0_i32, %c0_i32_0 : i32, i32
  }
  func.func @transform_4(%arg0: i32, %arg1: i32) -> (i32, i32) {
    %c0_i32 = arith.constant 0 : i32
    %c0_i32_0 = arith.constant 0 : i32
    %c0_i32_1 = arith.constant 0 : i32
    return %c0_i32, %c0_i32_0 : i32, i32
  }
  func.func @transform_5(%arg0: i32, %arg1: i32) -> (i32, i32) {
    %c0_i32 = arith.constant 0 : i32
    %c0_i32_0 = arith.constant 0 : i32
    %c0_i32_1 = arith.constant 0 : i32
    return %c0_i32, %c0_i32_0 : i32, i32
  }
  func.func @transform_6(%arg0: i32, %arg1: i32) -> (i32, i32) {
    %c0_i32 = arith.constant 0 : i32
    %c0_i32_0 = arith.constant 0 : i32
    %c0_i32_1 = arith.constant 0 : i32
    return %c0_i32, %c0_i32_0 : i32, i32
  }
  func.func @transform_7(%arg0: i32, %arg1: i32) -> (i32, i32) {
    %c0_i32 = arith.constant 0 : i32
    %c0_i32_0 = arith.constant 0 : i32
    %c0_i32_1 = arith.constant 0 : i32
    return %c0_i32, %c0_i32_0 : i32, i32
  }
  func.func @transform_8(%arg0: i32, %arg1: i32) -> (i32, i32) {
    %c0_i32 = arith.constant 0 : i32
    %c0_i32_0 = arith.constant 0 : i32
    %c0_i32_1 = arith.constant 0 : i32
    return %c0_i32, %c0_i32_0 : i32, i32
  }
  func.func @transform_9(%arg0: i32, %arg1: i32) -> (i32, i32) {
    %c0_i32 = arith.constant 0 : i32
    %c0_i32_0 = arith.constant 0 : i32
    %c0_i32_1 = arith.constant 0 : i32
    return %c0_i32, %c0_i32_0 : i32, i32
  }
  func.func @transform_10(%arg0: i32, %arg1: i32) -> (i32, i32, i32) {
    %c0_i32 = arith.constant 0 : i32
    %c0_i32_0 = arith.constant 0 : i32
    return %arg0, %arg1, %c0_i32 : i32, i32, i32
  }
}

module attributes {stable_mosaic.version = 11 : i64} {
  func.func @_attn_sublayer_kernel(%arg0: i32, %arg1: i32, %arg2: memref<1x8x32xf32, #tpu.memory_space<vmem>>, %arg3: memref<1x8x32xf32, #tpu.memory_space<vmem>>, %arg4: memref<1x1x8xbf16, #tpu.memory_space<vmem>>, %arg5: memref<1x32xf32, #tpu.memory_space<vmem>>, %arg6: memref<1x32xf32, #tpu.memory_space<vmem>>, %arg7: memref<32x32xf32, #tpu.memory_space<vmem>>, %arg8: memref<1x32xf32, #tpu.memory_space<vmem>>, %arg9: memref<32x64xf32, #tpu.memory_space<vmem>>, %arg10: memref<1x64xf32, #tpu.memory_space<vmem>>, %arg11: memref<32x32xf32, #tpu.memory_space<vmem>>, %arg12: memref<1x32xf32, #tpu.memory_space<vmem>>, %arg13: memref<1x8x32xf32, #tpu.memory_space<vmem>>) attributes {dimension_semantics = [#tpu.dimension_semantics<parallel>, #tpu.dimension_semantics<parallel>], iteration_bounds = array<i64: 2, 1>, scalar_prefetch = 0 : i64, scratch_operands = 0 : i64, tpu.core_type = #tpu.core_type<tc>, window_params = [{transform_indices = @transform_0, window_bounds = array<i64: 1, 8, 32>}, {transform_indices = @transform_1, window_bounds = array<i64: 1, 8, 32>}, {transform_indices = @transform_2, window_bounds = array<i64: 1, 1, 8>}, {pipeline_mode = #tpu.pipeline_mode<synchronous>, transform_indices = @transform_3, window_bounds = array<i64: 1, 32>}, {pipeline_mode = #tpu.pipeline_mode<synchronous>, transform_indices = @transform_4, window_bounds = array<i64: 1, 32>}, {pipeline_mode = #tpu.pipeline_mode<synchronous>, transform_indices = @transform_5, window_bounds = array<i64: 32, 32>}, {pipeline_mode = #tpu.pipeline_mode<synchronous>, transform_indices = @transform_6, window_bounds = array<i64: 1, 32>}, {pipeline_mode = #tpu.pipeline_mode<synchronous>, transform_indices = @transform_7, window_bounds = array<i64: 32, 64>}, {pipeline_mode = #tpu.pipeline_mode<synchronous>, transform_indices = @transform_8, window_bounds = array<i64: 1, 64>}, {pipeline_mode = #tpu.pipeline_mode<synchronous>, transform_indices = @transform_9, window_bounds = array<i64: 32, 32>}, {pipeline_mode = #tpu.pipeline_mode<synchronous>, transform_indices = @transform_10, window_bounds = array<i64: 1, 32>}, {transform_indices = @transform_11, window_bounds = array<i64: 1, 8, 32>}]} {
    %c0 = arith.constant 0 : index
    %c0_0 = arith.constant 0 : index
    %c0_1 = arith.constant 0 : index
    %0 = vector.load %arg2[%c0, %c0_0, %c0_1] : memref<1x8x32xf32, #tpu.memory_space<vmem>>, vector<1x8x32xf32>
    %1 = vector.shape_cast %0 : vector<1x8x32xf32> to vector<8x32xf32>
    %c0_2 = arith.constant 0 : index
    %c0_3 = arith.constant 0 : index
    %2 = vector.load %arg5[%c0_2, %c0_3] : memref<1x32xf32, #tpu.memory_space<vmem>>, vector<1x32xf32>
    %c0_4 = arith.constant 0 : index
    %c0_5 = arith.constant 0 : index
    %3 = vector.load %arg6[%c0_4, %c0_5] : memref<1x32xf32, #tpu.memory_space<vmem>>, vector<1x32xf32>
    %cst = arith.constant dense<0.000000e+00> : vector<8xf32>
    %4 = vector.multi_reduction <add>, %1, %cst [1] : vector<8x32xf32> to vector<8xf32>
    %5 = vector.shape_cast %4 : vector<8xf32> to vector<8x1xf32>
    %cst_6 = arith.constant 3.200000e+01 : f32
    %6 = vector.broadcast %cst_6 : f32 to vector<8x1xf32>
    %7 = arith.divf %5, %6 : vector<8x1xf32>
    %8 = vector.broadcast %7 : vector<8x1xf32> to vector<8x32xf32>
    %9 = arith.subf %1, %8 : vector<8x32xf32>
    %10 = arith.mulf %9, %9 : vector<8x32xf32>
    %cst_7 = arith.constant dense<0.000000e+00> : vector<8xf32>
    %11 = vector.multi_reduction <add>, %10, %cst_7 [1] : vector<8x32xf32> to vector<8xf32>
    %12 = vector.shape_cast %11 : vector<8xf32> to vector<8x1xf32>
    %cst_8 = arith.constant 0.0322580636 : f32
    %13 = vector.broadcast %cst_8 : f32 to vector<8x1xf32>
    %14 = arith.mulf %12, %13 : vector<8x1xf32>
    %15 = math.sqrt %14 : vector<8x1xf32>
    %cst_9 = arith.constant 9.99999997E-7 : f32
    %16 = vector.broadcast %cst_9 : f32 to vector<8x1xf32>
    %17 = arith.addf %15, %16 : vector<8x1xf32>
    %18 = tpu.reciprocal %17 : vector<8x1xf32> -> vector<8x1xf32>
    %19 = vector.broadcast %7 : vector<8x1xf32> to vector<8x32xf32>
    %20 = arith.subf %1, %19 : vector<8x32xf32>
    %21 = vector.broadcast %2 : vector<1x32xf32> to vector<8x32xf32>
    %22 = arith.mulf %21, %20 : vector<8x32xf32>
    %23 = vector.broadcast %18 : vector<8x1xf32> to vector<8x32xf32>
    %24 = arith.mulf %22, %23 : vector<8x32xf32>
    %25 = vector.broadcast %3 : vector<1x32xf32> to vector<8x32xf32>
    %26 = arith.addf %24, %25 : vector<8x32xf32>
    %c0_10 = arith.constant 0 : index
    %c0_11 = arith.constant 0 : index
    %c0_12 = arith.constant 0 : index
    %27 = vector.load %arg3[%c0_10, %c0_11, %c0_12] : memref<1x8x32xf32, #tpu.memory_space<vmem>>, vector<1x8x32xf32>
    %28 = vector.shape_cast %27 : vector<1x8x32xf32> to vector<8x32xf32>
    %c0_13 = arith.constant 0 : index
    %c0_14 = arith.constant 0 : index
    %29 = vector.load %arg7[%c0_13, %c0_14] : memref<32x32xf32, #tpu.memory_space<vmem>>, vector<32x32xf32>
    %cst_15 = arith.constant dense<0.000000e+00> : vector<8x32xf32>
    %30 = tpu.matmul %26, %29, %cst_15 {dimension_numbers = #tpu.dot_dimension_numbers<[1], [0], [0], [1], [0, 0, 1, 1], [], []>} : vector<8x32xf32>, vector<32x32xf32>, vector<8x32xf32> -> vector<8x32xf32>
    %c0_16 = arith.constant 0 : index
    %c0_17 = arith.constant 0 : index
    %31 = vector.load %arg8[%c0_16, %c0_17] : memref<1x32xf32, #tpu.memory_space<vmem>>, vector<1x32xf32>
    %32 = vector.broadcast %31 : vector<1x32xf32> to vector<8x32xf32>
    %33 = arith.addf %30, %32 : vector<8x32xf32>
    %c0_18 = arith.constant 0 : index
    %c0_19 = arith.constant 0 : index
    %34 = vector.load %arg9[%c0_18, %c0_19] : memref<32x64xf32, #tpu.memory_space<vmem>>, vector<32x64xf32>
    %cst_20 = arith.constant dense<0.000000e+00> : vector<8x64xf32>
    %35 = tpu.matmul %28, %34, %cst_20 {dimension_numbers = #tpu.dot_dimension_numbers<[1], [0], [0], [1], [0, 0, 1, 1], [], []>} : vector<8x32xf32>, vector<32x64xf32>, vector<8x64xf32> -> vector<8x64xf32>
    %c0_21 = arith.constant 0 : index
    %c0_22 = arith.constant 0 : index
    %36 = vector.load %arg10[%c0_21, %c0_22] : memref<1x64xf32, #tpu.memory_space<vmem>>, vector<1x64xf32>
    %37 = vector.broadcast %36 : vector<1x64xf32> to vector<8x64xf32>
    %38 = arith.addf %35, %37 : vector<8x64xf32>
    %39 = vector.extract_strided_slice %38 {offsets = [0, 0], sizes = [8, 32], strides = [1, 1]} : vector<8x64xf32> to vector<8x32xf32>
    %40 = vector.extract_strided_slice %38 {offsets = [0, 32], sizes = [8, 32], strides = [1, 1]} : vector<8x64xf32> to vector<8x32xf32>
    %cst_23 = arith.constant 0.353553385 : f32
    %41 = vector.broadcast %cst_23 : f32 to vector<8x32xf32>
    %42 = arith.mulf %33, %41 : vector<8x32xf32>
    %43 = vector.extract_strided_slice %42 {offsets = [0, 0], sizes = [8, 8], strides = [1, 1]} : vector<8x32xf32> to vector<8x8xf32>
    %44 = vector.extract_strided_slice %42 {offsets = [0, 8], sizes = [8, 8], strides = [1, 1]} : vector<8x32xf32> to vector<8x8xf32>
    %45 = vector.extract_strided_slice %42 {offsets = [0, 16], sizes = [8, 8], strides = [1, 1]} : vector<8x32xf32> to vector<8x8xf32>
    %46 = vector.extract_strided_slice %42 {offsets = [0, 24], sizes = [8, 8], strides = [1, 1]} : vector<8x32xf32> to vector<8x8xf32>
    %47 = vector.shape_cast %43 : vector<8x8xf32> to vector<1x8x8xf32>
    %48 = vector.shape_cast %44 : vector<8x8xf32> to vector<1x8x8xf32>
    %49 = vector.shape_cast %45 : vector<8x8xf32> to vector<1x8x8xf32>
    %50 = vector.shape_cast %46 : vector<8x8xf32> to vector<1x8x8xf32>
    %51 = tpu.concatenate %47, %48, %49, %50 in 0 : vector<1x8x8xf32>, vector<1x8x8xf32>, vector<1x8x8xf32>, vector<1x8x8xf32> -> vector<4x8x8xf32>
    %52 = vector.extract_strided_slice %39 {offsets = [0, 0], sizes = [8, 8], strides = [1, 1]} : vector<8x32xf32> to vector<8x8xf32>
    %53 = vector.extract_strided_slice %39 {offsets = [0, 8], sizes = [8, 8], strides = [1, 1]} : vector<8x32xf32> to vector<8x8xf32>
    %54 = vector.extract_strided_slice %39 {offsets = [0, 16], sizes = [8, 8], strides = [1, 1]} : vector<8x32xf32> to vector<8x8xf32>
    %55 = vector.extract_strided_slice %39 {offsets = [0, 24], sizes = [8, 8], strides = [1, 1]} : vector<8x32xf32> to vector<8x8xf32>
    %56 = vector.shape_cast %52 : vector<8x8xf32> to vector<1x8x8xf32>
    %57 = vector.shape_cast %53 : vector<8x8xf32> to vector<1x8x8xf32>
    %58 = vector.shape_cast %54 : vector<8x8xf32> to vector<1x8x8xf32>
    %59 = vector.shape_cast %55 : vector<8x8xf32> to vector<1x8x8xf32>
    %60 = tpu.concatenate %56, %57, %58, %59 in 0 : vector<1x8x8xf32>, vector<1x8x8xf32>, vector<1x8x8xf32>, vector<1x8x8xf32> -> vector<4x8x8xf32>
    %61 = vector.extract_strided_slice %40 {offsets = [0, 0], sizes = [8, 8], strides = [1, 1]} : vector<8x32xf32> to vector<8x8xf32>
    %62 = vector.extract_strided_slice %40 {offsets = [0, 8], sizes = [8, 8], strides = [1, 1]} : vector<8x32xf32> to vector<8x8xf32>
    %63 = vector.extract_strided_slice %40 {offsets = [0, 16], sizes = [8, 8], strides = [1, 1]} : vector<8x32xf32> to vector<8x8xf32>
    %64 = vector.extract_strided_slice %40 {offsets = [0, 24], sizes = [8, 8], strides = [1, 1]} : vector<8x32xf32> to vector<8x8xf32>
    %65 = vector.shape_cast %61 : vector<8x8xf32> to vector<1x8x8xf32>
    %66 = vector.shape_cast %62 : vector<8x8xf32> to vector<1x8x8xf32>
    %67 = vector.shape_cast %63 : vector<8x8xf32> to vector<1x8x8xf32>
    %68 = vector.shape_cast %64 : vector<8x8xf32> to vector<1x8x8xf32>
    %69 = tpu.concatenate %65, %66, %67, %68 in 0 : vector<1x8x8xf32>, vector<1x8x8xf32>, vector<1x8x8xf32>, vector<1x8x8xf32> -> vector<4x8x8xf32>
    "tpu.trace_start"() <{level = 10 : i32, message = "hqd,hkd->hqk"}> : () -> ()
    %cst_24 = arith.constant dense<0.000000e+00> : vector<4x8x8xf32>
    %70 = tpu.matmul %51, %60, %cst_24 {dimension_numbers = #tpu.dot_dimension_numbers<[2], [2], [1], [1], [0, 0, 0, 1, 1, 1], [0], [0]>} : vector<4x8x8xf32>, vector<4x8x8xf32>, vector<4x8x8xf32> -> vector<4x8x8xf32>
    "tpu.trace_stop"() : () -> ()
    %c0_25 = arith.constant 0 : index
    %c0_26 = arith.constant 0 : index
    %c0_27 = arith.constant 0 : index
    %71 = vector.load %arg4[%c0_25, %c0_26, %c0_27] : memref<1x1x8xbf16, #tpu.memory_space<vmem>>, vector<1x1x8xbf16>
    %72 = vector.shape_cast %71 : vector<1x1x8xbf16> to vector<1x8xbf16>
    %73 = arith.extf %72 : vector<1x8xbf16> to vector<1x8xf32>
    %74 = vector.shape_cast %73 : vector<1x8xf32> to vector<1x8xf32>
    %75 = vector.broadcast %74 : vector<1x8xf32> to vector<8x8xf32>
    %76 = vector.shape_cast %75 : vector<8x8xf32> to vector<1x8x8xf32>
    %77 = vector.broadcast %76 : vector<1x8x8xf32> to vector<4x8x8xf32>
    %78 = arith.addf %70, %77 : vector<4x8x8xf32>
    %cst_28 = arith.constant dense<0xFF800000> : vector<4x8xf32>
    %79 = vector.multi_reduction <maximumf>, %78, %cst_28 [2] : vector<4x8x8xf32> to vector<4x8xf32>
    %80 = vector.shape_cast %79 : vector<4x8xf32> to vector<4x8x1xf32>
    %81 = vector.broadcast %80 : vector<4x8x1xf32> to vector<4x8x8xf32>
    %82 = arith.subf %78, %81 : vector<4x8x8xf32>
    %83 = math.exp %82 : vector<4x8x8xf32>
    %cst_29 = arith.constant dense<0.000000e+00> : vector<4x8xf32>
    %84 = vector.multi_reduction <add>, %83, %cst_29 [2] : vector<4x8x8xf32> to vector<4x8xf32>
    %85 = vector.shape_cast %84 : vector<4x8xf32> to vector<4x8x1xf32>
    %86 = tpu.reciprocal %85 : vector<4x8x1xf32> -> vector<4x8x1xf32>
    %87 = vector.broadcast %86 : vector<4x8x1xf32> to vector<4x8x8xf32>
    %88 = arith.mulf %83, %87 : vector<4x8x8xf32>
    "tpu.trace_start"() <{level = 10 : i32, message = "hqk,hkd->hqd"}> : () -> ()
    %cst_30 = arith.constant dense<0.000000e+00> : vector<4x8x8xf32>
    %89 = tpu.matmul %88, %69, %cst_30 {dimension_numbers = #tpu.dot_dimension_numbers<[2], [1], [1], [2], [0, 0, 0, 1, 1, 2], [0], [0]>} : vector<4x8x8xf32>, vector<4x8x8xf32>, vector<4x8x8xf32> -> vector<4x8x8xf32>
    "tpu.trace_stop"() : () -> ()
    %90 = vector.extract_strided_slice %89 {offsets = [0, 0, 0], sizes = [1, 8, 8], strides = [1, 1, 1]} : vector<4x8x8xf32> to vector<1x8x8xf32>
    %91 = vector.shape_cast %90 : vector<1x8x8xf32> to vector<8x8xf32>
    %92 = vector.extract_strided_slice %89 {offsets = [1, 0, 0], sizes = [1, 8, 8], strides = [1, 1, 1]} : vector<4x8x8xf32> to vector<1x8x8xf32>
    %93 = vector.shape_cast %92 : vector<1x8x8xf32> to vector<8x8xf32>
    %94 = vector.extract_strided_slice %89 {offsets = [2, 0, 0], sizes = [1, 8, 8], strides = [1, 1, 1]} : vector<4x8x8xf32> to vector<1x8x8xf32>
    %95 = vector.shape_cast %94 : vector<1x8x8xf32> to vector<8x8xf32>
    %96 = vector.extract_strided_slice %89 {offsets = [3, 0, 0], sizes = [1, 8, 8], strides = [1, 1, 1]} : vector<4x8x8xf32> to vector<1x8x8xf32>
    %97 = vector.shape_cast %96 : vector<1x8x8xf32> to vector<8x8xf32>
    %98 = tpu.concatenate %91, %93, %95, %97 in 1 : vector<8x8xf32>, vector<8x8xf32>, vector<8x8xf32>, vector<8x8xf32> -> vector<8x32xf32>
    %c0_31 = arith.constant 0 : index
    %c0_32 = arith.constant 0 : index
    %99 = vector.load %arg11[%c0_31, %c0_32] : memref<32x32xf32, #tpu.memory_space<vmem>>, vector<32x32xf32>
    %cst_33 = arith.constant dense<0.000000e+00> : vector<8x32xf32>
    %100 = tpu.matmul %98, %99, %cst_33 {dimension_numbers = #tpu.dot_dimension_numbers<[1], [0], [0], [1], [0, 0, 1, 1], [], []>} : vector<8x32xf32>, vector<32x32xf32>, vector<8x32xf32> -> vector<8x32xf32>
    %c0_34 = arith.constant 0 : index
    %c0_35 = arith.constant 0 : index
    %101 = vector.load %arg12[%c0_34, %c0_35] : memref<1x32xf32, #tpu.memory_space<vmem>>, vector<1x32xf32>
    %102 = vector.broadcast %101 : vector<1x32xf32> to vector<8x32xf32>
    %103 = arith.addf %100, %102 : vector<8x32xf32>
    %104 = arith.addf %1, %103 : vector<8x32xf32>
    %c0_36 = arith.constant 0 : index
    %c0_37 = arith.constant 0 : index
    %c0_38 = arith.constant 0 : index
    %105 = vector.load %arg13[%c0_36, %c0_37, %c0_38] : memref<1x8x32xf32, #tpu.memory_space<vmem>>, vector<1x8x32xf32>
    %106 = vector.shape_cast %105 : vector<1x8x32xf32> to vector<8x32xf32>
    %107 = vector.shape_cast %104 : vector<8x32xf32> to vector<1x8x32xf32>
    tpu.vector_store %arg13[%c0_36, %c0_37, %c0_38], %107 {strides = array<i32>} : memref<1x8x32xf32, #tpu.memory_space<vmem>>, vector<1x8x32xf32>,
    return
  }
  func.func @transform_0(%arg0: i32, %arg1: i32) -> (i32, i32, i32) {
    %c0_i32 = arith.constant 0 : i32
    %c0_i32_0 = arith.constant 0 : i32
    return %arg0, %arg1, %c0_i32 : i32, i32, i32
  }
  func.func @transform_1(%arg0: i32, %arg1: i32) -> (i32, i32, i32) {
    %c0_i32 = arith.constant 0 : i32
    %c0_i32_0 = arith.constant 0 : i32
    %c0_i32_1 = arith.constant 0 : i32
    return %arg0, %c0_i32, %c0_i32_0 : i32, i32, i32
  }
  func.func @transform_2(%arg0: i32, %arg1: i32) -> (i32, i32, i32) {
    %c0_i32 = arith.constant 0 : i32
    %c0_i32_0 = arith.constant 0 : i32
    %c0_i32_1 = arith.constant 0 : i32
    return %arg0, %c0_i32, %c0_i32_0 : i32, i32, i32
  }
  func.func @transform_3(%arg0: i32, %arg1: i32) -> (i32, i32) {
    %c0_i32 = arith.constant 0 : i32
    %c0_i32_0 = arith.constant 0 : i32
    %c0_i32_1 = arith.constant 0 : i32
    return %c0_i32, %c0_i32_0 : i32, i32
  }
  func.func @transform_4(%arg0: i32, %arg1: i32) -> (i32, i32) {
    %c0_i32 = arith.constant 0 : i32
    %c0_i32_0 = arith.constant 0 : i32
    %c0_i32_1 = arith.constant 0 : i32
    return %c0_i32, %c0_i32_0 : i32, i32
  }
  func.func @transform_5(%arg0: i32, %arg1: i32) -> (i32, i32) {
    %c0_i32 = arith.constant 0 : i32
    %c0_i32_0 = arith.constant 0 : i32
    %c0_i32_1 = arith.constant 0 : i32
    return %c0_i32, %c0_i32_0 : i32, i32
  }
  func.func @transform_6(%arg0: i32, %arg1: i32) -> (i32, i32) {
    %c0_i32 = arith.constant 0 : i32
    %c0_i32_0 = arith.constant 0 : i32
    %c0_i32_1 = arith.constant 0 : i32
    return %c0_i32, %c0_i32_0 : i32, i32
  }
  func.func @transform_7(%arg0: i32, %arg1: i32) -> (i32, i32) {
    %c0_i32 = arith.constant 0 : i32
    %c0_i32_0 = arith.constant 0 : i32
    %c0_i32_1 = arith.constant 0 : i32
    return %c0_i32, %c0_i32_0 : i32, i32
  }
  func.func @transform_8(%arg0: i32, %arg1: i32) -> (i32, i32) {
    %c0_i32 = arith.constant 0 : i32
    %c0_i32_0 = arith.constant 0 : i32
    %c0_i32_1 = arith.constant 0 : i32
    return %c0_i32, %c0_i32_0 : i32, i32
  }
  func.func @transform_9(%arg0: i32, %arg1: i32) -> (i32, i32) {
    %c0_i32 = arith.constant 0 : i32
    %c0_i32_0 = arith.constant 0 : i32
    %c0_i32_1 = arith.constant 0 : i32
    return %c0_i32, %c0_i32_0 : i32, i32
  }
  func.func @transform_10(%arg0: i32, %arg1: i32) -> (i32, i32) {
    %c0_i32 = arith.constant 0 : i32
    %c0_i32_0 = arith.constant 0 : i32
    %c0_i32_1 = arith.constant 0 : i32
    return %c0_i32, %c0_i32_0 : i32, i32
  }
  func.func @transform_11(%arg0: i32, %arg1: i32) -> (i32, i32, i32) {
    %c0_i32 = arith.constant 0 : i32
    %c0_i32_0 = arith.constant 0 : i32
    return %arg0, %arg1, %c0_i32 : i32, i32, i32
  }
}

module attributes {stable_mosaic.version = 11 : i64} {
  func.func @_attn_sublayer_kernel(%arg0: i32, %arg1: i32, %arg2: memref<1x8x32xf32, #tpu.memory_space<vmem>>, %arg3: memref<1x8x8xbf16, #tpu.memory_space<vmem>>, %arg4: memref<1x32xf32, #tpu.memory_space<vmem>>, %arg5: memref<1x32xf32, #tpu.memory_space<vmem>>, %arg6: memref<32x32xf32, #tpu.memory_space<vmem>>, %arg7: memref<1x32xf32, #tpu.memory_space<vmem>>, %arg8: memref<32x64xf32, #tpu.memory_space<vmem>>, %arg9: memref<1x64xf32, #tpu.memory_space<vmem>>, %arg10: memref<32x32xf32, #tpu.memory_space<vmem>>, %arg11: memref<1x32xf32, #tpu.memory_space<vmem>>, %arg12: memref<1x8x32xf32, #tpu.memory_space<vmem>>) attributes {dimension_semantics = [#tpu.dimension_semantics<parallel>, #tpu.dimension_semantics<parallel>], iteration_bounds = array<i64: 2, 1>, scalar_prefetch = 0 : i64, scratch_operands = 0 : i64, tpu.core_type = #tpu.core_type<tc>, window_params = [{transform_indices = @transform_0, window_bounds = array<i64: 1, 8, 32>}, {transform_indices = @transform_1, window_bounds = array<i64: 1, 8, 8>}, {pipeline_mode = #tpu.pipeline_mode<synchronous>, transform_indices = @transform_2, window_bounds = array<i64: 1, 32>}, {pipeline_mode = #tpu.pipeline_mode<synchronous>, transform_indices = @transform_3, window_bounds = array<i64: 1, 32>}, {pipeline_mode = #tpu.pipeline_mode<synchronous>, transform_indices = @transform_4, window_bounds = array<i64: 32, 32>}, {pipeline_mode = #tpu.pipeline_mode<synchronous>, transform_indices = @transform_5, window_bounds = array<i64: 1, 32>}, {pipeline_mode = #tpu.pipeline_mode<synchronous>, transform_indices = @transform_6, window_bounds = array<i64: 32, 64>}, {pipeline_mode = #tpu.pipeline_mode<synchronous>, transform_indices = @transform_7, window_bounds = array<i64: 1, 64>}, {pipeline_mode = #tpu.pipeline_mode<synchronous>, transform_indices = @transform_8, window_bounds = array<i64: 32, 32>}, {pipeline_mode = #tpu.pipeline_mode<synchronous>, transform_indices = @transform_9, window_bounds = array<i64: 1, 32>}, {transform_indices = @transform_10, window_bounds = array<i64: 1, 8, 32>}]} {
    %c0 = arith.constant 0 : index
    %c0_0 = arith.constant 0 : index
    %c0_1 = arith.constant 0 : index
    %0 = vector.load %arg2[%c0, %c0_0, %c0_1] : memref<1x8x32xf32, #tpu.memory_space<vmem>>, vector<1x8x32xf32>
    %1 = vector.shape_cast %0 : vector<1x8x32xf32> to vector<8x32xf32>
    %c0_2 = arith.constant 0 : index
    %c0_3 = arith.constant 0 : index
    %2 = vector.load %arg4[%c0_2, %c0_3] : memref<1x32xf32, #tpu.memory_space<vmem>>, vector<1x32xf32>
    %c0_4 = arith.constant 0 : index
    %c0_5 = arith.constant 0 : index
    %3 = vector.load %arg5[%c0_4, %c0_5] : memref<1x32xf32, #tpu.memory_space<vmem>>, vector<1x32xf32>
    %cst = arith.constant dense<0.000000e+00> : vector<8xf32>
    %4 = vector.multi_reduction <add>, %1, %cst [1] : vector<8x32xf32> to vector<8xf32>
    %5 = vector.shape_cast %4 : vector<8xf32> to vector<8x1xf32>
    %cst_6 = arith.constant 3.200000e+01 : f32
    %6 = vector.broadcast %cst_6 : f32 to vector<8x1xf32>
    %7 = arith.divf %5, %6 : vector<8x1xf32>
    %8 = vector.broadcast %7 : vector<8x1xf32> to vector<8x32xf32>
    %9 = arith.subf %1, %8 : vector<8x32xf32>
    %10 = arith.mulf %9, %9 : vector<8x32xf32>
    %cst_7 = arith.constant dense<0.000000e+00> : vector<8xf32>
    %11 = vector.multi_reduction <add>, %10, %cst_7 [1] : vector<8x32xf32> to vector<8xf32>
    %12 = vector.shape_cast %11 : vector<8xf32> to vector<8x1xf32>
    %cst_8 = arith.constant 0.0322580636 : f32
    %13 = vector.broadcast %cst_8 : f32 to vector<8x1xf32>
    %14 = arith.mulf %12, %13 : vector<8x1xf32>
    %15 = math.sqrt %14 : vector<8x1xf32>
    %cst_9 = arith.constant 9.99999997E-7 : f32
    %16 = vector.broadcast %cst_9 : f32 to vector<8x1xf32>
    %17 = arith.addf %15, %16 : vector<8x1xf32>
    %18 = tpu.reciprocal %17 : vector<8x1xf32> -> vector<8x1xf32>
    %19 = vector.broadcast %7 : vector<8x1xf32> to vector<8x32xf32>
    %20 = arith.subf %1, %19 : vector<8x32xf32>
    %21 = vector.broadcast %2 : vector<1x32xf32> to vector<8x32xf32>
    %22 = arith.mulf %21, %20 : vector<8x32xf32>
    %23 = vector.broadcast %18 : vector<8x1xf32> to vector<8x32xf32>
    %24 = arith.mulf %22, %23 : vector<8x32xf32>
    %25 = vector.broadcast %3 : vector<1x32xf32> to vector<8x32xf32>
    %26 = arith.addf %24, %25 : vector<8x32xf32>
    %c0_10 = arith.constant 0 : index
    %c0_11 = arith.constant 0 : index
    %27 = vector.load %arg6[%c0_10, %c0_11] : memref<32x32xf32, #tpu.memory_space<vmem>>, vector<32x32xf32>
    %cst_12 = arith.constant dense<0.000000e+00> : vector<8x32xf32>
    %28 = tpu.matmul %26, %27, %cst_12 {dimension_numbers = #tpu.dot_dimension_numbers<[1], [0], [0], [1], [0, 0, 1, 1], [], []>} : vector<8x32xf32>, vector<32x32xf32>, vector<8x32xf32> -> vector<8x32xf32>
    %c0_13 = arith.constant 0 : index
    %c0_14 = arith.constant 0 : index
    %29 = vector.load %arg7[%c0_13, %c0_14] : memref<1x32xf32, #tpu.memory_space<vmem>>, vector<1x32xf32>
    %30 = vector.broadcast %29 : vector<1x32xf32> to vector<8x32xf32>
    %31 = arith.addf %28, %30 : vector<8x32xf32>
    %c0_15 = arith.constant 0 : index
    %c0_16 = arith.constant 0 : index
    %32 = vector.load %arg8[%c0_15, %c0_16] : memref<32x64xf32, #tpu.memory_space<vmem>>, vector<32x64xf32>
    %cst_17 = arith.constant dense<0.000000e+00> : vector<8x64xf32>
    %33 = tpu.matmul %26, %32, %cst_17 {dimension_numbers = #tpu.dot_dimension_numbers<[1], [0], [0], [1], [0, 0, 1, 1], [], []>} : vector<8x32xf32>, vector<32x64xf32>, vector<8x64xf32> -> vector<8x64xf32>
    %c0_18 = arith.constant 0 : index
    %c0_19 = arith.constant 0 : index
    %34 = vector.load %arg9[%c0_18, %c0_19] : memref<1x64xf32, #tpu.memory_space<vmem>>, vector<1x64xf32>
    %35 = vector.broadcast %34 : vector<1x64xf32> to vector<8x64xf32>
    %36 = arith.addf %33, %35 : vector<8x64xf32>
    %37 = vector.extract_strided_slice %36 {offsets = [0, 0], sizes = [8, 32], strides = [1, 1]} : vector<8x64xf32> to vector<8x32xf32>
    %38 = vector.extract_strided_slice %36 {offsets = [0, 32], sizes = [8, 32], strides = [1, 1]} : vector<8x64xf32> to vector<8x32xf32>
    %cst_20 = arith.constant 0.353553385 : f32
    %39 = vector.broadcast %cst_20 : f32 to vector<8x32xf32>
    %40 = arith.mulf %31, %39 : vector<8x32xf32>
    %41 = vector.extract_strided_slice %40 {offsets = [0, 0], sizes = [8, 8], strides = [1, 1]} : vector<8x32xf32> to vector<8x8xf32>
    %42 = vector.extract_strided_slice %40 {offsets = [0, 8], sizes = [8, 8], strides = [1, 1]} : vector<8x32xf32> to vector<8x8xf32>
    %43 = vector.extract_strided_slice %40 {offsets = [0, 16], sizes = [8, 8], strides = [1, 1]} : vector<8x32xf32> to vector<8x8xf32>
    %44 = vector.extract_strided_slice %40 {offsets = [0, 24], sizes = [8, 8], strides = [1, 1]} : vector<8x32xf32> to vector<8x8xf32>
    %45 = vector.shape_cast %41 : vector<8x8xf32> to vector<1x8x8xf32>
    %46 = vector.shape_cast %42 : vector<8x8xf32> to vector<1x8x8xf32>
    %47 = vector.shape_cast %43 : vector<8x8xf32> to vector<1x8x8xf32>
    %48 = vector.shape_cast %44 : vector<8x8xf32> to vector<1x8x8xf32>
    %49 = tpu.concatenate %45, %46, %47, %48 in 0 : vector<1x8x8xf32>, vector<1x8x8xf32>, vector<1x8x8xf32>, vector<1x8x8xf32> -> vector<4x8x8xf32>
    %50 = vector.extract_strided_slice %37 {offsets = [0, 0], sizes = [8, 8], strides = [1, 1]} : vector<8x32xf32> to vector<8x8xf32>
    %51 = vector.extract_strided_slice %37 {offsets = [0, 8], sizes = [8, 8], strides = [1, 1]} : vector<8x32xf32> to vector<8x8xf32>
    %52 = vector.extract_strided_slice %37 {offsets = [0, 16], sizes = [8, 8], strides = [1, 1]} : vector<8x32xf32> to vector<8x8xf32>
    %53 = vector.extract_strided_slice %37 {offsets = [0, 24], sizes = [8, 8], strides = [1, 1]} : vector<8x32xf32> to vector<8x8xf32>
    %54 = vector.shape_cast %50 : vector<8x8xf32> to vector<1x8x8xf32>
    %55 = vector.shape_cast %51 : vector<8x8xf32> to vector<1x8x8xf32>
    %56 = vector.shape_cast %52 : vector<8x8xf32> to vector<1x8x8xf32>
    %57 = vector.shape_cast %53 : vector<8x8xf32> to vector<1x8x8xf32>
    %58 = tpu.concatenate %54, %55, %56, %57 in 0 : vector<1x8x8xf32>, vector<1x8x8xf32>, vector<1x8x8xf32>, vector<1x8x8xf32> -> vector<4x8x8xf32>
    %59 = vector.extract_strided_slice %38 {offsets = [0, 0], sizes = [8, 8], strides = [1, 1]} : vector<8x32xf32> to vector<8x8xf32>
    %60 = vector.extract_strided_slice %38 {offsets = [0, 8], sizes = [8, 8], strides = [1, 1]} : vector<8x32xf32> to vector<8x8xf32>
    %61 = vector.extract_strided_slice %38 {offsets = [0, 16], sizes = [8, 8], strides = [1, 1]} : vector<8x32xf32> to vector<8x8xf32>
    %62 = vector.extract_strided_slice %38 {offsets = [0, 24], sizes = [8, 8], strides = [1, 1]} : vector<8x32xf32> to vector<8x8xf32>
    %63 = vector.shape_cast %59 : vector<8x8xf32> to vector<1x8x8xf32>
    %64 = vector.shape_cast %60 : vector<8x8xf32> to vector<1x8x8xf32>
    %65 = vector.shape_cast %61 : vector<8x8xf32> to vector<1x8x8xf32>
    %66 = vector.shape_cast %62 : vector<8x8xf32> to vector<1x8x8xf32>
    %67 = tpu.concatenate %63, %64, %65, %66 in 0 : vector<1x8x8xf32>, vector<1x8x8xf32>, vector<1x8x8xf32>, vector<1x8x8xf32> -> vector<4x8x8xf32>
    "tpu.trace_start"() <{level = 10 : i32, message = "hqd,hkd->hqk"}> : () -> ()
    %cst_21 = arith.constant dense<0.000000e+00> : vector<4x8x8xf32>
    %68 = tpu.matmul %49, %58, %cst_21 {dimension_numbers = #tpu.dot_dimension_numbers<[2], [2], [1], [1], [0, 0, 0, 1, 1, 1], [0], [0]>} : vector<4x8x8xf32>, vector<4x8x8xf32>, vector<4x8x8xf32> -> vector<4x8x8xf32>
    "tpu.trace_stop"() : () -> ()
    %c0_22 = arith.constant 0 : index
    %c0_23 = arith.constant 0 : index
    %c0_24 = arith.constant 0 : index
    %69 = vector.load %arg3[%c0_22, %c0_23, %c0_24] : memref<1x8x8xbf16, #tpu.memory_space<vmem>>, vector<1x8x8xbf16>
    %70 = vector.shape_cast %69 : vector<1x8x8xbf16> to vector<8x8xbf16>
    %71 = arith.extf %70 : vector<8x8xbf16> to vector<8x8xf32>
    %72 = vector.shape_cast %71 : vector<8x8xf32> to vector<1x8x8xf32>
    %73 = vector.broadcast %72 : vector<1x8x8xf32> to vector<4x8x8xf32>
    %74 = arith.addf %68, %73 : vector<4x8x8xf32>
    %cst_25 = arith.constant dense<0xFF800000> : vector<4x8xf32>
    %75 = vector.multi_reduction <maximumf>, %74, %cst_25 [2] : vector<4x8x8xf32> to vector<4x8xf32>
    %76 = vector.shape_cast %75 : vector<4x8xf32> to vector<4x8x1xf32>
    %77 = vector.broadcast %76 : vector<4x8x1xf32> to vector<4x8x8xf32>
    %78 = arith.subf %74, %77 : vector<4x8x8xf32>
    %79 = math.exp %78 : vector<4x8x8xf32>
    %cst_26 = arith.constant dense<0.000000e+00> : vector<4x8xf32>
    %80 = vector.multi_reduction <add>, %79, %cst_26 [2] : vector<4x8x8xf32> to vector<4x8xf32>
    %81 = vector.shape_cast %80 : vector<4x8xf32> to vector<4x8x1xf32>
    %82 = tpu.reciprocal %81 : vector<4x8x1xf32> -> vector<4x8x1xf32>
    %83 = vector.broadcast %82 : vector<4x8x1xf32> to vector<4x8x8xf32>
    %84 = arith.mulf %79, %83 : vector<4x8x8xf32>
    "tpu.trace_start"() <{level = 10 : i32, message = "hqk,hkd->hqd"}> : () -> ()
    %cst_27 = arith.constant dense<0.000000e+00> : vector<4x8x8xf32>
    %85 = tpu.matmul %84, %67, %cst_27 {dimension_numbers = #tpu.dot_dimension_numbers<[2], [1], [1], [2], [0, 0, 0, 1, 1, 2], [0], [0]>} : vector<4x8x8xf32>, vector<4x8x8xf32>, vector<4x8x8xf32> -> vector<4x8x8xf32>
    "tpu.trace_stop"() : () -> ()
    %86 = vector.extract_strided_slice %85 {offsets = [0, 0, 0], sizes = [1, 8, 8], strides = [1, 1, 1]} : vector<4x8x8xf32> to vector<1x8x8xf32>
    %87 = vector.shape_cast %86 : vector<1x8x8xf32> to vector<8x8xf32>
    %88 = vector.extract_strided_slice %85 {offsets = [1, 0, 0], sizes = [1, 8, 8], strides = [1, 1, 1]} : vector<4x8x8xf32> to vector<1x8x8xf32>
    %89 = vector.shape_cast %88 : vector<1x8x8xf32> to vector<8x8xf32>
    %90 = vector.extract_strided_slice %85 {offsets = [2, 0, 0], sizes = [1, 8, 8], strides = [1, 1, 1]} : vector<4x8x8xf32> to vector<1x8x8xf32>
    %91 = vector.shape_cast %90 : vector<1x8x8xf32> to vector<8x8xf32>
    %92 = vector.extract_strided_slice %85 {offsets = [3, 0, 0], sizes = [1, 8, 8], strides = [1, 1, 1]} : vector<4x8x8xf32> to vector<1x8x8xf32>
    %93 = vector.shape_cast %92 : vector<1x8x8xf32> to vector<8x8xf32>
    %94 = tpu.concatenate %87, %89, %91, %93 in 1 : vector<8x8xf32>, vector<8x8xf32>, vector<8x8xf32>, vector<8x8xf32> -> vector<8x32xf32>
    %c0_28 = arith.constant 0 : index
    %c0_29 = arith.constant 0 : index
    %95 = vector.load %arg10[%c0_28, %c0_29] : memref<32x32xf32, #tpu.memory_space<vmem>>, vector<32x32xf32>
    %cst_30 = arith.constant dense<0.000000e+00> : vector<8x32xf32>
    %96 = tpu.matmul %94, %95, %cst_30 {dimension_numbers = #tpu.dot_dimension_numbers<[1], [0], [0], [1], [0, 0, 1, 1], [], []>} : vector<8x32xf32>, vector<32x32xf32>, vector<8x32xf32> -> vector<8x32xf32>
    %c0_31 = arith.constant 0 : index
    %c0_32 = arith.constant 0 : index
    %97 = vector.load %arg11[%c0_31, %c0_32] : memref<1x32xf32, #tpu.memory_space<vmem>>, vector<1x32xf32>
    %98 = vector.broadcast %97 : vector<1x32xf32> to vector<8x32xf32>
    %99 = arith.addf %96, %98 : vector<8x32xf32>
    %100 = arith.addf %1, %99 : vector<8x32xf32>
    %c0_33 = arith.constant 0 : index
    %c0_34 = arith.constant 0 : index
    %c0_35 = arith.constant 0 : index
    %101 = vector.load %arg12[%c0_33, %c0_34, %c0_35] : memref<1x8x32xf32, #tpu.memory_space<vmem>>, vector<1x8x32xf32>
    %102 = vector.shape_cast %101 : vector<1x8x32xf32> to vector<8x32xf32>
    %103 = vector.shape_cast %100 : vector<8x32xf32> to vector<1x8x32xf32>
    tpu.vector_store %arg12[%c0_33, %c0_34, %c0_35], %103 {strides = array<i32>} : memref<1x8x32xf32, #tpu.memory_space<vmem>>, vector<1x8x32xf32>,
    return
  }
  func.func @transform_0(%arg0: i32, %arg1: i32) -> (i32, i32, i32) {
    %c0_i32 = arith.constant 0 : i32
    %c0_i32_0 = arith.constant 0 : i32
    return %arg0, %arg1, %c0_i32 : i32, i32, i32
  }
  func.func @transform_1(%arg0: i32, %arg1: i32) -> (i32, i32, i32) {
    %c0_i32 = arith.constant 0 : i32
    %c0_i32_0 = arith.constant 0 : i32
    return %arg0, %arg1, %c0_i32 : i32, i32, i32
  }
  func.func @transform_2(%arg0: i32, %arg1: i32) -> (i32, i32) {
    %c0_i32 = arith.constant 0 : i32
    %c0_i32_0 = arith.constant 0 : i32
    %c0_i32_1 = arith.constant 0 : i32
    return %c0_i32, %c0_i32_0 : i32, i32
  }
  func.func @transform_3(%arg0: i32, %arg1: i32) -> (i32, i32) {
    %c0_i32 = arith.constant 0 : i32
    %c0_i32_0 = arith.constant 0 : i32
    %c0_i32_1 = arith.constant 0 : i32
    return %c0_i32, %c0_i32_0 : i32, i32
  }
  func.func @transform_4(%arg0: i32, %arg1: i32) -> (i32, i32) {
    %c0_i32 = arith.constant 0 : i32
    %c0_i32_0 = arith.constant 0 : i32
    %c0_i32_1 = arith.constant 0 : i32
    return %c0_i32, %c0_i32_0 : i32, i32
  }
  func.func @transform_5(%arg0: i32, %arg1: i32) -> (i32, i32) {
    %c0_i32 = arith.constant 0 : i32
    %c0_i32_0 = arith.constant 0 : i32
    %c0_i32_1 = arith.constant 0 : i32
    return %c0_i32, %c0_i32_0 : i32, i32
  }
  func.func @transform_6(%arg0: i32, %arg1: i32) -> (i32, i32) {
    %c0_i32 = arith.constant 0 : i32
    %c0_i32_0 = arith.constant 0 : i32
    %c0_i32_1 = arith.constant 0 : i32
    return %c0_i32, %c0_i32_0 : i32, i32
  }
  func.func @transform_7(%arg0: i32, %arg1: i32) -> (i32, i32) {
    %c0_i32 = arith.constant 0 : i32
    %c0_i32_0 = arith.constant 0 : i32
    %c0_i32_1 = arith.constant 0 : i32
    return %c0_i32, %c0_i32_0 : i32, i32
  }
  func.func @transform_8(%arg0: i32, %arg1: i32) -> (i32, i32) {
    %c0_i32 = arith.constant 0 : i32
    %c0_i32_0 = arith.constant 0 : i32
    %c0_i32_1 = arith.constant 0 : i32
    return %c0_i32, %c0_i32_0 : i32, i32
  }
  func.func @transform_9(%arg0: i32, %arg1: i32) -> (i32, i32) {
    %c0_i32 = arith.constant 0 : i32
    %c0_i32_0 = arith.constant 0 : i32
    %c0_i32_1 = arith.constant 0 : i32
    return %c0_i32, %c0_i32_0 : i32, i32
  }
  func.func @transform_10(%arg0: i32, %arg1: i32) -> (i32, i32, i32) {
    %c0_i32 = arith.constant 0 : i32
    %c0_i32_0 = arith.constant 0 : i32
    return %arg0, %arg1, %c0_i32 : i32, i32, i32
  }
}

module attributes {stable_mosaic.version = 11 : i64} {
  func.func @_ffn_sublayer_kernel(%arg0: i32, %arg1: i32, %arg2: memref<16x32xf32, #tpu.memory_space<vmem>>, %arg3: memref<1x32xf32, #tpu.memory_space<vmem>>, %arg4: memref<1x32xf32, #tpu.memory_space<vmem>>, %arg5: memref<32x64xf32, #tpu.memory_space<vmem>>, %arg6: memref<1x64xf32, #tpu.memory_space<vmem>>, %arg7: memref<64x32xf32, #tpu.memory_space<vmem>>, %arg8: memref<1x32xf32, #tpu.memory_space<vmem>>, %arg9: memref<16x32xf32, #tpu.memory_space<vmem>>, %arg10: memref<16x32xf32, #tpu.memory_space<vmem>>, %arg11: memref<16x32xf32, #tpu.memory_space<vmem>>) attributes {dimension_semantics = [#tpu.dimension_semantics<parallel>, #tpu.dimension_semantics<arbitrary>], iteration_bounds = array<i64: 1, 1>, scalar_prefetch = 0 : i64, scratch_operands = 2 : i64, tpu.core_type = #tpu.core_type<tc>, window_params = [{transform_indices = @transform_0, window_bounds = array<i64: 16, 32>}, {pipeline_mode = #tpu.pipeline_mode<synchronous>, transform_indices = @transform_1, window_bounds = array<i64: 1, 32>}, {pipeline_mode = #tpu.pipeline_mode<synchronous>, transform_indices = @transform_2, window_bounds = array<i64: 1, 32>}, {transform_indices = @transform_3, window_bounds = array<i64: 32, 64>}, {transform_indices = @transform_4, window_bounds = array<i64: 1, 64>}, {transform_indices = @transform_5, window_bounds = array<i64: 64, 32>}, {pipeline_mode = #tpu.pipeline_mode<synchronous>, transform_indices = @transform_6, window_bounds = array<i64: 1, 32>}, {transform_indices = @transform_7, window_bounds = array<i64: 16, 32>}]} {
    %c0_i32 = arith.constant 0 : i32
    %0 = arith.cmpi eq, %arg1, %c0_i32 : i32
    %1 = arith.extui %0 : i1 to i32
    %c0_i32_0 = arith.constant 0 : i32
    %2 = arith.cmpi ne, %1, %c0_i32_0 : i32
    scf.if %2 {
      %cst_16 = arith.constant 0.000000e+00 : f32
      %19 = vector.broadcast %cst_16 : f32 to vector<16x32xf32>
      %c0_17 = arith.constant 0 : index
      %c0_18 = arith.constant 0 : index
      %20 = vector.load %arg11[%c0_17, %c0_18] : memref<16x32xf32, #tpu.memory_space<vmem>>, vector<16x32xf32>
      tpu.vector_store %arg11[%c0_17, %c0_18], %19 {strides = array<i32>} : memref<16x32xf32, #tpu.memory_space<vmem>>, vector<16x32xf32>,
      %c0_19 = arith.constant 0 : index
      %c0_20 = arith.constant 0 : index
      %21 = vector.load %arg2[%c0_19, %c0_20] : memref<16x32xf32, #tpu.memory_space<vmem>>, vector<16x32xf32>
      %c0_21 = arith.constant 0 : index
      %c0_22 = arith.constant 0 : index
      %22 = vector.load %arg3[%c0_21, %c0_22] : memref<1x32xf32, #tpu.memory_space<vmem>>, vector<1x32xf32>
      %c0_23 = arith.constant 0 : index
      %c0_24 = arith.constant 0 : index
      %23 = vector.load %arg4[%c0_23, %c0_24] : memref<1x32xf32, #tpu.memory_space<vmem>>, vector<1x32xf32>
      %cst_25 = arith.constant dense<0.000000e+00> : vector<16xf32>
      %24 = vector.multi_reduction <add>, %21, %cst_25 [1] : vector<16x32xf32> to vector<16xf32>
      %25 = vector.shape_cast %24 : vector<16xf32> to vector<16x1xf32>
      %cst_26 = arith.constant 3.200000e+01 : f32
      %26 = vector.broadcast %cst_26 : f32 to vector<16x1xf32>
      %27 = arith.divf %25, %26 : vector<16x1xf32>
      %28 = vector.broadcast %27 : vector<16x1xf32> to vector<16x32xf32>
      %29 = arith.subf %21, %28 : vector<16x32xf32>
      %30 = arith.mulf %29, %29 : vector<16x32xf32>
      %cst_27 = arith.constant dense<0.000000e+00> : vector<16xf32>
      %31 = vector.multi_reduction <add>, %30, %cst_27 [1] : vector<16x32xf32> to vector<16xf32>
      %32 = vector.shape_cast %31 : vector<16xf32> to vector<16x1xf32>
      %cst_28 = arith.constant 0.0322580636 : f32
      %33 = vector.broadcast %cst_28 : f32 to vector<16x1xf32>
      %34 = arith.mulf %32, %33 : vector<16x1xf32>
      %35 = math.sqrt %34 : vector<16x1xf32>
      %cst_29 = arith.constant 9.99999997E-7 : f32
      %36 = vector.broadcast %cst_29 : f32 to vector<16x1xf32>
      %37 = arith.addf %35, %36 : vector<16x1xf32>
      %38 = tpu.reciprocal %37 : vector<16x1xf32> -> vector<16x1xf32>
      %39 = vector.broadcast %27 : vector<16x1xf32> to vector<16x32xf32>
      %40 = arith.subf %21, %39 : vector<16x32xf32>
      %41 = vector.broadcast %22 : vector<1x32xf32> to vector<16x32xf32>
      %42 = arith.mulf %41, %40 : vector<16x32xf32>
      %43 = vector.broadcast %38 : vector<16x1xf32> to vector<16x32xf32>
      %44 = arith.mulf %42, %43 : vector<16x32xf32>
      %45 = vector.broadcast %23 : vector<1x32xf32> to vector<16x32xf32>
      %46 = arith.addf %44, %45 : vector<16x32xf32>
      %c0_30 = arith.constant 0 : index
      %c0_31 = arith.constant 0 : index
      %47 = vector.load %arg10[%c0_30, %c0_31] : memref<16x32xf32, #tpu.memory_space<vmem>>, vector<16x32xf32>
      tpu.vector_store %arg10[%c0_30, %c0_31], %46 {strides = array<i32>} : memref<16x32xf32, #tpu.memory_space<vmem>>, vector<16x32xf32>,
    } else {
    }
    %c0 = arith.constant 0 : index
    %c0_1 = arith.constant 0 : index
    %3 = vector.load %arg10[%c0, %c0_1] : memref<16x32xf32, #tpu.memory_space<vmem>>, vector<16x32xf32>
    %c0_2 = arith.constant 0 : index
    %c0_3 = arith.constant 0 : index
    %4 = vector.load %arg5[%c0_2, %c0_3] : memref<32x64xf32, #tpu.memory_space<vmem>>, vector<32x64xf32>
    %cst = arith.constant dense<0.000000e+00> : vector<16x64xf32>
    %5 = tpu.matmul %3, %4, %cst {dimension_numbers = #tpu.dot_dimension_numbers<[1], [0], [0], [1], [0, 0, 1, 1], [], []>} : vector<16x32xf32>, vector<32x64xf32>, vector<16x64xf32> -> vector<16x64xf32>
    %c0_4 = arith.constant 0 : index
    %c0_5 = arith.constant 0 : index
    %6 = vector.load %arg6[%c0_4, %c0_5] : memref<1x64xf32, #tpu.memory_space<vmem>>, vector<1x64xf32>
    %7 = vector.broadcast %6 : vector<1x64xf32> to vector<16x64xf32>
    %8 = arith.addf %5, %7 : vector<16x64xf32>
    %cst_6 = arith.constant 0.000000e+00 : f32
    %9 = vector.broadcast %cst_6 : f32 to vector<16x64xf32>
    %10 = arith.maximumf %8, %9 : vector<16x64xf32>
    %c0_7 = arith.constant 0 : index
    %c0_8 = arith.constant 0 : index
    %11 = vector.load %arg11[%c0_7, %c0_8] : memref<16x32xf32, #tpu.memory_space<vmem>>, vector<16x32xf32>
    %c0_9 = arith.constant 0 : index
    %c0_10 = arith.constant 0 : index
    %12 = vector.load %arg7[%c0_9, %c0_10] : memref<64x32xf32, #tpu.memory_space<vmem>>, vector<64x32xf32>
    %cst_11 = arith.constant dense<0.000000e+00> : vector<16x32xf32>
    %13 = tpu.matmul %10, %12, %cst_11 {dimension_numbers = #tpu.dot_dimension_numbers<[1], [0], [0], [1], [0, 0, 1, 1], [], []>} : vector<16x64xf32>, vector<64x32xf32>, vector<16x32xf32> -> vector<16x32xf32>
    %14 = arith.addf %11, %13 : vector<16x32xf32>
    %c0_12 = arith.constant 0 : index
    %c0_13 = arith.constant 0 : index
    %15 = vector.load %arg11[%c0_12, %c0_13] : memref<16x32xf32, #tpu.memory_space<vmem>>, vector<16x32xf32>
    tpu.vector_store %arg11[%c0_12, %c0_13], %14 {strides = array<i32>} : memref<16x32xf32, #tpu.memory_space<vmem>>, vector<16x32xf32>,
    %c0_i32_14 = arith.constant 0 : i32
    %16 = arith.cmpi eq, %arg1, %c0_i32_14 : i32
    %17 = arith.extui %16 : i1 to i32
    %c0_i32_15 = arith.constant 0 : i32
    %18 = arith.cmpi ne, %17, %c0_i32_15 : i32
    scf.if %18 {
      %c0_16 = arith.constant 0 : index
      %c0_17 = arith.constant 0 : index
      %19 = vector.load %arg2[%c0_16, %c0_17] : memref<16x32xf32, #tpu.memory_space<vmem>>, vector<16x32xf32>
      %c0_18 = arith.constant 0 : index
      %c0_19 = arith.constant 0 : index
      %20 = vector.load %arg11[%c0_18, %c0_19] : memref<16x32xf32, #tpu.memory_space<vmem>>, vector<16x32xf32>
      %21 = arith.addf %19, %20 : vector<16x32xf32>
      %c0_20 = arith.constant 0 : index
      %c0_21 = arith.constant 0 : index
      %22 = vector.load %arg8[%c0_20, %c0_21] : memref<1x32xf32, #tpu.memory_space<vmem>>, vector<1x32xf32>
      %23 = vector.broadcast %22 : vector<1x32xf32> to vector<16x32xf32>
      %24 = arith.addf %21, %23 : vector<16x32xf32>
      %c0_22 = arith.constant 0 : index
      %c0_23 = arith.constant 0 : index
      %25 = vector.load %arg9[%c0_22, %c0_23] : memref<16x32xf32, #tpu.memory_space<vmem>>, vector<16x32xf32>
      tpu.vector_store %arg9[%c0_22, %c0_23], %24 {strides = array<i32>} : memref<16x32xf32, #tpu.memory_space<vmem>>, vector<16x32xf32>,
    } else {
    }
    return
  }
  func.func @transform_0(%arg0: i32, %arg1: i32) -> (i32, i32) {
    %c0_i32 = arith.constant 0 : i32
    %c0_i32_0 = arith.constant 0 : i32
    return %arg0, %c0_i32 : i32, i32
  }
  func.func @transform_1(%arg0: i32, %arg1: i32) -> (i32, i32) {
    %c0_i32 = arith.constant 0 : i32
    %c0_i32_0 = arith.constant 0 : i32
    %c0_i32_1 = arith.constant 0 : i32
    return %c0_i32, %c0_i32_0 : i32, i32
  }
  func.func @transform_2(%arg0: i32, %arg1: i32) -> (i32, i32) {
    %c0_i32 = arith.constant 0 : i32
    %c0_i32_0 = arith.constant 0 : i32
    %c0_i32_1 = arith.constant 0 : i32
    return %c0_i32, %c0_i32_0 : i32, i32
  }
  func.func @transform_3(%arg0: i32, %arg1: i32) -> (i32, i32) {
    %c0_i32 = arith.constant 0 : i32
    %c0_i32_0 = arith.constant 0 : i32
    return %c0_i32, %arg1 : i32, i32
  }
  func.func @transform_4(%arg0: i32, %arg1: i32) -> (i32, i32) {
    %c0_i32 = arith.constant 0 : i32
    %c0_i32_0 = arith.constant 0 : i32
    return %c0_i32, %arg1 : i32, i32
  }
  func.func @transform_5(%arg0: i32, %arg1: i32) -> (i32, i32) {
    %c0_i32 = arith.constant 0 : i32
    %c0_i32_0 = arith.constant 0 : i32
    return %arg1, %c0_i32 : i32, i32
  }
  func.func @transform_6(%arg0: i32, %arg1: i32) -> (i32, i32) {
    %c0_i32 = arith.constant 0 : i32
    %c0_i32_0 = arith.constant 0 : i32
    %c0_i32_1 = arith.constant 0 : i32
    return %c0_i32, %c0_i32_0 : i32, i32
  }
  func.func @transform_7(%arg0: i32, %arg1: i32) -> (i32, i32) {
    %c0_i32 = arith.constant 0 : i32
    %c0_i32_0 = arith.constant 0 : i32
    return %arg0, %c0_i32 : i32, i32
  }
}

module attributes {stable_mosaic.version = 11 : i64} {
  func.func @_attn_sublayer_kernel(%arg0: i32, %arg1: i32, %arg2: memref<1x8x32xf32, #tpu.memory_space<vmem>>, %arg3: memref<1x8x32xf32, #tpu.memory_space<vmem>>, %arg4: memref<1x1x8xbf16, #tpu.memory_space<vmem>>, %arg5: memref<1x32xf32, #tpu.memory_space<vmem>>, %arg6: memref<1x32xf32, #tpu.memory_space<vmem>>, %arg7: memref<32x32xf32, #tpu.memory_space<vmem>>, %arg8: memref<1x32xf32, #tpu.memory_space<vmem>>, %arg9: memref<32x64xf32, #tpu.memory_space<vmem>>, %arg10: memref<1x64xf32, #tpu.memory_space<vmem>>, %arg11: memref<32x32xf32, #tpu.memory_space<vmem>>, %arg12: memref<1x32xf32, #tpu.memory_space<vmem>>, %arg13: memref<1x8x32xf32, #tpu.memory_space<vmem>>) attributes {dimension_semantics = [#tpu.dimension_semantics<parallel>, #tpu.dimension_semantics<parallel>], iteration_bounds = array<i64: 2, 1>, scalar_prefetch = 0 : i64, scratch_operands = 0 : i64, tpu.core_type = #tpu.core_type<tc>, window_params = [{transform_indices = @transform_0, window_bounds = array<i64: 1, 8, 32>}, {transform_indices = @transform_1, window_bounds = array<i64: 1, 8, 32>}, {transform_indices = @transform_2, window_bounds = array<i64: 1, 1, 8>}, {pipeline_mode = #tpu.pipeline_mode<synchronous>, transform_indices = @transform_3, window_bounds = array<i64: 1, 32>}, {pipeline_mode = #tpu.pipeline_mode<synchronous>, transform_indices = @transform_4, window_bounds = array<i64: 1, 32>}, {pipeline_mode = #tpu.pipeline_mode<synchronous>, transform_indices = @transform_5, window_bounds = array<i64: 32, 32>}, {pipeline_mode = #tpu.pipeline_mode<synchronous>, transform_indices = @transform_6, window_bounds = array<i64: 1, 32>}, {pipeline_mode = #tpu.pipeline_mode<synchronous>, transform_indices = @transform_7, window_bounds = array<i64: 32, 64>}, {pipeline_mode = #tpu.pipeline_mode<synchronous>, transform_indices = @transform_8, window_bounds = array<i64: 1, 64>}, {pipeline_mode = #tpu.pipeline_mode<synchronous>, transform_indices = @transform_9, window_bounds = array<i64: 32, 32>}, {pipeline_mode = #tpu.pipeline_mode<synchronous>, transform_indices = @transform_10, window_bounds = array<i64: 1, 32>}, {transform_indices = @transform_11, window_bounds = array<i64: 1, 8, 32>}]} {
    %c0 = arith.constant 0 : index
    %c0_0 = arith.constant 0 : index
    %c0_1 = arith.constant 0 : index
    %0 = vector.load %arg2[%c0, %c0_0, %c0_1] : memref<1x8x32xf32, #tpu.memory_space<vmem>>, vector<1x8x32xf32>
    %1 = vector.shape_cast %0 : vector<1x8x32xf32> to vector<8x32xf32>
    %c0_2 = arith.constant 0 : index
    %c0_3 = arith.constant 0 : index
    %2 = vector.load %arg5[%c0_2, %c0_3] : memref<1x32xf32, #tpu.memory_space<vmem>>, vector<1x32xf32>
    %c0_4 = arith.constant 0 : index
    %c0_5 = arith.constant 0 : index
    %3 = vector.load %arg6[%c0_4, %c0_5] : memref<1x32xf32, #tpu.memory_space<vmem>>, vector<1x32xf32>
    %cst = arith.constant dense<0.000000e+00> : vector<8xf32>
    %4 = vector.multi_reduction <add>, %1, %cst [1] : vector<8x32xf32> to vector<8xf32>
    %5 = vector.shape_cast %4 : vector<8xf32> to vector<8x1xf32>
    %cst_6 = arith.constant 3.200000e+01 : f32
    %6 = vector.broadcast %cst_6 : f32 to vector<8x1xf32>
    %7 = arith.divf %5, %6 : vector<8x1xf32>
    %8 = vector.broadcast %7 : vector<8x1xf32> to vector<8x32xf32>
    %9 = arith.subf %1, %8 : vector<8x32xf32>
    %10 = arith.mulf %9, %9 : vector<8x32xf32>
    %cst_7 = arith.constant dense<0.000000e+00> : vector<8xf32>
    %11 = vector.multi_reduction <add>, %10, %cst_7 [1] : vector<8x32xf32> to vector<8xf32>
    %12 = vector.shape_cast %11 : vector<8xf32> to vector<8x1xf32>
    %cst_8 = arith.constant 0.0322580636 : f32
    %13 = vector.broadcast %cst_8 : f32 to vector<8x1xf32>
    %14 = arith.mulf %12, %13 : vector<8x1xf32>
    %15 = math.sqrt %14 : vector<8x1xf32>
    %cst_9 = arith.constant 9.99999997E-7 : f32
    %16 = vector.broadcast %cst_9 : f32 to vector<8x1xf32>
    %17 = arith.addf %15, %16 : vector<8x1xf32>
    %18 = tpu.reciprocal %17 : vector<8x1xf32> -> vector<8x1xf32>
    %19 = vector.broadcast %7 : vector<8x1xf32> to vector<8x32xf32>
    %20 = arith.subf %1, %19 : vector<8x32xf32>
    %21 = vector.broadcast %2 : vector<1x32xf32> to vector<8x32xf32>
    %22 = arith.mulf %21, %20 : vector<8x32xf32>
    %23 = vector.broadcast %18 : vector<8x1xf32> to vector<8x32xf32>
    %24 = arith.mulf %22, %23 : vector<8x32xf32>
    %25 = vector.broadcast %3 : vector<1x32xf32> to vector<8x32xf32>
    %26 = arith.addf %24, %25 : vector<8x32xf32>
    %c0_10 = arith.constant 0 : index
    %c0_11 = arith.constant 0 : index
    %c0_12 = arith.constant 0 : index
    %27 = vector.load %arg3[%c0_10, %c0_11, %c0_12] : memref<1x8x32xf32, #tpu.memory_space<vmem>>, vector<1x8x32xf32>
    %28 = vector.shape_cast %27 : vector<1x8x32xf32> to vector<8x32xf32>
    %c0_13 = arith.constant 0 : index
    %c0_14 = arith.constant 0 : index
    %29 = vector.load %arg7[%c0_13, %c0_14] : memref<32x32xf32, #tpu.memory_space<vmem>>, vector<32x32xf32>
    %cst_15 = arith.constant dense<0.000000e+00> : vector<8x32xf32>
    %30 = tpu.matmul %26, %29, %cst_15 {dimension_numbers = #tpu.dot_dimension_numbers<[1], [0], [0], [1], [0, 0, 1, 1], [], []>} : vector<8x32xf32>, vector<32x32xf32>, vector<8x32xf32> -> vector<8x32xf32>
    %c0_16 = arith.constant 0 : index
    %c0_17 = arith.constant 0 : index
    %31 = vector.load %arg8[%c0_16, %c0_17] : memref<1x32xf32, #tpu.memory_space<vmem>>, vector<1x32xf32>
    %32 = vector.broadcast %31 : vector<1x32xf32> to vector<8x32xf32>
    %33 = arith.addf %30, %32 : vector<8x32xf32>
    %c0_18 = arith.constant 0 : index
    %c0_19 = arith.constant 0 : index
    %34 = vector.load %arg9[%c0_18, %c0_19] : memref<32x64xf32, #tpu.memory_space<vmem>>, vector<32x64xf32>
    %cst_20 = arith.constant dense<0.000000e+00> : vector<8x64xf32>
    %35 = tpu.matmul %28, %34, %cst_20 {dimension_numbers = #tpu.dot_dimension_numbers<[1], [0], [0], [1], [0, 0, 1, 1], [], []>} : vector<8x32xf32>, vector<32x64xf32>, vector<8x64xf32> -> vector<8x64xf32>
    %c0_21 = arith.constant 0 : index
    %c0_22 = arith.constant 0 : index
    %36 = vector.load %arg10[%c0_21, %c0_22] : memref<1x64xf32, #tpu.memory_space<vmem>>, vector<1x64xf32>
    %37 = vector.broadcast %36 : vector<1x64xf32> to vector<8x64xf32>
    %38 = arith.addf %35, %37 : vector<8x64xf32>
    %39 = vector.extract_strided_slice %38 {offsets = [0, 0], sizes = [8, 32], strides = [1, 1]} : vector<8x64xf32> to vector<8x32xf32>
    %40 = vector.extract_strided_slice %38 {offsets = [0, 32], sizes = [8, 32], strides = [1, 1]} : vector<8x64xf32> to vector<8x32xf32>
    %cst_23 = arith.constant 0.353553385 : f32
    %41 = vector.broadcast %cst_23 : f32 to vector<8x32xf32>
    %42 = arith.mulf %33, %41 : vector<8x32xf32>
    %43 = vector.extract_strided_slice %42 {offsets = [0, 0], sizes = [8, 8], strides = [1, 1]} : vector<8x32xf32> to vector<8x8xf32>
    %44 = vector.extract_strided_slice %42 {offsets = [0, 8], sizes = [8, 8], strides = [1, 1]} : vector<8x32xf32> to vector<8x8xf32>
    %45 = vector.extract_strided_slice %42 {offsets = [0, 16], sizes = [8, 8], strides = [1, 1]} : vector<8x32xf32> to vector<8x8xf32>
    %46 = vector.extract_strided_slice %42 {offsets = [0, 24], sizes = [8, 8], strides = [1, 1]} : vector<8x32xf32> to vector<8x8xf32>
    %47 = vector.shape_cast %43 : vector<8x8xf32> to vector<1x8x8xf32>
    %48 = vector.shape_cast %44 : vector<8x8xf32> to vector<1x8x8xf32>
    %49 = vector.shape_cast %45 : vector<8x8xf32> to vector<1x8x8xf32>
    %50 = vector.shape_cast %46 : vector<8x8xf32> to vector<1x8x8xf32>
    %51 = tpu.concatenate %47, %48, %49, %50 in 0 : vector<1x8x8xf32>, vector<1x8x8xf32>, vector<1x8x8xf32>, vector<1x8x8xf32> -> vector<4x8x8xf32>
    %52 = vector.extract_strided_slice %39 {offsets = [0, 0], sizes = [8, 8], strides = [1, 1]} : vector<8x32xf32> to vector<8x8xf32>
    %53 = vector.extract_strided_slice %39 {offsets = [0, 8], sizes = [8, 8], strides = [1, 1]} : vector<8x32xf32> to vector<8x8xf32>
    %54 = vector.extract_strided_slice %39 {offsets = [0, 16], sizes = [8, 8], strides = [1, 1]} : vector<8x32xf32> to vector<8x8xf32>
    %55 = vector.extract_strided_slice %39 {offsets = [0, 24], sizes = [8, 8], strides = [1, 1]} : vector<8x32xf32> to vector<8x8xf32>
    %56 = vector.shape_cast %52 : vector<8x8xf32> to vector<1x8x8xf32>
    %57 = vector.shape_cast %53 : vector<8x8xf32> to vector<1x8x8xf32>
    %58 = vector.shape_cast %54 : vector<8x8xf32> to vector<1x8x8xf32>
    %59 = vector.shape_cast %55 : vector<8x8xf32> to vector<1x8x8xf32>
    %60 = tpu.concatenate %56, %57, %58, %59 in 0 : vector<1x8x8xf32>, vector<1x8x8xf32>, vector<1x8x8xf32>, vector<1x8x8xf32> -> vector<4x8x8xf32>
    %61 = vector.extract_strided_slice %40 {offsets = [0, 0], sizes = [8, 8], strides = [1, 1]} : vector<8x32xf32> to vector<8x8xf32>
    %62 = vector.extract_strided_slice %40 {offsets = [0, 8], sizes = [8, 8], strides = [1, 1]} : vector<8x32xf32> to vector<8x8xf32>
    %63 = vector.extract_strided_slice %40 {offsets = [0, 16], sizes = [8, 8], strides = [1, 1]} : vector<8x32xf32> to vector<8x8xf32>
    %64 = vector.extract_strided_slice %40 {offsets = [0, 24], sizes = [8, 8], strides = [1, 1]} : vector<8x32xf32> to vector<8x8xf32>
    %65 = vector.shape_cast %61 : vector<8x8xf32> to vector<1x8x8xf32>
    %66 = vector.shape_cast %62 : vector<8x8xf32> to vector<1x8x8xf32>
    %67 = vector.shape_cast %63 : vector<8x8xf32> to vector<1x8x8xf32>
    %68 = vector.shape_cast %64 : vector<8x8xf32> to vector<1x8x8xf32>
    %69 = tpu.concatenate %65, %66, %67, %68 in 0 : vector<1x8x8xf32>, vector<1x8x8xf32>, vector<1x8x8xf32>, vector<1x8x8xf32> -> vector<4x8x8xf32>
    "tpu.trace_start"() <{level = 10 : i32, message = "hqd,hkd->hqk"}> : () -> ()
    %cst_24 = arith.constant dense<0.000000e+00> : vector<4x8x8xf32>
    %70 = tpu.matmul %51, %60, %cst_24 {dimension_numbers = #tpu.dot_dimension_numbers<[2], [2], [1], [1], [0, 0, 0, 1, 1, 1], [0], [0]>} : vector<4x8x8xf32>, vector<4x8x8xf32>, vector<4x8x8xf32> -> vector<4x8x8xf32>
    "tpu.trace_stop"() : () -> ()
    %c0_25 = arith.constant 0 : index
    %c0_26 = arith.constant 0 : index
    %c0_27 = arith.constant 0 : index
    %71 = vector.load %arg4[%c0_25, %c0_26, %c0_27] : memref<1x1x8xbf16, #tpu.memory_space<vmem>>, vector<1x1x8xbf16>
    %72 = vector.shape_cast %71 : vector<1x1x8xbf16> to vector<1x8xbf16>
    %73 = arith.extf %72 : vector<1x8xbf16> to vector<1x8xf32>
    %74 = vector.shape_cast %73 : vector<1x8xf32> to vector<1x8xf32>
    %75 = vector.broadcast %74 : vector<1x8xf32> to vector<8x8xf32>
    %76 = vector.shape_cast %75 : vector<8x8xf32> to vector<1x8x8xf32>
    %77 = vector.broadcast %76 : vector<1x8x8xf32> to vector<4x8x8xf32>
    %78 = arith.addf %70, %77 : vector<4x8x8xf32>
    %cst_28 = arith.constant dense<0xFF800000> : vector<4x8xf32>
    %79 = vector.multi_reduction <maximumf>, %78, %cst_28 [2] : vector<4x8x8xf32> to vector<4x8xf32>
    %80 = vector.shape_cast %79 : vector<4x8xf32> to vector<4x8x1xf32>
    %81 = vector.broadcast %80 : vector<4x8x1xf32> to vector<4x8x8xf32>
    %82 = arith.subf %78, %81 : vector<4x8x8xf32>
    %83 = math.exp %82 : vector<4x8x8xf32>
    %cst_29 = arith.constant dense<0.000000e+00> : vector<4x8xf32>
    %84 = vector.multi_reduction <add>, %83, %cst_29 [2] : vector<4x8x8xf32> to vector<4x8xf32>
    %85 = vector.shape_cast %84 : vector<4x8xf32> to vector<4x8x1xf32>
    %86 = tpu.reciprocal %85 : vector<4x8x1xf32> -> vector<4x8x1xf32>
    %87 = vector.broadcast %86 : vector<4x8x1xf32> to vector<4x8x8xf32>
    %88 = arith.mulf %83, %87 : vector<4x8x8xf32>
    "tpu.trace_start"() <{level = 10 : i32, message = "hqk,hkd->hqd"}> : () -> ()
    %cst_30 = arith.constant dense<0.000000e+00> : vector<4x8x8xf32>
    %89 = tpu.matmul %88, %69, %cst_30 {dimension_numbers = #tpu.dot_dimension_numbers<[2], [1], [1], [2], [0, 0, 0, 1, 1, 2], [0], [0]>} : vector<4x8x8xf32>, vector<4x8x8xf32>, vector<4x8x8xf32> -> vector<4x8x8xf32>
    "tpu.trace_stop"() : () -> ()
    %90 = vector.extract_strided_slice %89 {offsets = [0, 0, 0], sizes = [1, 8, 8], strides = [1, 1, 1]} : vector<4x8x8xf32> to vector<1x8x8xf32>
    %91 = vector.shape_cast %90 : vector<1x8x8xf32> to vector<8x8xf32>
    %92 = vector.extract_strided_slice %89 {offsets = [1, 0, 0], sizes = [1, 8, 8], strides = [1, 1, 1]} : vector<4x8x8xf32> to vector<1x8x8xf32>
    %93 = vector.shape_cast %92 : vector<1x8x8xf32> to vector<8x8xf32>
    %94 = vector.extract_strided_slice %89 {offsets = [2, 0, 0], sizes = [1, 8, 8], strides = [1, 1, 1]} : vector<4x8x8xf32> to vector<1x8x8xf32>
    %95 = vector.shape_cast %94 : vector<1x8x8xf32> to vector<8x8xf32>
    %96 = vector.extract_strided_slice %89 {offsets = [3, 0, 0], sizes = [1, 8, 8], strides = [1, 1, 1]} : vector<4x8x8xf32> to vector<1x8x8xf32>
    %97 = vector.shape_cast %96 : vector<1x8x8xf32> to vector<8x8xf32>
    %98 = tpu.concatenate %91, %93, %95, %97 in 1 : vector<8x8xf32>, vector<8x8xf32>, vector<8x8xf32>, vector<8x8xf32> -> vector<8x32xf32>
    %c0_31 = arith.constant 0 : index
    %c0_32 = arith.constant 0 : index
    %99 = vector.load %arg11[%c0_31, %c0_32] : memref<32x32xf32, #tpu.memory_space<vmem>>, vector<32x32xf32>
    %cst_33 = arith.constant dense<0.000000e+00> : vector<8x32xf32>
    %100 = tpu.matmul %98, %99, %cst_33 {dimension_numbers = #tpu.dot_dimension_numbers<[1], [0], [0], [1], [0, 0, 1, 1], [], []>} : vector<8x32xf32>, vector<32x32xf32>, vector<8x32xf32> -> vector<8x32xf32>
    %c0_34 = arith.constant 0 : index
    %c0_35 = arith.constant 0 : index
    %101 = vector.load %arg12[%c0_34, %c0_35] : memref<1x32xf32, #tpu.memory_space<vmem>>, vector<1x32xf32>
    %102 = vector.broadcast %101 : vector<1x32xf32> to vector<8x32xf32>
    %103 = arith.addf %100, %102 : vector<8x32xf32>
    %104 = arith.addf %1, %103 : vector<8x32xf32>
    %c0_36 = arith.constant 0 : index
    %c0_37 = arith.constant 0 : index
    %c0_38 = arith.constant 0 : index
    %105 = vector.load %arg13[%c0_36, %c0_37, %c0_38] : memref<1x8x32xf32, #tpu.memory_space<vmem>>, vector<1x8x32xf32>
    %106 = vector.shape_cast %105 : vector<1x8x32xf32> to vector<8x32xf32>
    %107 = vector.shape_cast %104 : vector<8x32xf32> to vector<1x8x32xf32>
    tpu.vector_store %arg13[%c0_36, %c0_37, %c0_38], %107 {strides = array<i32>} : memref<1x8x32xf32, #tpu.memory_space<vmem>>, vector<1x8x32xf32>,
    return
  }
  func.func @transform_0(%arg0: i32, %arg1: i32) -> (i32, i32, i32) {
    %c0_i32 = arith.constant 0 : i32
    %c0_i32_0 = arith.constant 0 : i32
    return %arg0, %arg1, %c0_i32 : i32, i32, i32
  }
  func.func @transform_1(%arg0: i32, %arg1: i32) -> (i32, i32, i32) {
    %c0_i32 = arith.constant 0 : i32
    %c0_i32_0 = arith.constant 0 : i32
    %c0_i32_1 = arith.constant 0 : i32
    return %arg0, %c0_i32, %c0_i32_0 : i32, i32, i32
  }
  func.func @transform_2(%arg0: i32, %arg1: i32) -> (i32, i32, i32) {
    %c0_i32 = arith.constant 0 : i32
    %c0_i32_0 = arith.constant 0 : i32
    %c0_i32_1 = arith.constant 0 : i32
    return %arg0, %c0_i32, %c0_i32_0 : i32, i32, i32
  }
  func.func @transform_3(%arg0: i32, %arg1: i32) -> (i32, i32) {
    %c0_i32 = arith.constant 0 : i32
    %c0_i32_0 = arith.constant 0 : i32
    %c0_i32_1 = arith.constant 0 : i32
    return %c0_i32, %c0_i32_0 : i32, i32
  }
  func.func @transform_4(%arg0: i32, %arg1: i32) -> (i32, i32) {
    %c0_i32 = arith.constant 0 : i32
    %c0_i32_0 = arith.constant 0 : i32
    %c0_i32_1 = arith.constant 0 : i32
    return %c0_i32, %c0_i32_0 : i32, i32
  }
  func.func @transform_5(%arg0: i32, %arg1: i32) -> (i32, i32) {
    %c0_i32 = arith.constant 0 : i32
    %c0_i32_0 = arith.constant 0 : i32
    %c0_i32_1 = arith.constant 0 : i32
    return %c0_i32, %c0_i32_0 : i32, i32
  }
  func.func @transform_6(%arg0: i32, %arg1: i32) -> (i32, i32) {
    %c0_i32 = arith.constant 0 : i32
    %c0_i32_0 = arith.constant 0 : i32
    %c0_i32_1 = arith.constant 0 : i32
    return %c0_i32, %c0_i32_0 : i32, i32
  }
  func.func @transform_7(%arg0: i32, %arg1: i32) -> (i32, i32) {
    %c0_i32 = arith.constant 0 : i32
    %c0_i32_0 = arith.constant 0 : i32
    %c0_i32_1 = arith.constant 0 : i32
    return %c0_i32, %c0_i32_0 : i32, i32
  }
  func.func @transform_8(%arg0: i32, %arg1: i32) -> (i32, i32) {
    %c0_i32 = arith.constant 0 : i32
    %c0_i32_0 = arith.constant 0 : i32
    %c0_i32_1 = arith.constant 0 : i32
    return %c0_i32, %c0_i32_0 : i32, i32
  }
  func.func @transform_9(%arg0: i32, %arg1: i32) -> (i32, i32) {
    %c0_i32 = arith.constant 0 : i32
    %c0_i32_0 = arith.constant 0 : i32
    %c0_i32_1 = arith.constant 0 : i32
    return %c0_i32, %c0_i32_0 : i32, i32
  }
  func.func @transform_10(%arg0: i32, %arg1: i32) -> (i32, i32) {
    %c0_i32 = arith.constant 0 : i32
    %c0_i32_0 = arith.constant 0 : i32
    %c0_i32_1 = arith.constant 0 : i32
    return %c0_i32, %c0_i32_0 : i32, i32
  }
  func.func @transform_11(%arg0: i32, %arg1: i32) -> (i32, i32, i32) {
    %c0_i32 = arith.constant 0 : i32
    %c0_i32_0 = arith.constant 0 : i32
    return %arg0, %arg1, %c0_i32 : i32, i32, i32
  }
}

module attributes {stable_mosaic.version = 11 : i64} {
  func.func @_ffn_sublayer_kernel(%arg0: i32, %arg1: i32, %arg2: memref<16x32xf32, #tpu.memory_space<vmem>>, %arg3: memref<1x32xf32, #tpu.memory_space<vmem>>, %arg4: memref<1x32xf32, #tpu.memory_space<vmem>>, %arg5: memref<32x64xf32, #tpu.memory_space<vmem>>, %arg6: memref<1x64xf32, #tpu.memory_space<vmem>>, %arg7: memref<64x32xf32, #tpu.memory_space<vmem>>, %arg8: memref<1x32xf32, #tpu.memory_space<vmem>>, %arg9: memref<1x32xf32, #tpu.memory_space<vmem>>, %arg10: memref<1x32xf32, #tpu.memory_space<vmem>>, %arg11: memref<16x32xf32, #tpu.memory_space<vmem>>, %arg12: memref<16x32xf32, #tpu.memory_space<vmem>>, %arg13: memref<16x32xf32, #tpu.memory_space<vmem>>) attributes {dimension_semantics = [#tpu.dimension_semantics<parallel>, #tpu.dimension_semantics<arbitrary>], iteration_bounds = array<i64: 1, 1>, scalar_prefetch = 0 : i64, scratch_operands = 2 : i64, tpu.core_type = #tpu.core_type<tc>, window_params = [{transform_indices = @transform_0, window_bounds = array<i64: 16, 32>}, {pipeline_mode = #tpu.pipeline_mode<synchronous>, transform_indices = @transform_1, window_bounds = array<i64: 1, 32>}, {pipeline_mode = #tpu.pipeline_mode<synchronous>, transform_indices = @transform_2, window_bounds = array<i64: 1, 32>}, {transform_indices = @transform_3, window_bounds = array<i64: 32, 64>}, {transform_indices = @transform_4, window_bounds = array<i64: 1, 64>}, {transform_indices = @transform_5, window_bounds = array<i64: 64, 32>}, {pipeline_mode = #tpu.pipeline_mode<synchronous>, transform_indices = @transform_6, window_bounds = array<i64: 1, 32>}, {pipeline_mode = #tpu.pipeline_mode<synchronous>, transform_indices = @transform_7, window_bounds = array<i64: 1, 32>}, {pipeline_mode = #tpu.pipeline_mode<synchronous>, transform_indices = @transform_8, window_bounds = array<i64: 1, 32>}, {transform_indices = @transform_9, window_bounds = array<i64: 16, 32>}]} {
    %c0_i32 = arith.constant 0 : i32
    %0 = arith.cmpi eq, %arg1, %c0_i32 : i32
    %1 = arith.extui %0 : i1 to i32
    %c0_i32_0 = arith.constant 0 : i32
    %2 = arith.cmpi ne, %1, %c0_i32_0 : i32
    scf.if %2 {
      %cst_16 = arith.constant 0.000000e+00 : f32
      %19 = vector.broadcast %cst_16 : f32 to vector<16x32xf32>
      %c0_17 = arith.constant 0 : index
      %c0_18 = arith.constant 0 : index
      %20 = vector.load %arg13[%c0_17, %c0_18] : memref<16x32xf32, #tpu.memory_space<vmem>>, vector<16x32xf32>
      tpu.vector_store %arg13[%c0_17, %c0_18], %19 {strides = array<i32>} : memref<16x32xf32, #tpu.memory_space<vmem>>, vector<16x32xf32>,
      %c0_19 = arith.constant 0 : index
      %c0_20 = arith.constant 0 : index
      %21 = vector.load %arg2[%c0_19, %c0_20] : memref<16x32xf32, #tpu.memory_space<vmem>>, vector<16x32xf32>
      %c0_21 = arith.constant 0 : index
      %c0_22 = arith.constant 0 : index
      %22 = vector.load %arg3[%c0_21, %c0_22] : memref<1x32xf32, #tpu.memory_space<vmem>>, vector<1x32xf32>
      %c0_23 = arith.constant 0 : index
      %c0_24 = arith.constant 0 : index
      %23 = vector.load %arg4[%c0_23, %c0_24] : memref<1x32xf32, #tpu.memory_space<vmem>>, vector<1x32xf32>
      %cst_25 = arith.constant dense<0.000000e+00> : vector<16xf32>
      %24 = vector.multi_reduction <add>, %21, %cst_25 [1] : vector<16x32xf32> to vector<16xf32>
      %25 = vector.shape_cast %24 : vector<16xf32> to vector<16x1xf32>
      %cst_26 = arith.constant 3.200000e+01 : f32
      %26 = vector.broadcast %cst_26 : f32 to vector<16x1xf32>
      %27 = arith.divf %25, %26 : vector<16x1xf32>
      %28 = vector.broadcast %27 : vector<16x1xf32> to vector<16x32xf32>
      %29 = arith.subf %21, %28 : vector<16x32xf32>
      %30 = arith.mulf %29, %29 : vector<16x32xf32>
      %cst_27 = arith.constant dense<0.000000e+00> : vector<16xf32>
      %31 = vector.multi_reduction <add>, %30, %cst_27 [1] : vector<16x32xf32> to vector<16xf32>
      %32 = vector.shape_cast %31 : vector<16xf32> to vector<16x1xf32>
      %cst_28 = arith.constant 0.0322580636 : f32
      %33 = vector.broadcast %cst_28 : f32 to vector<16x1xf32>
      %34 = arith.mulf %32, %33 : vector<16x1xf32>
      %35 = math.sqrt %34 : vector<16x1xf32>
      %cst_29 = arith.constant 9.99999997E-7 : f32
      %36 = vector.broadcast %cst_29 : f32 to vector<16x1xf32>
      %37 = arith.addf %35, %36 : vector<16x1xf32>
      %38 = tpu.reciprocal %37 : vector<16x1xf32> -> vector<16x1xf32>
      %39 = vector.broadcast %27 : vector<16x1xf32> to vector<16x32xf32>
      %40 = arith.subf %21, %39 : vector<16x32xf32>
      %41 = vector.broadcast %22 : vector<1x32xf32> to vector<16x32xf32>
      %42 = arith.mulf %41, %40 : vector<16x32xf32>
      %43 = vector.broadcast %38 : vector<16x1xf32> to vector<16x32xf32>
      %44 = arith.mulf %42, %43 : vector<16x32xf32>
      %45 = vector.broadcast %23 : vector<1x32xf32> to vector<16x32xf32>
      %46 = arith.addf %44, %45 : vector<16x32xf32>
      %c0_30 = arith.constant 0 : index
      %c0_31 = arith.constant 0 : index
      %47 = vector.load %arg12[%c0_30, %c0_31] : memref<16x32xf32, #tpu.memory_space<vmem>>, vector<16x32xf32>
      tpu.vector_store %arg12[%c0_30, %c0_31], %46 {strides = array<i32>} : memref<16x32xf32, #tpu.memory_space<vmem>>, vector<16x32xf32>,
    } else {
    }
    %c0 = arith.constant 0 : index
    %c0_1 = arith.constant 0 : index
    %3 = vector.load %arg12[%c0, %c0_1] : memref<16x32xf32, #tpu.memory_space<vmem>>, vector<16x32xf32>
    %c0_2 = arith.constant 0 : index
    %c0_3 = arith.constant 0 : index
    %4 = vector.load %arg5[%c0_2, %c0_3] : memref<32x64xf32, #tpu.memory_space<vmem>>, vector<32x64xf32>
    %cst = arith.constant dense<0.000000e+00> : vector<16x64xf32>
    %5 = tpu.matmul %3, %4, %cst {dimension_numbers = #tpu.dot_dimension_numbers<[1], [0], [0], [1], [0, 0, 1, 1], [], []>} : vector<16x32xf32>, vector<32x64xf32>, vector<16x64xf32> -> vector<16x64xf32>
    %c0_4 = arith.constant 0 : index
    %c0_5 = arith.constant 0 : index
    %6 = vector.load %arg6[%c0_4, %c0_5] : memref<1x64xf32, #tpu.memory_space<vmem>>, vector<1x64xf32>
    %7 = vector.broadcast %6 : vector<1x64xf32> to vector<16x64xf32>
    %8 = arith.addf %5, %7 : vector<16x64xf32>
    %cst_6 = arith.constant 0.000000e+00 : f32
    %9 = vector.broadcast %cst_6 : f32 to vector<16x64xf32>
    %10 = arith.maximumf %8, %9 : vector<16x64xf32>
    %c0_7 = arith.constant 0 : index
    %c0_8 = arith.constant 0 : index
    %11 = vector.load %arg13[%c0_7, %c0_8] : memref<16x32xf32, #tpu.memory_space<vmem>>, vector<16x32xf32>
    %c0_9 = arith.constant 0 : index
    %c0_10 = arith.constant 0 : index
    %12 = vector.load %arg7[%c0_9, %c0_10] : memref<64x32xf32, #tpu.memory_space<vmem>>, vector<64x32xf32>
    %cst_11 = arith.constant dense<0.000000e+00> : vector<16x32xf32>
    %13 = tpu.matmul %10, %12, %cst_11 {dimension_numbers = #tpu.dot_dimension_numbers<[1], [0], [0], [1], [0, 0, 1, 1], [], []>} : vector<16x64xf32>, vector<64x32xf32>, vector<16x32xf32> -> vector<16x32xf32>
    %14 = arith.addf %11, %13 : vector<16x32xf32>
    %c0_12 = arith.constant 0 : index
    %c0_13 = arith.constant 0 : index
    %15 = vector.load %arg13[%c0_12, %c0_13] : memref<16x32xf32, #tpu.memory_space<vmem>>, vector<16x32xf32>
    tpu.vector_store %arg13[%c0_12, %c0_13], %14 {strides = array<i32>} : memref<16x32xf32, #tpu.memory_space<vmem>>, vector<16x32xf32>,
    %c0_i32_14 = arith.constant 0 : i32
    %16 = arith.cmpi eq, %arg1, %c0_i32_14 : i32
    %17 = arith.extui %16 : i1 to i32
    %c0_i32_15 = arith.constant 0 : i32
    %18 = arith.cmpi ne, %17, %c0_i32_15 : i32
    scf.if %18 {
      %c0_16 = arith.constant 0 : index
      %c0_17 = arith.constant 0 : index
      %19 = vector.load %arg2[%c0_16, %c0_17] : memref<16x32xf32, #tpu.memory_space<vmem>>, vector<16x32xf32>
      %c0_18 = arith.constant 0 : index
      %c0_19 = arith.constant 0 : index
      %20 = vector.load %arg13[%c0_18, %c0_19] : memref<16x32xf32, #tpu.memory_space<vmem>>, vector<16x32xf32>
      %21 = arith.addf %19, %20 : vector<16x32xf32>
      %c0_20 = arith.constant 0 : index
      %c0_21 = arith.constant 0 : index
      %22 = vector.load %arg8[%c0_20, %c0_21] : memref<1x32xf32, #tpu.memory_space<vmem>>, vector<1x32xf32>
      %23 = vector.broadcast %22 : vector<1x32xf32> to vector<16x32xf32>
      %24 = arith.addf %21, %23 : vector<16x32xf32>
      %c0_22 = arith.constant 0 : index
      %c0_23 = arith.constant 0 : index
      %25 = vector.load %arg9[%c0_22, %c0_23] : memref<1x32xf32, #tpu.memory_space<vmem>>, vector<1x32xf32>
      %c0_24 = arith.constant 0 : index
      %c0_25 = arith.constant 0 : index
      %26 = vector.load %arg10[%c0_24, %c0_25] : memref<1x32xf32, #tpu.memory_space<vmem>>, vector<1x32xf32>
      %cst_26 = arith.constant dense<0.000000e+00> : vector<16xf32>
      %27 = vector.multi_reduction <add>, %24, %cst_26 [1] : vector<16x32xf32> to vector<16xf32>
      %28 = vector.shape_cast %27 : vector<16xf32> to vector<16x1xf32>
      %cst_27 = arith.constant 3.200000e+01 : f32
      %29 = vector.broadcast %cst_27 : f32 to vector<16x1xf32>
      %30 = arith.divf %28, %29 : vector<16x1xf32>
      %31 = vector.broadcast %30 : vector<16x1xf32> to vector<16x32xf32>
      %32 = arith.subf %24, %31 : vector<16x32xf32>
      %33 = arith.mulf %32, %32 : vector<16x32xf32>
      %cst_28 = arith.constant dense<0.000000e+00> : vector<16xf32>
      %34 = vector.multi_reduction <add>, %33, %cst_28 [1] : vector<16x32xf32> to vector<16xf32>
      %35 = vector.shape_cast %34 : vector<16xf32> to vector<16x1xf32>
      %cst_29 = arith.constant 0.0322580636 : f32
      %36 = vector.broadcast %cst_29 : f32 to vector<16x1xf32>
      %37 = arith.mulf %35, %36 : vector<16x1xf32>
      %38 = math.sqrt %37 : vector<16x1xf32>
      %cst_30 = arith.constant 9.99999997E-7 : f32
      %39 = vector.broadcast %cst_30 : f32 to vector<16x1xf32>
      %40 = arith.addf %38, %39 : vector<16x1xf32>
      %41 = tpu.reciprocal %40 : vector<16x1xf32> -> vector<16x1xf32>
      %42 = vector.broadcast %30 : vector<16x1xf32> to vector<16x32xf32>
      %43 = arith.subf %24, %42 : vector<16x32xf32>
      %44 = vector.broadcast %25 : vector<1x32xf32> to vector<16x32xf32>
      %45 = arith.mulf %44, %43 : vector<16x32xf32>
      %46 = vector.broadcast %41 : vector<16x1xf32> to vector<16x32xf32>
      %47 = arith.mulf %45, %46 : vector<16x32xf32>
      %48 = vector.broadcast %26 : vector<1x32xf32> to vector<16x32xf32>
      %49 = arith.addf %47, %48 : vector<16x32xf32>
      %c0_31 = arith.constant 0 : index
      %c0_32 = arith.constant 0 : index
      %50 = vector.load %arg11[%c0_31, %c0_32] : memref<16x32xf32, #tpu.memory_space<vmem>>, vector<16x32xf32>
      tpu.vector_store %arg11[%c0_31, %c0_32], %49 {strides = array<i32>} : memref<16x32xf32, #tpu.memory_space<vmem>>, vector<16x32xf32>,
    } else {
    }
    return
  }
  func.func @transform_0(%arg0: i32, %arg1: i32) -> (i32, i32) {
    %c0_i32 = arith.constant 0 : i32
    %c0_i32_0 = arith.constant 0 : i32
    return %arg0, %c0_i32 : i32, i32
  }
  func.func @transform_1(%arg0: i32, %arg1: i32) -> (i32, i32) {
    %c0_i32 = arith.constant 0 : i32
    %c0_i32_0 = arith.constant 0 : i32
    %c0_i32_1 = arith.constant 0 : i32
    return %c0_i32, %c0_i32_0 : i32, i32
  }
  func.func @transform_2(%arg0: i32, %arg1: i32) -> (i32, i32) {
    %c0_i32 = arith.constant 0 : i32
    %c0_i32_0 = arith.constant 0 : i32
    %c0_i32_1 = arith.constant 0 : i32
    return %c0_i32, %c0_i32_0 : i32, i32
  }
  func.func @transform_3(%arg0: i32, %arg1: i32) -> (i32, i32) {
    %c0_i32 = arith.constant 0 : i32
    %c0_i32_0 = arith.constant 0 : i32
    return %c0_i32, %arg1 : i32, i32
  }
  func.func @transform_4(%arg0: i32, %arg1: i32) -> (i32, i32) {
    %c0_i32 = arith.constant 0 : i32
    %c0_i32_0 = arith.constant 0 : i32
    return %c0_i32, %arg1 : i32, i32
  }
  func.func @transform_5(%arg0: i32, %arg1: i32) -> (i32, i32) {
    %c0_i32 = arith.constant 0 : i32
    %c0_i32_0 = arith.constant 0 : i32
    return %arg1, %c0_i32 : i32, i32
  }
  func.func @transform_6(%arg0: i32, %arg1: i32) -> (i32, i32) {
    %c0_i32 = arith.constant 0 : i32
    %c0_i32_0 = arith.constant 0 : i32
    %c0_i32_1 = arith.constant 0 : i32
    return %c0_i32, %c0_i32_0 : i32, i32
  }
  func.func @transform_7(%arg0: i32, %arg1: i32) -> (i32, i32) {
    %c0_i32 = arith.constant 0 : i32
    %c0_i32_0 = arith.constant 0 : i32
    %c0_i32_1 = arith.constant 0 : i32
    return %c0_i32, %c0_i32_0 : i32, i32
  }
  func.func @transform_8(%arg0: i32, %arg1: i32) -> (i32, i32) {
    %c0_i32 = arith.constant 0 : i32
    %c0_i32_0 = arith.constant 0 : i32
    %c0_i32_1 = arith.constant 0 : i32
    return %c0_i32, %c0_i32_0 : i32, i32
  }
  func.func @transform_9(%arg0: i32, %arg1: i32) -> (i32, i32) {
    %c0_i32 = arith.constant 0 : i32
    %c0_i32_0 = arith.constant 0 : i32
    return %arg0, %c0_i32 : i32, i32
  }
}

</mosaic_0001>

<bundles_post_ra>
// kernel: encoder_decoder_forward.13
= control target key start
LH: loop header
LB: loop body
LE: loop exit
PB: predicated region body
PF: predicated region fallthrough
CT: control target
= control target key end

     0   :  { %vm36_vm0 = vcmask 261120   ;;  %v382_v4 = vmov 32.0   ;;  %vm190_vm14 = vcmask 523264   ;;  %s545_s0 = inlined_call_operand.vmem [shape: f32[16,32], index: 0, kind: input, shape index: {}]   ;;  %s546_s1 = inlined_call_operand.vmem [shape: f32[1,32], index: 1, kind: input, shape index: {}]   ;;  %s547_s2 = inlined_call_operand.vmem [shape: f32[1,32], index: 2, kind: input, shape index: {}]   ;;  %s548_s4 = inlined_call_operand.vmem [shape: f32[1,64], index: 4, kind: input, shape index: {}]   ;;  %s549_s3 = inlined_call_operand.vmem [shape: f32[32,64], index: 3, kind: input, shape index: {}]   ;;  %s550_s5 = inlined_call_operand.vmem [shape: f32[64,32], index: 5, kind: input, shape index: {}]   ;;  %s551_s6 = inlined_call_operand.vmem [shape: f32[1,32], index: 6, kind: input, shape index: {}]   ;;  %s552_s7 = inlined_call_operand.vmem [shape: f32[1,32], index: 7, kind: input, shape index: {}]   ;;  %s553_s8 = inlined_call_operand.vmem [shape: f32[1,32], index: 8, kind: input, shape index: {}]   ;;  %s554_s9 = inlined_call_operand.vmem [shape: f32[16,32], index: 9, kind: output, shape index: {}]  }
   0x1   :  { %v437_v0 = vld [vmem:[%s545_s0 + $0x8] sm:$0xff]  ;;  %v444_v2 = vld [vmem:[%s545_s0] sm:$0xff]  ;;  %364 = vrcp.f32 %v382_v4  ;;  %v143_v33 = vld [vmem:[%s549_s3 + $0x18] sm:$0xff] }
   0x2   :  { %v46_v1 = vsel %vm36_vm0, %v437_v0, 0.0  ;;  %v43_v3 = vsel %vm36_vm0, %v444_v2, 0.0  ;;  %v358_v12 = vld [vmem:[%s546_s1] ss:$0 sm:$0xff]  ;;  %v142_v34 = vld [vmem:[%s549_s3 + $0x10] sm:$0xff]  ;;  %344 = vmatpush.msra.mxu3 %v143_v33  ;;  %167 = vmatpush.msra.mxu0 %v143_v33  ;;  %v141_v38 = vld [vmem:[%s549_s3 + $0x8] sm:$0xff] }
   0x3   :  { %47 = vadd.xlane.f32.xlu0 %v46_v1  ;;  %v140_v41 = vld [vmem:[%s549_s3] sm:$0xff]  ;;  %v189_v54 = vld [vmem:[%s550_s5 + $0x38] sm:$0xff]  ;;  %v188_v55 = vld [vmem:[%s550_s5 + $0x30] sm:$0xff] }
   0x4   :  { %345 = vmatpush.msra.mxu3 %v142_v34  ;;  %168 = vmatpush.msra.mxu0 %v142_v34  ;;  %v187_v58 = vld [vmem:[%s550_s5 + $0x28] sm:$0xff]  ;;  %v186_v61 = vld [vmem:[%s550_s5 + $0x20] sm:$0xff]  ;;  %v185_v1 = vld [vmem:[%s550_s5 + $0x18] sm:$0xff] }
   0x5   :  { %348 = vmatpush.msra.mxu2 %v189_v54  ;;  %205 = vmatpush.msra.mxu1 %v189_v54 }
   0x6   :  { %346 = vmatpush.msra.mxu3 %v141_v38  ;;  %169 = vmatpush.msra.mxu0 %v141_v38 }
   0x7   :  { %v365_v5 = vpop.eup %364  ;;  %349 = vmatpush.msra.mxu2 %v188_v55  ;;  %206 = vmatpush.msra.mxu1 %v188_v55 }
   0x8   :  { %v50_v6 = vmul.f32 32.0, %v365_v5  ;;  %vm54_vm1 = vweird.f32 %v365_v5  ;;  %347 = vmatpush.msra.mxu3 %v140_v41  ;;  %170 = vmatpush.msra.mxu0 %v140_v41 }
   0x9   :  { %350 = vmatpush.msra.mxu2 %v187_v58  ;;  %207 = vmatpush.msra.mxu1 %v187_v58 }
   0xa   :  { %v51_v7 = vsub.f32 1.0, %v50_v6 }
   0xb   :  { %44 = vadd.xlane.f32.xlu0 %v43_v3  ;;  %351 = vmatpush.msra.mxu2 %v186_v61 }
   0xc   :  { %v52_v8 = vmul.f32 %v365_v5, %v51_v7  ;;  %208 = vmatpush.msra.mxu1 %v186_v61  ;;  %v359_v7 = vld [vmem:[%s547_s2] ss:$0 sm:$0xff] }
   0xd   :  { %352 = vmatpush.msra.mxu2 %v185_v1 }
   0xe   :  { %v53_v9 = vadd.f32 %v365_v5, %v52_v8  ;;  %209 = vmatpush.msra.mxu1 %v185_v1 }
  0x10   :  { %v448_v10 = vsel %vm54_vm1, %v365_v5, %v53_v9 }
  0x76   :  { %v48_v11 = vpop.xlane.xlu0 %47 }
  0x77   :  { %v57_v13 = vmul.f32 %v448_v10, %v48_v11 }
  0x79   :  { %v59_v14 = vsub.f32 %v437_v0, %v57_v13 }
  0x7b   :  { %v455_v15 = vmul.f32 %v358_v12, %v59_v14  ;;  %v61_v16 = vmul.f32 %v59_v14, %v59_v14 }
  0x7d   :  { %v65_v17 = vsel %vm36_vm0, %v61_v16, 0.0 }
  0x7e   :  { %66 = vadd.xlane.f32.xlu1 %v65_v17  ;;  %v45_v18 = vpop.xlane.xlu0 %44 }
  0x7f   :  { %v56_v19 = vmul.f32 %v448_v10, %v45_v18 }
  0x81   :  { %v58_v20 = vsub.f32 %v444_v2, %v56_v19 }
  0x83   :  { %v460_v21 = vmul.f32 %v358_v12, %v58_v20  ;;  %v60_v22 = vmul.f32 %v58_v20, %v58_v20 }
  0x85   :  { %v62_v23 = vsel %vm36_vm0, %v60_v22, 0.0 }
  0x86   :  { %63 = vadd.xlane.f32.xlu1 %v62_v23 }
  0xf1   :  { %v67_v24 = vpop.xlane.xlu1 %66 }
  0xf2   :  { %v69_v25 = vmul.f32 0.032258064, %v67_v24 }
  0xf4   :  { %366 = vrsqrt.f32 %v69_v25  ;;  %vm89_vm2 = vcmp.eq.f32.partialorder %v69_v25, inf  ;;  %v92_v42 = vand.u32 2147483648, %v69_v25  ;;  %vm91_vm3 = vcmp.eq.f32.partialorder %v69_v25, 0.0 }
  0xf9   :  { %v64_v26 = vpop.xlane.xlu1 %63 }
  0xfa   :  { %v367_v27 = vpop.eup %366  ;;  %v68_v28 = vmul.f32 0.032258064, %v64_v26  ;;  %v184_v26 = vld [vmem:[%s550_s5 + $0x10] sm:$0xff] }
  0xfb   :  { %v83_v29 = vmul.f32 %v367_v27, %v69_v25  ;;  %353 = vmatpush.msra.mxu2 %v184_v26  ;;  %210 = vmatpush.msra.mxu1 %v184_v26 }
  0xfc   :  { %368 = vrsqrt.f32 %v68_v28  ;;  %vm77_vm4 = vcmp.eq.f32.partialorder %v68_v28, inf  ;;  %v80_v50 = vand.u32 2147483648, %v68_v28  ;;  %vm79_vm5 = vcmp.eq.f32.partialorder %v68_v28, 0.0 }
  0xfd   :  { %v84_v30 = vmul.f32 %v367_v27, %v83_v29  ;;  %v360_v29 = vld [vmem:[%s548_s4] ss:$0 sm:$0xff] }
  0xff   :  { %v85_v31 = vmul.f32 0.5, %v84_v30 }
 0x101   :  { %v86_v32 = vsub.f32 1.5, %v85_v31 }
 0x102   :  { %v369_v35 = vpop.eup %368 }
 0x103   :  { %v87_v36 = vmul.f32 %v367_v27, %v86_v32  ;;  %v71_v37 = vmul.f32 %v369_v35, %v68_v28  ;;  %v183_v27 = vld [vmem:[%s550_s5 + $0x8] sm:$0xff] }
 0x104   :  { %354 = vmatpush.msra.mxu2 %v183_v27  ;;  %211 = vmatpush.msra.mxu1 %v183_v27 }
 0x105   :  { %v88_v39 = vmul.f32 %v87_v36, %v69_v25  ;;  %v72_v40 = vmul.f32 %v369_v35, %v71_v37 }
 0x107   :  { %v90_v43 = vsel %vm89_vm2, %v69_v25, %v88_v39  ;;  %v73_v44 = vmul.f32 0.5, %v72_v40 }
 0x108   :  { %v93_v45 = vsel %vm91_vm3, %v92_v42, %v90_v43  ;;  %v361_v42 = vld [vmem:[%s551_s6] ss:$0 sm:$0xff] }
 0x109   :  { %v95_v46 = vadd.f32 1e-06, %v93_v45  ;;  %v74_v47 = vsub.f32 1.5, %v73_v44 }
 0x10b   :  { %370 = vrcp.f32 %v95_v46  ;;  %v75_v48 = vmul.f32 %v369_v35, %v74_v47  ;;  %v121_v60 = vand.u32 2147483648, %v95_v46  ;;  %v119_v63 = vand.u32 2147483647, %v95_v46 }
 0x10c   :  { %vm115_vm7 = vweird.f32 %v95_v46 }
 0x10d   :  { %v76_v49 = vmul.f32 %v75_v48, %v68_v28  ;;  %v122_v4 = vor.u32 1.1754944e-38, %v121_v60  ;;  %vm120_vm9 = vcmp.eq.f32.partialorder %v119_v63, 8.507059e+37 }
 0x10f   :  { %v78_v51 = vsel %vm77_vm4, %v68_v28, %v76_v49  ;;  %v383_v28 = vmov 0.0  }
 0x110   :  { %v81_v53 = vsel %vm79_vm5, %v80_v50, %v78_v51  ;;  %37 = vst.msk [vmem:[#allocation3] sm:$0xff] %vm36_vm0, %v383_v28 }
 0x111   :  { %v371_v52 = vpop.eup %370  ;;  %v94_v57 = vadd.f32 1e-06, %v81_v53  ;;  %38 = vst.msk [vmem:[#allocation3 + $0x8] sm:$0xff] %vm36_vm0, %v383_v28 }
 0x112   :  { %v111_v56 = vmul.f32 %v371_v52, %v95_v46  ;;  %vm116_vm6 = vweird.f32 %v371_v52 }
 0x113   :  { %372 = vrcp.f32 %v94_v57  ;;  %vm117_vm8 = vmor %vm115_vm7, %vm116_vm6  ;;  %v107_v13 = vand.u32 2147483648, %v94_v57  ;;  %v105_v17 = vand.u32 2147483647, %v94_v57  ;;  %vm101_vm11 = vweird.f32 %v94_v57 }
 0x114   :  { %v112_v59 = vsub.f32 1.0, %v111_v56 }
 0x115   :  { %v108_v19 = vor.u32 1.1754944e-38, %v107_v13  ;;  %vm106_vm13 = vcmp.eq.f32.partialorder %v105_v17, 8.507059e+37 }
 0x116   :  { %v113_v62 = vmul.f32 %v371_v52, %v112_v59 }
 0x117   :  { %v180_v36 = vld [vmem:[#allocation3] sm:$0xff] }
 0x118   :  { %v114_v3 = vadd.f32 %v371_v52, %v113_v62  ;;  %v181_v39 = vld [vmem:[#allocation3 + $0x8] sm:$0xff] }
 0x119   :  { %v373_v5 = vpop.eup %372 }
 0x11a   :  { %v118_v6 = vsel %vm117_vm8, %v371_v52, %v114_v3  ;;  %v97_v8 = vmul.f32 %v373_v5, %v94_v57  ;;  %vm102_vm10 = vweird.f32 %v373_v5 }
 0x11b   :  { %v123_v9 = vsel %vm120_vm9, %v122_v4, %v118_v6  ;;  %vm103_vm12 = vmor %vm101_vm11, %vm102_vm10 }
 0x11c   :  { %v130_v11 = vmul.f32 %v455_v15, %v123_v9  ;;  %v98_v12 = vsub.f32 1.0, %v97_v8 }
 0x11e   :  { %v135_v14 = vadd.f32 %v359_v7, %v130_v11  ;;  %v99_v16 = vmul.f32 %v373_v5, %v98_v12 }
 0x120   :  { %137 = vst.msk [vmem:[#allocation2 + $0x8] sm:$0xff] %vm36_vm0, %v135_v14  ;;  %v100_v18 = vadd.f32 %v373_v5, %v99_v16 }
 0x122   :  { %v104_v20 = vsel %vm103_vm12, %v373_v5, %v100_v18 }
 0x123   :  { %v109_v22 = vsel %vm106_vm13, %v108_v19, %v104_v20 }
 0x124   :  { %v129_v23 = vmul.f32 %v460_v21, %v109_v22  ;;  %v182_v21 = vld [vmem:[%s550_s5] sm:$0xff] }
 0x125   :  { %355 = vmatpush.msra.mxu2 %v182_v21  ;;  %212 = vmatpush.msra.mxu1 %v182_v21  ;;  %v362_v21 = vld [vmem:[%s552_s7] ss:$0 sm:$0xff] }
 0x126   :  { %v134_v25 = vadd.f32 %v359_v7, %v129_v23 }
 0x127   :  { %v139_v24 = vld [vmem:[#allocation2 + $0x8] sm:$0xff] }
 0x128   :  { %341 = vmatmul.msk.f32.vlgmr.msra.gmra.mxu3 %vm36_vm0, %v139_v24  ;;  %136 = vst.msk [vmem:[#allocation2] sm:$0xff] %vm36_vm0, %v134_v25 }
 0x12f   :  { %v138_v15 = vld [vmem:[#allocation2] sm:$0xff] }
 0x130   :  { %340 = vmatmul.msk.f32.vlgmr.msra.gmra.mxu0 %vm36_vm0, %v138_v15 }
 0x1ab   :  { %v175_v30 = vpop.f32.mrf.mxu3 }
 0x1ac   :  { %v176_v31 = vadd.f32 %v360_v29, %v175_v30 }
 0x1ad   :  { %v172_v33 = vpop.f32.mrf.mxu0 }
 0x1ae   :  { %v179_v32 = vmax.f32 %v176_v31, 0.0  ;;  %v173_v34 = vadd.f32 %v360_v29, %v172_v33 }
 0x1b0   :  { %343 = vmatmul.msk.f32.vlgmr.msra.gmra.mxu2 %vm190_vm14, %v179_v32  ;;  %v178_v35 = vmax.f32 %v173_v34, 0.0  ;;  %v363_v34 = vld [vmem:[%s553_s8] ss:$0 sm:$0xff] }
 0x1b2   :  { %342 = vmatmul.msk.f32.vlgmr.msra.gmra.mxu1 %vm190_vm14, %v178_v35 }
 0x22f   :  { %v214_v37 = vpop.f32.mrf.mxu1 }
 0x230   :  { %v220_v38 = vadd.f32 %v214_v37, %v180_v36 }
 0x232   :  { %222 = vst.msk [vmem:[#allocation3] sm:$0xff] %vm36_vm0, %v220_v38 }
 0x233   :  { %v217_v40 = vpop.f32.mrf.mxu2 }
 0x234   :  { %v221_v41 = vadd.f32 %v217_v40, %v181_v39 }
 0x236   :  { %223 = vst.msk [vmem:[#allocation3 + $0x8] sm:$0xff] %vm36_vm0, %v221_v41 }
 0x239   :  { %v229_v43 = vld [vmem:[#allocation3] sm:$0xff] }
 0x23a   :  { %v231_v44 = vadd.f32 %v229_v43, %v444_v2 }
 0x23c   :  { %v237_v45 = vadd.f32 %v361_v42, %v231_v44 }
 0x23d   :  { %v230_v46 = vld [vmem:[#allocation3 + $0x8] sm:$0xff] }
 0x23e   :  { %v241_v47 = vsel %vm36_vm0, %v237_v45, 0.0  ;;  %v232_v48 = vadd.f32 %v230_v46, %v437_v0 }
 0x23f   :  { %242 = vadd.xlane.f32.xlu2 %v241_v47 }
 0x240   :  { %v238_v49 = vadd.f32 %v361_v42, %v232_v48 }
 0x242   :  { %v244_v50 = vsel %vm36_vm0, %v238_v49, 0.0 }
 0x247   :  { %245 = vadd.xlane.f32.xlu2 %v244_v50 }
 0x2b2   :  { %v243_v51 = vpop.xlane.xlu2 %242 }
 0x2b3   :  { %v254_v52 = vmul.f32 %v243_v51, %v448_v10 }
 0x2b5   :  { %v256_v53 = vsub.f32 %v237_v45, %v254_v52 }
 0x2b7   :  { %v258_v54 = vmul.f32 %v256_v53, %v256_v53  ;;  %v325_v33 = vmul.f32 %v362_v21, %v256_v53 }
 0x2b9   :  { %v260_v55 = vsel %vm36_vm0, %v258_v54, 0.0 }
 0x2ba   :  { %261 = vadd.xlane.f32.xlu0 %v260_v55  ;;  %v246_v2 = vpop.xlane.xlu2 %245 }
 0x2bb   :  { %v255_v56 = vmul.f32 %v246_v2, %v448_v10 }
 0x2bd   :  { %v525_v57 = vsub.f32 %v238_v49, %v255_v56 }
 0x2bf   :  { %v259_v0 = vmul.f32 %v525_v57, %v525_v57  ;;  %v326_v46 = vmul.f32 %v362_v21, %v525_v57 }
 0x2c1   :  { %v263_v58 = vsel %vm36_vm0, %v259_v0, 0.0 }
 0x2c2   :  { %264 = vadd.xlane.f32.xlu1 %v263_v58 }
 0x32d   :  { %v262_v59 = vpop.xlane.xlu0 %261 }
 0x32e   :  { %v266_v60 = vmul.f32 0.032258064, %v262_v59 }
 0x330   :  { %374 = vrsqrt.f32 %v266_v60  ;;  %vm275_vm15 = vcmp.eq.f32.partialorder %v266_v60, inf  ;;  %v278_v11 = vand.u32 2147483648, %v266_v60  ;;  %vm277_vm1 = vcmp.eq.f32.partialorder %v266_v60, 0.0 }
 0x335   :  { %v265_v61 = vpop.xlane.xlu1 %264 }
 0x336   :  { %v375_v62 = vpop.eup %374  ;;  %v267_v63 = vmul.f32 0.032258064, %v265_v61 }
 0x337   :  { %v269_v1 = vmul.f32 %v375_v62, %v266_v60 }
 0x338   :  { %376 = vrsqrt.f32 %v267_v63  ;;  %vm287_vm2 = vcmp.eq.f32.partialorder %v267_v63, inf  ;;  %v290_v20 = vand.u32 2147483648, %v267_v63  ;;  %vm289_vm3 = vcmp.eq.f32.partialorder %v267_v63, 0.0 }
 0x339   :  { %v270_v3 = vmul.f32 %v375_v62, %v269_v1 }
 0x33b   :  { %v271_v4 = vmul.f32 0.5, %v270_v3 }
 0x33d   :  { %v272_v5 = vsub.f32 1.5, %v271_v4 }
 0x33e   :  { %v377_v10 = vpop.eup %376 }
 0x33f   :  { %v273_v6 = vmul.f32 %v375_v62, %v272_v5  ;;  %v281_v7 = vmul.f32 %v377_v10, %v267_v63 }
 0x341   :  { %v274_v8 = vmul.f32 %v273_v6, %v266_v60  ;;  %v282_v9 = vmul.f32 %v377_v10, %v281_v7 }
 0x343   :  { %v276_v12 = vsel %vm275_vm15, %v266_v60, %v274_v8  ;;  %v283_v13 = vmul.f32 0.5, %v282_v9 }
 0x344   :  { %v279_v14 = vsel %vm277_vm1, %v278_v11, %v276_v12 }
 0x345   :  { %v292_v16 = vadd.f32 1e-06, %v279_v14  ;;  %v284_v17 = vsub.f32 1.5, %v283_v13 }
 0x347   :  { %378 = vrcp.f32 %v292_v16  ;;  %v285_v18 = vmul.f32 %v377_v10, %v284_v17  ;;  %v305_v27 = vand.u32 2147483648, %v292_v16  ;;  %v303_v29 = vand.u32 2147483647, %v292_v16 }
 0x348   :  { %vm299_vm5 = vweird.f32 %v292_v16 }
 0x349   :  { %v286_v19 = vmul.f32 %v285_v18, %v267_v63  ;;  %v306_v31 = vor.u32 1.1754944e-38, %v305_v27  ;;  %vm304_vm7 = vcmp.eq.f32.partialorder %v303_v29, 8.507059e+37 }
 0x34b   :  { %v288_v22 = vsel %vm287_vm2, %v267_v63, %v286_v19 }
 0x34c   :  { %v291_v24 = vsel %vm289_vm3, %v290_v20, %v288_v22 }
 0x34d   :  { %v379_v23 = vpop.eup %378  ;;  %v293_v15 = vadd.f32 1e-06, %v291_v24 }
 0x34e   :  { %v295_v25 = vmul.f32 %v379_v23, %v292_v16  ;;  %vm300_vm4 = vweird.f32 %v379_v23 }
 0x34f   :  { %380 = vrcp.f32 %v293_v15  ;;  %vm301_vm6 = vmor %vm299_vm5, %vm300_vm4  ;;  %v319_v41 = vand.u32 2147483648, %v293_v15  ;;  %v317_v43 = vand.u32 2147483647, %v293_v15  ;;  %vm313_vm9 = vweird.f32 %v293_v15 }
 0x350   :  { %v296_v26 = vsub.f32 1.0, %v295_v25 }
 0x351   :  { %v320_v45 = vor.u32 1.1754944e-38, %v319_v41  ;;  %vm318_vm11 = vcmp.eq.f32.partialorder %v317_v43, 8.507059e+37 }
 0x352   :  { %v297_v28 = vmul.f32 %v379_v23, %v296_v26 }
 0x354   :  { %v298_v30 = vadd.f32 %v379_v23, %v297_v28 }
 0x355   :  { %v381_v32 = vpop.eup %380 }
 0x356   :  { %v302_v35 = vsel %vm301_vm6, %v379_v23, %v298_v30  ;;  %v309_v37 = vmul.f32 %v381_v32, %v293_v15  ;;  %vm314_vm8 = vweird.f32 %v381_v32 }
 0x357   :  { %v307_v36 = vsel %vm304_vm7, %v306_v31, %v302_v35  ;;  %vm315_vm10 = vmor %vm313_vm9, %vm314_vm8 }
 0x358   :  { %v327_v38 = vmul.f32 %v325_v33, %v307_v36  ;;  %v310_v39 = vsub.f32 1.0, %v309_v37 }
 0x35a   :  { %v332_v40 = vadd.f32 %v363_v34, %v327_v38  ;;  %v311_v42 = vmul.f32 %v381_v32, %v310_v39 }
 0x35c   :  { %334 = vst.msk [vmem:[%s554_s9] sm:$0xff] %vm36_vm0, %v332_v40  ;;  %v312_v44 = vadd.f32 %v381_v32, %v311_v42 }
 0x35e   :  { %v316_v47 = vsel %vm315_vm10, %v381_v32, %v312_v44 }
 0x35f   :  { %v321_v48 = vsel %vm318_vm11, %v320_v45, %v316_v47 }
 0x360   :  { %v328_v49 = vmul.f32 %v326_v46, %v321_v48 }
 0x362   :  { %v333_v50 = vadd.f32 %v363_v34, %v328_v49 }
 0x364   :  { %335 = vst.msk [vmem:[%s554_s9 + $0x8] sm:$0xff] %vm36_vm0, %v333_v50 }

// kernel: encoder_decoder_forward.11
= control target key start
LH: loop header
LB: loop body
LE: loop exit
PB: predicated region body
PF: predicated region fallthrough
CT: control target
= control target key end

     0   :  { %vm30_vm0 = vcmask 261120   ;;  %v271_v4 = vmov 32.0   ;;  %vm184_vm14 = vcmask 523264   ;;  %s403_s0 = inlined_call_operand.vmem [shape: f32[16,32], index: 0, kind: input, shape index: {}]   ;;  %s404_s1 = inlined_call_operand.vmem [shape: f32[1,32], index: 1, kind: input, shape index: {}]   ;;  %s405_s2 = inlined_call_operand.vmem [shape: f32[1,32], index: 2, kind: input, shape index: {}]   ;;  %s406_s4 = inlined_call_operand.vmem [shape: f32[1,64], index: 4, kind: input, shape index: {}]   ;;  %s407_s3 = inlined_call_operand.vmem [shape: f32[32,64], index: 3, kind: input, shape index: {}]   ;;  %s408_s5 = inlined_call_operand.vmem [shape: f32[64,32], index: 5, kind: input, shape index: {}]   ;;  %s409_s6 = inlined_call_operand.vmem [shape: f32[1,32], index: 6, kind: input, shape index: {}]   ;;  %s410_s7 = inlined_call_operand.vmem [shape: f32[16,32], index: 7, kind: output, shape index: {}]  }
   0x1   :  { %v316_v0 = vld [vmem:[%s403_s0 + $0x8] sm:$0xff]  ;;  %v323_v2 = vld [vmem:[%s403_s0] sm:$0xff]  ;;  %261 = vrcp.f32 %v271_v4  ;;  %v137_v33 = vld [vmem:[%s407_s3 + $0x18] sm:$0xff] }
   0x2   :  { %v40_v1 = vsel %vm30_vm0, %v316_v0, 0.0  ;;  %v37_v3 = vsel %vm30_vm0, %v323_v2, 0.0  ;;  %v257_v12 = vld [vmem:[%s404_s1] ss:$0 sm:$0xff]  ;;  %v136_v34 = vld [vmem:[%s407_s3 + $0x10] sm:$0xff]  ;;  %243 = vmatpush.msra.mxu3 %v137_v33  ;;  %161 = vmatpush.msra.mxu0 %v137_v33  ;;  %v135_v38 = vld [vmem:[%s407_s3 + $0x8] sm:$0xff] }
   0x3   :  { %41 = vadd.xlane.f32.xlu0 %v40_v1  ;;  %v134_v41 = vld [vmem:[%s407_s3] sm:$0xff]  ;;  %v183_v54 = vld [vmem:[%s408_s5 + $0x38] sm:$0xff]  ;;  %v182_v55 = vld [vmem:[%s408_s5 + $0x30] sm:$0xff] }
   0x4   :  { %244 = vmatpush.msra.mxu3 %v136_v34  ;;  %162 = vmatpush.msra.mxu0 %v136_v34  ;;  %v181_v58 = vld [vmem:[%s408_s5 + $0x28] sm:$0xff]  ;;  %v180_v61 = vld [vmem:[%s408_s5 + $0x20] sm:$0xff]  ;;  %v179_v1 = vld [vmem:[%s408_s5 + $0x18] sm:$0xff] }
   0x5   :  { %247 = vmatpush.msra.mxu2 %v183_v54  ;;  %199 = vmatpush.msra.mxu1 %v183_v54 }
   0x6   :  { %245 = vmatpush.msra.mxu3 %v135_v38  ;;  %163 = vmatpush.msra.mxu0 %v135_v38 }
   0x7   :  { %v262_v5 = vpop.eup %261  ;;  %248 = vmatpush.msra.mxu2 %v182_v55  ;;  %200 = vmatpush.msra.mxu1 %v182_v55 }
   0x8   :  { %v44_v6 = vmul.f32 32.0, %v262_v5  ;;  %vm48_vm1 = vweird.f32 %v262_v5  ;;  %246 = vmatpush.msra.mxu3 %v134_v41  ;;  %164 = vmatpush.msra.mxu0 %v134_v41  ;;  %v260_v41 = vld [vmem:[%s409_s6] ss:$0 sm:$0xff] }
   0x9   :  { %249 = vmatpush.msra.mxu2 %v181_v58  ;;  %201 = vmatpush.msra.mxu1 %v181_v58 }
   0xa   :  { %v45_v7 = vsub.f32 1.0, %v44_v6 }
   0xb   :  { %38 = vadd.xlane.f32.xlu0 %v37_v3  ;;  %250 = vmatpush.msra.mxu2 %v180_v61 }
   0xc   :  { %v46_v8 = vmul.f32 %v262_v5, %v45_v7  ;;  %202 = vmatpush.msra.mxu1 %v180_v61  ;;  %v258_v7 = vld [vmem:[%s405_s2] ss:$0 sm:$0xff] }
   0xd   :  { %251 = vmatpush.msra.mxu2 %v179_v1 }
   0xe   :  { %v47_v9 = vadd.f32 %v262_v5, %v46_v8  ;;  %203 = vmatpush.msra.mxu1 %v179_v1 }
  0x10   :  { %v49_v10 = vsel %vm48_vm1, %v262_v5, %v47_v9 }
  0x76   :  { %v42_v11 = vpop.xlane.xlu0 %41 }
  0x77   :  { %v51_v13 = vmul.f32 %v49_v10, %v42_v11 }
  0x79   :  { %v53_v14 = vsub.f32 %v316_v0, %v51_v13 }
  0x7b   :  { %v331_v15 = vmul.f32 %v257_v12, %v53_v14  ;;  %v55_v16 = vmul.f32 %v53_v14, %v53_v14 }
  0x7d   :  { %v59_v17 = vsel %vm30_vm0, %v55_v16, 0.0 }
  0x7e   :  { %60 = vadd.xlane.f32.xlu1 %v59_v17  ;;  %v39_v18 = vpop.xlane.xlu0 %38 }
  0x7f   :  { %v50_v19 = vmul.f32 %v49_v10, %v39_v18 }
  0x81   :  { %v52_v20 = vsub.f32 %v323_v2, %v50_v19 }
  0x83   :  { %v335_v21 = vmul.f32 %v257_v12, %v52_v20  ;;  %v54_v22 = vmul.f32 %v52_v20, %v52_v20 }
  0x85   :  { %v56_v23 = vsel %vm30_vm0, %v54_v22, 0.0 }
  0x86   :  { %57 = vadd.xlane.f32.xlu1 %v56_v23 }
  0xf1   :  { %v61_v24 = vpop.xlane.xlu1 %60 }
  0xf2   :  { %v63_v25 = vmul.f32 0.032258064, %v61_v24 }
  0xf4   :  { %263 = vrsqrt.f32 %v63_v25  ;;  %vm83_vm2 = vcmp.eq.f32.partialorder %v63_v25, inf  ;;  %v86_v42 = vand.u32 2147483648, %v63_v25  ;;  %vm85_vm3 = vcmp.eq.f32.partialorder %v63_v25, 0.0 }
  0xf9   :  { %v58_v26 = vpop.xlane.xlu1 %57 }
  0xfa   :  { %v264_v27 = vpop.eup %263  ;;  %v62_v28 = vmul.f32 0.032258064, %v58_v26  ;;  %v177_v26 = vld [vmem:[%s408_s5 + $0x8] sm:$0xff] }
  0xfb   :  { %v77_v29 = vmul.f32 %v264_v27, %v63_v25 }
  0xfc   :  { %265 = vrsqrt.f32 %v62_v28  ;;  %vm71_vm4 = vcmp.eq.f32.partialorder %v62_v28, inf  ;;  %v74_v50 = vand.u32 2147483648, %v62_v28  ;;  %vm73_vm5 = vcmp.eq.f32.partialorder %v62_v28, 0.0 }
  0xfd   :  { %v78_v30 = vmul.f32 %v264_v27, %v77_v29 }
  0xff   :  { %v79_v31 = vmul.f32 0.5, %v78_v30 }
 0x101   :  { %v80_v32 = vsub.f32 1.5, %v79_v31 }
 0x102   :  { %v266_v35 = vpop.eup %265 }
 0x103   :  { %v81_v36 = vmul.f32 %v264_v27, %v80_v32  ;;  %v65_v37 = vmul.f32 %v266_v35, %v62_v28  ;;  %v272_v27 = vmov 0.0  }
 0x104   :  { %31 = vst.msk [vmem:[#allocation3] sm:$0xff] %vm30_vm0, %v272_v27 }
 0x105   :  { %v82_v39 = vmul.f32 %v81_v36, %v63_v25  ;;  %v66_v40 = vmul.f32 %v266_v35, %v65_v37  ;;  %32 = vst.msk [vmem:[#allocation3 + $0x8] sm:$0xff] %vm30_vm0, %v272_v27 }
 0x107   :  { %v84_v43 = vsel %vm83_vm2, %v63_v25, %v82_v39  ;;  %v67_v44 = vmul.f32 0.5, %v66_v40  ;;  %v178_v25 = vld [vmem:[%s408_s5 + $0x10] sm:$0xff] }
 0x108   :  { %v87_v45 = vsel %vm85_vm3, %v86_v42, %v84_v43  ;;  %252 = vmatpush.msra.mxu2 %v178_v25  ;;  %204 = vmatpush.msra.mxu1 %v178_v25 }
 0x109   :  { %v89_v46 = vadd.f32 1e-06, %v87_v45  ;;  %v68_v47 = vsub.f32 1.5, %v67_v44 }
 0x10a   :  { %253 = vmatpush.msra.mxu2 %v177_v26  ;;  %205 = vmatpush.msra.mxu1 %v177_v26 }
 0x10b   :  { %267 = vrcp.f32 %v89_v46  ;;  %v69_v48 = vmul.f32 %v266_v35, %v68_v47  ;;  %v115_v60 = vand.u32 2147483648, %v89_v46  ;;  %v113_v63 = vand.u32 2147483647, %v89_v46  ;;  %v174_v35 = vld [vmem:[#allocation3] sm:$0xff] }
 0x10c   :  { %vm109_vm7 = vweird.f32 %v89_v46  ;;  %v175_v38 = vld [vmem:[#allocation3 + $0x8] sm:$0xff] }
 0x10d   :  { %v70_v49 = vmul.f32 %v69_v48, %v62_v28  ;;  %v116_v4 = vor.u32 1.1754944e-38, %v115_v60  ;;  %vm114_vm9 = vcmp.eq.f32.partialorder %v113_v63, 8.507059e+37 }
 0x10f   :  { %v72_v51 = vsel %vm71_vm4, %v62_v28, %v70_v49  ;;  %v259_v28 = vld [vmem:[%s406_s4] ss:$0 sm:$0xff] }
 0x110   :  { %v75_v53 = vsel %vm73_vm5, %v74_v50, %v72_v51 }
 0x111   :  { %v268_v52 = vpop.eup %267  ;;  %v88_v57 = vadd.f32 1e-06, %v75_v53 }
 0x112   :  { %v105_v56 = vmul.f32 %v268_v52, %v89_v46  ;;  %vm110_vm6 = vweird.f32 %v268_v52 }
 0x113   :  { %269 = vrcp.f32 %v88_v57  ;;  %vm111_vm8 = vmor %vm109_vm7, %vm110_vm6  ;;  %v101_v12 = vand.u32 2147483648, %v88_v57  ;;  %v99_v16 = vand.u32 2147483647, %v88_v57  ;;  %vm95_vm11 = vweird.f32 %v88_v57 }
 0x114   :  { %v106_v59 = vsub.f32 1.0, %v105_v56 }
 0x115   :  { %v102_v18 = vor.u32 1.1754944e-38, %v101_v12  ;;  %vm100_vm13 = vcmp.eq.f32.partialorder %v99_v16, 8.507059e+37 }
 0x116   :  { %v107_v62 = vmul.f32 %v268_v52, %v106_v59 }
 0x118   :  { %v108_v3 = vadd.f32 %v268_v52, %v107_v62 }
 0x119   :  { %v270_v5 = vpop.eup %269 }
 0x11a   :  { %v112_v6 = vsel %vm111_vm8, %v268_v52, %v108_v3  ;;  %v91_v8 = vmul.f32 %v270_v5, %v88_v57  ;;  %vm96_vm10 = vweird.f32 %v270_v5 }
 0x11b   :  { %v117_v9 = vsel %vm114_vm9, %v116_v4, %v112_v6  ;;  %vm97_vm12 = vmor %vm95_vm11, %vm96_vm10 }
 0x11c   :  { %v124_v10 = vmul.f32 %v331_v15, %v117_v9  ;;  %v92_v11 = vsub.f32 1.0, %v91_v8 }
 0x11e   :  { %v129_v13 = vadd.f32 %v258_v7, %v124_v10  ;;  %v93_v14 = vmul.f32 %v270_v5, %v92_v11 }
 0x120   :  { %131 = vst.msk [vmem:[#allocation2 + $0x8] sm:$0xff] %vm30_vm0, %v129_v13  ;;  %v94_v17 = vadd.f32 %v270_v5, %v93_v14 }
 0x122   :  { %v98_v19 = vsel %vm97_vm12, %v270_v5, %v94_v17 }
 0x123   :  { %v103_v20 = vsel %vm100_vm13, %v102_v18, %v98_v19 }
 0x124   :  { %v123_v22 = vmul.f32 %v335_v21, %v103_v20  ;;  %v176_v21 = vld [vmem:[%s408_s5] sm:$0xff] }
 0x125   :  { %254 = vmatpush.msra.mxu2 %v176_v21  ;;  %206 = vmatpush.msra.mxu1 %v176_v21 }
 0x126   :  { %v128_v24 = vadd.f32 %v258_v7, %v123_v22 }
 0x127   :  { %v133_v23 = vld [vmem:[#allocation2 + $0x8] sm:$0xff] }
 0x128   :  { %240 = vmatmul.msk.f32.vlgmr.msra.gmra.mxu3 %vm30_vm0, %v133_v23  ;;  %130 = vst.msk [vmem:[#allocation2] sm:$0xff] %vm30_vm0, %v128_v24 }
 0x12f   :  { %v132_v15 = vld [vmem:[#allocation2] sm:$0xff] }
 0x130   :  { %239 = vmatmul.msk.f32.vlgmr.msra.gmra.mxu0 %vm30_vm0, %v132_v15 }
 0x1ab   :  { %v169_v29 = vpop.f32.mrf.mxu3 }
 0x1ac   :  { %v170_v30 = vadd.f32 %v259_v28, %v169_v29 }
 0x1ad   :  { %v166_v32 = vpop.f32.mrf.mxu0 }
 0x1ae   :  { %v173_v31 = vmax.f32 %v170_v30, 0.0  ;;  %v167_v33 = vadd.f32 %v259_v28, %v166_v32 }
 0x1b0   :  { %242 = vmatmul.msk.f32.vlgmr.msra.gmra.mxu2 %vm184_vm14, %v173_v31  ;;  %v172_v34 = vmax.f32 %v167_v33, 0.0 }
 0x1b2   :  { %241 = vmatmul.msk.f32.vlgmr.msra.gmra.mxu1 %vm184_vm14, %v172_v34 }
 0x22f   :  { %v208_v36 = vpop.f32.mrf.mxu1 }
 0x230   :  { %v214_v37 = vadd.f32 %v208_v36, %v174_v35 }
 0x232   :  { %216 = vst.msk [vmem:[#allocation3] sm:$0xff] %vm30_vm0, %v214_v37 }
 0x233   :  { %v211_v39 = vpop.f32.mrf.mxu2 }
 0x234   :  { %v215_v40 = vadd.f32 %v211_v39, %v175_v38 }
 0x236   :  { %217 = vst.msk [vmem:[#allocation3 + $0x8] sm:$0xff] %vm30_vm0, %v215_v40 }
 0x239   :  { %v223_v42 = vld [vmem:[#allocation3] sm:$0xff] }
 0x23a   :  { %v225_v43 = vadd.f32 %v223_v42, %v323_v2 }
 0x23c   :  { %v231_v44 = vadd.f32 %v260_v41, %v225_v43 }
 0x23d   :  { %v224_v45 = vld [vmem:[#allocation3 + $0x8] sm:$0xff] }
 0x23e   :  { %v226_v46 = vadd.f32 %v224_v45, %v316_v0  ;;  %233 = vst.msk [vmem:[%s410_s7] sm:$0xff] %vm30_vm0, %v231_v44 }
 0x240   :  { %v232_v47 = vadd.f32 %v260_v41, %v226_v46 }
 0x242   :  { %234 = vst.msk [vmem:[%s410_s7 + $0x8] sm:$0xff] %vm30_vm0, %v232_v47 }

// kernel: encoder_decoder_forward.14
= control target key start
LH: loop header
LB: loop body
LE: loop exit
PB: predicated region body
PF: predicated region fallthrough
CT: control target
= control target key end

     0   :  { %15 = vsyncpa [#allocation3], 0  ;;  %s1729_s0 = inlined_call_operand.vmem [shape: f32[2,8,32], index: 0, kind: input, shape index: {}]   ;;  %s1730_s1 = inlined_call_operand.vmem [shape: bf16[2,8,8], index: 1, kind: input, shape index: {}]   ;;  %s1731_s2 = inlined_call_operand.hbm [shape: f32[1,32], index: 2, kind: input, shape index: {}]   ;;  %s1732_s3 = inlined_call_operand.hbm [shape: f32[1,32], index: 3, kind: input, shape index: {}]   ;;  %s1733_s4 = inlined_call_operand.vmem [shape: f32[32,32], index: 4, kind: input, shape index: {}]   ;;  %s1734_s5 = inlined_call_operand.hbm [shape: f32[1,32], index: 5, kind: input, shape index: {}]   ;;  %s1735_s6 = inlined_call_operand.vmem [shape: f32[32,64], index: 6, kind: input, shape index: {}]   ;;  %s1736_s7 = inlined_call_operand.hbm [shape: f32[1,64], index: 7, kind: input, shape index: {}]   ;;  %s1737_s8 = inlined_call_operand.vmem [shape: f32[32,32], index: 8, kind: input, shape index: {}]   ;;  %s1738_s9 = inlined_call_operand.hbm [shape: f32[1,32], index: 9, kind: input, shape index: {}]   ;;  %s1739_s10 = inlined_call_operand.vmem [shape: f32[2,8,32], index: 10, kind: output, shape index: {}]  }
   0x1   :  { %16 = vsyncpa [#allocation5], 0 }
   0x2   :  { %17 = vsyncpa [#allocation8], 0  ;;  %s1511_s13 = smov 0   ;;  %s1513_s14 = smov 0  }
   0x3   :  { %s1515_s15 = smov 0  }
   0x4 LB: > { %s316_s18 = sshll.u32 %s1732_s3, 4  ;;  %s1107_s19 = sadd.s32 4294967295, %s1441_s15   ;;  %s1441_s15 = sphi %s1515_s15, %s23_s15   ;;  %s1437_s14 = sphi %s1513_s14, %s1746_s14   ;;  %s1433_s13 = sphi %s1511_s13, %s1745_s13   ;;  %s317_s18 = int_to_ptr.hbm [resolvable:$true] %s316_s18 }
   0x5   : > { %p1109_p0 = scmp.ge.s32.totalorder %s1441_s15, 1  ;;  %p292_p1 = scmp.lt.s32.totalorder %s1441_s15, 3 }
   0x6   : > { %p1532_p2 = scmp.eq.s32.totalorder %s1107_s19, 0  ;;  %s1443_s22 = smov [#allocation4]  }
   0x7   : > { %p1536_p3 = pnand %p1109_p0, %p292_p1  ;;  %s318_s23 = sshll.u32 %s1443_s22, 4  ;;  %s319_s23 = int_to_ptr.vmem [resolvable:$true] %s318_s23 }
   0x8   : > { %s346_s26 = sshll.u32 %s1736_s7, 4  ;;  %s1444_s28 = smov [#allocation7]   ;;  %s347_s26 = int_to_ptr.hbm [resolvable:$true] %s346_s26 }
   0x9   : > { %p1162_p4 = pneg %p1536_p3  ;;  %s348_s29 = sshll.u32 %s1444_s28, 4  ;;  %s349_s29 = int_to_ptr.vmem [resolvable:$true] %s348_s29 }
   0xa   : > { %s35_s30 = sadd.s32 1, %s1437_s14  ;;  %s304_s16 = sshll.u32 %s1731_s2, 4  ;;  %s305_s16 = int_to_ptr.hbm [resolvable:$true] %s304_s16 }
   0xb   : > { %p1547_p5 = pnand %p1532_p2, %p1162_p4  ;;  %p37_p6 = scmp.ge.s32.totalorder %s35_s30, 2 }
   0xc   : > { %s1445_s17 = smov [#allocation2]   ;;  %s331_s25 = sshll.u32 %s1734_s5, 4  ;;  %s332_s25 = int_to_ptr.hbm [resolvable:$true] %s331_s25 }
   0xd   : > { %1168 = dma.hbm_to_vmem [thread:$0]  (!%p1547_p5), %s317_s18, 16, %s319_s23, [#allocation5]  }
   0xe   : > { %1174 = dma.hbm_to_vmem [thread:$0]  (!%p1547_p5), %s347_s26, 16, %s349_s29, [#allocation8]  }
   0xf   : > { %s1748_s30 = smov (%p37_p6, %s35_s30), 0  ;;  %s306_s19 = sshll.u32 %s1445_s17, 4  ;;  %s307_s19 = int_to_ptr.vmem [resolvable:$true] %s306_s19 }
  0x10   : > { %1165 = dma.hbm_to_vmem [thread:$0]  (!%p1547_p5), %s305_s16, 16, %s307_s19, [#allocation3]  }
  0x11   : > { %s361_s26 = sshll.u32 %s1738_s9, 4  ;;  %s1446_s28 = smov [#allocation6]   ;;  %s362_s26 = int_to_ptr.hbm [resolvable:$true] %s361_s26 }
  0x12   : > { %s333_s29 = sshll.u32 %s1446_s28, 4  ;;  %s1447_s11 = smov [#allocation9]   ;;  %s334_s29 = int_to_ptr.vmem [resolvable:$true] %s333_s29 }
  0x13   : > { %1171 = dma.hbm_to_vmem [thread:$0]  (!%p1547_p5), %s332_s25, 16, %s334_s29, [#allocation5]  }
  0x14   : > { %s363_s12 = sshll.u32 %s1447_s11, 4  ;;  %396 = sbr.rel (%p1536_p3) target bundleno = 1367 (0x557), region = 60  ;;  %s364_s12 = int_to_ptr.vmem [resolvable:$true] %s363_s12 }
  0x15   : > { %1177 = dma.hbm_to_vmem [thread:$0]  (!%p1547_p5), %s362_s26, 16, %s364_s12, [#allocation8]  }
  0x19   : > { %1420 = dma.done.wait (%p1532_p2), [#allocation3], 16  }
  0x1a   : > { %1422 = vsyncadd (%p1532_p2), [#allocation3], 4294967280 }
  0x1b   : > { %1424 = dma.done.wait (%p1532_p2), [#allocation5], 32  }
  0x1c   : > { %1426 = vsyncadd (%p1532_p2), [#allocation5], 4294967264 }
  0x1d   : > { %1428 = dma.done.wait (%p1532_p2), [#allocation8], 32  }
  0x1e   : > { %1430 = vsyncadd (%p1532_p2), [#allocation8], 4294967264  ;;  %p466_p7 = scmp.lt.s32.totalorder %s1433_s13, 1  ;;  %vm490_vm0 = vcmask 261120   ;;  %v1448_v2 = vmov 32.0   ;;  %v547_v14 = vld [vmem:[%s1733_s4 + $0x18] sm:$0xff] }
  0x1f   : > { %1235 = vrcp.f32 %v1448_v2  ;;  %v578_v15 = vld [vmem:[%s1735_s6 + $0x18] sm:$0xff]  ;;  %v546_v16 = vld [vmem:[%s1733_s4 + $0x10] sm:$0xff]  ;;  %567 = vmatpush.msra.mxu0 %v547_v14  ;;  %v545_v18 = vld [vmem:[%s1733_s4 + $0x8] sm:$0xff]  ;;  %vm620_vm8 = vcmask 64512   ;;  %s1449_s19 = smov 112   ;;  %s1450_s22 = smov 120  }
  0x20   : > { %s1750_s13 = smov (!%p466_p7, %s1433_s13), 1  ;;  %595 = vmatpush.msra.mxu1 %v578_v15  ;;  %v577_v17 = vld [vmem:[%s1735_s6 + $0x10] sm:$0xff]  ;;  %v576_v19 = vld [vmem:[%s1735_s6 + $0x8] sm:$0xff]  ;;  %v544_v20 = vld [vmem:[%s1733_s4] sm:$0xff]  ;;  %s1451_s24 = smov 104  }
  0x21   : > { %s1122_s21 = sshll.u32 %s1750_s13, 3  ;;  %568 = vmatpush.msra.mxu0 %v546_v16  ;;  %v575_v21 = vld [vmem:[%s1735_s6] sm:$0xff]  ;;  %s1123_s25 = sshll.u32 %s1750_s13, 2 }
  0x22   : > { %s472_s17 = scalar_lea.vmem %s1729_s0, %s1122_s21  ;;  %596 = vmatpush.msra.mxu1 %v577_v17  ;;  %v1230_v39 = vld [vmem:[#allocation2] ss:$0 sm:$0xff]  ;;  %v1231_v46 = vld [vmem:[#allocation4] ss:$0 sm:$0xff]  ;;  %v1232_v50 = vld [vmem:[#allocation6] ss:$0 sm:$0xff]  ;;  %s479_s26 = scalar_lea.vmem %s1730_s1, %s1123_s25 }
  0x23   : > { %v1597_v0 = vld [vmem:[%s472_s17] sm:$0xff]  ;;  %569 = vmatpush.msra.mxu0 %v545_v18  ;;  %s1452_s28 = smov 96   ;;  %s1453_s29 = smov 8  }
  0x24   : > { %v491_v1 = vsel %vm490_vm0, %v1597_v0, 0.0  ;;  %597 = vmatpush.msra.mxu1 %v576_v19  ;;  %v1233_v51 = vld [vmem:[#allocation7] ss:$0 sm:$0xff]  ;;  %s1454_s11 = smov 16   ;;  %s1455_s12 = smov 24  }
  0x25   : > { %492 = vadd.xlane.f32.xlu0 %v491_v1  ;;  %v1236_v3 = vpop.eup %1235  ;;  %570 = vmatpush.msra.mxu0 %v544_v20  ;;  %v618_v1 = vld [vmem:[%s479_s26] sm:$0xf]  ;;  %s486_s26 = scalar_lea.vmem %s1739_s10, %s1122_s21 }
  0x26   : > { %v495_v4 = vmul.f32 32.0, %v1236_v3  ;;  %vm499_vm1 = vweird.f32 %v1236_v3  ;;  %598 = vmatpush.msra.mxu1 %v575_v21  ;;  %v619_v2 = vunpack.c.l.bf16 %v618_v1 }
  0x28   : > { %v496_v5 = vsub.f32 1.0, %v495_v4 }
  0x2a   : > { %v497_v6 = vmul.f32 %v1236_v3, %v496_v5 }
  0x2c   : > { %v498_v7 = vadd.f32 %v1236_v3, %v497_v6 }
  0x2e   : > { %v500_v8 = vsel %vm499_vm1, %v1236_v3, %v498_v7 }
  0x98   : > { %v493_v9 = vpop.xlane.xlu0 %492 }
  0x99   : > { %v501_v10 = vmul.f32 %v500_v8, %v493_v9 }
  0x9b   : > { %v502_v11 = vsub.f32 %v1597_v0, %v501_v10 }
  0x9d   : > { %v503_v12 = vmul.f32 %v502_v11, %v502_v11  ;;  %v538_v44 = vmul.f32 %v1230_v39, %v502_v11 }
  0x9f   : > { %v504_v13 = vsel %vm490_vm0, %v503_v12, 0.0 }
  0xa0   : > { %505 = vadd.xlane.f32.xlu0 %v504_v13 }
 0x113   : > { %v506_v22 = vpop.xlane.xlu0 %505 }
 0x114   : > { %v507_v23 = vmul.f32 0.032258064, %v506_v22 }
 0x116   : > { %1237 = vrsqrt.f32 %v507_v23  ;;  %vm515_vm2 = vcmp.eq.f32.partialorder %v507_v23, inf  ;;  %v518_v31 = vand.u32 2147483648, %v507_v23  ;;  %vm517_vm3 = vcmp.eq.f32.partialorder %v507_v23, 0.0 }
 0x11c   : > { %v1238_v24 = vpop.eup %1237 }
 0x11d   : > { %v509_v25 = vmul.f32 %v1238_v24, %v507_v23 }
 0x11f   : > { %v510_v26 = vmul.f32 %v1238_v24, %v509_v25 }
 0x121   : > { %v511_v27 = vmul.f32 0.5, %v510_v26 }
 0x123   : > { %v512_v28 = vsub.f32 1.5, %v511_v27 }
 0x125   : > { %v513_v29 = vmul.f32 %v1238_v24, %v512_v28 }
 0x127   : > { %v514_v30 = vmul.f32 %v513_v29, %v507_v23 }
 0x129   : > { %v516_v32 = vsel %vm515_vm2, %v507_v23, %v514_v30 }
 0x12a   : > { %v519_v33 = vsel %vm517_vm3, %v518_v31, %v516_v32 }
 0x12b   : > { %v520_v34 = vadd.f32 1e-06, %v519_v33 }
 0x12d   : > { %1239 = vrcp.f32 %v520_v34  ;;  %v532_v38 = vand.u32 2147483648, %v520_v34  ;;  %v530_v41 = vand.u32 2147483647, %v520_v34  ;;  %vm526_vm5 = vweird.f32 %v520_v34 }
 0x12f   : > { %v533_v43 = vor.u32 1.1754944e-38, %v532_v38  ;;  %vm531_vm7 = vcmp.eq.f32.partialorder %v530_v41, 8.507059e+37 }
 0x133   : > { %v1240_v35 = vpop.eup %1239 }
 0x134   : > { %v522_v36 = vmul.f32 %v1240_v35, %v520_v34  ;;  %vm527_vm4 = vweird.f32 %v1240_v35 }
 0x135   : > { %vm528_vm6 = vmor %vm526_vm5, %vm527_vm4 }
 0x136   : > { %v523_v37 = vsub.f32 1.0, %v522_v36 }
 0x138   : > { %v524_v40 = vmul.f32 %v1240_v35, %v523_v37 }
 0x13a   : > { %v525_v42 = vadd.f32 %v1240_v35, %v524_v40 }
 0x13c   : > { %v529_v45 = vsel %vm528_vm6, %v1240_v35, %v525_v42 }
 0x13d   : > { %v534_v47 = vsel %vm531_vm7, %v533_v43, %v529_v45 }
 0x13e   : > { %v539_v48 = vmul.f32 %v538_v44, %v534_v47 }
 0x140   : > { %v543_v49 = vadd.f32 %v1231_v46, %v539_v48 }
 0x142   : > { %1125 = vmatmul.msk.f32.vlgmr.msra.gmra.mxu0 %vm490_vm0, %v543_v49  ;;  %1126 = vmatmul.msk.f32.vlgmr.msra.gmra.mxu1 %vm490_vm0, %v543_v49 }
 0x1bf   : > { %v572_v52 = vpop.f32.mrf.mxu0  ;;  %v600_v53 = vpop.f32.mrf.mxu1 }
 0x1c0   : > { %v573_v54 = vadd.f32 %v1232_v50, %v572_v52  ;;  %v1629_v55 = vadd.f32 %v1233_v51, %v600_v53 }
 0x1c2   : > { %v603_v56 = vmul.f32 0.35355338, %v573_v54  ;;  %614 = vrot.lane.b32.xlu2 %v1629_v55, %s1449_s19  ;;  %612 = vrot.lane.b32.xlu1 %v1629_v55, %s1450_s22 }
 0x1c3   : > { %1127 = vmatpush.xpose.msk.msra.mxu2 %vm620_vm8, %v1629_v55 }
 0x1c4   : > { %607 = vrot.lane.b32.xlu0 %v603_v56, %s1449_s19 }
 0x1c6   : > { %1128 = vmatmul.msk.f32.vlgmr.msra.gmra.mxu2 %vm620_vm8, %v603_v56 }
 0x1ca   : > { %616 = vrot.lane.b32.xlu2 %v1629_v55, %s1451_s24  ;;  %605 = vrot.lane.b32.xlu1 %v603_v56, %s1450_s22 }
 0x1d2   : > { %609 = vrot.lane.b32.xlu1 %v603_v56, %s1451_s24 }
 0x21c   : > { %v1637_v57 = vpop.permute.xlu2 %614 }
 0x21d   : > { %1131 = vmatpush.xpose.msk.msrb.mxu2 %vm620_vm8, %v1637_v57 }
 0x224   : > { %v617_v59 = vpop.permute.xlu2 %616 }
 0x225   : > { %v1225_v35 = vpack.i.bf16 %v617_v59, %v1637_v57 }
 0x234   : > { %v613_v58 = vpop.permute.xlu1 %612 }
 0x235   : > { %1129 = vmatpush.xpose.msk.msra.mxu3 %vm620_vm8, %v613_v58 }
 0x236   : > { %v608_v60 = vpop.permute.xlu0 %607 }
 0x237   : > { %1132 = vmatmul.msk.f32.vlgmr.msrb.gmra.mxu2 %vm620_vm8, %v608_v60 }
 0x239   : > { %1133 = vmatpush.xpose.msk.msrb.mxu3 %vm620_vm8, %v617_v59 }
 0x23c   : > { %v606_v61 = vpop.permute.xlu1 %605 }
 0x23d   : > { %1130 = vmatmul.msk.f32.vlgmr.msra.gmra.mxu3 %vm620_vm8, %v606_v61 }
 0x244   : > { %v610_v62 = vpop.permute.xlu1 %609 }
 0x245   : > { %1134 = vmatmul.msk.f32.vlgmr.msrb.gmra.mxu3 %vm620_vm8, %v610_v62 }
 0x249   : > { %v642_v63 = vpop.f32.mrf.mxu2 }
 0x24a   : > { %v643_v7 = vadd.f32 %v642_v63, %v619_v2 }
 0x24c   : > { %v717_v10 = vsel %vm620_vm8, %v643_v7, -inf }
 0x2ba   : > { %v690_v3 = vpop.f32.mrf.mxu2 }
 0x2bb   : > { %v691_v4 = vadd.f32 %v690_v3, %v619_v2 }
 0x2bd   : > { %v723_v5 = vsel %vm620_vm8, %v691_v4, -inf }
 0x2be   : > { %724 = vmax.xlane.f32.xlu2 %v723_v5 }
 0x2c0   : > { %v666_v6 = vpop.f32.mrf.mxu3 }
 0x2c1   : > { %v667_v8 = vadd.f32 %v666_v6, %v619_v2 }
 0x2c3   : > { %v720_v9 = vsel %vm620_vm8, %v667_v8, -inf }
 0x2c4   : > { %721 = vmax.xlane.f32.xlu0 %v720_v9 }
 0x2c6   : > { %718 = vmax.xlane.f32.xlu2 %v717_v10 }
 0x2c8   : > { %v714_v11 = vpop.f32.mrf.mxu3 }
 0x2c9   : > { %v715_v12 = vadd.f32 %v714_v11, %v619_v2 }
 0x2cb   : > { %v726_v13 = vsel %vm620_vm8, %v715_v12, -inf }
 0x2cc   : > { %727 = vmax.xlane.f32.xlu1 %v726_v13 }
 0x2d8   : > { %839 = vrot.lane.b32.xlu0 %v613_v58, %s1452_s28 }
 0x331   : > { %v725_v14 = vpop.xlane.xlu2 %724 }
 0x332   : > { %v731_v15 = vsub.f32 %v691_v4, %v725_v14 }
 0x334   : > { %v737_v16 = vmul.f32 1.442695, %v731_v15 }
 0x336   : > { %1241 = vpow2.f32 %v737_v16 }
 0x337   : > { %v722_v17 = vpop.xlane.xlu0 %721 }
 0x338   : > { %v730_v18 = vsub.f32 %v667_v8, %v722_v17 }
 0x339   : > { %v719_v19 = vpop.xlane.xlu2 %718 }
 0x33a   : > { %v735_v20 = vmul.f32 1.442695, %v730_v18  ;;  %v729_v21 = vsub.f32 %v643_v7, %v719_v19 }
 0x33c   : > { %v1655_v22 = vpop.eup %1241  ;;  %1243 = vpow2.f32 %v735_v20  ;;  %v733_v24 = vmul.f32 1.442695, %v729_v21 }
 0x33d   : > { %v747_v23 = vsel %vm620_vm8, %v1655_v22, 0.0 }
 0x33e   : > { %748 = vadd.xlane.f32.xlu2 %v747_v23  ;;  %1245 = vpow2.f32 %v733_v24 }
 0x33f   : > { %v728_v25 = vpop.xlane.xlu1 %727 }
 0x340   : > { %v732_v26 = vsub.f32 %v715_v12, %v728_v25 }
 0x342   : > { %v1244_v27 = vpop.eup %1243  ;;  %v739_v28 = vmul.f32 1.442695, %v732_v26 }
 0x343   : > { %v744_v29 = vsel %vm620_vm8, %v1244_v27, 0.0 }
 0x344   : > { %1247 = vpow2.f32 %v739_v28  ;;  %v1660_v30 = vpop.eup %1245 }
 0x345   : > { %v741_v34 = vsel %vm620_vm8, %v1660_v30, 0.0 }
 0x346   : > { %745 = vadd.xlane.f32.xlu2 %v744_v29 }
 0x34a   : > { %v1662_v31 = vpop.eup %1247  ;;  %v840_v32 = vpop.permute.xlu0 %839 }
 0x34b   : > { %860 = vmatpush.msrb.mxu1 %v840_v32  ;;  %v750_v33 = vsel %vm620_vm8, %v1662_v31, 0.0  ;;  %v934_v32 = vld [vmem:[%s1737_s8] sm:$0xff] }
 0x34c   : > { %751 = vadd.xlane.f32.xlu1 %v750_v33 }
 0x34e   : > { %742 = vadd.xlane.f32.xlu2 %v741_v34 }
 0x365   : > { %1226 = vrot.lane.b32.xlu1 %v1225_v35, %s1452_s28 }
 0x366   : > { %813 = vrot.lane.b32.xlu2 %v1629_v55, %s1452_s28 }
 0x3b1   : > { %v1672_v36 = vpop.xlane.xlu2 %748 }
 0x3b2   : > { %1249 = vrcp.f32 %v1672_v36  ;;  %vm786_vm14 = vweird.f32 %v1672_v36  ;;  %v790_v6 = vand.u32 2147483647, %v1672_v36  ;;  %v792_v7 = vand.u32 2147483648, %v1672_v36 }
 0x3b4   : > { %v793_v17 = vor.u32 1.1754944e-38, %v792_v7 }
 0x3b8   : > { %v1675_v38 = vpop.eup %1249 }
 0x3b9   : > { %v746_v37 = vpop.xlane.xlu2 %745  ;;  %v782_v43 = vmul.f32 %v1675_v38, %v1672_v36  ;;  %vm787_vm15 = vweird.f32 %v1675_v38 }
 0x3ba   : > { %1251 = vrcp.f32 %v746_v37  ;;  %v778_v45 = vand.u32 2147483648, %v746_v37  ;;  %v776_v47 = vand.u32 2147483647, %v746_v37  ;;  %vm772_vm10 = vweird.f32 %v746_v37  ;;  %vm1686_vm4 = vmor %vm786_vm14, %vm787_vm15 }
 0x3bb   : > { %v783_v49 = vsub.f32 1.0, %v782_v43 }
 0x3bc   : > { %v779_v53 = vor.u32 1.1754944e-38, %v778_v45  ;;  %vm777_vm12 = vcmp.eq.f32.partialorder %v776_v47, 8.507059e+37 }
 0x3bd   : > { %v784_v58 = vmul.f32 %v1675_v38, %v783_v49 }
 0x3bf   : > { %v752_v39 = vpop.xlane.xlu1 %751  ;;  %v785_v3 = vadd.f32 %v1675_v38, %v784_v58 }
 0x3c0   : > { %v1252_v40 = vpop.eup %1251  ;;  %1253 = vrcp.f32 %v752_v39  ;;  %v806_v8 = vand.u32 2147483648, %v752_v39  ;;  %vm800_vm5 = vweird.f32 %v752_v39  ;;  %v804_v11 = vand.u32 2147483647, %v752_v39 }
 0x3c1   : > { %v768_v41 = vmul.f32 %v1252_v40, %v746_v37  ;;  %v743_v42 = vpop.xlane.xlu2 %742  ;;  %vm773_vm9 = vweird.f32 %v1252_v40  ;;  %v789_v14 = vsel %vm1686_vm4, %v1675_v38, %v785_v3 }
 0x3c2   : > { %1255 = vrcp.f32 %v743_v42  ;;  %vm774_vm11 = vmor %vm772_vm10, %vm773_vm9  ;;  %v764_v63 = vand.u32 2147483648, %v743_v42  ;;  %v762_v2 = vand.u32 2147483647, %v743_v42  ;;  %vm758_vm2 = vweird.f32 %v743_v42 }
 0x3c3   : > { %v769_v44 = vsub.f32 1.0, %v768_v41  ;;  %v807_v18 = vor.u32 1.1754944e-38, %v806_v8  ;;  %vm791_vm9 = vcmp.eq.f32.partialorder %v790_v6, 8.507059e+37  ;;  %vm805_vm10 = vcmp.eq.f32.partialorder %v804_v11, 8.507059e+37 }
 0x3c4   : > { %v765_v9 = vor.u32 1.1754944e-38, %v764_v63  ;;  %vm763_vm6 = vcmp.eq.f32.partialorder %v762_v2, 8.507059e+37  ;;  %v794_v19 = vsel %vm791_vm9, %v793_v17, %v789_v14 }
 0x3c5   : > { %v770_v46 = vmul.f32 %v1252_v40, %v769_v44  ;;  %v811_v25 = vmul.f32 %v1655_v22, %v794_v19  ;;  %v937_v22 = vld [vmem:[%s1737_s8 + $0x18] sm:$0xff] }
 0x3c6   : > { %v1254_v48 = vpop.eup %1253 }
 0x3c7   : > { %v771_v50 = vadd.f32 %v1252_v40, %v770_v46  ;;  %v796_v51 = vmul.f32 %v1254_v48, %v752_v39  ;;  %vm801_vm1 = vweird.f32 %v1254_v48 }
 0x3c8   : > { %v1256_v52 = vpop.eup %1255  ;;  %vm802_vm7 = vmor %vm800_vm5, %vm801_vm1 }
 0x3c9   : > { %v797_v54 = vsub.f32 1.0, %v796_v51  ;;  %v754_v55 = vmul.f32 %v1256_v52, %v743_v42  ;;  %v814_v56 = vpop.permute.xlu2 %813  ;;  %v775_v57 = vsel %vm774_vm11, %v1252_v40, %v771_v50  ;;  %vm759_vm13 = vweird.f32 %v1256_v52  ;;  %v1234_v40 = vld [vmem:[#allocation9] ss:$0 sm:$0xff] }
 0x3ca   : > { %834 = vmatpush.msrb.mxu0 %v814_v56  ;;  %v780_v59 = vsel %vm777_vm12, %v779_v53, %v775_v57  ;;  %vm760_vm3 = vmor %vm758_vm2, %vm759_vm13  ;;  %vm930_vm11 = vcmask 130048   ;;  %vm932_vm12 = vcmask 195584  }
 0x3cb   : > { %v798_v60 = vmul.f32 %v1254_v48, %v797_v54  ;;  %v755_v61 = vsub.f32 1.0, %v754_v55  ;;  %v810_v62 = vmul.f32 %v1244_v27, %v780_v59 }
 0x3cc   : > { %957 = vmatpush.msra.mxu0 %v937_v22 }
 0x3cd   : > { %v756_v1 = vmul.f32 %v1256_v52, %v755_v61  ;;  %1136 = vmatmul.msk.f32.vlgmr.msrb.gmra.mxu1 %vm620_vm8, %v810_v62  ;;  %v799_v4 = vadd.f32 %v1254_v48, %v798_v60 }
 0x3cf   : > { %v757_v5 = vadd.f32 %v1256_v52, %v756_v1  ;;  %v803_v15 = vsel %vm802_vm7, %v1254_v48, %v799_v4 }
 0x3d0   : > { %v808_v20 = vsel %vm805_vm10, %v807_v18, %v803_v15 }
 0x3d1   : > { %v761_v12 = vsel %vm760_vm3, %v1256_v52, %v757_v5  ;;  %v812_v26 = vmul.f32 %v1662_v31, %v808_v20  ;;  %v935_v31 = vld [vmem:[%s1737_s8 + $0x8] sm:$0xff] }
 0x3d2   : > { %v766_v13 = vsel %vm763_vm6, %v765_v9, %v761_v12 }
 0x3d3   : > { %v809_v16 = vmul.f32 %v1660_v30, %v766_v13  ;;  %v936_v30 = vld [vmem:[%s1737_s8 + $0x10] sm:$0xff] }
 0x3d4   : > { %958 = vmatpush.msra.mxu0 %v936_v30 }
 0x3d5   : > { %1135 = vmatmul.msk.f32.vlgmr.msrb.gmra.mxu0 %vm620_vm8, %v809_v16 }
 0x3d6   : > { %959 = vmatpush.msra.mxu0 %v935_v31 }
 0x3d7   : > { %v1227_v21 = vpop.permute.xlu1 %1226 }
 0x3d8   : > { %v1229_v23 = vunpack.i.h.bf16 %v1227_v21  ;;  %v1228_v24 = vunpack.i.l.bf16 %v1227_v21  ;;  %960 = vmatpush.msra.mxu0 %v934_v32 }
 0x3da   : > { %886 = vmatpush.msra.mxu2 %v1228_v24  ;;  %912 = vmatpush.msra.mxu3 %v1229_v23 }
 0x3db   : > { %1137 = vmatmul.msk.f32.vlgmr.msra.gmra.mxu2 %vm620_vm8, %v811_v25  ;;  %1138 = vmatmul.msk.f32.vlgmr.msra.gmra.mxu3 %vm620_vm8, %v812_v26 }
 0x44a   : > { %v862_v27 = vpop.f32.mrf.mxu1 }
 0x44b   : > { %918 = vrot.lane.b32.xlu0 %v862_v27, %s1453_s29 }
 0x452   : > { %v836_v34 = vpop.f32.mrf.mxu0 }
 0x45e   : > { %v888_v28 = vpop.f32.mrf.mxu2  ;;  %v914_v29 = vpop.f32.mrf.mxu3 }
 0x45f   : > { %922 = vrot.lane.b32.xlu1 %v888_v28, %s1454_s11  ;;  %926 = vrot.lane.b32.xlu0 %v914_v29, %s1455_s12 }
 0x4bd   : > { %v919_v33 = vpop.permute.xlu0 %918 }
 0x4be   : > { %v929_v35 = vsel %vm620_vm8, %v836_v34, %v919_v33 }
 0x4d1   : > { %v923_v36 = vpop.permute.xlu1 %922  ;;  %v927_v37 = vpop.permute.xlu0 %926 }
 0x4d2   : > { %v931_v38 = vsel %vm930_vm11, %v929_v35, %v923_v36 }
 0x4d3   : > { %v933_v39 = vsel %vm932_vm12, %v931_v38, %v927_v37 }
 0x4d4   : > { %1139 = vmatmul.msk.f32.vlgmr.msra.gmra.mxu0 %vm490_vm0, %v933_v39 }
 0x551   : > { %v962_v41 = vpop.f32.mrf.mxu0 }
 0x552   : > { %v963_v42 = vadd.f32 %v1234_v40, %v962_v41 }
 0x554   : > { %v965_v43 = vadd.f32 %v963_v42, %v1597_v0 }
 0x556   : > { %966 = vst.msk [vmem:[%s486_s26] sm:$0xff] %vm490_vm0, %v965_v43 }
 0x557 PF: > { %s23_s15 = sadd.s32 1, %s1441_s15   ;;  %s1745_s13 = smov %s1437_s14 }
 0x558   : > { %p20_p8 = scmp.ge.s32.totalorder %s23_s15, 4   ;;  %s1746_s14 = smov %s1748_s30 }
 0x55a   :  { %22 = sbr.rel (!%p20_p8) target bundleno = 4 (0x4), region = 114 }
 0x55f   :  { %992 = vsyncpa [#allocation3], 1 }
 0x560   :  { %994 = vsyncpa [#allocation3 + $0x1], 1 }
 0x561   :  { %995 = vsyncpa [#allocation5], 1 }
 0x562   :  { %996 = vsyncpa [#allocation8], 1 }

// kernel: encoder_decoder_forward.10
= control target key start
LH: loop header
LB: loop body
LE: loop exit
PB: predicated region body
PF: predicated region fallthrough
CT: control target
= control target key end

     0   :  { %s1139_s13 = smov 0   ;;  %s1141_s14 = smov 0   ;;  %s1312_s0 = inlined_call_operand.vmem [shape: f32[2,8,32], index: 0, kind: input, shape index: {}]   ;;  %s1313_s1 = inlined_call_operand.vmem [shape: bf16[2,1,8], index: 1, kind: input, shape index: {}]   ;;  %s1314_s2 = inlined_call_operand.vmem [shape: f32[1,32], index: 2, kind: input, shape index: {}]   ;;  %s1315_s3 = inlined_call_operand.vmem [shape: f32[1,32], index: 3, kind: input, shape index: {}]   ;;  %s1316_s4 = inlined_call_operand.vmem [shape: f32[32,32], index: 4, kind: input, shape index: {}]   ;;  %s1317_s5 = inlined_call_operand.vmem [shape: f32[1,32], index: 5, kind: input, shape index: {}]   ;;  %s1318_s6 = inlined_call_operand.vmem [shape: f32[32,64], index: 6, kind: input, shape index: {}]   ;;  %s1319_s7 = inlined_call_operand.vmem [shape: f32[1,64], index: 7, kind: input, shape index: {}]   ;;  %s1320_s8 = inlined_call_operand.vmem [shape: f32[32,32], index: 8, kind: input, shape index: {}]   ;;  %s1321_s9 = inlined_call_operand.vmem [shape: f32[1,32], index: 9, kind: input, shape index: {}]   ;;  %s1322_s10 = inlined_call_operand.vmem [shape: f32[2,8,32], index: 10, kind: output, shape index: {}]  }
   0x1   :  { %s1143_s15 = smov 0  }
   0x2 LB: > { %s32_s16 = sadd.s32 1, %s1070_s14  ;;  %p968_p0 = scmp.ge.s32.totalorder %s1074_s15, 1  ;;  %s1074_s15 = sphi %s1143_s15, %s20_s15   ;;  %s1070_s14 = sphi %s1141_s14, %s1326_s14   ;;  %s1066_s13 = sphi %s1139_s13, %s1325_s13  }
   0x3   : > { %p34_p1 = scmp.ge.s32.totalorder %s32_s16, 2  ;;  %p338_p2 = scmp.lt.s32.totalorder %s1074_s15, 3 }
   0x5   : > { %s1328_s16 = smov (%p34_p1, %s32_s16), 0  ;;  %p339_p3 = pnand %p968_p0, %p338_p2 }
   0x6   : > { %p383_p4 = scmp.lt.s32.totalorder (!%p339_p3), %s1066_s13, 1  ;;  %s1077_s30 = smov (!%p339_p3), 112  }
   0x7   : > { %342 = sbr.rel (%p339_p3) target bundleno = 1347 (0x543), region = 60  ;;  %s1078_s11 = smov (!%p339_p3), 120  }
   0x8   : > { %s1079_s12 = smov (!%p339_p3), 104   ;;  %s1080_s21 = smov (!%p339_p3), 96  }
   0x9   : > { %s1081_s22 = smov (!%p339_p3), 8   ;;  %s1082_s23 = smov (!%p339_p3), 16  }
   0xa   : > { %s1083_s24 = smov (!%p339_p3), 24  }
   0xc   : > { %s1330_s13 = smov (!%p383_p4, %s1066_s13), 1  ;;  %vm403_vm0 = vcmask 261120   ;;  %v1076_v2 = vmov 32.0   ;;  %v460_v14 = vld [vmem:[%s1316_s4 + $0x18] sm:$0xff]  ;;  %v459_v16 = vld [vmem:[%s1316_s4 + $0x10] sm:$0xff]  ;;  %v458_v18 = vld [vmem:[%s1316_s4 + $0x8] sm:$0xff] }
   0xd   : > { %s969_s17 = sshll.u32 %s1330_s13, 3  ;;  %1030 = vrcp.f32 %v1076_v2  ;;  %v491_v15 = vld [vmem:[%s1318_s6 + $0x18] sm:$0xff]  ;;  %480 = vmatpush.msra.mxu0 %v460_v14  ;;  %v490_v17 = vld [vmem:[%s1318_s6 + $0x10] sm:$0xff]  ;;  %v489_v19 = vld [vmem:[%s1318_s6 + $0x8] sm:$0xff]  ;;  %vm534_vm8 = vcmask 64512  }
   0xe   : > { %s389_s20 = scalar_lea.vmem %s1312_s0, %s969_s17  ;;  %508 = vmatpush.msra.mxu1 %v491_v15  ;;  %v457_v20 = vld [vmem:[%s1316_s4] sm:$0xff] }
   0xf   : > { %v1165_v0 = vld [vmem:[%s389_s20] sm:$0xff]  ;;  %481 = vmatpush.msra.mxu0 %v459_v16  ;;  %s392_s20 = scalar_lea.vmem %s1313_s1, %s1330_s13 }
  0x10   : > { %v404_v1 = vsel %vm403_vm0, %v1165_v0, 0.0  ;;  %509 = vmatpush.msra.mxu1 %v490_v17  ;;  %v488_v21 = vld [vmem:[%s1318_s6] sm:$0xff] }
  0x11   : > { %405 = vadd.xlane.f32.xlu0 %v404_v1  ;;  %482 = vmatpush.msra.mxu0 %v458_v18  ;;  %v1025_v39 = vld [vmem:[%s1314_s2] ss:$0 sm:$0xff] }
  0x12   : > { %510 = vmatpush.msra.mxu1 %v489_v19  ;;  %v1026_v46 = vld [vmem:[%s1315_s3] ss:$0 sm:$0xff] }
  0x13   : > { %v1031_v3 = vpop.eup %1030  ;;  %483 = vmatpush.msra.mxu0 %v457_v20  ;;  %v1027_v50 = vld [vmem:[%s1317_s5] ss:$0 sm:$0xff] }
  0x14   : > { %v408_v4 = vmul.f32 32.0, %v1031_v3  ;;  %vm412_vm1 = vweird.f32 %v1031_v3  ;;  %511 = vmatpush.msra.mxu1 %v488_v21  ;;  %v1028_v51 = vld [vmem:[%s1319_s7] ss:$0 sm:$0xff] }
  0x15   : > { %v531_v63 = vld [vmem:[%s392_s20] sm:$0x1] }
  0x16   : > { %v409_v5 = vsub.f32 1.0, %v408_v4  ;;  %v532_v2 = vunpack.c.l.bf16 %v531_v63 }
  0x18   : > { %v410_v6 = vmul.f32 %v1031_v3, %v409_v5 }
  0x1a   : > { %v411_v7 = vadd.f32 %v1031_v3, %v410_v6 }
  0x1c   : > { %v413_v8 = vsel %vm412_vm1, %v1031_v3, %v411_v7  ;;  %v533_v3 = vperm.slane %v532_v2, 0 }
  0x84   : > { %v406_v9 = vpop.xlane.xlu0 %405 }
  0x85   : > { %v414_v10 = vmul.f32 %v413_v8, %v406_v9 }
  0x87   : > { %v415_v11 = vsub.f32 %v1165_v0, %v414_v10 }
  0x89   : > { %v416_v12 = vmul.f32 %v415_v11, %v415_v11  ;;  %v451_v44 = vmul.f32 %v1025_v39, %v415_v11 }
  0x8b   : > { %v417_v13 = vsel %vm403_vm0, %v416_v12, 0.0 }
  0x8c   : > { %418 = vadd.xlane.f32.xlu0 %v417_v13 }
  0xff   : > { %v419_v22 = vpop.xlane.xlu0 %418 }
 0x100   : > { %v420_v23 = vmul.f32 0.032258064, %v419_v22 }
 0x102   : > { %1032 = vrsqrt.f32 %v420_v23  ;;  %vm428_vm2 = vcmp.eq.f32.partialorder %v420_v23, inf  ;;  %v431_v31 = vand.u32 2147483648, %v420_v23  ;;  %vm430_vm3 = vcmp.eq.f32.partialorder %v420_v23, 0.0 }
 0x108   : > { %v1033_v24 = vpop.eup %1032 }
 0x109   : > { %v422_v25 = vmul.f32 %v1033_v24, %v420_v23 }
 0x10b   : > { %v423_v26 = vmul.f32 %v1033_v24, %v422_v25 }
 0x10d   : > { %v424_v27 = vmul.f32 0.5, %v423_v26 }
 0x10f   : > { %v425_v28 = vsub.f32 1.5, %v424_v27 }
 0x111   : > { %v426_v29 = vmul.f32 %v1033_v24, %v425_v28 }
 0x113   : > { %v427_v30 = vmul.f32 %v426_v29, %v420_v23 }
 0x115   : > { %v429_v32 = vsel %vm428_vm2, %v420_v23, %v427_v30 }
 0x116   : > { %v432_v33 = vsel %vm430_vm3, %v431_v31, %v429_v32 }
 0x117   : > { %v433_v34 = vadd.f32 1e-06, %v432_v33 }
 0x119   : > { %1034 = vrcp.f32 %v433_v34  ;;  %v445_v38 = vand.u32 2147483648, %v433_v34  ;;  %v443_v41 = vand.u32 2147483647, %v433_v34  ;;  %vm439_vm5 = vweird.f32 %v433_v34 }
 0x11b   : > { %v446_v43 = vor.u32 1.1754944e-38, %v445_v38  ;;  %vm444_vm7 = vcmp.eq.f32.partialorder %v443_v41, 8.507059e+37 }
 0x11f   : > { %v1035_v35 = vpop.eup %1034 }
 0x120   : > { %v435_v36 = vmul.f32 %v1035_v35, %v433_v34  ;;  %vm440_vm4 = vweird.f32 %v1035_v35 }
 0x121   : > { %vm441_vm6 = vmor %vm439_vm5, %vm440_vm4 }
 0x122   : > { %v436_v37 = vsub.f32 1.0, %v435_v36 }
 0x124   : > { %v437_v40 = vmul.f32 %v1035_v35, %v436_v37 }
 0x126   : > { %v438_v42 = vadd.f32 %v1035_v35, %v437_v40 }
 0x128   : > { %v442_v45 = vsel %vm441_vm6, %v1035_v35, %v438_v42 }
 0x129   : > { %v447_v47 = vsel %vm444_vm7, %v446_v43, %v442_v45 }
 0x12a   : > { %v452_v48 = vmul.f32 %v451_v44, %v447_v47 }
 0x12c   : > { %v456_v49 = vadd.f32 %v1026_v46, %v452_v48 }
 0x12e   : > { %971 = vmatmul.msk.f32.vlgmr.msra.gmra.mxu0 %vm403_vm0, %v456_v49  ;;  %972 = vmatmul.msk.f32.vlgmr.msra.gmra.mxu1 %vm403_vm0, %v456_v49 }
 0x1ab   : > { %v485_v52 = vpop.f32.mrf.mxu0  ;;  %v513_v53 = vpop.f32.mrf.mxu1 }
 0x1ac   : > { %v486_v54 = vadd.f32 %v1027_v50, %v485_v52  ;;  %v1209_v55 = vadd.f32 %v1028_v51, %v513_v53 }
 0x1ae   : > { %v516_v56 = vmul.f32 0.35355338, %v486_v54  ;;  %527 = vrot.lane.b32.xlu2 %v1209_v55, %s1077_s30  ;;  %525 = vrot.lane.b32.xlu1 %v1209_v55, %s1078_s11 }
 0x1af   : > { %973 = vmatpush.xpose.msk.msra.mxu2 %vm534_vm8, %v1209_v55 }
 0x1b0   : > { %520 = vrot.lane.b32.xlu0 %v516_v56, %s1077_s30 }
 0x1b2   : > { %974 = vmatmul.msk.f32.vlgmr.msra.gmra.mxu2 %vm534_vm8, %v516_v56 }
 0x1b6   : > { %529 = vrot.lane.b32.xlu2 %v1209_v55, %s1079_s12  ;;  %518 = vrot.lane.b32.xlu1 %v516_v56, %s1078_s11 }
 0x1be   : > { %522 = vrot.lane.b32.xlu1 %v516_v56, %s1079_s12 }
 0x208   : > { %v1217_v57 = vpop.permute.xlu2 %527 }
 0x209   : > { %977 = vmatpush.xpose.msk.msrb.mxu2 %vm534_vm8, %v1217_v57 }
 0x210   : > { %v530_v59 = vpop.permute.xlu2 %529 }
 0x211   : > { %v1020_v36 = vpack.i.bf16 %v530_v59, %v1217_v57 }
 0x220   : > { %v526_v58 = vpop.permute.xlu1 %525 }
 0x221   : > { %975 = vmatpush.xpose.msk.msra.mxu3 %vm534_vm8, %v526_v58 }
 0x222   : > { %v521_v60 = vpop.permute.xlu0 %520 }
 0x223   : > { %978 = vmatmul.msk.f32.vlgmr.msrb.gmra.mxu2 %vm534_vm8, %v521_v60 }
 0x225   : > { %979 = vmatpush.xpose.msk.msrb.mxu3 %vm534_vm8, %v530_v59 }
 0x228   : > { %v519_v61 = vpop.permute.xlu1 %518 }
 0x229   : > { %976 = vmatmul.msk.f32.vlgmr.msra.gmra.mxu3 %vm534_vm8, %v519_v61 }
 0x230   : > { %v523_v62 = vpop.permute.xlu1 %522 }
 0x231   : > { %980 = vmatmul.msk.f32.vlgmr.msrb.gmra.mxu3 %vm534_vm8, %v523_v62 }
 0x235   : > { %v556_v1 = vpop.f32.mrf.mxu2 }
 0x236   : > { %v557_v8 = vadd.f32 %v556_v1, %v533_v3 }
 0x238   : > { %v631_v11 = vsel %vm534_vm8, %v557_v8, -inf }
 0x2a6   : > { %v604_v4 = vpop.f32.mrf.mxu2 }
 0x2a7   : > { %v605_v5 = vadd.f32 %v604_v4, %v533_v3 }
 0x2a9   : > { %v637_v6 = vsel %vm534_vm8, %v605_v5, -inf }
 0x2aa   : > { %638 = vmax.xlane.f32.xlu2 %v637_v6 }
 0x2ac   : > { %v580_v7 = vpop.f32.mrf.mxu3 }
 0x2ad   : > { %v581_v9 = vadd.f32 %v580_v7, %v533_v3 }
 0x2af   : > { %v634_v10 = vsel %vm534_vm8, %v581_v9, -inf }
 0x2b0   : > { %635 = vmax.xlane.f32.xlu0 %v634_v10 }
 0x2b2   : > { %632 = vmax.xlane.f32.xlu2 %v631_v11 }
 0x2b4   : > { %v628_v12 = vpop.f32.mrf.mxu3 }
 0x2b5   : > { %v629_v13 = vadd.f32 %v628_v12, %v533_v3 }
 0x2b7   : > { %v640_v14 = vsel %vm534_vm8, %v629_v13, -inf }
 0x2b8   : > { %641 = vmax.xlane.f32.xlu1 %v640_v14 }
 0x2c4   : > { %753 = vrot.lane.b32.xlu0 %v526_v58, %s1080_s21 }
 0x31d   : > { %v639_v15 = vpop.xlane.xlu2 %638 }
 0x31e   : > { %v645_v16 = vsub.f32 %v605_v5, %v639_v15 }
 0x320   : > { %v651_v17 = vmul.f32 1.442695, %v645_v16 }
 0x322   : > { %1036 = vpow2.f32 %v651_v17 }
 0x323   : > { %v636_v18 = vpop.xlane.xlu0 %635 }
 0x324   : > { %v644_v19 = vsub.f32 %v581_v9, %v636_v18 }
 0x325   : > { %v633_v20 = vpop.xlane.xlu2 %632 }
 0x326   : > { %v649_v21 = vmul.f32 1.442695, %v644_v19  ;;  %v643_v22 = vsub.f32 %v557_v8, %v633_v20 }
 0x328   : > { %v1235_v23 = vpop.eup %1036  ;;  %1038 = vpow2.f32 %v649_v21  ;;  %v647_v25 = vmul.f32 1.442695, %v643_v22 }
 0x329   : > { %v661_v24 = vsel %vm534_vm8, %v1235_v23, 0.0 }
 0x32a   : > { %662 = vadd.xlane.f32.xlu2 %v661_v24  ;;  %1040 = vpow2.f32 %v647_v25 }
 0x32b   : > { %v642_v26 = vpop.xlane.xlu1 %641 }
 0x32c   : > { %v646_v27 = vsub.f32 %v629_v13, %v642_v26 }
 0x32e   : > { %v1039_v28 = vpop.eup %1038  ;;  %v653_v29 = vmul.f32 1.442695, %v646_v27 }
 0x32f   : > { %v658_v30 = vsel %vm534_vm8, %v1039_v28, 0.0 }
 0x330   : > { %1042 = vpow2.f32 %v653_v29  ;;  %v1240_v31 = vpop.eup %1040 }
 0x331   : > { %v655_v35 = vsel %vm534_vm8, %v1240_v31, 0.0 }
 0x332   : > { %659 = vadd.xlane.f32.xlu2 %v658_v30 }
 0x336   : > { %v1242_v32 = vpop.eup %1042  ;;  %v754_v33 = vpop.permute.xlu0 %753 }
 0x337   : > { %774 = vmatpush.msrb.mxu1 %v754_v33  ;;  %v664_v34 = vsel %vm534_vm8, %v1242_v32, 0.0  ;;  %v848_v33 = vld [vmem:[%s1320_s8] sm:$0xff] }
 0x338   : > { %665 = vadd.xlane.f32.xlu1 %v664_v34 }
 0x33a   : > { %656 = vadd.xlane.f32.xlu2 %v655_v35 }
 0x351   : > { %1021 = vrot.lane.b32.xlu1 %v1020_v36, %s1080_s21 }
 0x352   : > { %727 = vrot.lane.b32.xlu2 %v1209_v55, %s1080_s21 }
 0x39d   : > { %v1252_v37 = vpop.xlane.xlu2 %662 }
 0x39e   : > { %1044 = vrcp.f32 %v1252_v37  ;;  %vm700_vm14 = vweird.f32 %v1252_v37  ;;  %v704_v7 = vand.u32 2147483647, %v1252_v37  ;;  %v706_v8 = vand.u32 2147483648, %v1252_v37 }
 0x3a0   : > { %v707_v18 = vor.u32 1.1754944e-38, %v706_v8 }
 0x3a4   : > { %v1255_v39 = vpop.eup %1044 }
 0x3a5   : > { %v660_v38 = vpop.xlane.xlu2 %659  ;;  %v696_v44 = vmul.f32 %v1255_v39, %v1252_v37  ;;  %vm701_vm15 = vweird.f32 %v1255_v39 }
 0x3a6   : > { %1046 = vrcp.f32 %v660_v38  ;;  %v692_v46 = vand.u32 2147483648, %v660_v38  ;;  %v690_v48 = vand.u32 2147483647, %v660_v38  ;;  %vm686_vm10 = vweird.f32 %v660_v38  ;;  %vm1266_vm4 = vmor %vm700_vm14, %vm701_vm15 }
 0x3a7   : > { %v697_v50 = vsub.f32 1.0, %v696_v44 }
 0x3a8   : > { %v693_v54 = vor.u32 1.1754944e-38, %v692_v46  ;;  %vm691_vm12 = vcmp.eq.f32.partialorder %v690_v48, 8.507059e+37 }
 0x3a9   : > { %v698_v59 = vmul.f32 %v1255_v39, %v697_v50 }
 0x3ab   : > { %v666_v40 = vpop.xlane.xlu1 %665  ;;  %v699_v4 = vadd.f32 %v1255_v39, %v698_v59 }
 0x3ac   : > { %v1047_v41 = vpop.eup %1046  ;;  %1048 = vrcp.f32 %v666_v40  ;;  %v720_v9 = vand.u32 2147483648, %v666_v40  ;;  %vm714_vm5 = vweird.f32 %v666_v40  ;;  %v718_v12 = vand.u32 2147483647, %v666_v40 }
 0x3ad   : > { %v682_v42 = vmul.f32 %v1047_v41, %v660_v38  ;;  %v657_v43 = vpop.xlane.xlu2 %656  ;;  %vm687_vm9 = vweird.f32 %v1047_v41  ;;  %v703_v15 = vsel %vm1266_vm4, %v1255_v39, %v699_v4 }
 0x3ae   : > { %1050 = vrcp.f32 %v657_v43  ;;  %vm688_vm11 = vmor %vm686_vm10, %vm687_vm9  ;;  %v678_v1 = vand.u32 2147483648, %v657_v43  ;;  %v676_v3 = vand.u32 2147483647, %v657_v43  ;;  %vm672_vm2 = vweird.f32 %v657_v43 }
 0x3af   : > { %v683_v45 = vsub.f32 1.0, %v682_v42  ;;  %v721_v19 = vor.u32 1.1754944e-38, %v720_v9  ;;  %vm705_vm9 = vcmp.eq.f32.partialorder %v704_v7, 8.507059e+37  ;;  %vm719_vm10 = vcmp.eq.f32.partialorder %v718_v12, 8.507059e+37 }
 0x3b0   : > { %v679_v10 = vor.u32 1.1754944e-38, %v678_v1  ;;  %vm677_vm6 = vcmp.eq.f32.partialorder %v676_v3, 8.507059e+37  ;;  %v708_v20 = vsel %vm705_vm9, %v707_v18, %v703_v15 }
 0x3b1   : > { %v684_v47 = vmul.f32 %v1047_v41, %v683_v45  ;;  %v725_v26 = vmul.f32 %v1235_v23, %v708_v20  ;;  %v851_v23 = vld [vmem:[%s1320_s8 + $0x18] sm:$0xff] }
 0x3b2   : > { %v1049_v49 = vpop.eup %1048 }
 0x3b3   : > { %v685_v51 = vadd.f32 %v1047_v41, %v684_v47  ;;  %v710_v52 = vmul.f32 %v1049_v49, %v666_v40  ;;  %vm715_vm1 = vweird.f32 %v1049_v49 }
 0x3b4   : > { %v1051_v53 = vpop.eup %1050  ;;  %vm716_vm7 = vmor %vm714_vm5, %vm715_vm1 }
 0x3b5   : > { %v711_v55 = vsub.f32 1.0, %v710_v52  ;;  %v668_v56 = vmul.f32 %v1051_v53, %v657_v43  ;;  %v728_v57 = vpop.permute.xlu2 %727  ;;  %v689_v58 = vsel %vm688_vm11, %v1047_v41, %v685_v51  ;;  %vm673_vm13 = vweird.f32 %v1051_v53  ;;  %v1029_v41 = vld [vmem:[%s1321_s9] ss:$0 sm:$0xff] }
 0x3b6   : > { %748 = vmatpush.msrb.mxu0 %v728_v57  ;;  %v694_v60 = vsel %vm691_vm12, %v693_v54, %v689_v58  ;;  %vm674_vm3 = vmor %vm672_vm2, %vm673_vm13  ;;  %vm844_vm11 = vcmask 130048   ;;  %vm846_vm12 = vcmask 195584  }
 0x3b7   : > { %v712_v61 = vmul.f32 %v1049_v49, %v711_v55  ;;  %v669_v62 = vsub.f32 1.0, %v668_v56  ;;  %v724_v63 = vmul.f32 %v1039_v28, %v694_v60 }
 0x3b8   : > { %871 = vmatpush.msra.mxu0 %v851_v23 }
 0x3b9   : > { %v670_v2 = vmul.f32 %v1051_v53, %v669_v62  ;;  %982 = vmatmul.msk.f32.vlgmr.msrb.gmra.mxu1 %vm534_vm8, %v724_v63  ;;  %v713_v5 = vadd.f32 %v1049_v49, %v712_v61 }
 0x3bb   : > { %v671_v6 = vadd.f32 %v1051_v53, %v670_v2  ;;  %v717_v16 = vsel %vm716_vm7, %v1049_v49, %v713_v5 }
 0x3bc   : > { %v722_v21 = vsel %vm719_vm10, %v721_v19, %v717_v16 }
 0x3bd   : > { %v675_v13 = vsel %vm674_vm3, %v1051_v53, %v671_v6  ;;  %v726_v27 = vmul.f32 %v1242_v32, %v722_v21  ;;  %v849_v32 = vld [vmem:[%s1320_s8 + $0x8] sm:$0xff] }
 0x3be   : > { %v680_v14 = vsel %vm677_vm6, %v679_v10, %v675_v13 }
 0x3bf   : > { %v723_v17 = vmul.f32 %v1240_v31, %v680_v14  ;;  %v850_v31 = vld [vmem:[%s1320_s8 + $0x10] sm:$0xff] }
 0x3c0   : > { %872 = vmatpush.msra.mxu0 %v850_v31 }
 0x3c1   : > { %981 = vmatmul.msk.f32.vlgmr.msrb.gmra.mxu0 %vm534_vm8, %v723_v17 }
 0x3c2   : > { %873 = vmatpush.msra.mxu0 %v849_v32 }
 0x3c3   : > { %v1022_v22 = vpop.permute.xlu1 %1021 }
 0x3c4   : > { %v1024_v24 = vunpack.i.h.bf16 %v1022_v22  ;;  %v1023_v25 = vunpack.i.l.bf16 %v1022_v22  ;;  %874 = vmatpush.msra.mxu0 %v848_v33 }
 0x3c6   : > { %800 = vmatpush.msra.mxu2 %v1023_v25  ;;  %826 = vmatpush.msra.mxu3 %v1024_v24 }
 0x3c7   : > { %983 = vmatmul.msk.f32.vlgmr.msra.gmra.mxu2 %vm534_vm8, %v725_v26  ;;  %984 = vmatmul.msk.f32.vlgmr.msra.gmra.mxu3 %vm534_vm8, %v726_v27 }
 0x436   : > { %v776_v28 = vpop.f32.mrf.mxu1 }
 0x437   : > { %832 = vrot.lane.b32.xlu0 %v776_v28, %s1081_s22  ;;  %s399_s22 = scalar_lea.vmem %s1322_s10, %s969_s17 }
 0x43e   : > { %v750_v35 = vpop.f32.mrf.mxu0 }
 0x44a   : > { %v802_v29 = vpop.f32.mrf.mxu2  ;;  %v828_v30 = vpop.f32.mrf.mxu3 }
 0x44b   : > { %836 = vrot.lane.b32.xlu1 %v802_v29, %s1082_s23  ;;  %840 = vrot.lane.b32.xlu0 %v828_v30, %s1083_s24 }
 0x4a9   : > { %v833_v34 = vpop.permute.xlu0 %832 }
 0x4aa   : > { %v843_v36 = vsel %vm534_vm8, %v750_v35, %v833_v34 }
 0x4bd   : > { %v837_v37 = vpop.permute.xlu1 %836  ;;  %v841_v38 = vpop.permute.xlu0 %840 }
 0x4be   : > { %v845_v39 = vsel %vm844_vm11, %v843_v36, %v837_v37 }
 0x4bf   : > { %v847_v40 = vsel %vm846_vm12, %v845_v39, %v841_v38 }
 0x4c0   : > { %985 = vmatmul.msk.f32.vlgmr.msra.gmra.mxu0 %vm403_vm0, %v847_v40 }
 0x53d   : > { %v876_v42 = vpop.f32.mrf.mxu0 }
 0x53e   : > { %v877_v43 = vadd.f32 %v1029_v41, %v876_v42 }
 0x540   : > { %v879_v44 = vadd.f32 %v877_v43, %v1165_v0 }
 0x542   : > { %880 = vst.msk [vmem:[%s399_s22] sm:$0xff] %vm403_vm0, %v879_v44 }
 0x543 PF: > { %s20_s15 = sadd.s32 1, %s1074_s15   ;;  %s1325_s13 = smov %s1070_s14 }
 0x544   : > { %p17_p5 = scmp.ge.s32.totalorder %s20_s15, 4   ;;  %s1326_s14 = smov %s1328_s16 }
 0x546   :  { %19 = sbr.rel (!%p17_p5) target bundleno = 2 (0x2), region = 93 }

// kernel: encoder_decoder_forward.16
= control target key start
LH: loop header
LB: loop body
LE: loop exit
PB: predicated region body
PF: predicated region fallthrough
CT: control target
= control target key end

     0   :  { %12 = vsyncpa [#allocation5], 0  ;;  %s313_s27 = smov [#allocation4]   ;;  %s450_s0 = inlined_call_operand.vmem [shape: f32[16,32], index: 0, kind: input, shape index: {}]   ;;  %s451_s1 = inlined_call_operand.vmem [shape: f32[1,32], index: 1, kind: input, shape index: {}]   ;;  %s452_s2 = inlined_call_operand.vmem [shape: f32[1,32], index: 2, kind: input, shape index: {}]   ;;  %s453_s3 = inlined_call_operand.vmem [shape: f32[32,64], index: 3, kind: input, shape index: {}]   ;;  %s454_s4 = inlined_call_operand.vmem [shape: f32[1,64], index: 4, kind: input, shape index: {}]   ;;  %s455_s5 = inlined_call_operand.vmem [shape: f32[64,32], index: 5, kind: input, shape index: {}]   ;;  %s456_s6 = inlined_call_operand.hbm [shape: f32[1,32], index: 6, kind: input, shape index: {}]   ;;  %s457_s7 = inlined_call_operand.vmem [shape: f32[16,32], index: 7, kind: output, shape index: {}]  }
   0x1   :  { %s30_s26 = sshll.u32 %s456_s6, 4  ;;  %s32_s28 = sshll.u32 %s313_s27, 4  ;;  %s31_s26 = int_to_ptr.hbm [resolvable:$true] %s30_s26  ;;  %s33_s28 = int_to_ptr.vmem [resolvable:$true] %s32_s28 }
   0x2   :  { %35 = dma.hbm_to_vmem [thread:$0]  %s31_s26, 16, %s33_s28, [#allocation5]  }
   0x3   :  { %311 = dma.done.wait [#allocation5], 16  }
   0x4   :  { %312 = vsyncadd [#allocation5], 4294967280  ;;  %vm44_vm0 = vcmask 261120   ;;  %v362_v0 = vld [vmem:[%s450_s0 + $0x8] sm:$0xff]  ;;  %v369_v2 = vld [vmem:[%s450_s0] sm:$0xff]  ;;  %v314_v4 = vmov 32.0  }
   0x5   :  { %v54_v1 = vsel %vm44_vm0, %v362_v0, 0.0  ;;  %v51_v3 = vsel %vm44_vm0, %v369_v2, 0.0  ;;  %277 = vrcp.f32 %v314_v4  ;;  %v151_v31 = vld [vmem:[%s453_s3 + $0x18] sm:$0xff]  ;;  %v150_v34 = vld [vmem:[%s453_s3 + $0x10] sm:$0xff]  ;;  %v149_v35 = vld [vmem:[%s453_s3 + $0x8] sm:$0xff]  ;;  %vm198_vm14 = vcmask 523264  }
   0x6   :  { %55 = vadd.xlane.f32.xlu0 %v54_v1  ;;  %258 = vmatpush.msra.mxu3 %v151_v31  ;;  %v148_v39 = vld [vmem:[%s453_s3] sm:$0xff]  ;;  %v197_v51 = vld [vmem:[%s455_s5 + $0x38] sm:$0xff]  ;;  %v196_v52 = vld [vmem:[%s455_s5 + $0x30] sm:$0xff] }
   0x7   :  { %175 = vmatpush.msra.mxu0 %v151_v31  ;;  %262 = vmatpush.msra.mxu2 %v197_v51  ;;  %v195_v55 = vld [vmem:[%s455_s5 + $0x28] sm:$0xff]  ;;  %v194_v58 = vld [vmem:[%s455_s5 + $0x20] sm:$0xff]  ;;  %v193_v62 = vld [vmem:[%s455_s5 + $0x18] sm:$0xff] }
   0x8   :  { %259 = vmatpush.msra.mxu3 %v150_v34  ;;  %213 = vmatpush.msra.mxu1 %v197_v51  ;;  %v273_v59 = vld [vmem:[%s451_s1] ss:$0 sm:$0xff] }
   0x9   :  { %176 = vmatpush.msra.mxu0 %v150_v34  ;;  %263 = vmatpush.msra.mxu2 %v196_v52 }
   0xa   :  { %260 = vmatpush.msra.mxu3 %v149_v35  ;;  %214 = vmatpush.msra.mxu1 %v196_v52 }
   0xb   :  { %v278_v5 = vpop.eup %277  ;;  %177 = vmatpush.msra.mxu0 %v149_v35  ;;  %264 = vmatpush.msra.mxu2 %v195_v55 }
   0xc   :  { %v58_v6 = vmul.f32 32.0, %v278_v5  ;;  %vm62_vm1 = vweird.f32 %v278_v5  ;;  %261 = vmatpush.msra.mxu3 %v148_v39  ;;  %215 = vmatpush.msra.mxu1 %v195_v55 }
   0xd   :  { %178 = vmatpush.msra.mxu0 %v148_v39  ;;  %265 = vmatpush.msra.mxu2 %v194_v58 }
   0xe   :  { %52 = vadd.xlane.f32.xlu0 %v51_v3  ;;  %v59_v7 = vsub.f32 1.0, %v58_v6  ;;  %216 = vmatpush.msra.mxu1 %v194_v58  ;;  %v274_v6 = vld [vmem:[%s452_s2] ss:$0 sm:$0xff] }
   0xf   :  { %266 = vmatpush.msra.mxu2 %v193_v62 }
  0x10   :  { %v60_v8 = vmul.f32 %v278_v5, %v59_v7  ;;  %217 = vmatpush.msra.mxu1 %v193_v62 }
  0x12   :  { %v61_v9 = vadd.f32 %v278_v5, %v60_v8 }
  0x14   :  { %v63_v10 = vsel %vm62_vm1, %v278_v5, %v61_v9 }
  0x79   :  { %v56_v11 = vpop.xlane.xlu0 %55 }
  0x7a   :  { %v65_v12 = vmul.f32 %v63_v10, %v56_v11 }
  0x7c   :  { %v374_v13 = vsub.f32 %v362_v0, %v65_v12 }
  0x7e   :  { %v69_v14 = vmul.f32 %v374_v13, %v374_v13  ;;  %v136_v4 = vmul.f32 %v273_v59, %v374_v13 }
  0x80   :  { %v73_v15 = vsel %vm44_vm0, %v69_v14, 0.0 }
  0x81   :  { %74 = vadd.xlane.f32.xlu1 %v73_v15  ;;  %v53_v16 = vpop.xlane.xlu0 %52 }
  0x82   :  { %v64_v17 = vmul.f32 %v63_v10, %v53_v16 }
  0x84   :  { %v380_v18 = vsub.f32 %v369_v2, %v64_v17 }
  0x86   :  { %v68_v19 = vmul.f32 %v380_v18, %v380_v18  ;;  %v135_v17 = vmul.f32 %v273_v59, %v380_v18  ;;  %v191_v18 = vld [vmem:[%s455_s5 + $0x8] sm:$0xff] }
  0x88   :  { %v70_v20 = vsel %vm44_vm0, %v68_v19, 0.0 }
  0x89   :  { %71 = vadd.xlane.f32.xlu1 %v70_v20 }
  0xf4   :  { %v75_v21 = vpop.xlane.xlu1 %74 }
  0xf5   :  { %v77_v22 = vmul.f32 0.032258064, %v75_v21 }
  0xf7   :  { %279 = vrsqrt.f32 %v77_v22  ;;  %vm97_vm2 = vcmp.eq.f32.partialorder %v77_v22, inf  ;;  %v100_v38 = vand.u32 2147483648, %v77_v22  ;;  %vm99_vm3 = vcmp.eq.f32.partialorder %v77_v22, 0.0 }
  0xfc   :  { %v72_v23 = vpop.xlane.xlu1 %71 }
  0xfd   :  { %v280_v24 = vpop.eup %279  ;;  %v76_v25 = vmul.f32 0.032258064, %v72_v23 }
  0xfe   :  { %v91_v26 = vmul.f32 %v280_v24, %v77_v22 }
  0xff   :  { %281 = vrsqrt.f32 %v76_v25  ;;  %vm85_vm4 = vcmp.eq.f32.partialorder %v76_v25, inf  ;;  %v88_v47 = vand.u32 2147483648, %v76_v25  ;;  %vm87_vm5 = vcmp.eq.f32.partialorder %v76_v25, 0.0 }
 0x100   :  { %v92_v27 = vmul.f32 %v280_v24, %v91_v26  ;;  %v190_v26 = vld [vmem:[%s455_s5] sm:$0xff] }
 0x102   :  { %v93_v28 = vmul.f32 0.5, %v92_v27  ;;  %v315_v27 = vmov 0.0  }
 0x103   :  { %45 = vst.msk [vmem:[#allocation3] sm:$0xff] %vm44_vm0, %v315_v27 }
 0x104   :  { %v94_v29 = vsub.f32 1.5, %v93_v28  ;;  %46 = vst.msk [vmem:[#allocation3 + $0x8] sm:$0xff] %vm44_vm0, %v315_v27  ;;  %v275_v28 = vld [vmem:[%s454_s4] ss:$0 sm:$0xff] }
 0x105   :  { %v282_v30 = vpop.eup %281 }
 0x106   :  { %v95_v32 = vmul.f32 %v280_v24, %v94_v29  ;;  %v79_v33 = vmul.f32 %v282_v30, %v76_v25 }
 0x108   :  { %v96_v36 = vmul.f32 %v95_v32, %v77_v22  ;;  %v80_v37 = vmul.f32 %v282_v30, %v79_v33 }
 0x10a   :  { %v98_v40 = vsel %vm97_vm2, %v77_v22, %v96_v36  ;;  %v81_v41 = vmul.f32 0.5, %v80_v37  ;;  %v188_v35 = vld [vmem:[#allocation3] sm:$0xff] }
 0x10b   :  { %v101_v42 = vsel %vm99_vm3, %v100_v38, %v98_v40  ;;  %v189_v38 = vld [vmem:[#allocation3 + $0x8] sm:$0xff] }
 0x10c   :  { %v103_v43 = vadd.f32 1e-06, %v101_v42  ;;  %v82_v44 = vsub.f32 1.5, %v81_v41  ;;  %v276_v41 = vld [vmem:[#allocation4] ss:$0 sm:$0xff] }
 0x10e   :  { %283 = vrcp.f32 %v103_v43  ;;  %v83_v45 = vmul.f32 %v282_v30, %v82_v44  ;;  %v129_v57 = vand.u32 2147483648, %v103_v43  ;;  %v127_v61 = vand.u32 2147483647, %v103_v43 }
 0x10f   :  { %vm123_vm7 = vweird.f32 %v103_v43 }
 0x110   :  { %v84_v46 = vmul.f32 %v83_v45, %v76_v25  ;;  %v130_v1 = vor.u32 1.1754944e-38, %v129_v57  ;;  %vm128_vm9 = vcmp.eq.f32.partialorder %v127_v61, 8.507059e+37 }
 0x112   :  { %v86_v48 = vsel %vm85_vm4, %v76_v25, %v84_v46  ;;  %v192_v25 = vld [vmem:[%s455_s5 + $0x10] sm:$0xff] }
 0x113   :  { %v89_v50 = vsel %vm87_vm5, %v88_v47, %v86_v48  ;;  %267 = vmatpush.msra.mxu2 %v192_v25  ;;  %218 = vmatpush.msra.mxu1 %v192_v25 }
 0x114   :  { %v284_v49 = vpop.eup %283  ;;  %v102_v54 = vadd.f32 1e-06, %v89_v50 }
 0x115   :  { %v119_v53 = vmul.f32 %v284_v49, %v103_v43  ;;  %vm124_vm6 = vweird.f32 %v284_v49  ;;  %268 = vmatpush.msra.mxu2 %v191_v18  ;;  %219 = vmatpush.msra.mxu1 %v191_v18 }
 0x116   :  { %285 = vrcp.f32 %v102_v54  ;;  %vm125_vm8 = vmor %vm123_vm7, %vm124_vm6  ;;  %v115_v11 = vand.u32 2147483648, %v102_v54  ;;  %v113_v15 = vand.u32 2147483647, %v102_v54  ;;  %vm109_vm11 = vweird.f32 %v102_v54 }
 0x117   :  { %v120_v56 = vsub.f32 1.0, %v119_v53  ;;  %269 = vmatpush.msra.mxu2 %v190_v26  ;;  %220 = vmatpush.msra.mxu1 %v190_v26 }
 0x118   :  { %v116_v16 = vor.u32 1.1754944e-38, %v115_v11  ;;  %vm114_vm13 = vcmp.eq.f32.partialorder %v113_v15, 8.507059e+37 }
 0x119   :  { %v121_v60 = vmul.f32 %v284_v49, %v120_v56 }
 0x11b   :  { %v122_v63 = vadd.f32 %v284_v49, %v121_v60 }
 0x11c   :  { %v286_v3 = vpop.eup %285 }
 0x11d   :  { %v126_v5 = vsel %vm125_vm8, %v284_v49, %v122_v63  ;;  %v105_v7 = vmul.f32 %v286_v3, %v102_v54  ;;  %vm110_vm10 = vweird.f32 %v286_v3 }
 0x11e   :  { %v131_v8 = vsel %vm128_vm9, %v130_v1, %v126_v5  ;;  %vm111_vm12 = vmor %vm109_vm11, %vm110_vm10 }
 0x11f   :  { %v138_v9 = vmul.f32 %v136_v4, %v131_v8  ;;  %v106_v10 = vsub.f32 1.0, %v105_v7 }
 0x121   :  { %v143_v12 = vadd.f32 %v274_v6, %v138_v9  ;;  %v107_v14 = vmul.f32 %v286_v3, %v106_v10 }
 0x123   :  { %145 = vst.msk [vmem:[#allocation2 + $0x8] sm:$0xff] %vm44_vm0, %v143_v12  ;;  %v108_v13 = vadd.f32 %v286_v3, %v107_v14 }
 0x125   :  { %v112_v19 = vsel %vm111_vm12, %v286_v3, %v108_v13 }
 0x126   :  { %v117_v20 = vsel %vm114_vm13, %v116_v16, %v112_v19 }
 0x127   :  { %v137_v21 = vmul.f32 %v135_v17, %v117_v20 }
 0x129   :  { %v142_v23 = vadd.f32 %v274_v6, %v137_v21 }
 0x12a   :  { %v147_v22 = vld [vmem:[#allocation2 + $0x8] sm:$0xff] }
 0x12b   :  { %255 = vmatmul.msk.f32.vlgmr.msra.gmra.mxu3 %vm44_vm0, %v147_v22  ;;  %144 = vst.msk [vmem:[#allocation2] sm:$0xff] %vm44_vm0, %v142_v23 }
 0x132   :  { %v146_v24 = vld [vmem:[#allocation2] sm:$0xff] }
 0x133   :  { %254 = vmatmul.msk.f32.vlgmr.msra.gmra.mxu0 %vm44_vm0, %v146_v24 }
 0x1ae   :  { %v183_v29 = vpop.f32.mrf.mxu3 }
 0x1af   :  { %v184_v30 = vadd.f32 %v275_v28, %v183_v29 }
 0x1b0   :  { %v180_v32 = vpop.f32.mrf.mxu0 }
 0x1b1   :  { %v187_v31 = vmax.f32 %v184_v30, 0.0  ;;  %v181_v33 = vadd.f32 %v275_v28, %v180_v32 }
 0x1b3   :  { %257 = vmatmul.msk.f32.vlgmr.msra.gmra.mxu2 %vm198_vm14, %v187_v31  ;;  %v186_v34 = vmax.f32 %v181_v33, 0.0 }
 0x1b5   :  { %256 = vmatmul.msk.f32.vlgmr.msra.gmra.mxu1 %vm198_vm14, %v186_v34 }
 0x232   :  { %v222_v36 = vpop.f32.mrf.mxu1 }
 0x233   :  { %v228_v37 = vadd.f32 %v222_v36, %v188_v35 }
 0x235   :  { %230 = vst.msk [vmem:[#allocation3] sm:$0xff] %vm44_vm0, %v228_v37 }
 0x236   :  { %v225_v39 = vpop.f32.mrf.mxu2 }
 0x237   :  { %v229_v40 = vadd.f32 %v225_v39, %v189_v38 }
 0x239   :  { %231 = vst.msk [vmem:[#allocation3 + $0x8] sm:$0xff] %vm44_vm0, %v229_v40 }
 0x23c   :  { %v237_v42 = vld [vmem:[#allocation3] sm:$0xff] }
 0x23d   :  { %v239_v43 = vadd.f32 %v237_v42, %v369_v2 }
 0x23f   :  { %v245_v44 = vadd.f32 %v276_v41, %v239_v43 }
 0x240   :  { %v238_v45 = vld [vmem:[#allocation3 + $0x8] sm:$0xff] }
 0x241   :  { %v240_v46 = vadd.f32 %v238_v45, %v362_v0  ;;  %247 = vst.msk [vmem:[%s457_s7] sm:$0xff] %vm44_vm0, %v245_v44 }
 0x243   :  { %v246_v47 = vadd.f32 %v276_v41, %v240_v46 }
 0x245   :  { %248 = vst.msk [vmem:[%s457_s7 + $0x8] sm:$0xff] %vm44_vm0, %v246_v47 }
 0x246   :  { %253 = vsyncpa [#allocation5], 1 }

// kernel: encoder_decoder_forward.15
= control target key start
LH: loop header
LB: loop body
LE: loop exit
PB: predicated region body
PF: predicated region fallthrough
CT: control target
= control target key end

     0   :  { %16 = vsyncpa [#allocation3], 0  ;;  %s1777_s0 = inlined_call_operand.vmem [shape: f32[2,8,32], index: 0, kind: input, shape index: {}]   ;;  %s1778_s1 = inlined_call_operand.vmem [shape: f32[2,8,32], index: 1, kind: input, shape index: {}]   ;;  %s1779_s2 = inlined_call_operand.vmem [shape: bf16[2,1,8], index: 2, kind: input, shape index: {}]   ;;  %s1780_s3 = inlined_call_operand.hbm [shape: f32[1,32], index: 3, kind: input, shape index: {}]   ;;  %s1781_s4 = inlined_call_operand.hbm [shape: f32[1,32], index: 4, kind: input, shape index: {}]   ;;  %s1782_s5 = inlined_call_operand.vmem [shape: f32[32,32], index: 5, kind: input, shape index: {}]   ;;  %s1783_s6 = inlined_call_operand.hbm [shape: f32[1,32], index: 6, kind: input, shape index: {}]   ;;  %s1784_s7 = inlined_call_operand.vmem [shape: f32[32,64], index: 7, kind: input, shape index: {}]   ;;  %s1785_s8 = inlined_call_operand.hbm [shape: f32[1,64], index: 8, kind: input, shape index: {}]   ;;  %s1786_s9 = inlined_call_operand.vmem [shape: f32[32,32], index: 9, kind: input, shape index: {}]   ;;  %s1787_s10 = inlined_call_operand.hbm [shape: f32[1,32], index: 10, kind: input, shape index: {}]   ;;  %s1788_s11 = inlined_call_operand.vmem [shape: f32[2,8,32], index: 11, kind: output, shape index: {}]  }
   0x1   :  { %17 = vsyncpa [#allocation5], 0 }
   0x2   :  { %18 = vsyncpa [#allocation8], 0  ;;  %s1557_s17 = smov 0   ;;  %s1559_s18 = smov 0  }
   0x3   :  { %s1561_s19 = smov 0  }
   0x4 LB: > { %s341_s22 = sshll.u32 %s1781_s4, 4  ;;  %s1148_s23 = sadd.s32 4294967295, %s1482_s19   ;;  %s1482_s19 = sphi %s1561_s19, %s24_s19   ;;  %s1478_s18 = sphi %s1559_s18, %s1797_s18   ;;  %s1474_s17 = sphi %s1557_s17, %s1796_s17   ;;  %s342_s22 = int_to_ptr.hbm [resolvable:$true] %s341_s22 }
   0x5   : > { %p1150_p0 = scmp.ge.s32.totalorder %s1482_s19, 1  ;;  %p317_p1 = scmp.lt.s32.totalorder %s1482_s19, 3 }
   0x6   : > { %p1578_p2 = scmp.eq.s32.totalorder %s1148_s23, 0  ;;  %s1484_s26 = smov [#allocation4]  }
   0x7   : > { %p1582_p3 = pnand %p1150_p0, %p317_p1  ;;  %s343_s27 = sshll.u32 %s1484_s26, 4  ;;  %s344_s27 = int_to_ptr.vmem [resolvable:$true] %s343_s27 }
   0x8   : > { %s371_s30 = sshll.u32 %s1785_s8, 4  ;;  %s1485_s13 = smov [#allocation7]   ;;  %s372_s30 = int_to_ptr.hbm [resolvable:$true] %s371_s30 }
   0x9   : > { %p1203_p4 = pneg %p1582_p3  ;;  %s373_s14 = sshll.u32 %s1485_s13, 4  ;;  %s374_s14 = int_to_ptr.vmem [resolvable:$true] %s373_s14 }
   0xa   : > { %s36_s15 = sadd.s32 1, %s1478_s18  ;;  %s329_s21 = sshll.u32 %s1780_s3, 4  ;;  %s330_s21 = int_to_ptr.hbm [resolvable:$true] %s329_s21 }
   0xb   : > { %p1593_p5 = pnand %p1578_p2, %p1203_p4  ;;  %p38_p6 = scmp.ge.s32.totalorder %s36_s15, 2 }
   0xc   : > { %s1486_s23 = smov [#allocation2]   ;;  %s356_s13 = sshll.u32 %s1783_s6, 4  ;;  %s357_s13 = int_to_ptr.hbm [resolvable:$true] %s356_s13 }
   0xd   : > { %1209 = dma.hbm_to_vmem [thread:$0]  (!%p1593_p5), %s342_s22, 16, %s344_s27, [#allocation5]  }
   0xe   : > { %1215 = dma.hbm_to_vmem [thread:$0]  (!%p1593_p5), %s372_s30, 16, %s374_s14, [#allocation8]  }
   0xf   : > { %s1799_s15 = smov (%p38_p6, %s36_s15), 0  ;;  %s331_s26 = sshll.u32 %s1486_s23, 4  ;;  %s332_s26 = int_to_ptr.vmem [resolvable:$true] %s331_s26 }
  0x10   : > { %1206 = dma.hbm_to_vmem [thread:$0]  (!%p1593_p5), %s330_s21, 16, %s332_s26, [#allocation3]  }
  0x11   : > { %s386_s30 = sshll.u32 %s1787_s10, 4  ;;  %s1487_s14 = smov [#allocation6]   ;;  %s387_s30 = int_to_ptr.hbm [resolvable:$true] %s386_s30 }
  0x12   : > { %s358_s16 = sshll.u32 %s1487_s14, 4  ;;  %s1488_s20 = smov [#allocation9]   ;;  %s359_s16 = int_to_ptr.vmem [resolvable:$true] %s358_s16 }
  0x13   : > { %1212 = dma.hbm_to_vmem [thread:$0]  (!%p1593_p5), %s357_s13, 16, %s359_s16, [#allocation5]  }
  0x14   : > { %s388_s23 = sshll.u32 %s1488_s20, 4  ;;  %424 = sbr.rel (%p1582_p3) target bundleno = 1361 (0x551), region = 64  ;;  %s389_s23 = int_to_ptr.vmem [resolvable:$true] %s388_s23 }
  0x15   : > { %1218 = dma.hbm_to_vmem [thread:$0]  (!%p1593_p5), %s387_s30, 16, %s389_s23, [#allocation8]  }
  0x19   : > { %1461 = dma.done.wait (%p1578_p2), [#allocation3], 16  }
  0x1a   : > { %1463 = vsyncadd (%p1578_p2), [#allocation3], 4294967280 }
  0x1b   : > { %1465 = dma.done.wait (%p1578_p2), [#allocation5], 32  }
  0x1c   : > { %1467 = vsyncadd (%p1578_p2), [#allocation5], 4294967264 }
  0x1d   : > { %1469 = dma.done.wait (%p1578_p2), [#allocation8], 32  }
  0x1e   : > { %1471 = vsyncadd (%p1578_p2), [#allocation8], 4294967264  ;;  %p496_p7 = scmp.lt.s32.totalorder %s1474_s17, 1  ;;  %vm520_vm0 = vcmask 261120   ;;  %v1489_v2 = vmov 32.0   ;;  %v609_v14 = vld [vmem:[%s1784_s7 + $0x18] sm:$0xff] }
  0x1f   : > { %1276 = vrcp.f32 %v1489_v2  ;;  %629 = vmatpush.msra.mxu1 %v609_v14  ;;  %v608_v15 = vld [vmem:[%s1784_s7 + $0x10] sm:$0xff]  ;;  %v607_v16 = vld [vmem:[%s1784_s7 + $0x8] sm:$0xff]  ;;  %v606_v17 = vld [vmem:[%s1784_s7] sm:$0xff]  ;;  %vm655_vm8 = vcmask 64512   ;;  %s1490_s27 = smov 120   ;;  %s1491_s30 = smov 112  }
  0x20   : > { %s1801_s17 = smov (!%p496_p7, %s1474_s17), 1  ;;  %v578_v19 = vld [vmem:[%s1782_s5 + $0x18] sm:$0xff]  ;;  %v577_v20 = vld [vmem:[%s1782_s5 + $0x10] sm:$0xff]  ;;  %v576_v21 = vld [vmem:[%s1782_s5 + $0x8] sm:$0xff]  ;;  %s1492_s14 = smov 104  }
  0x21   : > { %s1638_s25 = sshll.u32 %s1801_s17, 3  ;;  %630 = vmatpush.msra.mxu1 %v608_v15  ;;  %598 = vmatpush.msra.mxu0 %v578_v19  ;;  %v575_v22 = vld [vmem:[%s1782_s5] sm:$0xff]  ;;  %s509_s23 = scalar_lea.vmem %s1779_s2, %s1801_s17 }
  0x22   : > { %s502_s26 = scalar_lea.vmem %s1777_s0, %s1638_s25  ;;  %s506_s16 = scalar_lea.vmem %s1778_s1, %s1638_s25  ;;  %v1271_v40 = vld [vmem:[#allocation2] ss:$0 sm:$0xff]  ;;  %v1272_v47 = vld [vmem:[#allocation4] ss:$0 sm:$0xff]  ;;  %v1273_v51 = vld [vmem:[#allocation7] ss:$0 sm:$0xff] }
  0x23   : > { %v1644_v0 = vld [vmem:[%s502_s26] sm:$0xff]  ;;  %631 = vmatpush.msra.mxu1 %v607_v16  ;;  %599 = vmatpush.msra.mxu0 %v577_v20  ;;  %s1493_s17 = smov 96   ;;  %s1494_s12 = smov 8  }
  0x24   : > { %v521_v1 = vsel %vm520_vm0, %v1644_v0, 0.0  ;;  %v574_v18 = vld [vmem:[%s506_s16] sm:$0xff]  ;;  %s1495_s21 = smov 16   ;;  %s1496_s26 = smov 24  }
  0x25   : > { %522 = vadd.xlane.f32.xlu0 %v521_v1  ;;  %v1277_v3 = vpop.eup %1276  ;;  %632 = vmatpush.msra.mxu1 %v606_v17  ;;  %v1274_v54 = vld [vmem:[#allocation6] ss:$0 sm:$0xff]  ;;  %v652_v1 = vld [vmem:[%s509_s23] sm:$0x1]  ;;  %s516_s23 = scalar_lea.vmem %s1788_s11, %s1638_s25 }
  0x26   : > { %v525_v4 = vmul.f32 32.0, %v1277_v3  ;;  %vm529_vm1 = vweird.f32 %v1277_v3  ;;  %1167 = vmatmul.msk.f32.vlgmr.msra.gmra.mxu1 %vm520_vm0, %v574_v18  ;;  %600 = vmatpush.msra.mxu0 %v576_v21 }
  0x28   : > { %v526_v5 = vsub.f32 1.0, %v525_v4  ;;  %601 = vmatpush.msra.mxu0 %v575_v22 }
  0x2a   : > { %v527_v6 = vmul.f32 %v1277_v3, %v526_v5 }
  0x2c   : > { %v528_v7 = vadd.f32 %v1277_v3, %v527_v6 }
  0x2e   : > { %v530_v8 = vsel %vm529_vm1, %v1277_v3, %v528_v7  ;;  %v653_v3 = vunpack.c.l.bf16 %v652_v1 }
  0x30   : > { %v654_v4 = vperm.slane %v653_v3, 0 }
  0x98   : > { %v523_v9 = vpop.xlane.xlu0 %522 }
  0x99   : > { %v531_v10 = vmul.f32 %v530_v8, %v523_v9 }
  0x9b   : > { %v532_v11 = vsub.f32 %v1644_v0, %v531_v10 }
  0x9d   : > { %v533_v12 = vmul.f32 %v532_v11, %v532_v11  ;;  %v568_v45 = vmul.f32 %v1271_v40, %v532_v11 }
  0x9f   : > { %v534_v13 = vsel %vm520_vm0, %v533_v12, 0.0 }
  0xa0   : > { %535 = vadd.xlane.f32.xlu0 %v534_v13 }
  0xa3   : > { %v634_v52 = vpop.f32.mrf.mxu1 }
  0xa4   : > { %v1680_v53 = vadd.f32 %v1273_v51, %v634_v52 }
  0xa6   : > { %646 = vrot.lane.b32.xlu1 %v1680_v53, %s1490_s27  ;;  %648 = vrot.lane.b32.xlu2 %v1680_v53, %s1491_s30 }
  0xa7   : > { %1168 = vmatpush.xpose.msk.msra.mxu2 %vm655_vm8, %v1680_v53 }
  0xae   : > { %650 = vrot.lane.b32.xlu2 %v1680_v53, %s1492_s14 }
 0x100   : > { %v1688_v58 = vpop.permute.xlu2 %648 }
 0x101   : > { %1172 = vmatpush.xpose.msk.msrb.mxu2 %vm655_vm8, %v1688_v58 }
 0x108   : > { %v1692_v59 = vpop.permute.xlu2 %650 }
 0x113   : > { %v536_v23 = vpop.xlane.xlu0 %535 }
 0x114   : > { %v537_v24 = vmul.f32 0.032258064, %v536_v23 }
 0x116   : > { %1278 = vrsqrt.f32 %v537_v24  ;;  %vm545_vm2 = vcmp.eq.f32.partialorder %v537_v24, inf  ;;  %v548_v32 = vand.u32 2147483648, %v537_v24  ;;  %vm547_vm3 = vcmp.eq.f32.partialorder %v537_v24, 0.0 }
 0x118   : > { %v647_v60 = vpop.permute.xlu1 %646 }
 0x119   : > { %1170 = vmatpush.xpose.msk.msra.mxu3 %vm655_vm8, %v647_v60 }
 0x11c   : > { %v1279_v25 = vpop.eup %1278 }
 0x11d   : > { %v539_v26 = vmul.f32 %v1279_v25, %v537_v24  ;;  %1174 = vmatpush.xpose.msk.msrb.mxu3 %vm655_vm8, %v1692_v59 }
 0x11f   : > { %v540_v27 = vmul.f32 %v1279_v25, %v539_v26 }
 0x121   : > { %v541_v28 = vmul.f32 0.5, %v540_v27 }
 0x123   : > { %v542_v29 = vsub.f32 1.5, %v541_v28 }
 0x125   : > { %v543_v30 = vmul.f32 %v1279_v25, %v542_v29 }
 0x127   : > { %v544_v31 = vmul.f32 %v543_v30, %v537_v24 }
 0x129   : > { %v546_v33 = vsel %vm545_vm2, %v537_v24, %v544_v31 }
 0x12a   : > { %v549_v34 = vsel %vm547_vm3, %v548_v32, %v546_v33 }
 0x12b   : > { %v550_v35 = vadd.f32 1e-06, %v549_v34 }
 0x12d   : > { %1280 = vrcp.f32 %v550_v35  ;;  %v562_v39 = vand.u32 2147483648, %v550_v35  ;;  %v560_v42 = vand.u32 2147483647, %v550_v35  ;;  %vm556_vm5 = vweird.f32 %v550_v35 }
 0x12f   : > { %v563_v44 = vor.u32 1.1754944e-38, %v562_v39  ;;  %vm561_vm7 = vcmp.eq.f32.partialorder %v560_v42, 8.507059e+37 }
 0x133   : > { %v1281_v36 = vpop.eup %1280 }
 0x134   : > { %v552_v37 = vmul.f32 %v1281_v36, %v550_v35  ;;  %vm557_vm4 = vweird.f32 %v1281_v36 }
 0x135   : > { %vm558_vm6 = vmor %vm556_vm5, %vm557_vm4 }
 0x136   : > { %v553_v38 = vsub.f32 1.0, %v552_v37  ;;  %v1266_v37 = vpack.i.bf16 %v1692_v59, %v1688_v58 }
 0x138   : > { %v554_v41 = vmul.f32 %v1281_v36, %v553_v38 }
 0x13a   : > { %v555_v43 = vadd.f32 %v1281_v36, %v554_v41 }
 0x13c   : > { %v559_v46 = vsel %vm558_vm6, %v1281_v36, %v555_v43 }
 0x13d   : > { %v564_v48 = vsel %vm561_vm7, %v563_v44, %v559_v46 }
 0x13e   : > { %v569_v49 = vmul.f32 %v568_v45, %v564_v48 }
 0x140   : > { %v573_v50 = vadd.f32 %v1272_v47, %v569_v49 }
 0x142   : > { %1166 = vmatmul.msk.f32.vlgmr.msra.gmra.mxu0 %vm520_vm0, %v573_v50 }
 0x1bf   : > { %v603_v55 = vpop.f32.mrf.mxu0 }
 0x1c0   : > { %v604_v56 = vadd.f32 %v1274_v54, %v603_v55 }
 0x1c2   : > { %v637_v57 = vmul.f32 0.35355338, %v604_v56 }
 0x1c4   : > { %641 = vrot.lane.b32.xlu0 %v637_v57, %s1491_s30  ;;  %639 = vrot.lane.b32.xlu1 %v637_v57, %s1490_s27 }
 0x1c5   : > { %1169 = vmatmul.msk.f32.vlgmr.msra.gmra.mxu2 %vm655_vm8, %v637_v57 }
 0x1cc   : > { %643 = vrot.lane.b32.xlu1 %v637_v57, %s1492_s14 }
 0x236   : > { %v642_v61 = vpop.permute.xlu0 %641  ;;  %v640_v62 = vpop.permute.xlu1 %639 }
 0x237   : > { %1171 = vmatmul.msk.f32.vlgmr.msra.gmra.mxu3 %vm655_vm8, %v640_v62  ;;  %1173 = vmatmul.msk.f32.vlgmr.msrb.gmra.mxu2 %vm655_vm8, %v642_v61 }
 0x23e   : > { %v644_v63 = vpop.permute.xlu1 %643 }
 0x23f   : > { %1175 = vmatmul.msk.f32.vlgmr.msrb.gmra.mxu3 %vm655_vm8, %v644_v63 }
 0x248   : > { %v677_v2 = vpop.f32.mrf.mxu2 }
 0x249   : > { %v678_v11 = vadd.f32 %v677_v2, %v654_v4 }
 0x24b   : > { %v752_v15 = vsel %vm655_vm8, %v678_v11, -inf }
 0x2ba   : > { %v701_v5 = vpop.f32.mrf.mxu3  ;;  %v725_v6 = vpop.f32.mrf.mxu2 }
 0x2bb   : > { %v702_v7 = vadd.f32 %v701_v5, %v654_v4  ;;  %v726_v8 = vadd.f32 %v725_v6, %v654_v4 }
 0x2bd   : > { %v755_v9 = vsel %vm655_vm8, %v702_v7, -inf  ;;  %v758_v10 = vsel %vm655_vm8, %v726_v8, -inf }
 0x2be   : > { %756 = vmax.xlane.f32.xlu0 %v755_v9  ;;  %759 = vmax.xlane.f32.xlu2 %v758_v10 }
 0x2c2   : > { %v749_v12 = vpop.f32.mrf.mxu3 }
 0x2c3   : > { %v750_v13 = vadd.f32 %v749_v12, %v654_v4 }
 0x2c5   : > { %v761_v14 = vsel %vm655_vm8, %v750_v13, -inf }
 0x2c6   : > { %762 = vmax.xlane.f32.xlu1 %v761_v14  ;;  %753 = vmax.xlane.f32.xlu2 %v752_v15 }
 0x2d2   : > { %874 = vrot.lane.b32.xlu0 %v647_v60, %s1493_s17 }
 0x331   : > { %v760_v16 = vpop.xlane.xlu2 %759  ;;  %v757_v17 = vpop.xlane.xlu0 %756 }
 0x332   : > { %v766_v18 = vsub.f32 %v726_v8, %v760_v16  ;;  %v765_v20 = vsub.f32 %v702_v7, %v757_v17 }
 0x334   : > { %v772_v19 = vmul.f32 1.442695, %v766_v18  ;;  %v770_v21 = vmul.f32 1.442695, %v765_v20 }
 0x336   : > { %1282 = vpow2.f32 %v772_v19 }
 0x337   : > { %1284 = vpow2.f32 %v770_v21 }
 0x339   : > { %v763_v22 = vpop.xlane.xlu1 %762  ;;  %v754_v24 = vpop.xlane.xlu2 %753 }
 0x33a   : > { %v767_v23 = vsub.f32 %v750_v13, %v763_v22  ;;  %v764_v27 = vsub.f32 %v678_v11, %v754_v24 }
 0x33c   : > { %v774_v25 = vmul.f32 1.442695, %v767_v23  ;;  %v1709_v26 = vpop.eup %1282  ;;  %v768_v29 = vmul.f32 1.442695, %v764_v27 }
 0x33d   : > { %v782_v28 = vsel %vm655_vm8, %v1709_v26, 0.0  ;;  %v1285_v30 = vpop.eup %1284 }
 0x33e   : > { %1286 = vpow2.f32 %v774_v25  ;;  %783 = vadd.xlane.f32.xlu2 %v782_v28  ;;  %v779_v34 = vsel %vm655_vm8, %v1285_v30, 0.0 }
 0x33f   : > { %1288 = vpow2.f32 %v768_v29 }
 0x344   : > { %v1713_v31 = vpop.eup %1286  ;;  %v875_v32 = vpop.permute.xlu0 %874 }
 0x345   : > { %895 = vmatpush.msrb.mxu1 %v875_v32  ;;  %v785_v33 = vsel %vm655_vm8, %v1713_v31, 0.0  ;;  %v1718_v35 = vpop.eup %1288 }
 0x346   : > { %786 = vadd.xlane.f32.xlu1 %v785_v33  ;;  %780 = vadd.xlane.f32.xlu2 %v779_v34  ;;  %v776_v36 = vsel %vm655_vm8, %v1718_v35, 0.0  ;;  %v970_v34 = vld [vmem:[%s1786_s9 + $0x8] sm:$0xff] }
 0x34e   : > { %777 = vadd.xlane.f32.xlu2 %v776_v36 }
 0x35f   : > { %1267 = vrot.lane.b32.xlu1 %v1266_v37, %s1493_s17 }
 0x366   : > { %848 = vrot.lane.b32.xlu2 %v1680_v53, %s1493_s17 }
 0x3b1   : > { %v784_v38 = vpop.xlane.xlu2 %783 }
 0x3b2   : > { %1290 = vrcp.f32 %v784_v38  ;;  %vm821_vm10 = vweird.f32 %v784_v38  ;;  %v827_v56 = vand.u32 2147483648, %v784_v38  ;;  %v825_v4 = vand.u32 2147483647, %v784_v38 }
 0x3b4   : > { %v828_v11 = vor.u32 1.1754944e-38, %v827_v56  ;;  %vm826_vm5 = vcmp.eq.f32.partialorder %v825_v4, 8.507059e+37 }
 0x3b8   : > { %v1291_v40 = vpop.eup %1290 }
 0x3b9   : > { %v787_v39 = vpop.xlane.xlu1 %786  ;;  %v781_v41 = vpop.xlane.xlu2 %780  ;;  %v817_v42 = vmul.f32 %v1291_v40, %v784_v38  ;;  %vm822_vm11 = vweird.f32 %v1291_v40 }
 0x3ba   : > { %1292 = vrcp.f32 %v787_v39  ;;  %v813_v53 = vand.u32 2147483648, %v781_v41  ;;  %v811_v55 = vand.u32 2147483647, %v781_v41  ;;  %vm807_vm12 = vweird.f32 %v781_v41  ;;  %vm1729_vm1 = vmor %vm821_vm10, %vm822_vm11 }
 0x3bb   : > { %1294 = vrcp.f32 %v781_v41  ;;  %v818_v45 = vsub.f32 1.0, %v817_v42  ;;  %v841_v62 = vand.u32 2147483648, %v787_v39  ;;  %vm835_vm2 = vweird.f32 %v787_v39 }
 0x3bc   : > { %v814_v61 = vor.u32 1.1754944e-38, %v813_v53  ;;  %vm812_vm15 = vcmp.eq.f32.partialorder %v811_v55, 8.507059e+37  ;;  %v839_v5 = vand.u32 2147483647, %v787_v39  ;;  %vm965_vm11 = vcmask 130048  }
 0x3bd   : > { %v819_v51 = vmul.f32 %v1291_v40, %v818_v45  ;;  %v842_v14 = vor.u32 1.1754944e-38, %v841_v62 }
 0x3be   : > { %vm840_vm6 = vcmp.eq.f32.partialorder %v839_v5, 8.507059e+37 }
 0x3bf   : > { %v820_v59 = vadd.f32 %v1291_v40, %v819_v51 }
 0x3c0   : > { %v1293_v43 = vpop.eup %1292 }
 0x3c1   : > { %v1295_v44 = vpop.eup %1294  ;;  %v831_v46 = vmul.f32 %v1293_v43, %v787_v39  ;;  %v778_v48 = vpop.xlane.xlu2 %777  ;;  %vm836_vm13 = vweird.f32 %v1293_v43  ;;  %v824_v10 = vsel %vm1729_vm1, %v1291_v40, %v820_v59 }
 0x3c2   : > { %v803_v47 = vmul.f32 %v1295_v44, %v781_v41  ;;  %1296 = vrcp.f32 %v778_v48  ;;  %vm808_vm9 = vweird.f32 %v1295_v44  ;;  %vm1733_vm3 = vmor %vm835_vm2, %vm836_vm13  ;;  %v799_v13 = vand.u32 2147483648, %v778_v48 }
 0x3c3   : > { %v832_v49 = vsub.f32 1.0, %v831_v46  ;;  %vm809_vm14 = vmor %vm807_vm12, %vm808_vm9  ;;  %v797_v16 = vand.u32 2147483647, %v778_v48  ;;  %v829_v17 = vsel %vm826_vm5, %v828_v11, %v824_v10  ;;  %vm793_vm7 = vweird.f32 %v778_v48 }
 0x3c4   : > { %v804_v50 = vsub.f32 1.0, %v803_v47  ;;  %v800_v20 = vor.u32 1.1754944e-38, %v799_v13  ;;  %v846_v27 = vmul.f32 %v1709_v26, %v829_v17  ;;  %v972_v26 = vld [vmem:[%s1786_s9 + $0x18] sm:$0xff]  ;;  %vm967_vm12 = vcmask 195584  }
 0x3c5   : > { %v833_v52 = vmul.f32 %v1293_v43, %v832_v49  ;;  %vm798_vm10 = vcmp.eq.f32.partialorder %v797_v16, 8.507059e+37 }
 0x3c6   : > { %v805_v54 = vmul.f32 %v1295_v44, %v804_v50 }
 0x3c7   : > { %v834_v60 = vadd.f32 %v1293_v43, %v833_v52 }
 0x3c8   : > { %v806_v57 = vadd.f32 %v1295_v44, %v805_v54  ;;  %v1297_v58 = vpop.eup %1296 }
 0x3c9   : > { %v789_v63 = vmul.f32 %v1297_v58, %v778_v48  ;;  %v849_v1 = vpop.permute.xlu2 %848  ;;  %v838_v12 = vsel %vm1733_vm3, %v1293_v43, %v834_v60  ;;  %vm794_vm4 = vweird.f32 %v1297_v58  ;;  %v1275_v43 = vld [vmem:[#allocation9] ss:$0 sm:$0xff] }
 0x3ca   : > { %v810_v2 = vsel %vm809_vm14, %v1295_v44, %v806_v57  ;;  %869 = vmatpush.msrb.mxu0 %v849_v1  ;;  %v843_v18 = vsel %vm840_vm6, %v842_v14, %v838_v12  ;;  %vm795_vm9 = vmor %vm793_vm7, %vm794_vm4 }
 0x3cb   : > { %v815_v6 = vsel %vm812_vm15, %v814_v61, %v810_v2  ;;  %v790_v8 = vsub.f32 1.0, %v789_v63  ;;  %v847_v28 = vmul.f32 %v1713_v31, %v843_v18  ;;  %v971_v31 = vld [vmem:[%s1786_s9 + $0x10] sm:$0xff] }
 0x3cc   : > { %v845_v9 = vmul.f32 %v1285_v30, %v815_v6  ;;  %992 = vmatpush.msra.mxu0 %v972_v26 }
 0x3cd   : > { %v791_v15 = vmul.f32 %v1297_v58, %v790_v8 }
 0x3ce   : > { %1177 = vmatmul.msk.f32.vlgmr.msrb.gmra.mxu1 %vm655_vm8, %v845_v9  ;;  %993 = vmatpush.msra.mxu0 %v971_v31 }
 0x3cf   : > { %v792_v19 = vadd.f32 %v1297_v58, %v791_v15 }
 0x3d0   : > { %994 = vmatpush.msra.mxu0 %v970_v34 }
 0x3d1   : > { %v1268_v21 = vpop.permute.xlu1 %1267  ;;  %v796_v24 = vsel %vm795_vm9, %v1297_v58, %v792_v19 }
 0x3d2   : > { %v1270_v22 = vunpack.i.h.bf16 %v1268_v21  ;;  %v1269_v23 = vunpack.i.l.bf16 %v1268_v21  ;;  %v801_v25 = vsel %vm798_vm10, %v800_v20, %v796_v24 }
 0x3d3   : > { %v844_v29 = vmul.f32 %v1718_v35, %v801_v25  ;;  %v969_v35 = vld [vmem:[%s1786_s9] sm:$0xff] }
 0x3d4   : > { %921 = vmatpush.msra.mxu2 %v1269_v23  ;;  %947 = vmatpush.msra.mxu3 %v1270_v22 }
 0x3d5   : > { %1178 = vmatmul.msk.f32.vlgmr.msra.gmra.mxu2 %vm655_vm8, %v846_v27  ;;  %1179 = vmatmul.msk.f32.vlgmr.msra.gmra.mxu3 %vm655_vm8, %v847_v28 }
 0x3d6   : > { %1176 = vmatmul.msk.f32.vlgmr.msrb.gmra.mxu0 %vm655_vm8, %v844_v29 }
 0x3d7   : > { %995 = vmatpush.msra.mxu0 %v969_v35 }
 0x44b   : > { %v897_v30 = vpop.f32.mrf.mxu1 }
 0x44c   : > { %953 = vrot.lane.b32.xlu0 %v897_v30, %s1494_s12 }
 0x453   : > { %v871_v37 = vpop.f32.mrf.mxu0 }
 0x458   : > { %v923_v32 = vpop.f32.mrf.mxu2  ;;  %v949_v33 = vpop.f32.mrf.mxu3 }
 0x459   : > { %957 = vrot.lane.b32.xlu1 %v923_v32, %s1495_s21  ;;  %961 = vrot.lane.b32.xlu0 %v949_v33, %s1496_s26 }
 0x4be   : > { %v954_v36 = vpop.permute.xlu0 %953 }
 0x4bf   : > { %v964_v38 = vsel %vm655_vm8, %v871_v37, %v954_v36 }
 0x4cb   : > { %v958_v39 = vpop.permute.xlu1 %957  ;;  %v962_v40 = vpop.permute.xlu0 %961 }
 0x4cc   : > { %v966_v41 = vsel %vm965_vm11, %v964_v38, %v958_v39 }
 0x4cd   : > { %v968_v42 = vsel %vm967_vm12, %v966_v41, %v962_v40 }
 0x4ce   : > { %1180 = vmatmul.msk.f32.vlgmr.msra.gmra.mxu0 %vm520_vm0, %v968_v42 }
 0x54b   : > { %v997_v44 = vpop.f32.mrf.mxu0 }
 0x54c   : > { %v998_v45 = vadd.f32 %v1275_v43, %v997_v44 }
 0x54e   : > { %v1000_v46 = vadd.f32 %v998_v45, %v1644_v0 }
 0x550   : > { %1001 = vst.msk [vmem:[%s516_s23] sm:$0xff] %vm520_vm0, %v1000_v46 }
 0x551 PF: > { %s24_s19 = sadd.s32 1, %s1482_s19   ;;  %s1796_s17 = smov %s1478_s18 }
 0x552   : > { %p21_p8 = scmp.ge.s32.totalorder %s24_s19, 4   ;;  %s1797_s18 = smov %s1799_s15 }
 0x554   :  { %23 = sbr.rel (!%p21_p8) target bundleno = 4 (0x4), region = 121 }
 0x559   :  { %1027 = vsyncpa [#allocation3], 1 }
 0x55a   :  { %1029 = vsyncpa [#allocation3 + $0x1], 1 }
 0x55b   :  { %1030 = vsyncpa [#allocation5], 1 }
 0x55c   :  { %1031 = vsyncpa [#allocation8], 1 }

// kernel: encoder_decoder_forward.17
= control target key start
LH: loop header
LB: loop body
LE: loop exit
PB: predicated region body
PF: predicated region fallthrough
CT: control target
= control target key end

     0   :  { %15 = vsyncpa [#allocation3], 0  ;;  %s1661_s0 = inlined_call_operand.vmem [shape: f32[2,8,32], index: 0, kind: input, shape index: {}]   ;;  %s1662_s1 = inlined_call_operand.vmem [shape: bf16[2,8,8], index: 1, kind: input, shape index: {}]   ;;  %s1663_s2 = inlined_call_operand.vmem [shape: f32[1,32], index: 2, kind: input, shape index: {}]   ;;  %s1664_s3 = inlined_call_operand.hbm [shape: f32[1,32], index: 3, kind: input, shape index: {}]   ;;  %s1665_s4 = inlined_call_operand.vmem [shape: f32[32,32], index: 4, kind: input, shape index: {}]   ;;  %s1666_s5 = inlined_call_operand.hbm [shape: f32[1,32], index: 5, kind: input, shape index: {}]   ;;  %s1667_s6 = inlined_call_operand.vmem [shape: f32[32,64], index: 6, kind: input, shape index: {}]   ;;  %s1668_s7 = inlined_call_operand.hbm [shape: f32[1,64], index: 7, kind: input, shape index: {}]   ;;  %s1669_s8 = inlined_call_operand.vmem [shape: f32[32,32], index: 8, kind: input, shape index: {}]   ;;  %s1670_s9 = inlined_call_operand.hbm [shape: f32[1,32], index: 9, kind: input, shape index: {}]   ;;  %s1671_s10 = inlined_call_operand.vmem [shape: f32[2,8,32], index: 10, kind: output, shape index: {}]  }
   0x1   :  { %16 = vsyncpa [#allocation5], 0 }
   0x2   :  { %17 = vsyncpa [#allocation8], 0  ;;  %s1445_s13 = smov 0   ;;  %s1447_s14 = smov 0  }
   0x3   :  { %s1449_s15 = smov 0  }
   0x4 LB: > { %s322_s18 = sshll.u32 %s1666_s5, 4  ;;  %s1084_s19 = sadd.s32 4294967295, %s1376_s15   ;;  %s1376_s15 = sphi %s1449_s15, %s23_s15   ;;  %s1372_s14 = sphi %s1447_s14, %s1678_s14   ;;  %s1368_s13 = sphi %s1445_s13, %s1677_s13   ;;  %s323_s18 = int_to_ptr.hbm [resolvable:$true] %s322_s18 }
   0x5   : > { %p1086_p0 = scmp.ge.s32.totalorder %s1376_s15, 1  ;;  %p292_p1 = scmp.lt.s32.totalorder %s1376_s15, 3 }
   0x6   : > { %p1466_p2 = scmp.eq.s32.totalorder %s1084_s19, 0  ;;  %s1378_s22 = smov [#allocation4]  }
   0x7   : > { %p1470_p3 = pnand %p1086_p0, %p292_p1  ;;  %s324_s23 = sshll.u32 %s1378_s22, 4  ;;  %s325_s23 = int_to_ptr.vmem [resolvable:$true] %s324_s23 }
   0x8   : > { %s35_s25 = sadd.s32 1, %s1372_s14  ;;  %s307_s28 = sshll.u32 %s1664_s3, 4  ;;  %s308_s28 = int_to_ptr.hbm [resolvable:$true] %s307_s28 }
   0x9   : > { %p1133_p4 = pneg %p1470_p3  ;;  %p37_p6 = scmp.ge.s32.totalorder %s35_s25, 2 }
   0xa   : > { %s337_s11 = sshll.u32 %s1668_s7, 4  ;;  %s1379_s12 = smov [#allocation2]   ;;  %s338_s11 = int_to_ptr.hbm [resolvable:$true] %s337_s11 }
   0xb   : > { %p1478_p5 = pnand %p1466_p2, %p1133_p4  ;;  %s1680_s25 = smov (%p37_p6, %s35_s25), 0 }
   0xc   : > { %s309_s16 = sshll.u32 %s1379_s12, 4  ;;  %s1380_s17 = smov [#allocation6]   ;;  %s310_s16 = int_to_ptr.vmem [resolvable:$true] %s309_s16 }
   0xd   : > { %1139 = dma.hbm_to_vmem [thread:$0]  (!%p1478_p5), %s323_s18, 16, %s325_s23, [#allocation5]  }
   0xe   : > { %1136 = dma.hbm_to_vmem [thread:$0]  (!%p1478_p5), %s308_s28, 16, %s310_s16, [#allocation3]  }
   0xf   : > { %s339_s19 = sshll.u32 %s1380_s17, 4  ;;  %s352_s27 = sshll.u32 %s1670_s9, 4  ;;  %s340_s19 = int_to_ptr.vmem [resolvable:$true] %s339_s19  ;;  %s353_s27 = int_to_ptr.hbm [resolvable:$true] %s352_s27 }
  0x10   : > { %1142 = dma.hbm_to_vmem [thread:$0]  (!%p1478_p5), %s338_s11, 16, %s340_s19, [#allocation5]  }
  0x11   : > { %s1381_s18 = smov [#allocation7]   ;;  %387 = sbr.rel (%p1470_p3) target bundleno = 1364 (0x554), region = 60 }
  0x12   : > { %s354_s23 = sshll.u32 %s1381_s18, 4  ;;  %s355_s23 = int_to_ptr.vmem [resolvable:$true] %s354_s23 }
  0x13   : > { %1145 = dma.hbm_to_vmem [thread:$0]  (!%p1478_p5), %s353_s27, 16, %s355_s23, [#allocation8]  }
  0x16   : > { %1355 = dma.done.wait (%p1466_p2), [#allocation3], 16  }
  0x17   : > { %1357 = vsyncadd (%p1466_p2), [#allocation3], 4294967280 }
  0x18   : > { %1359 = dma.done.wait (%p1466_p2), [#allocation5], 32  }
  0x19   : > { %1361 = vsyncadd (%p1466_p2), [#allocation5], 4294967264 }
  0x1a   : > { %1363 = dma.done.wait (%p1466_p2), [#allocation8], 16  }
  0x1b   : > { %1365 = vsyncadd (%p1466_p2), [#allocation8], 4294967280  ;;  %p452_p7 = scmp.lt.s32.totalorder %s1368_s13, 1  ;;  %vm476_vm0 = vcmask 261120   ;;  %v1382_v2 = vmov 32.0   ;;  %v533_v14 = vld [vmem:[%s1665_s4 + $0x18] sm:$0xff] }
  0x1c   : > { %1200 = vrcp.f32 %v1382_v2  ;;  %v564_v15 = vld [vmem:[%s1667_s6 + $0x18] sm:$0xff]  ;;  %v532_v16 = vld [vmem:[%s1665_s4 + $0x10] sm:$0xff]  ;;  %553 = vmatpush.msra.mxu0 %v533_v14  ;;  %v531_v18 = vld [vmem:[%s1665_s4 + $0x8] sm:$0xff]  ;;  %vm606_vm8 = vcmask 64512   ;;  %s1383_s12 = smov 112   ;;  %s1384_s16 = smov 120  }
  0x1d   : > { %s1682_s13 = smov (!%p452_p7, %s1368_s13), 1  ;;  %581 = vmatpush.msra.mxu1 %v564_v15  ;;  %v563_v17 = vld [vmem:[%s1667_s6 + $0x10] sm:$0xff]  ;;  %v562_v19 = vld [vmem:[%s1667_s6 + $0x8] sm:$0xff]  ;;  %v530_v20 = vld [vmem:[%s1665_s4] sm:$0xff]  ;;  %s1385_s17 = smov 104  }
  0x1e   : > { %s1097_s21 = sshll.u32 %s1682_s13, 3  ;;  %554 = vmatpush.msra.mxu0 %v532_v16  ;;  %v561_v21 = vld [vmem:[%s1667_s6] sm:$0xff]  ;;  %s1098_s19 = sshll.u32 %s1682_s13, 2 }
  0x1f   : > { %s458_s29 = scalar_lea.vmem %s1661_s0, %s1097_s21  ;;  %582 = vmatpush.msra.mxu1 %v563_v17  ;;  %v1195_v39 = vld [vmem:[%s1663_s2] ss:$0 sm:$0xff]  ;;  %v1197_v50 = vld [vmem:[#allocation4] ss:$0 sm:$0xff]  ;;  %v1198_v51 = vld [vmem:[#allocation6] ss:$0 sm:$0xff]  ;;  %s465_s27 = scalar_lea.vmem %s1662_s1, %s1098_s19 }
  0x20   : > { %v1526_v0 = vld [vmem:[%s458_s29] sm:$0xff]  ;;  %555 = vmatpush.msra.mxu0 %v531_v18  ;;  %s1386_s18 = smov 96   ;;  %s1387_s23 = smov 8  }
  0x21   : > { %v477_v1 = vsel %vm476_vm0, %v1526_v0, 0.0  ;;  %583 = vmatpush.msra.mxu1 %v562_v19  ;;  %v1196_v46 = vld [vmem:[#allocation2] ss:$0 sm:$0xff]  ;;  %s1388_s24 = smov 16   ;;  %s1389_s28 = smov 24  }
  0x22   : > { %478 = vadd.xlane.f32.xlu0 %v477_v1  ;;  %v1201_v3 = vpop.eup %1200  ;;  %556 = vmatpush.msra.mxu0 %v530_v20  ;;  %v604_v1 = vld [vmem:[%s465_s27] sm:$0xf]  ;;  %s472_s27 = scalar_lea.vmem %s1671_s10, %s1097_s21 }
  0x23   : > { %v481_v4 = vmul.f32 32.0, %v1201_v3  ;;  %vm485_vm1 = vweird.f32 %v1201_v3  ;;  %584 = vmatpush.msra.mxu1 %v561_v21  ;;  %v605_v2 = vunpack.c.l.bf16 %v604_v1 }
  0x25   : > { %v482_v5 = vsub.f32 1.0, %v481_v4 }
  0x27   : > { %v483_v6 = vmul.f32 %v1201_v3, %v482_v5 }
  0x29   : > { %v484_v7 = vadd.f32 %v1201_v3, %v483_v6 }
  0x2b   : > { %v486_v8 = vsel %vm485_vm1, %v1201_v3, %v484_v7 }
  0x95   : > { %v479_v9 = vpop.xlane.xlu0 %478 }
  0x96   : > { %v487_v10 = vmul.f32 %v486_v8, %v479_v9 }
  0x98   : > { %v488_v11 = vsub.f32 %v1526_v0, %v487_v10 }
  0x9a   : > { %v489_v12 = vmul.f32 %v488_v11, %v488_v11  ;;  %v524_v44 = vmul.f32 %v1195_v39, %v488_v11 }
  0x9c   : > { %v490_v13 = vsel %vm476_vm0, %v489_v12, 0.0 }
  0x9d   : > { %491 = vadd.xlane.f32.xlu0 %v490_v13 }
 0x110   : > { %v492_v22 = vpop.xlane.xlu0 %491 }
 0x111   : > { %v493_v23 = vmul.f32 0.032258064, %v492_v22 }
 0x113   : > { %1202 = vrsqrt.f32 %v493_v23  ;;  %vm501_vm2 = vcmp.eq.f32.partialorder %v493_v23, inf  ;;  %v504_v31 = vand.u32 2147483648, %v493_v23  ;;  %vm503_vm3 = vcmp.eq.f32.partialorder %v493_v23, 0.0 }
 0x119   : > { %v1203_v24 = vpop.eup %1202 }
 0x11a   : > { %v495_v25 = vmul.f32 %v1203_v24, %v493_v23 }
 0x11c   : > { %v496_v26 = vmul.f32 %v1203_v24, %v495_v25 }
 0x11e   : > { %v497_v27 = vmul.f32 0.5, %v496_v26 }
 0x120   : > { %v498_v28 = vsub.f32 1.5, %v497_v27 }
 0x122   : > { %v499_v29 = vmul.f32 %v1203_v24, %v498_v28 }
 0x124   : > { %v500_v30 = vmul.f32 %v499_v29, %v493_v23 }
 0x126   : > { %v502_v32 = vsel %vm501_vm2, %v493_v23, %v500_v30 }
 0x127   : > { %v505_v33 = vsel %vm503_vm3, %v504_v31, %v502_v32 }
 0x128   : > { %v506_v34 = vadd.f32 1e-06, %v505_v33 }
 0x12a   : > { %1204 = vrcp.f32 %v506_v34  ;;  %v518_v38 = vand.u32 2147483648, %v506_v34  ;;  %v516_v41 = vand.u32 2147483647, %v506_v34  ;;  %vm512_vm5 = vweird.f32 %v506_v34 }
 0x12c   : > { %v519_v43 = vor.u32 1.1754944e-38, %v518_v38  ;;  %vm517_vm7 = vcmp.eq.f32.partialorder %v516_v41, 8.507059e+37 }
 0x130   : > { %v1205_v35 = vpop.eup %1204 }
 0x131   : > { %v508_v36 = vmul.f32 %v1205_v35, %v506_v34  ;;  %vm513_vm4 = vweird.f32 %v1205_v35 }
 0x132   : > { %vm514_vm6 = vmor %vm512_vm5, %vm513_vm4 }
 0x133   : > { %v509_v37 = vsub.f32 1.0, %v508_v36 }
 0x135   : > { %v510_v40 = vmul.f32 %v1205_v35, %v509_v37 }
 0x137   : > { %v511_v42 = vadd.f32 %v1205_v35, %v510_v40 }
 0x139   : > { %v515_v45 = vsel %vm514_vm6, %v1205_v35, %v511_v42 }
 0x13a   : > { %v520_v47 = vsel %vm517_vm7, %v519_v43, %v515_v45 }
 0x13b   : > { %v525_v48 = vmul.f32 %v524_v44, %v520_v47 }
 0x13d   : > { %v529_v49 = vadd.f32 %v1196_v46, %v525_v48 }
 0x13f   : > { %1100 = vmatmul.msk.f32.vlgmr.msra.gmra.mxu0 %vm476_vm0, %v529_v49  ;;  %1101 = vmatmul.msk.f32.vlgmr.msra.gmra.mxu1 %vm476_vm0, %v529_v49 }
 0x1bc   : > { %v558_v52 = vpop.f32.mrf.mxu0  ;;  %v586_v53 = vpop.f32.mrf.mxu1 }
 0x1bd   : > { %v559_v54 = vadd.f32 %v1197_v50, %v558_v52  ;;  %v1561_v55 = vadd.f32 %v1198_v51, %v586_v53 }
 0x1bf   : > { %v589_v56 = vmul.f32 0.35355338, %v559_v54  ;;  %600 = vrot.lane.b32.xlu2 %v1561_v55, %s1383_s12  ;;  %598 = vrot.lane.b32.xlu1 %v1561_v55, %s1384_s16 }
 0x1c0   : > { %1102 = vmatpush.xpose.msk.msra.mxu2 %vm606_vm8, %v1561_v55 }
 0x1c1   : > { %593 = vrot.lane.b32.xlu0 %v589_v56, %s1383_s12 }
 0x1c3   : > { %1103 = vmatmul.msk.f32.vlgmr.msra.gmra.mxu2 %vm606_vm8, %v589_v56 }
 0x1c7   : > { %602 = vrot.lane.b32.xlu2 %v1561_v55, %s1385_s17  ;;  %591 = vrot.lane.b32.xlu1 %v589_v56, %s1384_s16 }
 0x1cf   : > { %595 = vrot.lane.b32.xlu1 %v589_v56, %s1385_s17 }
 0x219   : > { %v1569_v57 = vpop.permute.xlu2 %600 }
 0x21a   : > { %1106 = vmatpush.xpose.msk.msrb.mxu2 %vm606_vm8, %v1569_v57 }
 0x221   : > { %v603_v59 = vpop.permute.xlu2 %602 }
 0x222   : > { %v1190_v35 = vpack.i.bf16 %v603_v59, %v1569_v57 }
 0x231   : > { %v599_v58 = vpop.permute.xlu1 %598 }
 0x232   : > { %1104 = vmatpush.xpose.msk.msra.mxu3 %vm606_vm8, %v599_v58 }
 0x233   : > { %v594_v60 = vpop.permute.xlu0 %593 }
 0x234   : > { %1107 = vmatmul.msk.f32.vlgmr.msrb.gmra.mxu2 %vm606_vm8, %v594_v60 }
 0x236   : > { %1108 = vmatpush.xpose.msk.msrb.mxu3 %vm606_vm8, %v603_v59 }
 0x239   : > { %v592_v61 = vpop.permute.xlu1 %591 }
 0x23a   : > { %1105 = vmatmul.msk.f32.vlgmr.msra.gmra.mxu3 %vm606_vm8, %v592_v61 }
 0x241   : > { %v596_v62 = vpop.permute.xlu1 %595 }
 0x242   : > { %1109 = vmatmul.msk.f32.vlgmr.msrb.gmra.mxu3 %vm606_vm8, %v596_v62 }
 0x246   : > { %v628_v63 = vpop.f32.mrf.mxu2 }
 0x247   : > { %v629_v7 = vadd.f32 %v628_v63, %v605_v2 }
 0x249   : > { %v703_v10 = vsel %vm606_vm8, %v629_v7, -inf }
 0x2b7   : > { %v676_v3 = vpop.f32.mrf.mxu2 }
 0x2b8   : > { %v677_v4 = vadd.f32 %v676_v3, %v605_v2 }
 0x2ba   : > { %v709_v5 = vsel %vm606_vm8, %v677_v4, -inf }
 0x2bb   : > { %710 = vmax.xlane.f32.xlu2 %v709_v5 }
 0x2bd   : > { %v652_v6 = vpop.f32.mrf.mxu3 }
 0x2be   : > { %v653_v8 = vadd.f32 %v652_v6, %v605_v2 }
 0x2c0   : > { %v706_v9 = vsel %vm606_vm8, %v653_v8, -inf }
 0x2c1   : > { %707 = vmax.xlane.f32.xlu0 %v706_v9 }
 0x2c3   : > { %704 = vmax.xlane.f32.xlu2 %v703_v10 }
 0x2c5   : > { %v700_v11 = vpop.f32.mrf.mxu3 }
 0x2c6   : > { %v701_v12 = vadd.f32 %v700_v11, %v605_v2 }
 0x2c8   : > { %v712_v13 = vsel %vm606_vm8, %v701_v12, -inf }
 0x2c9   : > { %713 = vmax.xlane.f32.xlu1 %v712_v13 }
 0x2d5   : > { %825 = vrot.lane.b32.xlu0 %v599_v58, %s1386_s18 }
 0x32e   : > { %v711_v14 = vpop.xlane.xlu2 %710 }
 0x32f   : > { %v717_v15 = vsub.f32 %v677_v4, %v711_v14 }
 0x331   : > { %v723_v16 = vmul.f32 1.442695, %v717_v15 }
 0x333   : > { %1206 = vpow2.f32 %v723_v16 }
 0x334   : > { %v708_v17 = vpop.xlane.xlu0 %707 }
 0x335   : > { %v716_v18 = vsub.f32 %v653_v8, %v708_v17 }
 0x336   : > { %v705_v19 = vpop.xlane.xlu2 %704 }
 0x337   : > { %v721_v20 = vmul.f32 1.442695, %v716_v18  ;;  %v715_v21 = vsub.f32 %v629_v7, %v705_v19 }
 0x339   : > { %v1587_v22 = vpop.eup %1206  ;;  %1208 = vpow2.f32 %v721_v20  ;;  %v719_v24 = vmul.f32 1.442695, %v715_v21 }
 0x33a   : > { %v733_v23 = vsel %vm606_vm8, %v1587_v22, 0.0 }
 0x33b   : > { %734 = vadd.xlane.f32.xlu2 %v733_v23  ;;  %1210 = vpow2.f32 %v719_v24 }
 0x33c   : > { %v714_v25 = vpop.xlane.xlu1 %713 }
 0x33d   : > { %v718_v26 = vsub.f32 %v701_v12, %v714_v25 }
 0x33f   : > { %v1209_v27 = vpop.eup %1208  ;;  %v725_v28 = vmul.f32 1.442695, %v718_v26 }
 0x340   : > { %v730_v29 = vsel %vm606_vm8, %v1209_v27, 0.0 }
 0x341   : > { %1212 = vpow2.f32 %v725_v28  ;;  %v1592_v30 = vpop.eup %1210 }
 0x342   : > { %v727_v34 = vsel %vm606_vm8, %v1592_v30, 0.0 }
 0x343   : > { %731 = vadd.xlane.f32.xlu2 %v730_v29 }
 0x347   : > { %v1594_v31 = vpop.eup %1212  ;;  %v826_v32 = vpop.permute.xlu0 %825 }
 0x348   : > { %846 = vmatpush.msrb.mxu1 %v826_v32  ;;  %v736_v33 = vsel %vm606_vm8, %v1594_v31, 0.0  ;;  %v920_v32 = vld [vmem:[%s1669_s8] sm:$0xff] }
 0x349   : > { %737 = vadd.xlane.f32.xlu1 %v736_v33 }
 0x34b   : > { %728 = vadd.xlane.f32.xlu2 %v727_v34 }
 0x362   : > { %1191 = vrot.lane.b32.xlu1 %v1190_v35, %s1386_s18 }
 0x363   : > { %799 = vrot.lane.b32.xlu2 %v1561_v55, %s1386_s18 }
 0x3ae   : > { %v1604_v36 = vpop.xlane.xlu2 %734 }
 0x3af   : > { %1214 = vrcp.f32 %v1604_v36  ;;  %vm772_vm14 = vweird.f32 %v1604_v36  ;;  %v776_v6 = vand.u32 2147483647, %v1604_v36  ;;  %v778_v7 = vand.u32 2147483648, %v1604_v36 }
 0x3b1   : > { %v779_v17 = vor.u32 1.1754944e-38, %v778_v7 }
 0x3b5   : > { %v1607_v38 = vpop.eup %1214 }
 0x3b6   : > { %v732_v37 = vpop.xlane.xlu2 %731  ;;  %v768_v43 = vmul.f32 %v1607_v38, %v1604_v36  ;;  %vm773_vm15 = vweird.f32 %v1607_v38 }
 0x3b7   : > { %1216 = vrcp.f32 %v732_v37  ;;  %v764_v45 = vand.u32 2147483648, %v732_v37  ;;  %v762_v47 = vand.u32 2147483647, %v732_v37  ;;  %vm758_vm10 = vweird.f32 %v732_v37  ;;  %vm1618_vm4 = vmor %vm772_vm14, %vm773_vm15 }
 0x3b8   : > { %v769_v49 = vsub.f32 1.0, %v768_v43 }
 0x3b9   : > { %v765_v53 = vor.u32 1.1754944e-38, %v764_v45  ;;  %vm763_vm12 = vcmp.eq.f32.partialorder %v762_v47, 8.507059e+37 }
 0x3ba   : > { %v770_v58 = vmul.f32 %v1607_v38, %v769_v49 }
 0x3bc   : > { %v738_v39 = vpop.xlane.xlu1 %737  ;;  %v771_v3 = vadd.f32 %v1607_v38, %v770_v58 }
 0x3bd   : > { %v1217_v40 = vpop.eup %1216  ;;  %1218 = vrcp.f32 %v738_v39  ;;  %v792_v8 = vand.u32 2147483648, %v738_v39  ;;  %vm786_vm5 = vweird.f32 %v738_v39  ;;  %v790_v11 = vand.u32 2147483647, %v738_v39 }
 0x3be   : > { %v754_v41 = vmul.f32 %v1217_v40, %v732_v37  ;;  %v729_v42 = vpop.xlane.xlu2 %728  ;;  %vm759_vm9 = vweird.f32 %v1217_v40  ;;  %v775_v14 = vsel %vm1618_vm4, %v1607_v38, %v771_v3 }
 0x3bf   : > { %1220 = vrcp.f32 %v729_v42  ;;  %vm760_vm11 = vmor %vm758_vm10, %vm759_vm9  ;;  %v750_v63 = vand.u32 2147483648, %v729_v42  ;;  %v748_v2 = vand.u32 2147483647, %v729_v42  ;;  %vm744_vm2 = vweird.f32 %v729_v42 }
 0x3c0   : > { %v755_v44 = vsub.f32 1.0, %v754_v41  ;;  %v793_v18 = vor.u32 1.1754944e-38, %v792_v8  ;;  %vm777_vm9 = vcmp.eq.f32.partialorder %v776_v6, 8.507059e+37  ;;  %vm791_vm10 = vcmp.eq.f32.partialorder %v790_v11, 8.507059e+37 }
 0x3c1   : > { %v751_v9 = vor.u32 1.1754944e-38, %v750_v63  ;;  %vm749_vm6 = vcmp.eq.f32.partialorder %v748_v2, 8.507059e+37  ;;  %v780_v19 = vsel %vm777_vm9, %v779_v17, %v775_v14 }
 0x3c2   : > { %v756_v46 = vmul.f32 %v1217_v40, %v755_v44  ;;  %v797_v25 = vmul.f32 %v1587_v22, %v780_v19  ;;  %v923_v22 = vld [vmem:[%s1669_s8 + $0x18] sm:$0xff] }
 0x3c3   : > { %v1219_v48 = vpop.eup %1218 }
 0x3c4   : > { %v757_v50 = vadd.f32 %v1217_v40, %v756_v46  ;;  %v782_v51 = vmul.f32 %v1219_v48, %v738_v39  ;;  %vm787_vm1 = vweird.f32 %v1219_v48 }
 0x3c5   : > { %v1221_v52 = vpop.eup %1220  ;;  %vm788_vm7 = vmor %vm786_vm5, %vm787_vm1 }
 0x3c6   : > { %v783_v54 = vsub.f32 1.0, %v782_v51  ;;  %v740_v55 = vmul.f32 %v1221_v52, %v729_v42  ;;  %v800_v56 = vpop.permute.xlu2 %799  ;;  %v761_v57 = vsel %vm760_vm11, %v1217_v40, %v757_v50  ;;  %vm745_vm13 = vweird.f32 %v1221_v52  ;;  %v1199_v40 = vld [vmem:[#allocation7] ss:$0 sm:$0xff] }
 0x3c7   : > { %820 = vmatpush.msrb.mxu0 %v800_v56  ;;  %v766_v59 = vsel %vm763_vm12, %v765_v53, %v761_v57  ;;  %vm746_vm3 = vmor %vm744_vm2, %vm745_vm13  ;;  %vm916_vm11 = vcmask 130048   ;;  %vm918_vm12 = vcmask 195584  }
 0x3c8   : > { %v784_v60 = vmul.f32 %v1219_v48, %v783_v54  ;;  %v741_v61 = vsub.f32 1.0, %v740_v55  ;;  %v796_v62 = vmul.f32 %v1209_v27, %v766_v59 }
 0x3c9   : > { %943 = vmatpush.msra.mxu0 %v923_v22 }
 0x3ca   : > { %v742_v1 = vmul.f32 %v1221_v52, %v741_v61  ;;  %1111 = vmatmul.msk.f32.vlgmr.msrb.gmra.mxu1 %vm606_vm8, %v796_v62  ;;  %v785_v4 = vadd.f32 %v1219_v48, %v784_v60 }
 0x3cc   : > { %v743_v5 = vadd.f32 %v1221_v52, %v742_v1  ;;  %v789_v15 = vsel %vm788_vm7, %v1219_v48, %v785_v4 }
 0x3cd   : > { %v794_v20 = vsel %vm791_vm10, %v793_v18, %v789_v15 }
 0x3ce   : > { %v747_v12 = vsel %vm746_vm3, %v1221_v52, %v743_v5  ;;  %v798_v26 = vmul.f32 %v1594_v31, %v794_v20  ;;  %v921_v31 = vld [vmem:[%s1669_s8 + $0x8] sm:$0xff] }
 0x3cf   : > { %v752_v13 = vsel %vm749_vm6, %v751_v9, %v747_v12 }
 0x3d0   : > { %v795_v16 = vmul.f32 %v1592_v30, %v752_v13  ;;  %v922_v30 = vld [vmem:[%s1669_s8 + $0x10] sm:$0xff] }
 0x3d1   : > { %944 = vmatpush.msra.mxu0 %v922_v30 }
 0x3d2   : > { %1110 = vmatmul.msk.f32.vlgmr.msrb.gmra.mxu0 %vm606_vm8, %v795_v16 }
 0x3d3   : > { %945 = vmatpush.msra.mxu0 %v921_v31 }
 0x3d4   : > { %v1192_v21 = vpop.permute.xlu1 %1191 }
 0x3d5   : > { %v1194_v23 = vunpack.i.h.bf16 %v1192_v21  ;;  %v1193_v24 = vunpack.i.l.bf16 %v1192_v21  ;;  %946 = vmatpush.msra.mxu0 %v920_v32 }
 0x3d7   : > { %872 = vmatpush.msra.mxu2 %v1193_v24  ;;  %898 = vmatpush.msra.mxu3 %v1194_v23 }
 0x3d8   : > { %1112 = vmatmul.msk.f32.vlgmr.msra.gmra.mxu2 %vm606_vm8, %v797_v25  ;;  %1113 = vmatmul.msk.f32.vlgmr.msra.gmra.mxu3 %vm606_vm8, %v798_v26 }
 0x447   : > { %v848_v27 = vpop.f32.mrf.mxu1 }
 0x448   : > { %904 = vrot.lane.b32.xlu0 %v848_v27, %s1387_s23 }
 0x44f   : > { %v822_v34 = vpop.f32.mrf.mxu0 }
 0x45b   : > { %v874_v28 = vpop.f32.mrf.mxu2  ;;  %v900_v29 = vpop.f32.mrf.mxu3 }
 0x45c   : > { %908 = vrot.lane.b32.xlu1 %v874_v28, %s1388_s24  ;;  %912 = vrot.lane.b32.xlu0 %v900_v29, %s1389_s28 }
 0x4ba   : > { %v905_v33 = vpop.permute.xlu0 %904 }
 0x4bb   : > { %v915_v35 = vsel %vm606_vm8, %v822_v34, %v905_v33 }
 0x4ce   : > { %v909_v36 = vpop.permute.xlu1 %908  ;;  %v913_v37 = vpop.permute.xlu0 %912 }
 0x4cf   : > { %v917_v38 = vsel %vm916_vm11, %v915_v35, %v909_v36 }
 0x4d0   : > { %v919_v39 = vsel %vm918_vm12, %v917_v38, %v913_v37 }
 0x4d1   : > { %1114 = vmatmul.msk.f32.vlgmr.msra.gmra.mxu0 %vm476_vm0, %v919_v39 }
 0x54e   : > { %v948_v41 = vpop.f32.mrf.mxu0 }
 0x54f   : > { %v949_v42 = vadd.f32 %v1199_v40, %v948_v41 }
 0x551   : > { %v951_v43 = vadd.f32 %v949_v42, %v1526_v0 }
 0x553   : > { %952 = vst.msk [vmem:[%s472_s27] sm:$0xff] %vm476_vm0, %v951_v43 }
 0x554 PF: > { %s23_s15 = sadd.s32 1, %s1376_s15   ;;  %s1677_s13 = smov %s1372_s14 }
 0x555   : > { %p20_p8 = scmp.ge.s32.totalorder %s23_s15, 4   ;;  %s1678_s14 = smov %s1680_s25 }
 0x557   :  { %22 = sbr.rel (!%p20_p8) target bundleno = 4 (0x4), region = 110 }
 0x55c   :  { %978 = vsyncpa [#allocation3], 1 }
 0x55d   :  { %980 = vsyncpa [#allocation3 + $0x1], 1 }
 0x55e   :  { %981 = vsyncpa [#allocation5], 1 }
 0x55f   :  { %982 = vsyncpa [#allocation8], 1 }

// kernel: encoder_decoder_forward.18
= control target key start
LH: loop header
LB: loop body
LE: loop exit
PB: predicated region body
PF: predicated region fallthrough
CT: control target
= control target key end

     0   :  { %s1205_s17 = smov 0   ;;  %s1207_s18 = smov 0   ;;  %s1380_s0 = inlined_call_operand.vmem [shape: f32[2,8,32], index: 0, kind: input, shape index: {}]   ;;  %s1381_s1 = inlined_call_operand.vmem [shape: f32[2,8,32], index: 1, kind: input, shape index: {}]   ;;  %s1382_s2 = inlined_call_operand.vmem [shape: bf16[2,1,8], index: 2, kind: input, shape index: {}]   ;;  %s1383_s3 = inlined_call_operand.vmem [shape: f32[1,32], index: 3, kind: input, shape index: {}]   ;;  %s1384_s4 = inlined_call_operand.vmem [shape: f32[1,32], index: 4, kind: input, shape index: {}]   ;;  %s1385_s5 = inlined_call_operand.vmem [shape: f32[32,32], index: 5, kind: input, shape index: {}]   ;;  %s1386_s6 = inlined_call_operand.vmem [shape: f32[1,32], index: 6, kind: input, shape index: {}]   ;;  %s1387_s7 = inlined_call_operand.vmem [shape: f32[32,64], index: 7, kind: input, shape index: {}]   ;;  %s1388_s8 = inlined_call_operand.vmem [shape: f32[1,64], index: 8, kind: input, shape index: {}]   ;;  %s1389_s9 = inlined_call_operand.vmem [shape: f32[32,32], index: 9, kind: input, shape index: {}]   ;;  %s1390_s10 = inlined_call_operand.vmem [shape: f32[1,32], index: 10, kind: input, shape index: {}]   ;;  %s1391_s11 = inlined_call_operand.vmem [shape: f32[2,8,32], index: 11, kind: output, shape index: {}]  }
   0x1   :  { %s1209_s19 = smov 0  }
   0x2 LB: > { %s33_s20 = sadd.s32 1, %s1131_s18  ;;  %p1028_p0 = scmp.ge.s32.totalorder %s1135_s19, 1  ;;  %s1135_s19 = sphi %s1209_s19, %s21_s19   ;;  %s1131_s18 = sphi %s1207_s18, %s1397_s18   ;;  %s1127_s17 = sphi %s1205_s17, %s1396_s17  }
   0x3   : > { %p35_p1 = scmp.ge.s32.totalorder %s33_s20, 2  ;;  %p372_p2 = scmp.lt.s32.totalorder %s1135_s19, 3 }
   0x5   : > { %s1399_s20 = smov (%p35_p1, %s33_s20), 0  ;;  %p373_p3 = pnand %p1028_p0, %p372_p2 }
   0x6   : > { %p423_p4 = scmp.lt.s32.totalorder (!%p373_p3), %s1127_s17, 1  ;;  %s1138_s22 = smov (!%p373_p3), 120  }
   0x7   : > { %376 = sbr.rel (%p373_p3) target bundleno = 1341 (0x53d), region = 64  ;;  %s1139_s23 = smov (!%p373_p3), 112  }
   0x8   : > { %s1142_s30 = smov (!%p373_p3), 8   ;;  %s1143_s12 = smov (!%p373_p3), 16  }
   0x9   : > { %s1144_s13 = smov (!%p373_p3), 24  }
   0xc   : > { %s1401_s17 = smov (!%p423_p4, %s1127_s17), 1  ;;  %vm447_vm0 = vcmask 261120   ;;  %v1137_v2 = vmov 32.0   ;;  %v536_v14 = vld [vmem:[%s1387_s7 + $0x18] sm:$0xff]  ;;  %v535_v15 = vld [vmem:[%s1387_s7 + $0x10] sm:$0xff]  ;;  %v534_v16 = vld [vmem:[%s1387_s7 + $0x8] sm:$0xff] }
   0xd   : > { %s1226_s21 = sshll.u32 %s1401_s17, 3  ;;  %1091 = vrcp.f32 %v1137_v2  ;;  %556 = vmatpush.msra.mxu1 %v536_v14  ;;  %v533_v17 = vld [vmem:[%s1387_s7] sm:$0xff]  ;;  %v505_v19 = vld [vmem:[%s1385_s5 + $0x18] sm:$0xff]  ;;  %v504_v20 = vld [vmem:[%s1385_s5 + $0x10] sm:$0xff]  ;;  %vm582_vm8 = vcmask 64512   ;;  %s436_s29 = scalar_lea.vmem %s1382_s2, %s1401_s17 }
   0xe   : > { %s429_s24 = scalar_lea.vmem %s1380_s0, %s1226_s21  ;;  %s433_s14 = scalar_lea.vmem %s1381_s1, %s1226_s21  ;;  %525 = vmatpush.msra.mxu0 %v505_v19  ;;  %v503_v21 = vld [vmem:[%s1385_s5 + $0x8] sm:$0xff]  ;;  %v502_v22 = vld [vmem:[%s1385_s5] sm:$0xff] }
   0xf   : > { %v1232_v0 = vld [vmem:[%s429_s24] sm:$0xff]  ;;  %557 = vmatpush.msra.mxu1 %v535_v15  ;;  %s1140_s24 = smov 104   ;;  %s1141_s17 = smov 96  }
  0x10   : > { %v448_v1 = vsel %vm447_vm0, %v1232_v0, 0.0  ;;  %v501_v18 = vld [vmem:[%s433_s14] sm:$0xff]  ;;  %526 = vmatpush.msra.mxu0 %v504_v20 }
  0x11   : > { %449 = vadd.xlane.f32.xlu0 %v448_v1  ;;  %558 = vmatpush.msra.mxu1 %v534_v16  ;;  %v1086_v40 = vld [vmem:[%s1383_s3] ss:$0 sm:$0xff] }
  0x12   : > { %527 = vmatpush.msra.mxu0 %v503_v21  ;;  %v1087_v47 = vld [vmem:[%s1384_s4] ss:$0 sm:$0xff] }
  0x13   : > { %v1092_v3 = vpop.eup %1091  ;;  %559 = vmatpush.msra.mxu1 %v533_v17  ;;  %v1088_v51 = vld [vmem:[%s1388_s8] ss:$0 sm:$0xff] }
  0x14   : > { %v452_v4 = vmul.f32 32.0, %v1092_v3  ;;  %vm456_vm1 = vweird.f32 %v1092_v3  ;;  %1033 = vmatmul.msk.f32.vlgmr.msra.gmra.mxu1 %vm447_vm0, %v501_v18  ;;  %528 = vmatpush.msra.mxu0 %v502_v22  ;;  %v1089_v54 = vld [vmem:[%s1386_s6] ss:$0 sm:$0xff] }
  0x15   : > { %v579_v1 = vld [vmem:[%s436_s29] sm:$0x1] }
  0x16   : > { %v453_v5 = vsub.f32 1.0, %v452_v4 }
  0x18   : > { %v454_v6 = vmul.f32 %v1092_v3, %v453_v5 }
  0x1a   : > { %v455_v7 = vadd.f32 %v1092_v3, %v454_v6 }
  0x1c   : > { %v457_v8 = vsel %vm456_vm1, %v1092_v3, %v455_v7  ;;  %v580_v3 = vunpack.c.l.bf16 %v579_v1 }
  0x1e   : > { %v581_v4 = vperm.slane %v580_v3, 0 }
  0x84   : > { %v450_v9 = vpop.xlane.xlu0 %449 }
  0x85   : > { %v458_v10 = vmul.f32 %v457_v8, %v450_v9 }
  0x87   : > { %v459_v11 = vsub.f32 %v1232_v0, %v458_v10 }
  0x89   : > { %v460_v12 = vmul.f32 %v459_v11, %v459_v11  ;;  %v495_v45 = vmul.f32 %v1086_v40, %v459_v11 }
  0x8b   : > { %v461_v13 = vsel %vm447_vm0, %v460_v12, 0.0 }
  0x8c   : > { %462 = vadd.xlane.f32.xlu0 %v461_v13 }
  0x91   : > { %v561_v52 = vpop.f32.mrf.mxu1 }
  0x92   : > { %v1277_v53 = vadd.f32 %v1088_v51, %v561_v52 }
  0x94   : > { %573 = vrot.lane.b32.xlu1 %v1277_v53, %s1138_s22  ;;  %575 = vrot.lane.b32.xlu2 %v1277_v53, %s1139_s23 }
  0x95   : > { %1034 = vmatpush.xpose.msk.msra.mxu2 %vm582_vm8, %v1277_v53 }
  0x9c   : > { %577 = vrot.lane.b32.xlu2 %v1277_v53, %s1140_s24 }
  0xee   : > { %v1288_v58 = vpop.permute.xlu2 %575 }
  0xef   : > { %1038 = vmatpush.xpose.msk.msrb.mxu2 %vm582_vm8, %v1288_v58 }
  0xf6   : > { %v1292_v59 = vpop.permute.xlu2 %577 }
  0xff   : > { %v463_v23 = vpop.xlane.xlu0 %462 }
 0x100   : > { %v464_v24 = vmul.f32 0.032258064, %v463_v23 }
 0x102   : > { %1093 = vrsqrt.f32 %v464_v24  ;;  %vm472_vm2 = vcmp.eq.f32.partialorder %v464_v24, inf  ;;  %v475_v32 = vand.u32 2147483648, %v464_v24  ;;  %vm474_vm3 = vcmp.eq.f32.partialorder %v464_v24, 0.0 }
 0x106   : > { %v574_v60 = vpop.permute.xlu1 %573 }
 0x107   : > { %1036 = vmatpush.xpose.msk.msra.mxu3 %vm582_vm8, %v574_v60 }
 0x108   : > { %v1094_v25 = vpop.eup %1093 }
 0x109   : > { %v466_v26 = vmul.f32 %v1094_v25, %v464_v24 }
 0x10b   : > { %v467_v27 = vmul.f32 %v1094_v25, %v466_v26  ;;  %1040 = vmatpush.xpose.msk.msrb.mxu3 %vm582_vm8, %v1292_v59 }
 0x10d   : > { %v468_v28 = vmul.f32 0.5, %v467_v27 }
 0x10f   : > { %v469_v29 = vsub.f32 1.5, %v468_v28 }
 0x111   : > { %v470_v30 = vmul.f32 %v1094_v25, %v469_v29 }
 0x113   : > { %v471_v31 = vmul.f32 %v470_v30, %v464_v24 }
 0x115   : > { %v473_v33 = vsel %vm472_vm2, %v464_v24, %v471_v31 }
 0x116   : > { %v476_v34 = vsel %vm474_vm3, %v475_v32, %v473_v33 }
 0x117   : > { %v477_v35 = vadd.f32 1e-06, %v476_v34 }
 0x119   : > { %1095 = vrcp.f32 %v477_v35  ;;  %v489_v39 = vand.u32 2147483648, %v477_v35  ;;  %v487_v42 = vand.u32 2147483647, %v477_v35  ;;  %vm483_vm5 = vweird.f32 %v477_v35 }
 0x11b   : > { %v490_v44 = vor.u32 1.1754944e-38, %v489_v39  ;;  %vm488_vm7 = vcmp.eq.f32.partialorder %v487_v42, 8.507059e+37 }
 0x11f   : > { %v1096_v36 = vpop.eup %1095 }
 0x120   : > { %v479_v37 = vmul.f32 %v1096_v36, %v477_v35  ;;  %vm484_vm4 = vweird.f32 %v1096_v36 }
 0x121   : > { %vm485_vm6 = vmor %vm483_vm5, %vm484_vm4 }
 0x122   : > { %v480_v38 = vsub.f32 1.0, %v479_v37  ;;  %v1081_v37 = vpack.i.bf16 %v1292_v59, %v1288_v58 }
 0x124   : > { %v481_v41 = vmul.f32 %v1096_v36, %v480_v38 }
 0x126   : > { %v482_v43 = vadd.f32 %v1096_v36, %v481_v41 }
 0x128   : > { %v486_v46 = vsel %vm485_vm6, %v1096_v36, %v482_v43 }
 0x129   : > { %v491_v48 = vsel %vm488_vm7, %v490_v44, %v486_v46 }
 0x12a   : > { %v496_v49 = vmul.f32 %v495_v45, %v491_v48 }
 0x12c   : > { %v500_v50 = vadd.f32 %v1087_v47, %v496_v49 }
 0x12e   : > { %1032 = vmatmul.msk.f32.vlgmr.msra.gmra.mxu0 %vm447_vm0, %v500_v50 }
 0x1ab   : > { %v530_v55 = vpop.f32.mrf.mxu0 }
 0x1ac   : > { %v531_v56 = vadd.f32 %v1089_v54, %v530_v55 }
 0x1ae   : > { %v564_v57 = vmul.f32 0.35355338, %v531_v56 }
 0x1b0   : > { %568 = vrot.lane.b32.xlu0 %v564_v57, %s1139_s23  ;;  %566 = vrot.lane.b32.xlu1 %v564_v57, %s1138_s22 }
 0x1b1   : > { %1035 = vmatmul.msk.f32.vlgmr.msra.gmra.mxu2 %vm582_vm8, %v564_v57 }
 0x1b8   : > { %570 = vrot.lane.b32.xlu1 %v564_v57, %s1140_s24 }
 0x222   : > { %v569_v61 = vpop.permute.xlu0 %568  ;;  %v567_v62 = vpop.permute.xlu1 %566 }
 0x223   : > { %1037 = vmatmul.msk.f32.vlgmr.msra.gmra.mxu3 %vm582_vm8, %v567_v62  ;;  %1039 = vmatmul.msk.f32.vlgmr.msrb.gmra.mxu2 %vm582_vm8, %v569_v61 }
 0x22a   : > { %v571_v63 = vpop.permute.xlu1 %570 }
 0x22b   : > { %1041 = vmatmul.msk.f32.vlgmr.msrb.gmra.mxu3 %vm582_vm8, %v571_v63 }
 0x234   : > { %v604_v2 = vpop.f32.mrf.mxu2 }
 0x235   : > { %v605_v11 = vadd.f32 %v604_v2, %v581_v4 }
 0x237   : > { %v679_v15 = vsel %vm582_vm8, %v605_v11, -inf }
 0x2a6   : > { %v628_v5 = vpop.f32.mrf.mxu3  ;;  %v652_v6 = vpop.f32.mrf.mxu2 }
 0x2a7   : > { %v629_v7 = vadd.f32 %v628_v5, %v581_v4  ;;  %v653_v8 = vadd.f32 %v652_v6, %v581_v4 }
 0x2a9   : > { %v682_v9 = vsel %vm582_vm8, %v629_v7, -inf  ;;  %v685_v10 = vsel %vm582_vm8, %v653_v8, -inf }
 0x2aa   : > { %683 = vmax.xlane.f32.xlu0 %v682_v9  ;;  %686 = vmax.xlane.f32.xlu2 %v685_v10 }
 0x2ae   : > { %v676_v12 = vpop.f32.mrf.mxu3 }
 0x2af   : > { %v677_v13 = vadd.f32 %v676_v12, %v581_v4 }
 0x2b1   : > { %v688_v14 = vsel %vm582_vm8, %v677_v13, -inf }
 0x2b2   : > { %689 = vmax.xlane.f32.xlu1 %v688_v14  ;;  %680 = vmax.xlane.f32.xlu2 %v679_v15 }
 0x2be   : > { %801 = vrot.lane.b32.xlu0 %v574_v60, %s1141_s17 }
 0x31d   : > { %v687_v16 = vpop.xlane.xlu2 %686  ;;  %v684_v17 = vpop.xlane.xlu0 %683 }
 0x31e   : > { %v693_v18 = vsub.f32 %v653_v8, %v687_v16  ;;  %v692_v20 = vsub.f32 %v629_v7, %v684_v17 }
 0x320   : > { %v699_v19 = vmul.f32 1.442695, %v693_v18  ;;  %v697_v21 = vmul.f32 1.442695, %v692_v20 }
 0x322   : > { %1097 = vpow2.f32 %v699_v19 }
 0x323   : > { %1099 = vpow2.f32 %v697_v21 }
 0x325   : > { %v690_v22 = vpop.xlane.xlu1 %689  ;;  %v681_v24 = vpop.xlane.xlu2 %680 }
 0x326   : > { %v694_v23 = vsub.f32 %v677_v13, %v690_v22  ;;  %v691_v27 = vsub.f32 %v605_v11, %v681_v24 }
 0x328   : > { %v701_v25 = vmul.f32 1.442695, %v694_v23  ;;  %v1309_v26 = vpop.eup %1097  ;;  %v695_v29 = vmul.f32 1.442695, %v691_v27 }
 0x329   : > { %v709_v28 = vsel %vm582_vm8, %v1309_v26, 0.0  ;;  %v1100_v30 = vpop.eup %1099 }
 0x32a   : > { %1101 = vpow2.f32 %v701_v25  ;;  %710 = vadd.xlane.f32.xlu2 %v709_v28  ;;  %v706_v34 = vsel %vm582_vm8, %v1100_v30, 0.0 }
 0x32b   : > { %1103 = vpow2.f32 %v695_v29 }
 0x330   : > { %v1313_v31 = vpop.eup %1101  ;;  %v802_v32 = vpop.permute.xlu0 %801 }
 0x331   : > { %822 = vmatpush.msrb.mxu1 %v802_v32  ;;  %v712_v33 = vsel %vm582_vm8, %v1313_v31, 0.0  ;;  %v1318_v35 = vpop.eup %1103 }
 0x332   : > { %713 = vadd.xlane.f32.xlu1 %v712_v33  ;;  %707 = vadd.xlane.f32.xlu2 %v706_v34  ;;  %v703_v36 = vsel %vm582_vm8, %v1318_v35, 0.0  ;;  %v897_v34 = vld [vmem:[%s1389_s9 + $0x8] sm:$0xff] }
 0x33a   : > { %704 = vadd.xlane.f32.xlu2 %v703_v36 }
 0x34b   : > { %1082 = vrot.lane.b32.xlu1 %v1081_v37, %s1141_s17 }
 0x352   : > { %775 = vrot.lane.b32.xlu2 %v1277_v53, %s1141_s17 }
 0x39d   : > { %v711_v38 = vpop.xlane.xlu2 %710 }
 0x39e   : > { %1105 = vrcp.f32 %v711_v38  ;;  %vm748_vm10 = vweird.f32 %v711_v38  ;;  %v754_v56 = vand.u32 2147483648, %v711_v38  ;;  %v752_v4 = vand.u32 2147483647, %v711_v38 }
 0x3a0   : > { %v755_v11 = vor.u32 1.1754944e-38, %v754_v56  ;;  %vm753_vm5 = vcmp.eq.f32.partialorder %v752_v4, 8.507059e+37 }
 0x3a4   : > { %v1106_v40 = vpop.eup %1105 }
 0x3a5   : > { %v714_v39 = vpop.xlane.xlu1 %713  ;;  %v708_v41 = vpop.xlane.xlu2 %707  ;;  %v744_v42 = vmul.f32 %v1106_v40, %v711_v38  ;;  %vm749_vm11 = vweird.f32 %v1106_v40 }
 0x3a6   : > { %1107 = vrcp.f32 %v714_v39  ;;  %v740_v53 = vand.u32 2147483648, %v708_v41  ;;  %v738_v55 = vand.u32 2147483647, %v708_v41  ;;  %vm734_vm12 = vweird.f32 %v708_v41  ;;  %vm1329_vm1 = vmor %vm748_vm10, %vm749_vm11 }
 0x3a7   : > { %1109 = vrcp.f32 %v708_v41  ;;  %v745_v45 = vsub.f32 1.0, %v744_v42  ;;  %v768_v62 = vand.u32 2147483648, %v714_v39  ;;  %vm762_vm2 = vweird.f32 %v714_v39 }
 0x3a8   : > { %v741_v61 = vor.u32 1.1754944e-38, %v740_v53  ;;  %vm739_vm15 = vcmp.eq.f32.partialorder %v738_v55, 8.507059e+37  ;;  %v766_v5 = vand.u32 2147483647, %v714_v39  ;;  %vm892_vm11 = vcmask 130048  }
 0x3a9   : > { %v746_v51 = vmul.f32 %v1106_v40, %v745_v45  ;;  %v769_v14 = vor.u32 1.1754944e-38, %v768_v62 }
 0x3aa   : > { %vm767_vm6 = vcmp.eq.f32.partialorder %v766_v5, 8.507059e+37 }
 0x3ab   : > { %v747_v59 = vadd.f32 %v1106_v40, %v746_v51 }
 0x3ac   : > { %v1108_v43 = vpop.eup %1107 }
 0x3ad   : > { %v1110_v44 = vpop.eup %1109  ;;  %v758_v46 = vmul.f32 %v1108_v43, %v714_v39  ;;  %v705_v48 = vpop.xlane.xlu2 %704  ;;  %vm763_vm13 = vweird.f32 %v1108_v43  ;;  %v751_v10 = vsel %vm1329_vm1, %v1106_v40, %v747_v59 }
 0x3ae   : > { %v730_v47 = vmul.f32 %v1110_v44, %v708_v41  ;;  %1111 = vrcp.f32 %v705_v48  ;;  %vm735_vm9 = vweird.f32 %v1110_v44  ;;  %vm1333_vm3 = vmor %vm762_vm2, %vm763_vm13  ;;  %v726_v13 = vand.u32 2147483648, %v705_v48 }
 0x3af   : > { %v759_v49 = vsub.f32 1.0, %v758_v46  ;;  %vm736_vm14 = vmor %vm734_vm12, %vm735_vm9  ;;  %v724_v16 = vand.u32 2147483647, %v705_v48  ;;  %v756_v17 = vsel %vm753_vm5, %v755_v11, %v751_v10  ;;  %vm720_vm7 = vweird.f32 %v705_v48 }
 0x3b0   : > { %v731_v50 = vsub.f32 1.0, %v730_v47  ;;  %v727_v20 = vor.u32 1.1754944e-38, %v726_v13  ;;  %v773_v27 = vmul.f32 %v1309_v26, %v756_v17  ;;  %v899_v26 = vld [vmem:[%s1389_s9 + $0x18] sm:$0xff]  ;;  %vm894_vm12 = vcmask 195584  }
 0x3b1   : > { %v760_v52 = vmul.f32 %v1108_v43, %v759_v49  ;;  %vm725_vm10 = vcmp.eq.f32.partialorder %v724_v16, 8.507059e+37 }
 0x3b2   : > { %v732_v54 = vmul.f32 %v1110_v44, %v731_v50 }
 0x3b3   : > { %v761_v60 = vadd.f32 %v1108_v43, %v760_v52 }
 0x3b4   : > { %v733_v57 = vadd.f32 %v1110_v44, %v732_v54  ;;  %v1112_v58 = vpop.eup %1111 }
 0x3b5   : > { %v716_v63 = vmul.f32 %v1112_v58, %v705_v48  ;;  %v776_v1 = vpop.permute.xlu2 %775  ;;  %v765_v12 = vsel %vm1333_vm3, %v1108_v43, %v761_v60  ;;  %vm721_vm4 = vweird.f32 %v1112_v58  ;;  %v1090_v43 = vld [vmem:[%s1390_s10] ss:$0 sm:$0xff] }
 0x3b6   : > { %v737_v2 = vsel %vm736_vm14, %v1110_v44, %v733_v57  ;;  %796 = vmatpush.msrb.mxu0 %v776_v1  ;;  %v770_v18 = vsel %vm767_vm6, %v769_v14, %v765_v12  ;;  %vm722_vm9 = vmor %vm720_vm7, %vm721_vm4 }
 0x3b7   : > { %v742_v6 = vsel %vm739_vm15, %v741_v61, %v737_v2  ;;  %v717_v8 = vsub.f32 1.0, %v716_v63  ;;  %v774_v28 = vmul.f32 %v1313_v31, %v770_v18  ;;  %v898_v31 = vld [vmem:[%s1389_s9 + $0x10] sm:$0xff] }
 0x3b8   : > { %v772_v9 = vmul.f32 %v1100_v30, %v742_v6  ;;  %919 = vmatpush.msra.mxu0 %v899_v26 }
 0x3b9   : > { %v718_v15 = vmul.f32 %v1112_v58, %v717_v8 }
 0x3ba   : > { %1043 = vmatmul.msk.f32.vlgmr.msrb.gmra.mxu1 %vm582_vm8, %v772_v9  ;;  %920 = vmatpush.msra.mxu0 %v898_v31 }
 0x3bb   : > { %v719_v19 = vadd.f32 %v1112_v58, %v718_v15 }
 0x3bc   : > { %921 = vmatpush.msra.mxu0 %v897_v34 }
 0x3bd   : > { %v1083_v21 = vpop.permute.xlu1 %1082  ;;  %v723_v24 = vsel %vm722_vm9, %v1112_v58, %v719_v19 }
 0x3be   : > { %v1085_v22 = vunpack.i.h.bf16 %v1083_v21  ;;  %v1084_v23 = vunpack.i.l.bf16 %v1083_v21  ;;  %v728_v25 = vsel %vm725_vm10, %v727_v20, %v723_v24 }
 0x3bf   : > { %v771_v29 = vmul.f32 %v1318_v35, %v728_v25  ;;  %v896_v35 = vld [vmem:[%s1389_s9] sm:$0xff] }
 0x3c0   : > { %848 = vmatpush.msra.mxu2 %v1084_v23  ;;  %874 = vmatpush.msra.mxu3 %v1085_v22 }
 0x3c1   : > { %1044 = vmatmul.msk.f32.vlgmr.msra.gmra.mxu2 %vm582_vm8, %v773_v27  ;;  %1045 = vmatmul.msk.f32.vlgmr.msra.gmra.mxu3 %vm582_vm8, %v774_v28 }
 0x3c2   : > { %1042 = vmatmul.msk.f32.vlgmr.msrb.gmra.mxu0 %vm582_vm8, %v771_v29 }
 0x3c3   : > { %922 = vmatpush.msra.mxu0 %v896_v35 }
 0x437   : > { %v824_v30 = vpop.f32.mrf.mxu1 }
 0x438   : > { %880 = vrot.lane.b32.xlu0 %v824_v30, %s1142_s30  ;;  %s443_s30 = scalar_lea.vmem %s1391_s11, %s1226_s21 }
 0x43f   : > { %v798_v37 = vpop.f32.mrf.mxu0 }
 0x444   : > { %v850_v32 = vpop.f32.mrf.mxu2  ;;  %v876_v33 = vpop.f32.mrf.mxu3 }
 0x445   : > { %884 = vrot.lane.b32.xlu1 %v850_v32, %s1143_s12  ;;  %888 = vrot.lane.b32.xlu0 %v876_v33, %s1144_s13 }
 0x4aa   : > { %v881_v36 = vpop.permute.xlu0 %880 }
 0x4ab   : > { %v891_v38 = vsel %vm582_vm8, %v798_v37, %v881_v36 }
 0x4b7   : > { %v885_v39 = vpop.permute.xlu1 %884  ;;  %v889_v40 = vpop.permute.xlu0 %888 }
 0x4b8   : > { %v893_v41 = vsel %vm892_vm11, %v891_v38, %v885_v39 }
 0x4b9   : > { %v895_v42 = vsel %vm894_vm12, %v893_v41, %v889_v40 }
 0x4ba   : > { %1046 = vmatmul.msk.f32.vlgmr.msra.gmra.mxu0 %vm447_vm0, %v895_v42 }
 0x537   : > { %v924_v44 = vpop.f32.mrf.mxu0 }
 0x538   : > { %v925_v45 = vadd.f32 %v1090_v43, %v924_v44 }
 0x53a   : > { %v927_v46 = vadd.f32 %v925_v45, %v1232_v0 }
 0x53c   : > { %928 = vst.msk [vmem:[%s443_s30] sm:$0xff] %vm447_vm0, %v927_v46 }
 0x53d PF: > { %s21_s19 = sadd.s32 1, %s1135_s19   ;;  %s1396_s17 = smov %s1131_s18 }
 0x53e   : > { %p18_p5 = scmp.ge.s32.totalorder %s21_s19, 4   ;;  %s1397_s18 = smov %s1399_s20 }
 0x540   :  { %20 = sbr.rel (!%p18_p5) target bundleno = 2 (0x2), region = 100 }

// kernel: encoder_decoder_forward.19
= control target key start
LH: loop header
LB: loop body
LE: loop exit
PB: predicated region body
PF: predicated region fallthrough
CT: control target
= control target key end

     0   :  { %vm37_vm0 = vcmask 261120   ;;  %s593_s0 = inlined_call_operand.vmem [shape: f32[16,32], index: 0, kind: input, shape index: {}]   ;;  %s594_s1 = inlined_call_operand.vmem [shape: f32[1,32], index: 1, kind: input, shape index: {}]   ;;  %s595_s2 = inlined_call_operand.vmem [shape: f32[1,32], index: 2, kind: input, shape index: {}]   ;;  %s596_s3 = inlined_call_operand.vmem [shape: f32[32,64], index: 3, kind: input, shape index: {}]   ;;  %s597_s4 = inlined_call_operand.vmem [shape: f32[1,64], index: 4, kind: input, shape index: {}]   ;;  %s598_s5 = inlined_call_operand.vmem [shape: f32[64,32], index: 5, kind: input, shape index: {}]   ;;  %s599_s6 = inlined_call_operand.vmem [shape: f32[1,32], index: 6, kind: input, shape index: {}]   ;;  %s600_s7 = inlined_call_operand.vmem [shape: f32[1,32], index: 7, kind: input, shape index: {}]   ;;  %s601_s8 = inlined_call_operand.vmem [shape: f32[1,32], index: 8, kind: input, shape index: {}]   ;;  %s602_s9 = inlined_call_operand.hbm [shape: f32[16,32], index: 9, kind: output, shape index: {}]  }
   0x1   :  { %v484_v0 = vld [vmem:[%s593_s0 + $0x8] sm:$0xff] }
   0x2   :  { %v47_v1 = vsel %vm37_vm0, %v484_v0, 0.0 }
   0x3   :  { %48 = vadd.xlane.f32.xlu0 %v47_v1 }
   0x4   :  { %14 = vsyncpa [#allocation5], 0  ;;  %v491_v2 = vld [vmem:[%s593_s0] sm:$0xff]  ;;  %v426_v4 = vmov 32.0   ;;  %v144_v30 = vld [vmem:[%s596_s3 + $0x18] sm:$0xff]  ;;  %vm191_vm14 = vcmask 523264  }
   0x5   :  { %v44_v3 = vsel %vm37_vm0, %v491_v2, 0.0  ;;  %382 = vrcp.f32 %v426_v4  ;;  %v143_v31 = vld [vmem:[%s596_s3 + $0x10] sm:$0xff]  ;;  %359 = vmatpush.msra.mxu3 %v144_v30  ;;  %168 = vmatpush.msra.mxu0 %v144_v30  ;;  %v142_v35 = vld [vmem:[%s596_s3 + $0x8] sm:$0xff]  ;;  %v141_v38 = vld [vmem:[%s596_s3] sm:$0xff]  ;;  %s343_s21 = sshll.u32 %s602_s9, 4  ;;  %s429_s22 = smov 128   ;;  %s344_s21 = int_to_ptr.hbm [resolvable:$true] %s343_s21 }
   0x6   :  { %v190_v51 = vld [vmem:[%s598_s5 + $0x38] sm:$0xff]  ;;  %v189_v52 = vld [vmem:[%s598_s5 + $0x30] sm:$0xff]  ;;  %v188_v55 = vld [vmem:[%s598_s5 + $0x28] sm:$0xff]  ;;  %s430_s23 = smov 8  }
   0x7   :  { %360 = vmatpush.msra.mxu3 %v143_v31  ;;  %169 = vmatpush.msra.mxu0 %v143_v31  ;;  %v187_v58 = vld [vmem:[%s598_s5 + $0x20] sm:$0xff]  ;;  %v186_v62 = vld [vmem:[%s598_s5 + $0x18] sm:$0xff] }
   0x8   :  { %363 = vmatpush.msra.mxu2 %v190_v51  ;;  %206 = vmatpush.msra.mxu1 %v190_v51  ;;  %v376_v59 = vld [vmem:[%s594_s1] ss:$0 sm:$0xff] }
   0x9   :  { %361 = vmatpush.msra.mxu3 %v142_v35  ;;  %170 = vmatpush.msra.mxu0 %v142_v35 }
   0xa   :  { %364 = vmatpush.msra.mxu2 %v189_v52  ;;  %207 = vmatpush.msra.mxu1 %v189_v52 }
   0xb   :  { %45 = vadd.xlane.f32.xlu0 %v44_v3  ;;  %v383_v5 = vpop.eup %382  ;;  %362 = vmatpush.msra.mxu3 %v141_v38 }
   0xc   :  { %v51_v6 = vmul.f32 32.0, %v383_v5  ;;  %vm55_vm1 = vweird.f32 %v383_v5  ;;  %171 = vmatpush.msra.mxu0 %v141_v38  ;;  %365 = vmatpush.msra.mxu2 %v188_v55 }
   0xd   :  { %208 = vmatpush.msra.mxu1 %v188_v55 }
   0xe   :  { %v52_v7 = vsub.f32 1.0, %v51_v6  ;;  %366 = vmatpush.msra.mxu2 %v187_v58  ;;  %v377_v6 = vld [vmem:[%s595_s2] ss:$0 sm:$0xff] }
   0xf   :  { %209 = vmatpush.msra.mxu1 %v187_v58 }
  0x10   :  { %v53_v8 = vmul.f32 %v383_v5, %v52_v7  ;;  %367 = vmatpush.msra.mxu2 %v186_v62 }
  0x11   :  { %210 = vmatpush.msra.mxu1 %v186_v62 }
  0x12   :  { %v54_v9 = vadd.f32 %v383_v5, %v53_v8 }
  0x14   :  { %v495_v10 = vsel %vm55_vm1, %v383_v5, %v54_v9 }
  0x76   :  { %v49_v11 = vpop.xlane.xlu0 %48 }
  0x77   :  { %v58_v12 = vmul.f32 %v495_v10, %v49_v11 }
  0x79   :  { %v499_v13 = vsub.f32 %v484_v0, %v58_v12 }
  0x7b   :  { %v62_v14 = vmul.f32 %v499_v13, %v499_v13  ;;  %v129_v4 = vmul.f32 %v376_v59, %v499_v13 }
  0x7d   :  { %v66_v15 = vsel %vm37_vm0, %v62_v14, 0.0 }
  0x7e   :  { %67 = vadd.xlane.f32.xlu1 %v66_v15  ;;  %v46_v16 = vpop.xlane.xlu0 %45 }
  0x7f   :  { %v57_v17 = vmul.f32 %v495_v10, %v46_v16 }
  0x81   :  { %v506_v18 = vsub.f32 %v491_v2, %v57_v17 }
  0x83   :  { %v61_v19 = vmul.f32 %v506_v18, %v506_v18 }
  0x85   :  { %v63_v20 = vsel %vm37_vm0, %v61_v19, 0.0  ;;  %v128_v19 = vmul.f32 %v376_v59, %v506_v18  ;;  %v184_v18 = vld [vmem:[%s598_s5 + $0x8] sm:$0xff] }
  0x86   :  { %64 = vadd.xlane.f32.xlu1 %v63_v20 }
  0xf1   :  { %v68_v21 = vpop.xlane.xlu1 %67 }
  0xf2   :  { %v70_v22 = vmul.f32 0.032258064, %v68_v21 }
  0xf4   :  { %384 = vrsqrt.f32 %v70_v22  ;;  %vm90_vm2 = vcmp.eq.f32.partialorder %v70_v22, inf  ;;  %v93_v39 = vand.u32 2147483648, %v70_v22  ;;  %vm92_vm3 = vcmp.eq.f32.partialorder %v70_v22, 0.0 }
  0xf9   :  { %v65_v23 = vpop.xlane.xlu1 %64 }
  0xfa   :  { %v385_v24 = vpop.eup %384  ;;  %v69_v25 = vmul.f32 0.032258064, %v65_v23 }
  0xfb   :  { %v84_v26 = vmul.f32 %v385_v24, %v70_v22 }
  0xfc   :  { %386 = vrsqrt.f32 %v69_v25  ;;  %vm78_vm4 = vcmp.eq.f32.partialorder %v69_v25, inf  ;;  %v81_v47 = vand.u32 2147483648, %v69_v25  ;;  %vm80_vm5 = vcmp.eq.f32.partialorder %v69_v25, 0.0 }
  0xfd   :  { %v85_v27 = vmul.f32 %v385_v24, %v84_v26  ;;  %v185_v26 = vld [vmem:[%s598_s5 + $0x10] sm:$0xff] }
  0xfe   :  { %368 = vmatpush.msra.mxu2 %v185_v26  ;;  %211 = vmatpush.msra.mxu1 %v185_v26 }
  0xff   :  { %v86_v28 = vmul.f32 0.5, %v85_v27  ;;  %v183_v27 = vld [vmem:[%s598_s5] sm:$0xff] }
 0x100   :  { %369 = vmatpush.msra.mxu2 %v184_v18  ;;  %212 = vmatpush.msra.mxu1 %v184_v18 }
 0x101   :  { %v87_v29 = vsub.f32 1.5, %v86_v28  ;;  %v427_v28 = vmov 0.0  }
 0x102   :  { %v387_v32 = vpop.eup %386  ;;  %370 = vmatpush.msra.mxu2 %v183_v27  ;;  %213 = vmatpush.msra.mxu1 %v183_v27  ;;  %38 = vst.msk [vmem:[#allocation3] sm:$0xff] %vm37_vm0, %v427_v28  ;;  %v380_v27 = vld [vmem:[%s600_s7] ss:$0 sm:$0xff]  ;;  %s428_s7 = smov [#allocation4]  }
 0x103   :  { %v88_v33 = vmul.f32 %v385_v24, %v87_v29  ;;  %v72_v34 = vmul.f32 %v387_v32, %v69_v25  ;;  %39 = vst.msk [vmem:[#allocation3 + $0x8] sm:$0xff] %vm37_vm0, %v427_v28  ;;  %v378_v29 = vld [vmem:[%s597_s4] ss:$0 sm:$0xff] }
 0x105   :  { %v89_v36 = vmul.f32 %v88_v33, %v70_v22  ;;  %v73_v37 = vmul.f32 %v387_v32, %v72_v34 }
 0x107   :  { %v91_v40 = vsel %vm90_vm2, %v70_v22, %v89_v36  ;;  %v74_v41 = vmul.f32 0.5, %v73_v37 }
 0x108   :  { %v94_v42 = vsel %vm92_vm3, %v93_v39, %v91_v40 }
 0x109   :  { %v96_v43 = vadd.f32 1e-06, %v94_v42  ;;  %v75_v44 = vsub.f32 1.5, %v74_v41  ;;  %v181_v36 = vld [vmem:[#allocation3] sm:$0xff]  ;;  %v379_v42 = vld [vmem:[%s599_s6] ss:$0 sm:$0xff] }
 0x10a   :  { %v182_v39 = vld [vmem:[#allocation3 + $0x8] sm:$0xff] }
 0x10b   :  { %388 = vrcp.f32 %v96_v43  ;;  %v76_v45 = vmul.f32 %v387_v32, %v75_v44  ;;  %v122_v57 = vand.u32 2147483648, %v96_v43  ;;  %v120_v61 = vand.u32 2147483647, %v96_v43 }
 0x10c   :  { %vm116_vm7 = vweird.f32 %v96_v43 }
 0x10d   :  { %v77_v46 = vmul.f32 %v76_v45, %v69_v25  ;;  %v123_v1 = vor.u32 1.1754944e-38, %v122_v57  ;;  %vm121_vm9 = vcmp.eq.f32.partialorder %v120_v61, 8.507059e+37 }
 0x10f   :  { %v79_v48 = vsel %vm78_vm4, %v69_v25, %v77_v46 }
 0x110   :  { %v82_v50 = vsel %vm80_vm5, %v81_v47, %v79_v48 }
 0x111   :  { %v389_v49 = vpop.eup %388  ;;  %v95_v54 = vadd.f32 1e-06, %v82_v50 }
 0x112   :  { %v112_v53 = vmul.f32 %v389_v49, %v96_v43  ;;  %vm117_vm6 = vweird.f32 %v389_v49 }
 0x113   :  { %390 = vrcp.f32 %v95_v54  ;;  %vm118_vm8 = vmor %vm116_vm7, %vm117_vm6  ;;  %v108_v12 = vand.u32 2147483648, %v95_v54  ;;  %v106_v16 = vand.u32 2147483647, %v95_v54  ;;  %vm102_vm11 = vweird.f32 %v95_v54 }
 0x114   :  { %v113_v56 = vsub.f32 1.0, %v112_v53 }
 0x115   :  { %v109_v17 = vor.u32 1.1754944e-38, %v108_v12  ;;  %vm107_vm13 = vcmp.eq.f32.partialorder %v106_v16, 8.507059e+37 }
 0x116   :  { %v114_v60 = vmul.f32 %v389_v49, %v113_v56 }
 0x118   :  { %v115_v63 = vadd.f32 %v389_v49, %v114_v60 }
 0x119   :  { %v391_v3 = vpop.eup %390 }
 0x11a   :  { %v119_v5 = vsel %vm118_vm8, %v389_v49, %v115_v63  ;;  %v98_v7 = vmul.f32 %v391_v3, %v95_v54  ;;  %vm103_vm10 = vweird.f32 %v391_v3 }
 0x11b   :  { %v124_v8 = vsel %vm121_vm9, %v123_v1, %v119_v5  ;;  %vm104_vm12 = vmor %vm102_vm11, %vm103_vm10 }
 0x11c   :  { %v131_v9 = vmul.f32 %v129_v4, %v124_v8  ;;  %v99_v11 = vsub.f32 1.0, %v98_v7 }
 0x11e   :  { %v136_v14 = vadd.f32 %v377_v6, %v131_v9  ;;  %v100_v15 = vmul.f32 %v391_v3, %v99_v11 }
 0x120   :  { %138 = vst.msk [vmem:[#allocation2 + $0x8] sm:$0xff] %vm37_vm0, %v136_v14  ;;  %v101_v13 = vadd.f32 %v391_v3, %v100_v15 }
 0x122   :  { %v105_v20 = vsel %vm104_vm12, %v391_v3, %v101_v13 }
 0x123   :  { %v110_v21 = vsel %vm107_vm13, %v109_v17, %v105_v20 }
 0x124   :  { %v130_v22 = vmul.f32 %v128_v19, %v110_v21 }
 0x126   :  { %v135_v24 = vadd.f32 %v377_v6, %v130_v22 }
 0x127   :  { %v140_v23 = vld [vmem:[#allocation2 + $0x8] sm:$0xff] }
 0x128   :  { %356 = vmatmul.msk.f32.vlgmr.msra.gmra.mxu3 %vm37_vm0, %v140_v23  ;;  %137 = vst.msk [vmem:[#allocation2] sm:$0xff] %vm37_vm0, %v135_v24 }
 0x12f   :  { %v139_v25 = vld [vmem:[#allocation2] sm:$0xff] }
 0x130   :  { %355 = vmatmul.msk.f32.vlgmr.msra.gmra.mxu0 %vm37_vm0, %v139_v25 }
 0x1ab   :  { %v176_v30 = vpop.f32.mrf.mxu3 }
 0x1ac   :  { %v177_v31 = vadd.f32 %v378_v29, %v176_v30 }
 0x1ad   :  { %v173_v33 = vpop.f32.mrf.mxu0 }
 0x1ae   :  { %v180_v32 = vmax.f32 %v177_v31, 0.0  ;;  %v174_v34 = vadd.f32 %v378_v29, %v173_v33 }
 0x1b0   :  { %358 = vmatmul.msk.f32.vlgmr.msra.gmra.mxu2 %vm191_vm14, %v180_v32  ;;  %v179_v35 = vmax.f32 %v174_v34, 0.0 }
 0x1b2   :  { %357 = vmatmul.msk.f32.vlgmr.msra.gmra.mxu1 %vm191_vm14, %v179_v35 }
 0x22f   :  { %v215_v37 = vpop.f32.mrf.mxu1 }
 0x230   :  { %v221_v38 = vadd.f32 %v215_v37, %v181_v36  ;;  %v381_v36 = vld [vmem:[%s601_s8] ss:$0 sm:$0xff]  ;;  %s341_s8 = sshll.u32 %s428_s7, 4  ;;  %s342_s8 = int_to_ptr.vmem [resolvable:$true] %s341_s8 }
 0x232   :  { %223 = vst.msk [vmem:[#allocation3] sm:$0xff] %vm37_vm0, %v221_v38 }
 0x233   :  { %v218_v40 = vpop.f32.mrf.mxu2 }
 0x234   :  { %v222_v41 = vadd.f32 %v218_v40, %v182_v39 }
 0x236   :  { %224 = vst.msk [vmem:[#allocation3 + $0x8] sm:$0xff] %vm37_vm0, %v222_v41 }
 0x239   :  { %v230_v43 = vld [vmem:[#allocation3] sm:$0xff] }
 0x23a   :  { %v232_v44 = vadd.f32 %v230_v43, %v491_v2 }
 0x23c   :  { %v238_v45 = vadd.f32 %v379_v42, %v232_v44 }
 0x23d   :  { %v231_v46 = vld [vmem:[#allocation3 + $0x8] sm:$0xff] }
 0x23e   :  { %v242_v47 = vsel %vm37_vm0, %v238_v45, 0.0  ;;  %v233_v48 = vadd.f32 %v231_v46, %v484_v0 }
 0x23f   :  { %243 = vadd.xlane.f32.xlu2 %v242_v47 }
 0x240   :  { %v239_v49 = vadd.f32 %v379_v42, %v233_v48 }
 0x242   :  { %v245_v50 = vsel %vm37_vm0, %v239_v49, 0.0 }
 0x247   :  { %246 = vadd.xlane.f32.xlu2 %v245_v50 }
 0x2b2   :  { %v244_v51 = vpop.xlane.xlu2 %243 }
 0x2b3   :  { %v255_v52 = vmul.f32 %v244_v51, %v495_v10 }
 0x2b5   :  { %v257_v53 = vsub.f32 %v238_v45, %v255_v52 }
 0x2b7   :  { %v259_v54 = vmul.f32 %v257_v53, %v257_v53  ;;  %v326_v33 = vmul.f32 %v380_v27, %v257_v53 }
 0x2b9   :  { %v261_v55 = vsel %vm37_vm0, %v259_v54, 0.0 }
 0x2ba   :  { %262 = vadd.xlane.f32.xlu0 %v261_v55  ;;  %v247_v2 = vpop.xlane.xlu2 %246 }
 0x2bb   :  { %v256_v56 = vmul.f32 %v247_v2, %v495_v10 }
 0x2bd   :  { %v576_v57 = vsub.f32 %v239_v49, %v256_v56 }
 0x2bf   :  { %v260_v0 = vmul.f32 %v576_v57, %v576_v57  ;;  %v327_v46 = vmul.f32 %v380_v27, %v576_v57 }
 0x2c1   :  { %v264_v58 = vsel %vm37_vm0, %v260_v0, 0.0 }
 0x2c2   :  { %265 = vadd.xlane.f32.xlu1 %v264_v58 }
 0x32d   :  { %v263_v59 = vpop.xlane.xlu0 %262 }
 0x32e   :  { %v267_v60 = vmul.f32 0.032258064, %v263_v59 }
 0x330   :  { %392 = vrsqrt.f32 %v267_v60  ;;  %vm276_vm15 = vcmp.eq.f32.partialorder %v267_v60, inf  ;;  %v279_v11 = vand.u32 2147483648, %v267_v60  ;;  %vm278_vm1 = vcmp.eq.f32.partialorder %v267_v60, 0.0 }
 0x335   :  { %v266_v61 = vpop.xlane.xlu1 %265 }
 0x336   :  { %v393_v62 = vpop.eup %392  ;;  %v268_v63 = vmul.f32 0.032258064, %v266_v61 }
 0x337   :  { %v270_v1 = vmul.f32 %v393_v62, %v267_v60 }
 0x338   :  { %394 = vrsqrt.f32 %v268_v63  ;;  %vm288_vm2 = vcmp.eq.f32.partialorder %v268_v63, inf  ;;  %v291_v20 = vand.u32 2147483648, %v268_v63  ;;  %vm290_vm3 = vcmp.eq.f32.partialorder %v268_v63, 0.0 }
 0x339   :  { %v271_v3 = vmul.f32 %v393_v62, %v270_v1 }
 0x33b   :  { %v272_v4 = vmul.f32 0.5, %v271_v3 }
 0x33d   :  { %v273_v5 = vsub.f32 1.5, %v272_v4 }
 0x33e   :  { %v395_v10 = vpop.eup %394 }
 0x33f   :  { %v274_v6 = vmul.f32 %v393_v62, %v273_v5  ;;  %v282_v7 = vmul.f32 %v395_v10, %v268_v63 }
 0x341   :  { %v275_v8 = vmul.f32 %v274_v6, %v267_v60  ;;  %v283_v9 = vmul.f32 %v395_v10, %v282_v7 }
 0x343   :  { %v277_v12 = vsel %vm276_vm15, %v267_v60, %v275_v8  ;;  %v284_v14 = vmul.f32 0.5, %v283_v9 }
 0x344   :  { %v280_v15 = vsel %vm278_vm1, %v279_v11, %v277_v12 }
 0x345   :  { %v293_v16 = vadd.f32 1e-06, %v280_v15  ;;  %v285_v13 = vsub.f32 1.5, %v284_v14 }
 0x347   :  { %396 = vrcp.f32 %v293_v16  ;;  %v286_v17 = vmul.f32 %v395_v10, %v285_v13  ;;  %v306_v18 = vand.u32 2147483648, %v293_v16  ;;  %v304_v29 = vand.u32 2147483647, %v293_v16 }
 0x348   :  { %vm300_vm5 = vweird.f32 %v293_v16 }
 0x349   :  { %v287_v19 = vmul.f32 %v286_v17, %v268_v63  ;;  %v307_v32 = vor.u32 1.1754944e-38, %v306_v18  ;;  %vm305_vm7 = vcmp.eq.f32.partialorder %v304_v29, 8.507059e+37 }
 0x34b   :  { %v289_v21 = vsel %vm288_vm2, %v268_v63, %v287_v19 }
 0x34c   :  { %v292_v22 = vsel %vm290_vm3, %v291_v20, %v289_v21 }
 0x34d   :  { %v397_v23 = vpop.eup %396  ;;  %v294_v24 = vadd.f32 1e-06, %v292_v22 }
 0x34e   :  { %v296_v25 = vmul.f32 %v397_v23, %v293_v16  ;;  %vm301_vm4 = vweird.f32 %v397_v23 }
 0x34f   :  { %398 = vrcp.f32 %v294_v24  ;;  %vm302_vm6 = vmor %vm300_vm5, %vm301_vm4  ;;  %v320_v40 = vand.u32 2147483648, %v294_v24  ;;  %v318_v42 = vand.u32 2147483647, %v294_v24  ;;  %vm314_vm9 = vweird.f32 %v294_v24 }
 0x350   :  { %v297_v26 = vsub.f32 1.0, %v296_v25 }
 0x351   :  { %v321_v45 = vor.u32 1.1754944e-38, %v320_v40  ;;  %vm319_vm11 = vcmp.eq.f32.partialorder %v318_v42, 8.507059e+37 }
 0x352   :  { %v298_v28 = vmul.f32 %v397_v23, %v297_v26 }
 0x354   :  { %v299_v30 = vadd.f32 %v397_v23, %v298_v28 }
 0x355   :  { %v399_v31 = vpop.eup %398 }
 0x356   :  { %v303_v34 = vsel %vm302_vm6, %v397_v23, %v299_v30  ;;  %v310_v35 = vmul.f32 %v399_v31, %v294_v24  ;;  %vm315_vm8 = vweird.f32 %v399_v31 }
 0x357   :  { %v308_v37 = vsel %vm305_vm7, %v307_v32, %v303_v34  ;;  %vm316_vm10 = vmor %vm314_vm9, %vm315_vm8 }
 0x358   :  { %v311_v38 = vsub.f32 1.0, %v310_v35  ;;  %v328_v39 = vmul.f32 %v326_v33, %v308_v37 }
 0x35a   :  { %v312_v41 = vmul.f32 %v399_v31, %v311_v38  ;;  %v333_v43 = vadd.f32 %v381_v36, %v328_v39 }
 0x35c   :  { %v313_v44 = vadd.f32 %v399_v31, %v312_v41  ;;  %335 = vst.msk [vmem:[#allocation4] sm:$0xff] %vm37_vm0, %v333_v43 }
 0x35e   :  { %v317_v47 = vsel %vm316_vm10, %v399_v31, %v313_v44 }
 0x35f   :  { %v322_v48 = vsel %vm319_vm11, %v321_v45, %v317_v47 }
 0x360   :  { %v329_v49 = vmul.f32 %v327_v46, %v322_v48 }
 0x362   :  { %v334_v50 = vadd.f32 %v381_v36, %v329_v49 }
 0x364   :  { %336 = vst.msk [vmem:[#allocation4 + $0x8] sm:$0xff] %vm37_vm0, %v334_v50 }
 0x365   :  { %349 = dma.vmem_to_hbm [thread:$0]  %s342_s8, 256, %s344_s21, [#allocation5], %s429_s22, %s429_s22, %s430_s23  }
 0x366   :  { %424 = dma.done.wait [#allocation5], 256  }
 0x367   :  { %425 = vsyncadd [#allocation5], 4294967040 }
 0x368   :  { %354 = vsyncpa [#allocation5], 1 }

</bundles_post_ra>
